<compile_context>
chip_gen: v6e
topology: v6e:2x2x1
jax: 0.10.0
libtpu: 0.0.40
codegen_flags: <defaults>
</compile_context>

<pallas_src>
import functools

import jax
import jax.numpy as jnp
from jax.experimental import pallas as pl
from jax.experimental.pallas import tpu as pltpu


def _energy(q, k):
    """e[b, i, j] = sum_c q[b, i, c] * k[b, j, c] (contraction over tiny Cq).

    CrissCrossAttention uses Cq = C // 8, so a K=Cq MXU matmul would run at a
    few percent utilisation; route the contraction to the VPU as an unrolled
    broadcast-multiply-add and only fall back to the MXU for large Cq.
    """
    cq = q.shape[-1]
    if cq >= 64:
        return jnp.einsum('bic,bjc->bij', q, k,
                          preferred_element_type=jnp.float32)
    acc = q[:, :, 0][:, :, None] * k[:, :, 0][:, None, :]
    for c in range(1, cq):
        acc = acc + q[:, :, c][:, :, None] * k[:, :, c][:, None, :]
    return acc


def _cca_kernel(gamma_ref,                        # SMEM (1, 1)
                x_ref,                            # VMEM (1, H, W, C)
                diag_ref,                         # VMEM (H, H) additive mask
                wq_ref, bq_ref,                   # (C, Cq), (1, Cq)
                wk_ref, bk_ref,                   # (C, Cq), (1, Cq)
                wv_ref, bv_ref,                   # (C, C),  (1, C)
                out_ref,                          # VMEM (1, H, W, C)
                *, matmul_dtype):
    X = x_ref[0]                                  # (H, W, C)
    H, W, C = X.shape

    cast = (lambda a: a) if matmul_dtype is None else \
           (lambda a: a.astype(matmul_dtype))

    Xf = cast(X.reshape(H * W, C))                # (H*W, C), flatten of leading dims

    def conv1x1(w_ref, b_ref):
        w = cast(w_ref[...])
        y = jnp.dot(Xf, w, preferred_element_type=jnp.float32) + b_ref[...]
        return y.reshape(H, W, w.shape[-1])

    # 1x1 convolutions (channel matmuls) — computed ONCE (no duplicated input).
    Q = conv1x1(wq_ref, bq_ref)                   # (H, W, Cq)
    K = conv1x1(wk_ref, bk_ref)                   # (H, W, Cq)
    V = conv1x1(wv_ref, bv_ref)                   # (H, W, C)

    # Column-path operands derived in-kernel (major-dim swap, lane dim kept).
    Qt = pltpu.einshape('hwc->whc', Q)            # (W, H, Cq)
    Kt = pltpu.einshape('hwc->whc', K)            # (W, H, Cq)
    Vt = pltpu.einshape('hwc->whc', V)            # (W, H, C)

    # Energies: eW[h,w,g] attends along the row, eH[w,h,g] along the column.
    eW = _energy(Q, K)                                      # (H, W, W)
    eH = _energy(Qt, Kt) + diag_ref[...][None, :, :]        # (W, H, H), diag = -1e30

    # Joint softmax over the concatenated (H + W) logits; the 1/l normalisation
    # is folded into the final scale, and eW/eH are overwritten by their exps.
    mW = jnp.max(eW, axis=-1)                     # (H, W)
    mH = jnp.max(eH, axis=-1)                     # (W, H)
    m = jnp.maximum(mW, mH.T)                     # (H, W)
    eW = jnp.exp(eW - m[:, :, None])              # unnormalised attW  (H, W, W)
    eH = jnp.exp(eH - m.T[:, :, None])            # unnormalised attH  (W, H, H)
    l = jnp.sum(eW, axis=-1) + jnp.sum(eH, axis=-1).T       # (H, W)

    # Attention @ V (MXU) on the unnormalised weights.
    outW = jnp.einsum('hwg,hgc->hwc', cast(eW), cast(V),
                      preferred_element_type=jnp.float32)   # (H, W, C)
    outH = jnp.einsum('whg,wgc->whc', cast(eH), cast(Vt),
                      preferred_element_type=jnp.float32)   # (W, H, C)
    outH = pltpu.einshape('whc->hwc', outH)                 # (H, W, C)

    # gamma / l folded into one multiply; EUP approx reciprocal (l >= 1 always).
    scale = gamma_ref[0, 0] * pl.reciprocal(l, approx=True)
    out_ref[0] = (scale[:, :, None] * (outW + outH) + X).astype(out_ref.dtype)
    # TODO(synk): lane-dense (B, H, W*C) output staging (feedback item) is
    # skipped: it requires an in-kernel (H,W,C)->(H,W*C) lane relayout that
    # Mosaic does not reliably lower for C < 128; with C >= 128 the store is
    # already lane-dense.


def criss_cross_attention_nhwc(x_nhwc, wq, bq, wk, bk, wv, bv, gamma,
                               *, matmul_dtype=None):
    B, H, W, C = x_nhwc.shape
    Cq = wq.shape[1]

    gamma_arr = jnp.reshape(jnp.asarray(gamma, jnp.float32), (1, 1))
    bq2 = bq.reshape(1, Cq).astype(jnp.float32)
    bk2 = bk.reshape(1, Cq).astype(jnp.float32)
    bv2 = bv.reshape(1, C).astype(jnp.float32)
    # Additive diagonal mask (the INF() helper), computed once and fetched once
    # by the kernel (constant index_map -> no re-DMA across grid steps).
    diag_bias = jnp.where(jnp.eye(H, dtype=bool), -1e30, 0.0).astype(jnp.float32)

    idx_x = lambda b: (b, 0, 0, 0)
    idx_c = lambda b: (0, 0)

    flops = int(B * (2 * H * W * C * (2 * Cq + C)       # 1x1 convs
                     + 2 * H * W * Cq * (H + W)         # energies
                     + 2 * H * W * C * (H + W)))        # attn @ V
    transcendentals = int(B * H * W * (H + W + 1))      # exps + reciprocal
    bytes_accessed = int(4 * (2 * B * H * W * C
                              + 2 * C * Cq + C * C + 2 * Cq + C + H * H))

    kernel = functools.partial(_cca_kernel, matmul_dtype=matmul_dtype)

    # TODO(synk): for v7x (64 MiB VMEM, 2 TensorCores) at production H/W/C,
    # add a spatial query-tile grid axis with an online joint softmax and a
    # second "parallel" axis so both cores are used even when B == 1.
    out = pl.pallas_call(
        kernel,
        out_shape=jax.ShapeDtypeStruct((B, H, W, C), x_nhwc.dtype),
        grid=(B,),
        in_specs=[
            pl.BlockSpec(memory_space=pltpu.MemorySpace.SMEM),   # gamma
            pl.BlockSpec((1, H, W, C), idx_x),                   # x (aliased to out)
            pl.BlockSpec((H, H), idx_c),                         # diagonal mask bias
            pl.BlockSpec((C, Cq), idx_c),                        # Wq
            pl.BlockSpec((1, Cq), idx_c),                        # bq
            pl.BlockSpec((C, Cq), idx_c),                        # Wk
            pl.BlockSpec((1, Cq), idx_c),                        # bk
            pl.BlockSpec((C, C), idx_c),                         # Wv
            pl.BlockSpec((1, C), idx_c),                         # bv
        ],
        out_specs=pl.BlockSpec((1, H, W, C), idx_x),
        input_output_aliases={1: 0},                             # reuse x's HBM buffer
        cost_estimate=pl.CostEstimate(flops=flops,
                                      transcendentals=transcendentals,
                                      bytes_accessed=bytes_accessed),
        compiler_params=pltpu.CompilerParams(
            dimension_semantics=("parallel",),
            vmem_limit_bytes=48 * 1024 * 1024),
    )(gamma_arr, x_nhwc, diag_bias, wq, bq2, wk, bk2, wv, bv2)
    return out


@functools.partial(jax.jit, static_argnames=("matmul_dtype",))
def criss_cross_attention(x_nchw, wq, bq, wk, bk, wv, bv, gamma,
                          *, matmul_dtype=None):
    """PyTorch-compatible entry point (NCHW in / NCHW out).

    matmul_dtype=jnp.bfloat16 routes the MXU matmuls through bf16 (recommended
    on v6e/v7x); default keeps f32 end-to-end.
    """
    x_nhwc = jnp.transpose(x_nchw, (0, 2, 3, 1))
    out_nhwc = criss_cross_attention_nhwc(x_nhwc, wq, bq, wk, bk, wv, bv, gamma,
                                          matmul_dtype=matmul_dtype)
    return jnp.transpose(out_nhwc, (0, 3, 1, 2))


def reference_nchw(x, wq, bq, wk, bk, wv, bv, gamma):
    """Pure-JAX transliteration of the PyTorch forward (for validation)."""
    B, C, H, W = x.shape

    def conv(inp, w, b):
        return jnp.einsum('bchw,co->bohw', inp, w) + b.reshape(1, -1, 1, 1)

    q = conv(x, wq, bq)
    k = conv(x, wk, bk)
    v = conv(x, wv, bv)
    eH = jnp.einsum('bchw,bcgw->bhwg', q, k)
    diag = jnp.eye(H, dtype=bool)[None, :, None, :]
    eH = jnp.where(diag, -jnp.inf, eH)
    eW = jnp.einsum('bchw,bchg->bhwg', q, k)
    att = jax.nn.softmax(jnp.concatenate([eH, eW], axis=3), axis=3)
    attH, attW = att[..., :H], att[..., H:]
    outH = jnp.einsum('bhwg,bcgw->bchw', attH, v)
    outW = jnp.einsum('bhwg,bchg->bchw', attW, v)
    return gamma * (outH + outW) + x


if __name__ == "__main__":
    B, C, H, W = 2, 32, 16, 16          # in_dim must be divisible by 8
    Cq = C // 8

    key = jax.random.PRNGKey(0)
    ks = jax.random.split(key, 7)
    x = jax.random.normal(ks[0], (B, C, H, W), jnp.float32)
    wq = jax.random.normal(ks[1], (C, Cq), jnp.float32) * 0.1
    bq = jax.random.normal(ks[2], (Cq,), jnp.float32) * 0.1
    wk = jax.random.normal(ks[3], (C, Cq), jnp.float32) * 0.1
    bk = jax.random.normal(ks[4], (Cq,), jnp.float32) * 0.1
    wv = jax.random.normal(ks[5], (C, C), jnp.float32) * 0.1
    bv = jax.random.normal(ks[6], (C,), jnp.float32) * 0.1
    # The module initializes gamma to 0 (output == x); use a nonzero value so
    # the attention path is actually exercised.
    gamma = jnp.float32(0.5)

    out = criss_cross_attention(x, wq, bq, wk, bk, wv, bv, gamma)
    out = jax.block_until_ready(out)

    ref = reference_nchw(x, wq, bq, wk, bk, wv, bv, gamma)
    ref = jax.block_until_ready(ref)

    max_err = float(jnp.max(jnp.abs(out - ref)))
    assert jnp.allclose(out, ref, rtol=1e-2, atol=1e-2), f"max_err={max_err}"
    print("KERNEL_OK")
</pallas_src>

<mosaic_0001>
module attributes {stable_mosaic.version = 11 : i64} {
  func.func @_cca_kernel(%arg0: i32, %arg1: memref<1x1xf32, #tpu.memory_space<smem>>, %arg2: memref<1x16x16x32xf32, #tpu.memory_space<vmem>>, %arg3: memref<16x16xf32, #tpu.memory_space<vmem>>, %arg4: memref<32x4xf32, #tpu.memory_space<vmem>>, %arg5: memref<1x4xf32, #tpu.memory_space<vmem>>, %arg6: memref<32x4xf32, #tpu.memory_space<vmem>>, %arg7: memref<1x4xf32, #tpu.memory_space<vmem>>, %arg8: memref<32x32xf32, #tpu.memory_space<vmem>>, %arg9: memref<1x32xf32, #tpu.memory_space<vmem>>, %arg10: memref<1x16x16x32xf32, #tpu.memory_space<vmem>>) attributes {dimension_semantics = [#tpu.dimension_semantics<parallel>], iteration_bounds = array<i64: 2>, scalar_prefetch = 0 : i64, scratch_operands = 0 : i64, tpu.core_type = #tpu.core_type<tc>, window_params = [{transform_indices = @transform_0, window_bounds = array<i64: 1, 1>}, {transform_indices = @transform_1, window_bounds = array<i64: 1, 16, 16, 32>}, {pipeline_mode = #tpu.pipeline_mode<synchronous>, transform_indices = @transform_2, window_bounds = array<i64: 16, 16>}, {pipeline_mode = #tpu.pipeline_mode<synchronous>, transform_indices = @transform_3, window_bounds = array<i64: 32, 4>}, {pipeline_mode = #tpu.pipeline_mode<synchronous>, transform_indices = @transform_4, window_bounds = array<i64: 1, 4>}, {pipeline_mode = #tpu.pipeline_mode<synchronous>, transform_indices = @transform_5, window_bounds = array<i64: 32, 4>}, {pipeline_mode = #tpu.pipeline_mode<synchronous>, transform_indices = @transform_6, window_bounds = array<i64: 1, 4>}, {pipeline_mode = #tpu.pipeline_mode<synchronous>, transform_indices = @transform_7, window_bounds = array<i64: 32, 32>}, {pipeline_mode = #tpu.pipeline_mode<synchronous>, transform_indices = @transform_8, window_bounds = array<i64: 1, 32>}, {transform_indices = @transform_9, window_bounds = array<i64: 1, 16, 16, 32>}]} {
    %c0 = arith.constant 0 : index
    %c0_0 = arith.constant 0 : index
    %c0_1 = arith.constant 0 : index
    %c0_2 = arith.constant 0 : index
    %0 = vector.load %arg2[%c0, %c0_0, %c0_1, %c0_2] : memref<1x16x16x32xf32, #tpu.memory_space<vmem>>, vector<1x16x16x32xf32>
    %1 = vector.shape_cast %0 : vector<1x16x16x32xf32> to vector<16x16x32xf32>
    %2 = vector.shape_cast %1 : vector<16x16x32xf32> to vector<256x32xf32>
    %c0_3 = arith.constant 0 : index
    %c0_4 = arith.constant 0 : index
    %3 = vector.load %arg4[%c0_3, %c0_4] : memref<32x4xf32, #tpu.memory_space<vmem>>, vector<32x4xf32>
    %cst = arith.constant dense<0.000000e+00> : vector<256x4xf32>
    %4 = tpu.matmul %2, %3, %cst {dimension_numbers = #tpu.dot_dimension_numbers<[1], [0], [0], [1], [0, 0, 1, 1], [], []>} : vector<256x32xf32>, vector<32x4xf32>, vector<256x4xf32> -> vector<256x4xf32>
    %c0_5 = arith.constant 0 : index
    %c0_6 = arith.constant 0 : index
    %5 = vector.load %arg5[%c0_5, %c0_6] : memref<1x4xf32, #tpu.memory_space<vmem>>, vector<1x4xf32>
    %6 = vector.broadcast %5 : vector<1x4xf32> to vector<256x4xf32>
    %7 = arith.addf %4, %6 : vector<256x4xf32>
    %8 = vector.shape_cast %7 : vector<256x4xf32> to vector<16x16x4xf32>
    %c0_7 = arith.constant 0 : index
    %c0_8 = arith.constant 0 : index
    %9 = vector.load %arg6[%c0_7, %c0_8] : memref<32x4xf32, #tpu.memory_space<vmem>>, vector<32x4xf32>
    %cst_9 = arith.constant dense<0.000000e+00> : vector<256x4xf32>
    %10 = tpu.matmul %2, %9, %cst_9 {dimension_numbers = #tpu.dot_dimension_numbers<[1], [0], [0], [1], [0, 0, 1, 1], [], []>} : vector<256x32xf32>, vector<32x4xf32>, vector<256x4xf32> -> vector<256x4xf32>
    %c0_10 = arith.constant 0 : index
    %c0_11 = arith.constant 0 : index
    %11 = vector.load %arg7[%c0_10, %c0_11] : memref<1x4xf32, #tpu.memory_space<vmem>>, vector<1x4xf32>
    %12 = vector.broadcast %11 : vector<1x4xf32> to vector<256x4xf32>
    %13 = arith.addf %10, %12 : vector<256x4xf32>
    %14 = vector.shape_cast %13 : vector<256x4xf32> to vector<16x16x4xf32>
    %c0_12 = arith.constant 0 : index
    %c0_13 = arith.constant 0 : index
    %15 = vector.load %arg8[%c0_12, %c0_13] : memref<32x32xf32, #tpu.memory_space<vmem>>, vector<32x32xf32>
    %cst_14 = arith.constant dense<0.000000e+00> : vector<256x32xf32>
    %16 = tpu.matmul %2, %15, %cst_14 {dimension_numbers = #tpu.dot_dimension_numbers<[1], [0], [0], [1], [0, 0, 1, 1], [], []>} : vector<256x32xf32>, vector<32x32xf32>, vector<256x32xf32> -> vector<256x32xf32>
    %c0_15 = arith.constant 0 : index
    %c0_16 = arith.constant 0 : index
    %17 = vector.load %arg9[%c0_15, %c0_16] : memref<1x32xf32, #tpu.memory_space<vmem>>, vector<1x32xf32>
    %18 = vector.broadcast %17 : vector<1x32xf32> to vector<256x32xf32>
    %19 = arith.addf %16, %18 : vector<256x32xf32>
    %20 = vector.shape_cast %19 : vector<256x32xf32> to vector<16x16x32xf32>
    %21 = tpu.transpose %8, [1, 0, 2] : vector<16x16x4xf32> -> vector<16x16x4xf32>
    %22 = tpu.transpose %14, [1, 0, 2] : vector<16x16x4xf32> -> vector<16x16x4xf32>
    %23 = tpu.transpose %20, [1, 0, 2] : vector<16x16x32xf32> -> vector<16x16x32xf32>
    %24 = vector.extract_strided_slice %8 {offsets = [0, 0, 0], sizes = [16, 16, 1], strides = [1, 1, 1]} : vector<16x16x4xf32> to vector<16x16x1xf32>
    %25 = vector.shape_cast %24 : vector<16x16x1xf32> to vector<16x16xf32>
    %26 = vector.shape_cast %25 : vector<16x16xf32> to vector<16x16x1xf32>
    %27 = vector.extract_strided_slice %14 {offsets = [0, 0, 0], sizes = [16, 16, 1], strides = [1, 1, 1]} : vector<16x16x4xf32> to vector<16x16x1xf32>
    %28 = vector.shape_cast %27 : vector<16x16x1xf32> to vector<16x16xf32>
    %29 = vector.shape_cast %28 : vector<16x16xf32> to vector<16x1x16xf32>
    %30 = vector.broadcast %26 : vector<16x16x1xf32> to vector<16x16x16xf32>
    %31 = vector.broadcast %29 : vector<16x1x16xf32> to vector<16x16x16xf32>
    %32 = arith.mulf %30, %31 : vector<16x16x16xf32>
    %33 = vector.extract_strided_slice %8 {offsets = [0, 0, 1], sizes = [16, 16, 1], strides = [1, 1, 1]} : vector<16x16x4xf32> to vector<16x16x1xf32>
    %34 = vector.shape_cast %33 : vector<16x16x1xf32> to vector<16x16xf32>
    %35 = vector.shape_cast %34 : vector<16x16xf32> to vector<16x16x1xf32>
    %36 = vector.extract_strided_slice %14 {offsets = [0, 0, 1], sizes = [16, 16, 1], strides = [1, 1, 1]} : vector<16x16x4xf32> to vector<16x16x1xf32>
    %37 = vector.shape_cast %36 : vector<16x16x1xf32> to vector<16x16xf32>
    %38 = vector.shape_cast %37 : vector<16x16xf32> to vector<16x1x16xf32>
    %39 = vector.broadcast %35 : vector<16x16x1xf32> to vector<16x16x16xf32>
    %40 = vector.broadcast %38 : vector<16x1x16xf32> to vector<16x16x16xf32>
    %41 = arith.mulf %39, %40 : vector<16x16x16xf32>
    %42 = arith.addf %32, %41 : vector<16x16x16xf32>
    %43 = vector.extract_strided_slice %8 {offsets = [0, 0, 2], sizes = [16, 16, 1], strides = [1, 1, 1]} : vector<16x16x4xf32> to vector<16x16x1xf32>
    %44 = vector.shape_cast %43 : vector<16x16x1xf32> to vector<16x16xf32>
    %45 = vector.shape_cast %44 : vector<16x16xf32> to vector<16x16x1xf32>
    %46 = vector.extract_strided_slice %14 {offsets = [0, 0, 2], sizes = [16, 16, 1], strides = [1, 1, 1]} : vector<16x16x4xf32> to vector<16x16x1xf32>
    %47 = vector.shape_cast %46 : vector<16x16x1xf32> to vector<16x16xf32>
    %48 = vector.shape_cast %47 : vector<16x16xf32> to vector<16x1x16xf32>
    %49 = vector.broadcast %45 : vector<16x16x1xf32> to vector<16x16x16xf32>
    %50 = vector.broadcast %48 : vector<16x1x16xf32> to vector<16x16x16xf32>
    %51 = arith.mulf %49, %50 : vector<16x16x16xf32>
    %52 = arith.addf %42, %51 : vector<16x16x16xf32>
    %53 = vector.extract_strided_slice %8 {offsets = [0, 0, 3], sizes = [16, 16, 1], strides = [1, 1, 1]} : vector<16x16x4xf32> to vector<16x16x1xf32>
    %54 = vector.shape_cast %53 : vector<16x16x1xf32> to vector<16x16xf32>
    %55 = vector.shape_cast %54 : vector<16x16xf32> to vector<16x16x1xf32>
    %56 = vector.extract_strided_slice %14 {offsets = [0, 0, 3], sizes = [16, 16, 1], strides = [1, 1, 1]} : vector<16x16x4xf32> to vector<16x16x1xf32>
    %57 = vector.shape_cast %56 : vector<16x16x1xf32> to vector<16x16xf32>
    %58 = vector.shape_cast %57 : vector<16x16xf32> to vector<16x1x16xf32>
    %59 = vector.broadcast %55 : vector<16x16x1xf32> to vector<16x16x16xf32>
    %60 = vector.broadcast %58 : vector<16x1x16xf32> to vector<16x16x16xf32>
    %61 = arith.mulf %59, %60 : vector<16x16x16xf32>
    %62 = arith.addf %52, %61 : vector<16x16x16xf32>
    %63 = vector.extract_strided_slice %21 {offsets = [0, 0, 0], sizes = [16, 16, 1], strides = [1, 1, 1]} : vector<16x16x4xf32> to vector<16x16x1xf32>
    %64 = vector.shape_cast %63 : vector<16x16x1xf32> to vector<16x16xf32>
    %65 = vector.shape_cast %64 : vector<16x16xf32> to vector<16x16x1xf32>
    %66 = vector.extract_strided_slice %22 {offsets = [0, 0, 0], sizes = [16, 16, 1], strides = [1, 1, 1]} : vector<16x16x4xf32> to vector<16x16x1xf32>
    %67 = vector.shape_cast %66 : vector<16x16x1xf32> to vector<16x16xf32>
    %68 = vector.shape_cast %67 : vector<16x16xf32> to vector<16x1x16xf32>
    %69 = vector.broadcast %65 : vector<16x16x1xf32> to vector<16x16x16xf32>
    %70 = vector.broadcast %68 : vector<16x1x16xf32> to vector<16x16x16xf32>
    %71 = arith.mulf %69, %70 : vector<16x16x16xf32>
    %72 = vector.extract_strided_slice %21 {offsets = [0, 0, 1], sizes = [16, 16, 1], strides = [1, 1, 1]} : vector<16x16x4xf32> to vector<16x16x1xf32>
    %73 = vector.shape_cast %72 : vector<16x16x1xf32> to vector<16x16xf32>
    %74 = vector.shape_cast %73 : vector<16x16xf32> to vector<16x16x1xf32>
    %75 = vector.extract_strided_slice %22 {offsets = [0, 0, 1], sizes = [16, 16, 1], strides = [1, 1, 1]} : vector<16x16x4xf32> to vector<16x16x1xf32>
    %76 = vector.shape_cast %75 : vector<16x16x1xf32> to vector<16x16xf32>
    %77 = vector.shape_cast %76 : vector<16x16xf32> to vector<16x1x16xf32>
    %78 = vector.broadcast %74 : vector<16x16x1xf32> to vector<16x16x16xf32>
    %79 = vector.broadcast %77 : vector<16x1x16xf32> to vector<16x16x16xf32>
    %80 = arith.mulf %78, %79 : vector<16x16x16xf32>
    %81 = arith.addf %71, %80 : vector<16x16x16xf32>
    %82 = vector.extract_strided_slice %21 {offsets = [0, 0, 2], sizes = [16, 16, 1], strides = [1, 1, 1]} : vector<16x16x4xf32> to vector<16x16x1xf32>
    %83 = vector.shape_cast %82 : vector<16x16x1xf32> to vector<16x16xf32>
    %84 = vector.shape_cast %83 : vector<16x16xf32> to vector<16x16x1xf32>
    %85 = vector.extract_strided_slice %22 {offsets = [0, 0, 2], sizes = [16, 16, 1], strides = [1, 1, 1]} : vector<16x16x4xf32> to vector<16x16x1xf32>
    %86 = vector.shape_cast %85 : vector<16x16x1xf32> to vector<16x16xf32>
    %87 = vector.shape_cast %86 : vector<16x16xf32> to vector<16x1x16xf32>
    %88 = vector.broadcast %84 : vector<16x16x1xf32> to vector<16x16x16xf32>
    %89 = vector.broadcast %87 : vector<16x1x16xf32> to vector<16x16x16xf32>
    %90 = arith.mulf %88, %89 : vector<16x16x16xf32>
    %91 = arith.addf %81, %90 : vector<16x16x16xf32>
    %92 = vector.extract_strided_slice %21 {offsets = [0, 0, 3], sizes = [16, 16, 1], strides = [1, 1, 1]} : vector<16x16x4xf32> to vector<16x16x1xf32>
    %93 = vector.shape_cast %92 : vector<16x16x1xf32> to vector<16x16xf32>
    %94 = vector.shape_cast %93 : vector<16x16xf32> to vector<16x16x1xf32>
    %95 = vector.extract_strided_slice %22 {offsets = [0, 0, 3], sizes = [16, 16, 1], strides = [1, 1, 1]} : vector<16x16x4xf32> to vector<16x16x1xf32>
    %96 = vector.shape_cast %95 : vector<16x16x1xf32> to vector<16x16xf32>
    %97 = vector.shape_cast %96 : vector<16x16xf32> to vector<16x1x16xf32>
    %98 = vector.broadcast %94 : vector<16x16x1xf32> to vector<16x16x16xf32>
    %99 = vector.broadcast %97 : vector<16x1x16xf32> to vector<16x16x16xf32>
    %100 = arith.mulf %98, %99 : vector<16x16x16xf32>
    %101 = arith.addf %91, %100 : vector<16x16x16xf32>
    %c0_17 = arith.constant 0 : index
    %c0_18 = arith.constant 0 : index
    %102 = vector.load %arg3[%c0_17, %c0_18] : memref<16x16xf32, #tpu.memory_space<vmem>>, vector<16x16xf32>
    %103 = vector.shape_cast %102 : vector<16x16xf32> to vector<1x16x16xf32>
    %104 = vector.broadcast %103 : vector<1x16x16xf32> to vector<16x16x16xf32>
    %105 = arith.addf %101, %104 : vector<16x16x16xf32>
    %cst_19 = arith.constant dense<0xFF800000> : vector<16x16xf32>
    %106 = vector.multi_reduction <maximumf>, %62, %cst_19 [2] : vector<16x16x16xf32> to vector<16x16xf32>
    %cst_20 = arith.constant dense<0xFF800000> : vector<16x16xf32>
    %107 = vector.multi_reduction <maximumf>, %105, %cst_20 [2] : vector<16x16x16xf32> to vector<16x16xf32>
    %108 = tpu.transpose %107, [1, 0] : vector<16x16xf32> -> vector<16x16xf32>
    %109 = arith.maximumf %106, %108 : vector<16x16xf32>
    %110 = vector.shape_cast %109 : vector<16x16xf32> to vector<16x16x1xf32>
    %111 = vector.broadcast %110 : vector<16x16x1xf32> to vector<16x16x16xf32>
    %112 = arith.subf %62, %111 : vector<16x16x16xf32>
    %113 = math.exp %112 : vector<16x16x16xf32>
    %114 = tpu.transpose %109, [1, 0] : vector<16x16xf32> -> vector<16x16xf32>
    %115 = vector.shape_cast %114 : vector<16x16xf32> to vector<16x16x1xf32>
    %116 = vector.broadcast %115 : vector<16x16x1xf32> to vector<16x16x16xf32>
    %117 = arith.subf %105, %116 : vector<16x16x16xf32>
    %118 = math.exp %117 : vector<16x16x16xf32>
    %cst_21 = arith.constant dense<0.000000e+00> : vector<16x16xf32>
    %119 = vector.multi_reduction <add>, %113, %cst_21 [2] : vector<16x16x16xf32> to vector<16x16xf32>
    %cst_22 = arith.constant dense<0.000000e+00> : vector<16x16xf32>
    %120 = vector.multi_reduction <add>, %118, %cst_22 [2] : vector<16x16x16xf32> to vector<16x16xf32>
    %121 = tpu.transpose %120, [1, 0] : vector<16x16xf32> -> vector<16x16xf32>
    %122 = arith.addf %119, %121 : vector<16x16xf32>
    "tpu.trace_start"() <{level = 10 : i32, message = "hwg,hgc->hwc"}> : () -> ()
    %cst_23 = arith.constant dense<0.000000e+00> : vector<16x16x32xf32>
    %123 = tpu.matmul %113, %20, %cst_23 {dimension_numbers = #tpu.dot_dimension_numbers<[2], [1], [1], [2], [0, 0, 0, 1, 1, 2], [0], [0]>} : vector<16x16x16xf32>, vector<16x16x32xf32>, vector<16x16x32xf32> -> vector<16x16x32xf32>
    "tpu.trace_stop"() : () -> ()
    "tpu.trace_start"() <{level = 10 : i32, message = "whg,wgc->whc"}> : () -> ()
    %cst_24 = arith.constant dense<0.000000e+00> : vector<16x16x32xf32>
    %124 = tpu.matmul %118, %23, %cst_24 {dimension_numbers = #tpu.dot_dimension_numbers<[2], [1], [1], [2], [0, 0, 0, 1, 1, 2], [0], [0]>} : vector<16x16x16xf32>, vector<16x16x32xf32>, vector<16x16x32xf32> -> vector<16x16x32xf32>
    "tpu.trace_stop"() : () -> ()
    %125 = tpu.transpose %124, [1, 0, 2] : vector<16x16x32xf32> -> vector<16x16x32xf32>
    %c0_25 = arith.constant 0 : index
    %c0_26 = arith.constant 0 : index
    %126 = memref.load %arg1[%c0_25, %c0_26] : memref<1x1xf32, #tpu.memory_space<smem>>
    %127 = tpu.reciprocal %122 {approx = true} : vector<16x16xf32> -> vector<16x16xf32>
    %128 = vector.broadcast %126 : f32 to vector<16x16xf32>
    %129 = arith.mulf %128, %127 : vector<16x16xf32>
    %130 = vector.shape_cast %129 : vector<16x16xf32> to vector<16x16x1xf32>
    %131 = arith.addf %123, %125 : vector<16x16x32xf32>
    %132 = vector.broadcast %130 : vector<16x16x1xf32> to vector<16x16x32xf32>
    %133 = arith.mulf %132, %131 : vector<16x16x32xf32>
    %134 = arith.addf %133, %1 : vector<16x16x32xf32>
    %c0_27 = arith.constant 0 : index
    %c0_28 = arith.constant 0 : index
    %c0_29 = arith.constant 0 : index
    %c0_30 = arith.constant 0 : index
    %135 = vector.load %arg10[%c0_27, %c0_28, %c0_29, %c0_30] : memref<1x16x16x32xf32, #tpu.memory_space<vmem>>, vector<1x16x16x32xf32>
    %136 = vector.shape_cast %135 : vector<1x16x16x32xf32> to vector<16x16x32xf32>
    %137 = vector.shape_cast %134 : vector<16x16x32xf32> to vector<1x16x16x32xf32>
    tpu.vector_store %arg10[%c0_27, %c0_28, %c0_29, %c0_30], %137 {strides = array<i32>} : memref<1x16x16x32xf32, #tpu.memory_space<vmem>>, vector<1x16x16x32xf32>,
    return
  }
  func.func @transform_0(%arg0: i32) -> (i32, i32) {
    %c0_i32 = arith.constant 0 : i32
    %c0_i32_0 = arith.constant 0 : i32
    %c0_i32_1 = arith.constant 0 : i32
    return %c0_i32, %c0_i32_0 : i32, i32
  }
  func.func @transform_1(%arg0: i32) -> (i32, i32, i32, i32) {
    %c0_i32 = arith.constant 0 : i32
    %c0_i32_0 = arith.constant 0 : i32
    %c0_i32_1 = arith.constant 0 : i32
    %c0_i32_2 = arith.constant 0 : i32
    return %arg0, %c0_i32, %c0_i32_0, %c0_i32_1 : i32, i32, i32, i32
  }
  func.func @transform_2(%arg0: i32) -> (i32, i32) {
    %c0_i32 = arith.constant 0 : i32
    %c0_i32_0 = arith.constant 0 : i32
    %c0_i32_1 = arith.constant 0 : i32
    return %c0_i32, %c0_i32_0 : i32, i32
  }
  func.func @transform_3(%arg0: i32) -> (i32, i32) {
    %c0_i32 = arith.constant 0 : i32
    %c0_i32_0 = arith.constant 0 : i32
    %c0_i32_1 = arith.constant 0 : i32
    return %c0_i32, %c0_i32_0 : i32, i32
  }
  func.func @transform_4(%arg0: i32) -> (i32, i32) {
    %c0_i32 = arith.constant 0 : i32
    %c0_i32_0 = arith.constant 0 : i32
    %c0_i32_1 = arith.constant 0 : i32
    return %c0_i32, %c0_i32_0 : i32, i32
  }
  func.func @transform_5(%arg0: i32) -> (i32, i32) {
    %c0_i32 = arith.constant 0 : i32
    %c0_i32_0 = arith.constant 0 : i32
    %c0_i32_1 = arith.constant 0 : i32
    return %c0_i32, %c0_i32_0 : i32, i32
  }
  func.func @transform_6(%arg0: i32) -> (i32, i32) {
    %c0_i32 = arith.constant 0 : i32
    %c0_i32_0 = arith.constant 0 : i32
    %c0_i32_1 = arith.constant 0 : i32
    return %c0_i32, %c0_i32_0 : i32, i32
  }
  func.func @transform_7(%arg0: i32) -> (i32, i32) {
    %c0_i32 = arith.constant 0 : i32
    %c0_i32_0 = arith.constant 0 : i32
    %c0_i32_1 = arith.constant 0 : i32
    return %c0_i32, %c0_i32_0 : i32, i32
  }
  func.func @transform_8(%arg0: i32) -> (i32, i32) {
    %c0_i32 = arith.constant 0 : i32
    %c0_i32_0 = arith.constant 0 : i32
    %c0_i32_1 = arith.constant 0 : i32
    return %c0_i32, %c0_i32_0 : i32, i32
  }
  func.func @transform_9(%arg0: i32) -> (i32, i32, i32, i32) {
    %c0_i32 = arith.constant 0 : i32
    %c0_i32_0 = arith.constant 0 : i32
    %c0_i32_1 = arith.constant 0 : i32
    %c0_i32_2 = arith.constant 0 : i32
    return %arg0, %c0_i32, %c0_i32_0, %c0_i32_1 : i32, i32, i32, i32
  }
}

</mosaic_0001>

<bundles_post_ra>
// kernel: criss_cross_attention.1
= control target key start
LH: loop header
LB: loop body
LE: loop exit
PB: predicated region body
PF: predicated region fallthrough
CT: control target
= control target key end

     0   :  { %s13976_s11 = smov 0   ;;  %s20578_s0 = inlined_call_operand.<no memory space> [shape: f32[1,1], index: 0, kind: input, shape index: {}]   ;;  %s20579_s1 = inlined_call_operand.vmem [shape: f32[2,16,16,32], index: 1, kind: input, shape index: {}, may-alias: {1,9}]   ;;  %s20580_s2 = inlined_call_operand.vmem [shape: f32[16,16], index: 2, kind: input, shape index: {}]   ;;  %s20581_s3 = inlined_call_operand.vmem [shape: f32[32,4], index: 3, kind: input, shape index: {}]   ;;  %s20582_s4 = inlined_call_operand.vmem [shape: f32[1,4], index: 4, kind: input, shape index: {}]   ;;  %s20583_s5 = inlined_call_operand.vmem [shape: f32[32,4], index: 5, kind: input, shape index: {}]   ;;  %s20584_s6 = inlined_call_operand.vmem [shape: f32[1,4], index: 6, kind: input, shape index: {}]   ;;  %s20585_s7 = inlined_call_operand.vmem [shape: f32[32,32], index: 7, kind: input, shape index: {}]   ;;  %s20586_s8 = inlined_call_operand.vmem [shape: f32[1,32], index: 8, kind: input, shape index: {}]   ;;  %s20587_s9 = inlined_call_operand.vmem [shape: f32[2,16,16,32], index: 9, kind: output, shape index: {}, may-alias: {1,9}]  }
   0x1   :  { %14 = sst [smem:[#allocation2]] %s20578_s0 }
   0x2 LB: > { %s12814_s12 = sadd.s32 4294967295, %s13915_s11   ;;  %p12818_p0 = scmp.ge.s32.totalorder %s13915_s11, 1  ;;  %s13915_s11 = sphi %s13976_s11, %s20_s11  }
   0x3   : > { %p288_p1 = scmp.lt.s32.totalorder %s13915_s11, 3 }
   0x5   : > { %p289_p2 = pnand %p12818_p0, %p288_p1 }
   0x7   : > { %292 = sbr.rel (%p289_p2) target bundleno = 3089 (0xc11), region = 56 }
   0xc   : > { %v369_v0 = vld [vmem:[%s20581_s3 + $0x18] sm:$0xff]  ;;  %v368_v2 = vld [vmem:[%s20581_s3 + $0x10] sm:$0xff]  ;;  %p324_p3 = scmp.lt.s32.totalorder %s12814_s12, 1  ;;  %v367_v4 = vld [vmem:[%s20581_s3 + $0x8] sm:$0xff]  ;;  %vm377_vm0 = vcmask 261120   ;;  %v20589_v40 = vmov 1   ;;  %v20588_v57 = vlaneseq }
   0xd   : > { %v702_v1 = vld [vmem:[%s20583_s5 + $0x18] sm:$0xff]  ;;  %13226 = vmatprep.subr.mxu0 %v369_v0  ;;  %v701_v3 = vld [vmem:[%s20583_s5 + $0x10] sm:$0xff]  ;;  %v700_v5 = vld [vmem:[%s20583_s5 + $0x8] sm:$0xff]  ;;  %13635 = vset.pattern.permute.xlu0 %v20589_v40  ;;  %v20591_v41 = vmov 0   ;;  %v20593_v54 = vmov 2   ;;  %vm3102_vm1 = vcmask 130112  }
   0xe   : > { %13282 = vmatprep.subr.mxu1 %v702_v1  ;;  %13227 = vmatpush3.msra.mxu0 %v369_v0  ;;  %s23004_s12 = smov (!%p324_p3, %s12814_s12), 1  ;;  %v366_v6 = vld [vmem:[%s20581_s3] sm:$0xff]  ;;  %v13920_v58 = vmov 1983009808   ;;  %vm7264_vm2 = vcmask 130048   ;;  %vm3239_vm3 = vcmask 1041409  }
   0xf   : > { %13283 = vmatpush3.msra.mxu1 %v702_v1  ;;  %13228 = vmatprep.subr.mxu0 %v368_v2  ;;  %v699_v7 = vld [vmem:[%s20583_s5] sm:$0xff]  ;;  %s12988_s28 = sshll.u32 %s23004_s12, 8  ;;  %v1174_v59 = vunpack.c.l.s4 %v13920_v58  ;;  %vm3240_vm4 = vcmask 1042434   ;;  %vm3242_vm5 = vcmask 1043459   ;;  %vm3244_vm6 = vcmask 1044484   ;;  %s11141_s0 = sld [smem:[#allocation2]] }
  0x10   : > { %13284 = vmatprep.subr.mxu1 %v701_v3  ;;  %13229 = vmatpush3.msra.mxu0 %v368_v2  ;;  %s14016_s10 = scalar_lea.vmem %s20579_s1, %s12988_s28  ;;  %v14125_v42 = vld [vmem:[%s20584_s6] ss:$0 sm:$0xff]  ;;  %vm3246_vm7 = vcmask 1045509   ;;  %vm3248_vm8 = vcmask 1046534   ;;  %vm3250_vm9 = vcmask 1047559   ;;  %s20397_s17 = scalar_lea.vmem %s20587_s9, %s12988_s28 }
  0x11   : > { %13285 = vmatpush3.msra.mxu1 %v701_v3  ;;  %13230 = vmatprep.subr.mxu0 %v367_v4  ;;  %v14019_v8 = vld [vmem:[%s14016_s10] sm:$0xff]  ;;  %v335_v9 = vld [vmem:[%s14016_s10 + $0x8] sm:$0xff]  ;;  %v336_v10 = vld [vmem:[%s14016_s10 + $0x10] sm:$0xff] }
  0x12   : > { %13286 = vmatprep.subr.mxu1 %v700_v5  ;;  %13231 = vmatpush3.msra.mxu0 %v367_v4  ;;  %v337_v11 = vld [vmem:[%s14016_s10 + $0x18] sm:$0xff]  ;;  %v338_v12 = vld [vmem:[%s14016_s10 + $0x20] sm:$0xff]  ;;  %v339_v13 = vld [vmem:[%s14016_s10 + $0x28] sm:$0xff]  ;;  %v14168_v4 = vshrl.u32 %v20588_v57, 7 }
  0x13   : > { %13287 = vmatpush3.msra.mxu1 %v700_v5  ;;  %13232 = vmatprep.subr.mxu0 %v366_v6  ;;  %v340_v14 = vld [vmem:[%s14016_s10 + $0x30] sm:$0xff]  ;;  %v341_v15 = vld [vmem:[%s14016_s10 + $0x38] sm:$0xff]  ;;  %v342_v16 = vld [vmem:[%s14016_s10 + $0x40] sm:$0xff]  ;;  %v1175_v5 = vunpack.c.0.s8 %v1174_v59 }
  0x14   : > { %13288 = vmatprep.subr.mxu1 %v699_v7  ;;  %13233 = vmatpush3.msra.mxu0 %v366_v6  ;;  %v343_v17 = vld [vmem:[%s14016_s10 + $0x48] sm:$0xff]  ;;  %v344_v18 = vld [vmem:[%s14016_s10 + $0x50] sm:$0xff]  ;;  %v345_v19 = vld [vmem:[%s14016_s10 + $0x58] sm:$0xff]  ;;  %21100 = vst [vmem:[#allocation9_spill] sm:$0xff] %v14168_v4 }
  0x15   : > { %13234 = vmatprep.mubr.msk.f32.mxu0 %vm377_vm0, %v14019_v8  ;;  %13289 = vmatpush3.msra.mxu1 %v699_v7  ;;  %v346_v20 = vld [vmem:[%s14016_s10 + $0x60] sm:$0xff]  ;;  %v347_v21 = vld [vmem:[%s14016_s10 + $0x68] sm:$0xff]  ;;  %v348_v22 = vld [vmem:[%s14016_s10 + $0x70] sm:$0xff] }
  0x16   : > { %13290 = vmatprep.mubr.msk.f32.mxu1 %vm377_vm0, %v14019_v8  ;;  %13235 = vmatmul.mubr.msk.f32.vlgmr.msra.gmra.mxu0 %vm377_vm0, %v335_v9  ;;  %v349_v23 = vld [vmem:[%s14016_s10 + $0x78] sm:$0xff]  ;;  %v350_v24 = vld [vmem:[%s14016_s10 + $0x80] sm:$0xff]  ;;  %v351_v25 = vld [vmem:[%s14016_s10 + $0x88] sm:$0xff] }
  0x17   : > { %13291 = vmatmul.mubr.msk.f32.vlgmr.msra.gmra.mxu1 %vm377_vm0, %v335_v9  ;;  %13237 = vmatprep.mubr.msk.f32.mxu0 %vm377_vm0, %v336_v10  ;;  %v352_v26 = vld [vmem:[%s14016_s10 + $0x90] sm:$0xff]  ;;  %v353_v27 = vld [vmem:[%s14016_s10 + $0x98] sm:$0xff]  ;;  %v354_v28 = vld [vmem:[%s14016_s10 + $0xa0] sm:$0xff] }
  0x18   : > { %13293 = vmatprep.mubr.msk.f32.mxu1 %vm377_vm0, %v336_v10  ;;  %v355_v29 = vld [vmem:[%s14016_s10 + $0xa8] sm:$0xff]  ;;  %v356_v30 = vld [vmem:[%s14016_s10 + $0xb0] sm:$0xff]  ;;  %v357_v31 = vld [vmem:[%s14016_s10 + $0xb8] sm:$0xff]  ;;  %13633 = vset.pattern.permute.xlu1 %v20591_v41 }
  0x19   : > { %v358_v32 = vld [vmem:[%s14016_s10 + $0xc0] sm:$0xff]  ;;  %v359_v33 = vld [vmem:[%s14016_s10 + $0xc8] sm:$0xff]  ;;  %v360_v34 = vld [vmem:[%s14016_s10 + $0xd0] sm:$0xff] }
  0x1a   : > { %13238 = vmatmul.mubr.msk.f32.gmra.mxu0 %vm377_vm0, %v337_v11  ;;  %v361_v35 = vld [vmem:[%s14016_s10 + $0xd8] sm:$0xff]  ;;  %v362_v36 = vld [vmem:[%s14016_s10 + $0xe0] sm:$0xff]  ;;  %v363_v37 = vld [vmem:[%s14016_s10 + $0xe8] sm:$0xff] }
  0x1b   : > { %13294 = vmatmul.mubr.msk.f32.gmra.mxu1 %vm377_vm0, %v337_v11  ;;  %13240 = vmatprep.mubr.msk.f32.mxu0 %vm377_vm0, %v338_v12  ;;  %v364_v38 = vld [vmem:[%s14016_s10 + $0xf0] sm:$0xff]  ;;  %v365_v39 = vld [vmem:[%s14016_s10 + $0xf8] sm:$0xff]  ;;  %v14130_v45 = vld [vmem:[%s20582_s4] ss:$0 sm:$0xff] }
  0x1c   : > { %13296 = vmatprep.mubr.msk.f32.mxu1 %vm377_vm0, %v338_v12 }
  0x1e   : > { %13241 = vmatmul.mubr.msk.f32.gmra.mxu0 %vm377_vm0, %v339_v13 }
  0x1f   : > { %13297 = vmatmul.mubr.msk.f32.gmra.mxu1 %vm377_vm0, %v339_v13  ;;  %13243 = vmatprep.mubr.msk.f32.mxu0 %vm377_vm0, %v340_v14  ;;  %v14188_v13 = vsub.s32 %v1175_v5, %v14168_v4 }
  0x20   : > { %13299 = vmatprep.mubr.msk.f32.mxu1 %vm377_vm0, %v340_v14 }
  0x21   : > { %21103 = vst [vmem:[#allocation12_spill] sm:$0xff] %v14188_v13 }
  0x22   : > { %13244 = vmatmul.mubr.msk.f32.gmra.mxu0 %vm377_vm0, %v341_v15 }
  0x23   : > { %13300 = vmatmul.mubr.msk.f32.gmra.mxu1 %vm377_vm0, %v341_v15  ;;  %13246 = vmatprep.mubr.msk.f32.mxu0 %vm377_vm0, %v342_v16 }
  0x24   : > { %13302 = vmatprep.mubr.msk.f32.mxu1 %vm377_vm0, %v342_v16 }
  0x26   : > { %13247 = vmatmul.mubr.msk.f32.gmra.mxu0 %vm377_vm0, %v343_v17 }
  0x27   : > { %13303 = vmatmul.mubr.msk.f32.gmra.mxu1 %vm377_vm0, %v343_v17  ;;  %13249 = vmatprep.mubr.msk.f32.mxu0 %vm377_vm0, %v344_v18 }
  0x28   : > { %13305 = vmatprep.mubr.msk.f32.mxu1 %vm377_vm0, %v344_v18 }
  0x2a   : > { %13250 = vmatmul.mubr.msk.f32.gmra.mxu0 %vm377_vm0, %v345_v19 }
  0x2b   : > { %13306 = vmatmul.mubr.msk.f32.gmra.mxu1 %vm377_vm0, %v345_v19  ;;  %13252 = vmatprep.mubr.msk.f32.mxu0 %vm377_vm0, %v346_v20 }
  0x2c   : > { %13308 = vmatprep.mubr.msk.f32.mxu1 %vm377_vm0, %v346_v20 }
  0x2e   : > { %13253 = vmatmul.mubr.msk.f32.gmra.mxu0 %vm377_vm0, %v347_v21 }
  0x2f   : > { %13309 = vmatmul.mubr.msk.f32.gmra.mxu1 %vm377_vm0, %v347_v21  ;;  %13255 = vmatprep.mubr.msk.f32.mxu0 %vm377_vm0, %v348_v22 }
  0x30   : > { %13311 = vmatprep.mubr.msk.f32.mxu1 %vm377_vm0, %v348_v22 }
  0x32   : > { %13256 = vmatmul.mubr.msk.f32.gmra.mxu0 %vm377_vm0, %v349_v23 }
  0x33   : > { %13312 = vmatmul.mubr.msk.f32.gmra.mxu1 %vm377_vm0, %v349_v23  ;;  %13258 = vmatprep.mubr.msk.f32.mxu0 %vm377_vm0, %v350_v24 }
  0x34   : > { %13314 = vmatprep.mubr.msk.f32.mxu1 %vm377_vm0, %v350_v24 }
  0x36   : > { %13259 = vmatmul.mubr.msk.f32.gmra.mxu0 %vm377_vm0, %v351_v25 }
  0x37   : > { %13315 = vmatmul.mubr.msk.f32.gmra.mxu1 %vm377_vm0, %v351_v25  ;;  %13261 = vmatprep.mubr.msk.f32.mxu0 %vm377_vm0, %v352_v26 }
  0x38   : > { %13317 = vmatprep.mubr.msk.f32.mxu1 %vm377_vm0, %v352_v26 }
  0x3a   : > { %13262 = vmatmul.mubr.msk.f32.gmra.mxu0 %vm377_vm0, %v353_v27 }
  0x3b   : > { %13318 = vmatmul.mubr.msk.f32.gmra.mxu1 %vm377_vm0, %v353_v27  ;;  %13264 = vmatprep.mubr.msk.f32.mxu0 %vm377_vm0, %v354_v28 }
  0x3c   : > { %13320 = vmatprep.mubr.msk.f32.mxu1 %vm377_vm0, %v354_v28 }
  0x3e   : > { %13265 = vmatmul.mubr.msk.f32.gmra.mxu0 %vm377_vm0, %v355_v29 }
  0x3f   : > { %13321 = vmatmul.mubr.msk.f32.gmra.mxu1 %vm377_vm0, %v355_v29  ;;  %13267 = vmatprep.mubr.msk.f32.mxu0 %vm377_vm0, %v356_v30 }
  0x40   : > { %13323 = vmatprep.mubr.msk.f32.mxu1 %vm377_vm0, %v356_v30 }
  0x42   : > { %13268 = vmatmul.mubr.msk.f32.gmra.mxu0 %vm377_vm0, %v357_v31 }
  0x43   : > { %13324 = vmatmul.mubr.msk.f32.gmra.mxu1 %vm377_vm0, %v357_v31  ;;  %13270 = vmatprep.mubr.msk.f32.mxu0 %vm377_vm0, %v358_v32 }
  0x44   : > { %13326 = vmatprep.mubr.msk.f32.mxu1 %vm377_vm0, %v358_v32 }
  0x46   : > { %13271 = vmatmul.mubr.msk.f32.gmra.mxu0 %vm377_vm0, %v359_v33 }
  0x47   : > { %13327 = vmatmul.mubr.msk.f32.gmra.mxu1 %vm377_vm0, %v359_v33  ;;  %13273 = vmatprep.mubr.msk.f32.mxu0 %vm377_vm0, %v360_v34 }
  0x48   : > { %13329 = vmatprep.mubr.msk.f32.mxu1 %vm377_vm0, %v360_v34 }
  0x4a   : > { %13274 = vmatmul.mubr.msk.f32.gmra.mxu0 %vm377_vm0, %v361_v35 }
  0x4b   : > { %13330 = vmatmul.mubr.msk.f32.gmra.mxu1 %vm377_vm0, %v361_v35  ;;  %13276 = vmatprep.mubr.msk.f32.mxu0 %vm377_vm0, %v362_v36 }
  0x4c   : > { %13332 = vmatprep.mubr.msk.f32.mxu1 %vm377_vm0, %v362_v36 }
  0x4e   : > { %13277 = vmatmul.mubr.msk.f32.gmra.mxu0 %vm377_vm0, %v363_v37 }
  0x4f   : > { %13333 = vmatmul.mubr.msk.f32.gmra.mxu1 %vm377_vm0, %v363_v37  ;;  %13279 = vmatprep.mubr.msk.f32.mxu0 %vm377_vm0, %v364_v38 }
  0x50   : > { %13335 = vmatprep.mubr.msk.f32.mxu1 %vm377_vm0, %v364_v38  ;;  %v13921_v38 = vmov 1934713408  }
  0x52   : > { %13280 = vmatmul.mubr.msk.f32.gmra.mxu0 %vm377_vm0, %v365_v39 }
  0x53   : > { %13336 = vmatmul.mubr.msk.f32.gmra.mxu1 %vm377_vm0, %v365_v39  ;;  %13346 = vmatprep.mubr.msk.f32.mxu0 %vm377_vm0, %v14019_v8  ;;  %v1238_v39 = vunpack.c.l.s4 %v13921_v38 }
  0xd6   : > { %v13236_v43 = vpop.f32.mrf.mxu0 }
  0xd7   : > { %v13292_v44 = vpop.f32.mrf.mxu1  ;;  %v14138_v49 = vadd.f32 %v13236_v43, %v14130_v45 }
  0xd8   : > { %v14133_v46 = vadd.f32 %v13292_v44, %v14125_v42  ;;  %v540_v47 = vpop.f32.mrf.mxu0 }
  0xd9   : > { %v776_v48 = vpop.f32.mrf.mxu1  ;;  %21095 = vst [vmem:[#allocation4_spill] sm:$0xff] %v14138_v49  ;;  %v14152_v63 = vadd.f32 %v14130_v45, %v540_v47 }
  0xda   : > { %21094 = vst [vmem:[#allocation3_spill] sm:$0xff] %v14133_v46  ;;  %3522 = vperm.xlu0 %13635, %v14133_v46   ;;  %2999 = vperm.xlu1 %13633, %v14133_v46   ;;  %v13239_v50 = vpop.f32.mrf.mxu0  ;;  %v14147_v60 = vadd.f32 %v14125_v42, %v776_v48 }
  0xdb   : > { %v13295_v51 = vpop.f32.mrf.mxu1  ;;  %21097 = vst [vmem:[#allocation6_spill] sm:$0xff] %v14152_v63  ;;  %v14173_v8 = vadd.f32 %v13239_v50, %v14130_v45 }
  0xdc   : > { %v550_v52 = vpop.f32.mrf.mxu0  ;;  %21096 = vst [vmem:[#allocation5_spill] sm:$0xff] %v14147_v60  ;;  %v14195_v17 = vadd.f32 %v13295_v51, %v14125_v42 }
  0xdd   : > { %v14140_v53 = vpop.f32.mrf.mxu1  ;;  %v14164_v3 = vadd.f32 %v14130_v45, %v550_v52  ;;  %21101 = vst [vmem:[#allocation10_spill] sm:$0xff] %v14173_v8 }
  0xde   : > { %13636 = vset.pattern.permute.xlu0 %v20593_v54  ;;  %13634 = vset.pattern.permute.xlu1 %v20589_v40  ;;  %v13242_v56 = vpop.f32.mrf.mxu0  ;;  %21104 = vst [vmem:[#allocation13_spill] sm:$0xff] %v14195_v17 }
  0xdf   : > { %v13298_v55 = vpop.f32.mrf.mxu1  ;;  %3939 = vperm.xlu0 %13636, %v14138_v49   ;;  %3395 = vperm.xlu1 %13634, %v14138_v49   ;;  %21099 = vst [vmem:[#allocation8_spill] sm:$0xff] %v14164_v3  ;;  %v14215_v25 = vadd.f32 %v13242_v56, %v14130_v45  ;;  %v1239_v56 = vunpack.c.0.s8 %v1238_v39 }
  0xe0   : > { %v560_v61 = vpop.f32.mrf.mxu0  ;;  %v14227_v31 = vadd.f32 %v13298_v55, %v14125_v42 }
  0xe1   : > { %v14149_v62 = vpop.f32.mrf.mxu1  ;;  %v14155_v0 = vadd.f32 %v14130_v45, %v560_v61  ;;  %21105 = vst [vmem:[#allocation14_spill] sm:$0xff] %v14215_v25 }
  0xe2   : > { %v14161_v2 = vpop.f32.mrf.mxu0  ;;  %21107 = vst [vmem:[#allocation16_spill] sm:$0xff] %v14227_v31 }
  0xe3   : > { %21098 = vst [vmem:[#allocation7_spill] sm:$0xff] %v14155_v0  ;;  %v14157_v1 = vpop.f32.mrf.mxu1  ;;  %13637 = vset.pattern.permute.xlu0 %v20589_v40  ;;  %3519 = vperm.xlu1 %13634, %v14147_v60   ;;  %v1171_v12 = vcombine.low %v14152_v63, %v14155_v0 }
  0xe4   : > { %3391 = vperm.xlu0 %13637, %v14152_v63   ;;  %v570_v6 = vpop.f32.mrf.mxu0 }
  0xe5   : > { %v14170_v7 = vpop.f32.mrf.mxu1  ;;  %v14176_v9 = vadd.f32 %v14130_v45, %v570_v6  ;;  %v14205_v21 = vrot.slane %v1171_v12, %v14188_v13 }
  0xe6   : > { %v14181_v11 = vpop.f32.mrf.mxu0 }
  0xe7   : > { %21102 = vst [vmem:[#allocation11_spill] sm:$0xff] %v14176_v9  ;;  %v14178_v10 = vpop.f32.mrf.mxu1  ;;  %13638 = vset.pattern.permute.xlu1 %v20593_v54  ;;  %v1187_v14 = vcombine.low %v14164_v3, %v14176_v9 }
  0xe8   : > { %3935 = vperm.xlu1 %13638, %v14152_v63   ;;  %3403 = vperm.xlu0 %13637, %v14173_v8   ;;  %v580_v15 = vpop.f32.mrf.mxu0  ;;  %v21131_v63 = vmov 0  }
  0xe9   : > { %v14192_v16 = vpop.f32.mrf.mxu1  ;;  %v14198_v18 = vrot.slane %v1187_v14, %v14188_v13  ;;  %v14222_v28 = vadd.f32 %v14130_v45, %v580_v15  ;;  %v14281_v15 = vadd.f32 %v14161_v2, %v14130_v45 }
  0xea   : > { %v14200_v19 = vpop.f32.mrf.mxu0 }
  0xeb   : > { %v14202_v20 = vpop.f32.mrf.mxu1  ;;  %v1236_v24 = vcombine.high %v14205_v21, %v14198_v18  ;;  %21106 = vst [vmem:[#allocation15_spill] sm:$0xff] %v14222_v28 }
  0xec   : > { %13639 = vset.pattern.permute.xlu1 %v20591_v41  ;;  %3528 = vperm.xlu0 %13637, %v14195_v17   ;;  %v590_v22 = vpop.f32.mrf.mxu0 }
  0xed   : > { %v14209_v23 = vpop.f32.mrf.mxu1  ;;  %2820 = vperm.xlu1 %13639, %v14173_v8   ;;  %v14240_v36 = vadd.f32 %v14130_v45, %v590_v22  ;;  %v14284_v22 = vsub.s32 %v1239_v56, %v14168_v4  ;;  %v14305_v56 = vadd.f32 %v14157_v1, %v14125_v42  ;;  %v21127_v4 = vmov 2  }
  0xee   : > { %v14217_v26 = vpop.f32.mrf.mxu0 }
  0xef   : > { %v14219_v27 = vpop.f32.mrf.mxu1  ;;  %21110 = vst [vmem:[#allocation19_spill] sm:$0xff] %v14240_v36  ;;  %21115 = vst [vmem:[#allocation24_spill] sm:$0xff] %v14284_v22  ;;  %v1250_v2 = vrot.slane %v1236_v24, %v14284_v22  ;;  %v14314_v24 = vadd.f32 %v14125_v42, %v14140_v53 }
  0xf0   : > { %3411 = vperm.xlu0 %13637, %v14215_v25   ;;  %v600_v29 = vpop.f32.mrf.mxu0  ;;  %21118 = vst [vmem:[#allocation27_spill] sm:$0xff] %v14305_v56 }
  0xf1   : > { %v836_v30 = vpop.f32.mrf.mxu1  ;;  %3005 = vperm.xlu1 %13639, %v14195_v17   ;;  %v14230_v32 = vadd.f32 %v14130_v45, %v600_v29  ;;  %21121 = vst [vmem:[#allocation30_spill] sm:$0xff] %v14314_v24 }
  0xf2   : > { %v14233_v33 = vadd.f32 %v14125_v42, %v836_v30  ;;  %v14235_v34 = vpop.f32.mrf.mxu0 }
  0xf3   : > { %21108 = vst [vmem:[#allocation17_spill] sm:$0xff] %v14230_v32  ;;  %v14237_v35 = vpop.f32.mrf.mxu1  ;;  %v1203_v37 = vcombine.low %v14222_v28, %v14230_v32 }
  0xf4   : > { %21109 = vst [vmem:[#allocation18_spill] sm:$0xff] %v14233_v33  ;;  %3534 = vperm.xlu0 %13637, %v14227_v31   ;;  %v610_v43 = vpop.f32.mrf.mxu0 }
  0xf5   : > { %v846_v44 = vpop.f32.mrf.mxu1  ;;  %13640 = vset.pattern.permute.xlu1 %v20593_v54  ;;  %v14247_v47 = vadd.f32 %v14130_v45, %v610_v43  ;;  %v14259_v52 = vrot.slane %v1203_v37, %v14188_v13 }
  0xf6   : > { %v14250_v48 = vadd.f32 %v14125_v42, %v846_v44  ;;  %3947 = vperm.xlu1 %13640, %v14173_v8   ;;  %v14253_v50 = vpop.f32.mrf.mxu0 }
  0xf7   : > { %21111 = vst [vmem:[#allocation20_spill] sm:$0xff] %v14247_v47  ;;  %v14255_v51 = vpop.f32.mrf.mxu1  ;;  %v1219_v55 = vcombine.low %v14240_v36, %v14247_v47 }
  0xf8   : > { %21112 = vst [vmem:[#allocation21_spill] sm:$0xff] %v14250_v48  ;;  %13646 = vset.pattern.permute.xlu0 %v20593_v54  ;;  %v620_v58 = vpop.f32.mrf.mxu0 }
  0xf9   : > { %3951 = vperm.xlu0 %13646, %v14155_v0   ;;  %v856_v59 = vpop.f32.mrf.mxu1  ;;  %v14266_v61 = vadd.f32 %v14130_v45, %v620_v58  ;;  %v14272_v6 = vrot.slane %v1219_v55, %v14188_v13 }
  0xfa   : > { %13641 = vset.pattern.permute.xlu1 %v20591_v41  ;;  %v14269_v5 = vadd.f32 %v14125_v42, %v856_v59  ;;  %v14275_v12 = vpop.f32.mrf.mxu0 }
  0xfb   : > { %21113 = vst [vmem:[#allocation22_spill] sm:$0xff] %v14266_v61  ;;  %2815 = vperm.xlu1 %13641, %v14164_v3   ;;  %v14277_v14 = vpop.f32.mrf.mxu1  ;;  %v1268_v29 = vcombine.high %v14259_v52, %v14272_v6 }
  0xfc   : > { %21114 = vst [vmem:[#allocation23_spill] sm:$0xff] %v14269_v5  ;;  %v630_v30 = vpop.f32.mrf.mxu0 }
  0xfd   : > { %13648 = vset.pattern.permute.xlu0 %v20589_v40  ;;  %v866_v37 = vpop.f32.mrf.mxu1  ;;  %v14291_v38 = vadd.f32 %v14130_v45, %v630_v30  ;;  %v1282_v43 = vrot.slane %v1268_v29, %v14284_v22 }
  0xfe   : > { %3419 = vperm.xlu0 %13648, %v14281_v15   ;;  %v14294_v39 = vadd.f32 %v14125_v42, %v866_v37  ;;  %v14299_v44 = vpop.f32.mrf.mxu0 }
  0xff   : > { %21116 = vst [vmem:[#allocation25_spill] sm:$0xff] %v14291_v38  ;;  %13642 = vset.pattern.permute.xlu1 %v20589_v40  ;;  %v14301_v55 = vpop.f32.mrf.mxu1  ;;  %v14308_v58 = vcombine.low %v1250_v2, %v1282_v43  ;;  %v14310_v37 = vcombine.high %v1250_v2, %v1282_v43  ;;  %v14329_v2 = vadd.f32 %v14181_v11, %v14130_v45 }
 0x100   : > { %21117 = vst [vmem:[#allocation26_spill] sm:$0xff] %v14294_v39  ;;  %3399 = vperm.xlu1 %13642, %v14164_v3   ;;  %v640_v59 = vpop.f32.mrf.mxu0  ;;  %v14345_v11 = vadd.f32 %v14178_v10, %v14125_v42  ;;  %v14362_v10 = vadd.f32 %v14200_v19, %v14130_v45  ;;  %v14379_v19 = vadd.f32 %v14202_v20, %v14125_v42 }
 0x101   : > { %21119 = vst [vmem:[#allocation28_spill] sm:$0xff] %v14308_v58  ;;  %v876_v30 = vpop.f32.mrf.mxu1  ;;  %21120 = vst [vmem:[#allocation29_spill] sm:$0xff] %v14310_v37  ;;  %v14318_v29 = vadd.f32 %v14130_v45, %v640_v59 }
 0x102   : > { %3540 = vperm.xlu0 %13648, %v14305_v56   ;;  %v14321_v1 = vadd.f32 %v14125_v42, %v876_v30  ;;  %v14323_v57 = vpop.f32.mrf.mxu0  ;;  %21126 = vst [vmem:[#allocation35_spill] sm:$0xff] %v14345_v11  ;;  %21130 = vst [vmem:[#allocation38_spill] sm:$0xff] %v14362_v10 }
 0x103   : > { %21122 = vst [vmem:[#allocation31_spill] sm:$0xff] %v14318_v29  ;;  %v14325_v40 = vpop.f32.mrf.mxu1  ;;  %21134 = vst [vmem:[#allocation41_spill] sm:$0xff] %v14379_v19 }
 0x104   : > { %21123 = vst [vmem:[#allocation32_spill] sm:$0xff] %v14321_v1  ;;  %3525 = vperm.xlu1 %13642, %v14314_v24   ;;  %v650_v53 = vpop.f32.mrf.mxu0 }
 0x105   : > { %v886_v43 = vpop.f32.mrf.mxu1  ;;  %v14334_v59 = vadd.f32 %v14130_v45, %v650_v53 }
 0x106   : > { %3427 = vperm.xlu0 %13648, %v14329_v2   ;;  %v14337_v30 = vadd.f32 %v14125_v42, %v886_v43  ;;  %v14339_v41 = vpop.f32.mrf.mxu0 }
 0x107   : > { %21124 = vst [vmem:[#allocation33_spill] sm:$0xff] %v14334_v59  ;;  %v14341_v54 = vpop.f32.mrf.mxu1 }
 0x108   : > { %21125 = vst [vmem:[#allocation34_spill] sm:$0xff] %v14337_v30  ;;  %13643 = vset.pattern.permute.xlu1 %v21127_v4  ;;  %v660_v49 = vpop.f32.mrf.mxu0 }
 0x109   : > { %3943 = vperm.xlu1 %13643, %v14164_v3   ;;  %v896_v8 = vpop.f32.mrf.mxu1  ;;  %v14351_v53 = vadd.f32 %v14130_v45, %v660_v49 }
 0x10a   : > { %3546 = vperm.xlu0 %13648, %v14345_v11   ;;  %v14354_v43 = vadd.f32 %v14125_v42, %v896_v8  ;;  %v14356_v37 = vpop.f32.mrf.mxu0 }
 0x10b   : > { %21128 = vst [vmem:[#allocation36_spill] sm:$0xff] %v14351_v53  ;;  %v14358_v58 = vpop.f32.mrf.mxu1 }
 0x10c   : > { %21129 = vst [vmem:[#allocation37_spill] sm:$0xff] %v14354_v43  ;;  %v670_v3 = vpop.f32.mrf.mxu0  ;;  %v21137_v43 = vmov 1  }
 0x10d   : > { %13644 = vset.pattern.permute.xlu1 %v21131_v63  ;;  %v906_v17 = vpop.f32.mrf.mxu1  ;;  %v14368_v49 = vadd.f32 %v14130_v45, %v670_v3 }
 0x10e   : > { %2830 = vperm.xlu1 %13644, %v14215_v25   ;;  %3435 = vperm.xlu0 %13648, %v14362_v10   ;;  %v14371_v8 = vadd.f32 %v14125_v42, %v906_v17  ;;  %v14373_v46 = vpop.f32.mrf.mxu0 }
 0x10f   : > { %21132 = vst [vmem:[#allocation39_spill] sm:$0xff] %v14368_v49  ;;  %v14375_v24 = vpop.f32.mrf.mxu1 }
 0x110   : > { %21133 = vst [vmem:[#allocation40_spill] sm:$0xff] %v14371_v8  ;;  %v680_v60 = vpop.f32.mrf.mxu0  ;;  %v14393_v8 = vadd.f32 %v14217_v26, %v14130_v45  ;;  %v1307_v26 = vcombine.low %v14266_v61, %v14318_v29 }
 0x111   : > { %v916_v4 = vpop.f32.mrf.mxu1  ;;  %v14384_v3 = vadd.f32 %v14130_v45, %v680_v60  ;;  %v14403_v60 = vadd.f32 %v14219_v27, %v14125_v42 }
 0x112   : > { %3011 = vperm.xlu1 %13644, %v14227_v31   ;;  %3552 = vperm.xlu0 %13648, %v14379_v19   ;;  %v14387_v17 = vadd.f32 %v14125_v42, %v916_v4  ;;  %v14389_v25 = vpop.f32.mrf.mxu0  ;;  %21136 = vst [vmem:[#allocation43_spill] sm:$0xff] %v14393_v8  ;;  %v14407_v4 = vadd.f32 %v14125_v42, %v14149_v62 }
 0x113   : > { %21139 = vst [vmem:[#allocation45_spill] sm:$0xff] %v14403_v60  ;;  %v14421_v62 = vadd.f32 %v14235_v34, %v14130_v45  ;;  %v14439_v34 = vadd.f32 %v14237_v35, %v14125_v42  ;;  %v14455_v35 = vadd.f32 %v14255_v51, %v14125_v42  ;;  %v14472_v51 = vadd.f32 %v14125_v42, %v14170_v7 }
 0x114   : > { %21135 = vst [vmem:[#allocation42_spill] sm:$0xff] %v14387_v17  ;;  %v690_v20 = vpop.f32.mrf.mxu0  ;;  %21140 = vst [vmem:[#allocation46_spill] sm:$0xff] %v14407_v4  ;;  %v14489_v7 = vadd.f32 %v14299_v44, %v14130_v45  ;;  %v14505_v44 = vadd.f32 %v14323_v57, %v14130_v45  ;;  %v14525_v57 = vadd.f32 %v14339_v41, %v14130_v45 }
 0x115   : > { %v14399_v31 = vadd.f32 %v14130_v45, %v690_v20  ;;  %v1339_v20 = vcombine.low %v14351_v53, %v14384_v3  ;;  %21141 = vst [vmem:[#allocation47_spill] sm:$0xff] %v14421_v62  ;;  %21143 = vst [vmem:[#allocation49_spill] sm:$0xff] %v14455_v35  ;;  %v14545_v41 = vadd.f32 %v14358_v58, %v14125_v42 }
 0x116   : > { %13645 = vset.pattern.permute.xlu1 %v21137_v43  ;;  %3443 = vperm.xlu0 %13648, %v14393_v8   ;;  %21145 = vst [vmem:[#allocation51_spill] sm:$0xff] %v14472_v51  ;;  %21147 = vst [vmem:[#allocation53_spill] sm:$0xff] %v14489_v7 }
 0x117   : > { %3407 = vperm.xlu1 %13645, %v14155_v0   ;;  %21138 = vst [vmem:[#allocation44_spill] sm:$0xff] %v14399_v31  ;;  %v1323_v0 = vcombine.low %v14291_v38, %v14334_v59  ;;  %v1355_v27 = vcombine.low %v14368_v49, %v14399_v31  ;;  %v14432_v30 = vrot.slane %v1339_v20, %v14188_v13  ;;  %21148 = vst [vmem:[#allocation54_spill] sm:$0xff] %v14505_v44 }
 0x118   : > { %21151 = vst [vmem:[#allocation57_spill] sm:$0xff] %v14525_v57  ;;  %21153 = vst [vmem:[#allocation59_spill] sm:$0xff] %v14545_v41 }
 0x119   : > { %v14429_v17 = vrot.slane %v1323_v0, %v14188_v13  ;;  %v14435_v1 = vrot.slane %v1355_v27, %v14188_v13 }
 0x11a   : > { %3558 = vperm.xlu0 %13648, %v14403_v60  }
 0x11b   : > { %3531 = vperm.xlu1 %13645, %v14407_v4   ;;  %v14426_v4 = vrot.slane %v1307_v26, %v14188_v13  ;;  %v14445_v26 = vadd.f32 %v14253_v50, %v14130_v45  ;;  %v1403_v20 = vcombine.low %v14432_v30, %v14435_v1 }
 0x11d   : > { %21142 = vst [vmem:[#allocation48_spill] sm:$0xff] %v14445_v26  ;;  %v1371_v0 = vcombine.low %v14426_v4, %v14429_v17  ;;  %v14461_v50 = vrot.slane %v1403_v20, %v14284_v22  ;;  %v14482_v20 = vadd.f32 %v14277_v14, %v14125_v42  ;;  %v1267_v14 = vcombine.low %v14259_v52, %v14272_v6 }
 0x11e   : > { %3451 = vperm.xlu0 %13648, %v14421_v62   ;;  %v14512_v52 = vadd.f32 %v14125_v42, %v14192_v16  ;;  %v14538_v16 = vadd.f32 %v14356_v37, %v14130_v45  ;;  %v14555_v6 = vadd.f32 %v14373_v46, %v14130_v45  ;;  %v14559_v37 = vadd.f32 %v14389_v25, %v14130_v45 }
 0x11f   : > { %13647 = vset.pattern.permute.xlu1 %v21131_v63  ;;  %v14458_v27 = vrot.slane %v1371_v0, %v14284_v22 }
 0x120   : > { %2840 = vperm.xlu1 %13647, %v14281_v15   ;;  %21149 = vst [vmem:[#allocation55_spill] sm:$0xff] %v14512_v52  ;;  %21152 = vst [vmem:[#allocation58_spill] sm:$0xff] %v14538_v16  ;;  %v1611_v46 = vcombine.low %v14525_v57, %v14555_v6  ;;  %v1627_v25 = vcombine.low %v14538_v16, %v14559_v37 }
 0x121   : > { %v14476_v0 = vcombine.low %v14458_v27, %v14461_v50  ;;  %21155 = vst [vmem:[#allocation61_spill] sm:$0xff] %v14555_v6  ;;  %21156 = vst [vmem:[#allocation62_spill] sm:$0xff] %v14559_v37 }
 0x122   : > { %3564 = vperm.xlu0 %13648, %v14439_v34  }
 0x123   : > { %21146 = vst [vmem:[#allocation52_spill] sm:$0xff] %v14476_v0  ;;  %v1235_v0 = vcombine.low %v14205_v21, %v14198_v18  ;;  %v14517_v18 = vadd.f32 %v14325_v40, %v14125_v42  ;;  %v14532_v40 = vadd.f32 %v14341_v54, %v14125_v42  ;;  %v14549_v54 = vadd.f32 %v14125_v42, %v14209_v23 }
 0x124   : > { %3017 = vperm.xlu1 %13647, %v14305_v56   ;;  %v14468_v56 = vadd.f32 %v14275_v12, %v14130_v45  ;;  %v14495_v12 = vadd.f32 %v14301_v55, %v14125_v42  ;;  %v1579_v23 = vcombine.low %v14445_v26, %v14489_v7  ;;  %v14574_v45 = vadd.f32 %v14375_v24, %v14125_v42 }
 0x125   : > { %v1243_v55 = vrot.slane %v1235_v0, %v14284_v22  ;;  %21154 = vst [vmem:[#allocation60_spill] sm:$0xff] %v14549_v54  ;;  %v1619_v24 = vrot.slane %v1611_v46, %v14188_v13 }
 0x126   : > { %3459 = vperm.xlu0 %13648, %v14445_v26   ;;  %21144 = vst [vmem:[#allocation50_spill] sm:$0xff] %v14468_v56 }
 0x128   : > { %13649 = vset.pattern.permute.xlu1 %v21137_v43 }
 0x129   : > { %3415 = vperm.xlu1 %13649, %v14176_v9  }
 0x12a   : > { %3570 = vperm.xlu0 %13648, %v14455_v35  }
 0x12d   : > { %3537 = vperm.xlu1 %13649, %v14472_v51  }
 0x12e   : > { %3467 = vperm.xlu0 %13648, %v14468_v56  }
 0x131   : > { %13650 = vset.pattern.permute.xlu1 %v21131_v63 }
 0x132   : > { %2850 = vperm.xlu1 %13650, %v14329_v2   ;;  %3576 = vperm.xlu0 %13648, %v14482_v20  }
 0x136   : > { %3023 = vperm.xlu1 %13650, %v14345_v11   ;;  %3475 = vperm.xlu0 %13648, %v14489_v7   ;;  %v1275_v11 = vrot.slane %v1267_v14, %v14284_v22  ;;  %v1595_v14 = vcombine.low %v14468_v56, %v14505_v44 }
 0x138   : > { %v14519_v21 = vcombine.high %v1243_v55, %v1275_v11 }
 0x13a   : > { %13651 = vset.pattern.permute.xlu1 %v21137_v43  ;;  %3582 = vperm.xlu0 %13648, %v14495_v12   ;;  %21150 = vst [vmem:[#allocation56_spill] sm:$0xff] %v14519_v21 }
 0x13b   : > { %3423 = vperm.xlu1 %13651, %v14222_v28  }
 0x13e   : > { %3483 = vperm.xlu0 %13648, %v14505_v44  }
 0x13f   : > { %3543 = vperm.xlu1 %13651, %v14512_v52   ;;  %v13337_v52 = vpop.f32.mrf.mxu1 }
 0x142   : > { %3588 = vperm.xlu0 %13648, %v14517_v18  }
 0x143   : > { %13652 = vset.pattern.permute.xlu1 %v21131_v63 }
 0x144   : > { %2860 = vperm.xlu1 %13652, %v14362_v10  }
 0x146   : > { %3491 = vperm.xlu0 %13648, %v14525_v57  }
 0x148   : > { %3029 = vperm.xlu1 %13652, %v14379_v19   ;;  %v1603_v19 = vrot.slane %v1595_v14, %v14188_v13 }
 0x14a   : > { %3594 = vperm.xlu0 %13648, %v14532_v40  }
 0x14c   : > { %13653 = vset.pattern.permute.xlu1 %v21137_v43 }
 0x14d   : > { %3431 = vperm.xlu1 %13653, %v14240_v36  }
 0x14e   : > { %3499 = vperm.xlu0 %13648, %v14538_v16  }
 0x151   : > { %3549 = vperm.xlu1 %13653, %v14549_v54   ;;  %v1635_v54 = vrot.slane %v1627_v25, %v14188_v13 }
 0x152   : > { %3600 = vperm.xlu0 %13648, %v14545_v41  }
 0x155   : > { %v14561_v0 = vpop.permute.xlu0 %3522  ;;  %v14563_v58 = vpop.permute.xlu1 %2999  ;;  %13654 = vset.pattern.permute.xlu1 %v21131_v63 }
 0x156   : > { %21157 = vst [vmem:[#allocation63_spill] sm:$0xff] %v14561_v0  ;;  %21158 = vst [vmem:[#allocation64_spill] sm:$0xff] %v14563_v58  ;;  %2870 = vperm.xlu1 %13654, %v14393_v8   ;;  %3507 = vperm.xlu0 %13648, %v14555_v6   ;;  %v1587_v58 = vrot.slane %v1579_v23, %v14188_v13  ;;  %v14595_v23 = vadd.f32 %v13337_v52, %v14125_v42 }
 0x157   : > { %v14608_v52 = vcombine.low %v1243_v55, %v1275_v11  ;;  %v1676_v55 = vcombine.high %v1619_v24, %v1635_v54 }
 0x158   : > { %v1644_v11 = vcombine.high %v1587_v58, %v1603_v19 }
 0x159   : > { %21165 = vst [vmem:[#allocation71_spill] sm:$0xff] %v14608_v52 }
 0x15a   : > { %v14581_v0 = vpop.permute.xlu0 %3939  ;;  %v14583_v21 = vpop.permute.xlu1 %3395  ;;  %3035 = vperm.xlu1 %13654, %v14403_v60   ;;  %3606 = vperm.xlu0 %13648, %v14574_v45  }
 0x15b   : > { %21159 = vst [vmem:[#allocation65_spill] sm:$0xff] %v14581_v0  ;;  %21160 = vst [vmem:[#allocation66_spill] sm:$0xff] %v14583_v21  ;;  %v1643_v0 = vcombine.low %v1587_v58, %v1603_v19  ;;  %v1675_v21 = vcombine.low %v1619_v24, %v1635_v54  ;;  %v1658_v54 = vrot.slane %v1644_v11, %v14284_v22 }
 0x15c   : > { %v1690_v58 = vrot.slane %v1676_v55, %v14284_v22 }
 0x15d   : > { %v1651_v14 = vrot.slane %v1643_v0, %v14284_v22  ;;  %v1683_v46 = vrot.slane %v1675_v21, %v14284_v22  ;;  %v1580_v0 = vcombine.high %v14445_v26, %v14489_v7  ;;  %v1596_v21 = vcombine.high %v14468_v56, %v14505_v44 }
 0x15e   : > { %v14590_v51 = vpop.permute.xlu1 %3519  ;;  %13655 = vset.pattern.permute.xlu1 %v21137_v43  ;;  %3515 = vperm.xlu0 %13648, %v14559_v37  }
 0x15f   : > { %21161 = vst [vmem:[#allocation67_spill] sm:$0xff] %v14590_v51  ;;  %3439 = vperm.xlu1 %13655, %v14230_v32   ;;  %v14598_v60 = vpop.permute.xlu0 %3391  ;;  %v14611_v8 = vcombine.low %v1651_v14, %v1683_v46  ;;  %v1594_v10 = vrot.slane %v1580_v0, %v14188_v13 }
 0x160   : > { %21162 = vst [vmem:[#allocation68_spill] sm:$0xff] %v14598_v60 }
 0x161   : > { %21166 = vst [vmem:[#allocation72_spill] sm:$0xff] %v14611_v8 }
 0x162   : > { %3612 = vperm.xlu0 %13648, %v14595_v23  }
 0x163   : > { %3555 = vperm.xlu1 %13655, %v14233_v33   ;;  %v14604_v25 = vpop.permute.xlu1 %3935  ;;  %v14606_v51 = vpop.permute.xlu0 %3403 }
 0x164   : > { %21163 = vst [vmem:[#allocation69_spill] sm:$0xff] %v14604_v25  ;;  %21164 = vst [vmem:[#allocation70_spill] sm:$0xff] %v14606_v51  ;;  %v1612_v51 = vcombine.high %v14525_v57, %v14555_v6 }
 0x166   : > { %5599 = vperm.xlu0 %13648, %v14608_v52   ;;  %v1628_v52 = vcombine.high %v14538_v16, %v14559_v37  ;;  %v1626_v24 = vrot.slane %v1612_v51, %v14188_v13  ;;  %v14653_v51 = vcombine.high %v1658_v54, %v1690_v58 }
 0x167   : > { %13656 = vset.pattern.permute.xlu1 %v21131_v63  ;;  %v14614_v60 = vpop.permute.xlu0 %3528 }
 0x168   : > { %21167 = vst [vmem:[#allocation73_spill] sm:$0xff] %v14614_v60  ;;  %2880 = vperm.xlu1 %13656, %v14421_v62   ;;  %v14621_v25 = vpop.permute.xlu1 %2820  ;;  %v14628_v60 = vcombine.high %v1651_v14, %v1683_v46  ;;  %v1610_v62 = vrot.slane %v1596_v21, %v14188_v13  ;;  %v14645_v46 = vcombine.low %v1658_v54, %v1690_v58  ;;  %21176 = vst [vmem:[#allocation82_spill] sm:$0xff] %v14653_v51 }
 0x169   : > { %21168 = vst [vmem:[#allocation74_spill] sm:$0xff] %v14621_v25  ;;  %v1642_v25 = vrot.slane %v1628_v52, %v14188_v13  ;;  %v2155_v58 = vcombine.low %v14532_v40, %v14574_v45 }
 0x16a   : > { %5667 = vperm.xlu0 %13648, %v14611_v8   ;;  %21169 = vst [vmem:[#allocation75_spill] sm:$0xff] %v14628_v60  ;;  %21173 = vst [vmem:[#allocation79_spill] sm:$0xff] %v14645_v46  ;;  %v1659_v0 = vcombine.low %v1594_v10, %v1610_v62 }
 0x16b   : > { %v14630_v33 = vpop.permute.xlu0 %3411  ;;  %v1691_v21 = vcombine.low %v1626_v24, %v1642_v25  ;;  %v1692_v54 = vcombine.high %v1626_v24, %v1642_v25 }
 0x16c   : > { %21170 = vst [vmem:[#allocation76_spill] sm:$0xff] %v14630_v33  ;;  %3041 = vperm.xlu1 %13656, %v14439_v34   ;;  %v14635_v19 = vpop.permute.xlu1 %3005  ;;  %v1667_v52 = vrot.slane %v1659_v0, %v14284_v22  ;;  %v2171_v0 = vcombine.low %v14545_v41, %v14595_v23 }
 0x16d   : > { %21171 = vst [vmem:[#allocation77_spill] sm:$0xff] %v14635_v19  ;;  %v1699_v55 = vrot.slane %v1691_v21, %v14284_v22 }
 0x16e   : > { %5675 = vperm.xlu0 %13648, %v14628_v60   ;;  %v2163_v60 = vrot.slane %v2155_v58, %v14188_v13 }
 0x16f   : > { %v14642_v14 = vpop.permute.xlu0 %3534 }
 0x170   : > { %21172 = vst [vmem:[#allocation78_spill] sm:$0xff] %v14642_v14  ;;  %13657 = vset.pattern.permute.xlu1 %v21137_v43  ;;  %v1660_v14 = vcombine.high %v1594_v10, %v1610_v62 }
 0x171   : > { %3447 = vperm.xlu1 %13657, %v14247_v47   ;;  %v14648_v33 = vpop.permute.xlu1 %3947 }
 0x172   : > { %21174 = vst [vmem:[#allocation80_spill] sm:$0xff] %v14648_v33  ;;  %5683 = vperm.xlu0 %13648, %v14645_v46   ;;  %v2123_v33 = vcombine.low %v14455_v35, %v14495_v12  ;;  %v2139_v46 = vcombine.low %v14482_v20, %v14517_v18  ;;  %v1674_v62 = vrot.slane %v1660_v14, %v14284_v22 }
 0x174   : > { %v14651_v11 = vpop.permute.xlu0 %3951  ;;  %v2131_v25 = vrot.slane %v2123_v33, %v14188_v13  ;;  %v2147_v24 = vrot.slane %v2139_v46, %v14188_v13 }
 0x175   : > { %21175 = vst [vmem:[#allocation81_spill] sm:$0xff] %v14651_v11  ;;  %3561 = vperm.xlu1 %13657, %v14250_v48   ;;  %v14665_v11 = vcombine.low %v1667_v52, %v1699_v55 }
 0x176   : > { %v14658_v19 = vpop.permute.xlu1 %2815  ;;  %5691 = vperm.xlu0 %13648, %v14653_v51   ;;  %v1706_v51 = vrot.slane %v1692_v54, %v14284_v22  ;;  %v2187_v33 = vcombine.low %v2131_v25, %v2147_v24 }
 0x177   : > { %21177 = vst [vmem:[#allocation83_spill] sm:$0xff] %v14658_v19  ;;  %21178 = vst [vmem:[#allocation84_spill] sm:$0xff] %v14665_v11  ;;  %v14681_v19 = vcombine.high %v1667_v52, %v1699_v55 }
 0x178   : > { %v14692_v14 = vcombine.low %v1674_v62, %v1706_v51  ;;  %v14701_v54 = vcombine.high %v1674_v62, %v1706_v51  ;;  %v2195_v58 = vrot.slane %v2187_v33, %v14284_v22  ;;  %v2156_v62 = vcombine.high %v14532_v40, %v14574_v45 }
 0x179   : > { %13658 = vset.pattern.permute.xlu1 %v21131_v63  ;;  %v14672_v21 = vpop.permute.xlu0 %3419  ;;  %21181 = vst [vmem:[#allocation87_spill] sm:$0xff] %v14681_v19  ;;  %v2172_v33 = vcombine.high %v14545_v41, %v14595_v23 }
 0x17a   : > { %21179 = vst [vmem:[#allocation85_spill] sm:$0xff] %v14672_v21  ;;  %2890 = vperm.xlu1 %13658, %v14445_v26   ;;  %5699 = vperm.xlu0 %13648, %v14665_v11   ;;  %v2179_v21 = vrot.slane %v2171_v0, %v14188_v13  ;;  %21184 = vst [vmem:[#allocation90_spill] sm:$0xff] %v14692_v14 }
 0x17b   : > { %v14676_v10 = vpop.permute.xlu1 %3399  ;;  %21187 = vst [vmem:[#allocation93_spill] sm:$0xff] %v14701_v54 }
 0x17c   : > { %21180 = vst [vmem:[#allocation86_spill] sm:$0xff] %v14676_v10  ;;  %v2219_v46 = vcombine.low %v2163_v60, %v2179_v21  ;;  %v2220_v51 = vcombine.high %v2163_v60, %v2179_v21 }
 0x17d   : > { %v14686_v8 = vpop.permute.xlu0 %3540 }
 0x17e   : > { %21182 = vst [vmem:[#allocation88_spill] sm:$0xff] %v14686_v8  ;;  %3047 = vperm.xlu1 %13658, %v14455_v35   ;;  %5707 = vperm.xlu0 %13648, %v14681_v19   ;;  %v2227_v0 = vrot.slane %v2219_v46, %v14284_v22 }
 0x17f   : > { %v14690_v10 = vpop.permute.xlu1 %3525 }
 0x180   : > { %21183 = vst [vmem:[#allocation89_spill] sm:$0xff] %v14690_v10  ;;  %v2124_v10 = vcombine.high %v14455_v35, %v14495_v12  ;;  %v14729_v21 = vcombine.high %v2195_v58, %v2227_v0 }
 0x181   : > { %v14694_v52 = vpop.permute.xlu0 %3427 }
 0x182   : > { %21185 = vst [vmem:[#allocation91_spill] sm:$0xff] %v14694_v52  ;;  %13659 = vset.pattern.permute.xlu1 %v21137_v43  ;;  %5715 = vperm.xlu0 %13648, %v14692_v14   ;;  %v2188_v52 = vcombine.high %v2131_v25, %v2147_v24  ;;  %v2140_v14 = vcombine.high %v14482_v20, %v14517_v18  ;;  %21192 = vst [vmem:[#allocation98_spill] sm:$0xff] %v14729_v21 }
 0x183   : > { %3455 = vperm.xlu1 %13659, %v14266_v61   ;;  %v2138_v24 = vrot.slane %v2124_v10, %v14188_v13 }
 0x184   : > { %v14699_v55 = vpop.permute.xlu1 %3943  ;;  %v2202_v25 = vrot.slane %v2188_v52, %v14284_v22  ;;  %v2154_v60 = vrot.slane %v2140_v14, %v14188_v13 }
 0x185   : > { %21186 = vst [vmem:[#allocation92_spill] sm:$0xff] %v14699_v55  ;;  %v14705_v8 = vpop.permute.xlu0 %3546  ;;  %v14713_v55 = vcombine.low %v2195_v58, %v2227_v0 }
 0x186   : > { %21188 = vst [vmem:[#allocation94_spill] sm:$0xff] %v14705_v8  ;;  %5723 = vperm.xlu0 %13648, %v14701_v54   ;;  %v2234_v54 = vrot.slane %v2220_v51, %v14284_v22  ;;  %v2203_v14 = vcombine.low %v2138_v24, %v2154_v60 }
 0x187   : > { %3567 = vperm.xlu1 %13659, %v14269_v5   ;;  %21189 = vst [vmem:[#allocation95_spill] sm:$0xff] %v14713_v55 }
 0x188   : > { %v14740_v10 = vcombine.low %v2202_v25, %v2234_v54  ;;  %v14748_v51 = vcombine.high %v2202_v25, %v2234_v54 }
 0x189   : > { %v14719_v46 = vpop.permute.xlu1 %2830  ;;  %v14721_v8 = vpop.permute.xlu0 %3435 }
 0x18a   : > { %21190 = vst [vmem:[#allocation96_spill] sm:$0xff] %v14719_v46  ;;  %21191 = vst [vmem:[#allocation97_spill] sm:$0xff] %v14721_v8  ;;  %5778 = vperm.xlu0 %13648, %v14713_v55   ;;  %v2170_v46 = vrot.slane %v2156_v62, %v14188_v13  ;;  %v2186_v8 = vrot.slane %v2172_v33, %v14188_v13  ;;  %v2211_v62 = vrot.slane %v2203_v14, %v14284_v22 }
 0x18b   : > { %13660 = vset.pattern.permute.xlu1 %v21131_v63  ;;  %21195 = vst [vmem:[#allocation101_spill] sm:$0xff] %v14740_v10  ;;  %21198 = vst [vmem:[#allocation104_spill] sm:$0xff] %v14748_v51 }
 0x18c   : > { %2900 = vperm.xlu1 %13660, %v14468_v56   ;;  %v2235_v52 = vcombine.low %v2170_v46, %v2186_v8 }
 0x18d   : > { %v14734_v19 = vpop.permute.xlu1 %3011  ;;  %v14736_v55 = vpop.permute.xlu0 %3552 }
 0x18e   : > { %21193 = vst [vmem:[#allocation99_spill] sm:$0xff] %v14734_v19  ;;  %21194 = vst [vmem:[#allocation100_spill] sm:$0xff] %v14736_v55  ;;  %5784 = vperm.xlu0 %13648, %v14729_v21   ;;  %v2243_v33 = vrot.slane %v2235_v52, %v14284_v22 }
 0x190   : > { %3053 = vperm.xlu1 %13660, %v14482_v20   ;;  %v14766_v14 = vcombine.high %v2211_v62, %v2243_v33 }
 0x191   : > { %v14742_v58 = vpop.permute.xlu0 %3443 }
 0x192   : > { %21196 = vst [vmem:[#allocation102_spill] sm:$0xff] %v14742_v58  ;;  %v14744_v0 = vpop.permute.xlu1 %3407  ;;  %5790 = vperm.xlu0 %13648, %v14740_v10   ;;  %v14758_v58 = vcombine.low %v2211_v62, %v2243_v33  ;;  %v2236_v10 = vcombine.high %v2170_v46, %v2186_v8  ;;  %21204 = vst [vmem:[#allocation110_spill] sm:$0xff] %v14766_v14 }
 0x193   : > { %21197 = vst [vmem:[#allocation103_spill] sm:$0xff] %v14744_v0  ;;  %v2204_v0 = vcombine.high %v2138_v24, %v2154_v60  ;;  %v1372_v60 = vcombine.high %v14426_v4, %v14429_v17 }
 0x194   : > { %13661 = vset.pattern.permute.xlu1 %v21137_v43  ;;  %21201 = vst [vmem:[#allocation107_spill] sm:$0xff] %v14758_v58 }
 0x195   : > { %3463 = vperm.xlu1 %13661, %v14291_v38   ;;  %v14753_v55 = vpop.permute.xlu0 %3558  ;;  %v2218_v52 = vrot.slane %v2204_v0, %v14284_v22  ;;  %v1324_v0 = vcombine.high %v14291_v38, %v14334_v59  ;;  %v1386_v4 = vrot.slane %v1372_v60, %v14284_v22  ;;  %v21215_v60 = vld [vmem:[#allocation32_spill] sm:$0xff] }
 0x196   : > { %21199 = vst [vmem:[#allocation105_spill] sm:$0xff] %v14753_v55  ;;  %v14755_v19 = vpop.permute.xlu1 %3531  ;;  %5796 = vperm.xlu0 %13648, %v14748_v51   ;;  %v2250_v55 = vrot.slane %v2236_v10, %v14284_v22  ;;  %v1308_v10 = vcombine.high %v14266_v61, %v14318_v29 }
 0x197   : > { %21200 = vst [vmem:[#allocation106_spill] sm:$0xff] %v14755_v19 }
 0x198   : > { %v14777_v46 = vcombine.low %v2218_v52, %v2250_v55  ;;  %v14791_v33 = vcombine.high %v2218_v52, %v2250_v55  ;;  %v1322_v55 = vrot.slane %v1308_v10, %v14188_v13  ;;  %v14811_v52 = vcombine.high %v14458_v27, %v14461_v50  ;;  %v926_v10 = vpop.f32.mrf.mxu1 }
 0x199   : > { %3573 = vperm.xlu1 %13661, %v14294_v39   ;;  %v14761_v54 = vpop.permute.xlu0 %3451  ;;  %v14829_v50 = vadd.f32 %v14125_v42, %v926_v10  ;;  %v21223_v42 = vld [vmem:[#allocation34_spill] sm:$0xff] }
 0x19a   : > { %21202 = vst [vmem:[#allocation108_spill] sm:$0xff] %v14761_v54  ;;  %5802 = vperm.xlu0 %13648, %v14758_v58   ;;  %21207 = vst [vmem:[#allocation113_spill] sm:$0xff] %v14777_v46  ;;  %v1356_v54 = vcombine.high %v14368_v49, %v14399_v31  ;;  %v1867_v10 = vcombine.low %v14294_v39, %v21223_v42 }
 0x19b   : > { %v14764_v25 = vpop.permute.xlu1 %2840  ;;  %21210 = vst [vmem:[#allocation116_spill] sm:$0xff] %v14791_v33  ;;  %21213 = vst [vmem:[#allocation119_spill] sm:$0xff] %v14811_v52 }
 0x19c   : > { %21203 = vst [vmem:[#allocation109_spill] sm:$0xff] %v14764_v25  ;;  %v1404_v25 = vcombine.high %v14432_v30, %v14435_v1  ;;  %v1338_v1 = vrot.slane %v1324_v0, %v14188_v13  ;;  %21219 = vst [vmem:[#allocation124_spill] sm:$0xff] %v14829_v50  ;;  %v1875_v11 = vrot.slane %v1867_v10, %v14188_v13 }
 0x19d   : > { %13662 = vset.pattern.permute.xlu1 %v21131_v63  ;;  %v14771_v19 = vpop.permute.xlu0 %3564 }
 0x19e   : > { %21205 = vst [vmem:[#allocation111_spill] sm:$0xff] %v14771_v19  ;;  %2910 = vperm.xlu1 %13662, %v14489_v7   ;;  %5808 = vperm.xlu0 %13648, %v14766_v14   ;;  %v1851_v14 = vcombine.low %v14269_v5, %v21215_v60 }
 0x19f   : > { %v14775_v8 = vpop.permute.xlu1 %3017 }
 0x1a0   : > { %21206 = vst [vmem:[#allocation112_spill] sm:$0xff] %v14775_v8  ;;  %v1370_v8 = vrot.slane %v1356_v54, %v14188_v13  ;;  %v1859_v21 = vrot.slane %v1851_v14, %v14188_v13 }
 0x1a1   : > { %v14779_v24 = vpop.permute.xlu0 %3459 }
 0x1a2   : > { %21208 = vst [vmem:[#allocation114_spill] sm:$0xff] %v14779_v24  ;;  %3059 = vperm.xlu1 %13662, %v14495_v12   ;;  %5814 = vperm.xlu0 %13648, %v14777_v46   ;;  %v1340_v24 = vcombine.high %v14351_v53, %v14384_v3 }
 0x1a4   : > { %v14789_v62 = vpop.permute.xlu1 %3415 }
 0x1a5   : > { %21209 = vst [vmem:[#allocation115_spill] sm:$0xff] %v14789_v62  ;;  %v14799_v17 = vpop.permute.xlu0 %3570  ;;  %v1418_v62 = vrot.slane %v1404_v25, %v14284_v22 }
 0x1a6   : > { %21211 = vst [vmem:[#allocation117_spill] sm:$0xff] %v14799_v17  ;;  %13663 = vset.pattern.permute.xlu1 %v21137_v43  ;;  %5820 = vperm.xlu0 %13648, %v14791_v33   ;;  %v1354_v17 = vrot.slane %v1340_v24, %v14188_v13 }
 0x1a7   : > { %3471 = vperm.xlu1 %13663, %v14318_v29   ;;  %v14820_v0 = vcombine.low %v1386_v4, %v1418_v62  ;;  %v14832_v54 = vcombine.high %v1386_v4, %v1418_v62 }
 0x1a8   : > { %v14807_v30 = vpop.permute.xlu1 %3537  ;;  %v1419_v33 = vcombine.low %v1354_v17, %v1370_v8  ;;  %v1420_v4 = vcombine.high %v1354_v17, %v1370_v8 }
 0x1a9   : > { %21212 = vst [vmem:[#allocation118_spill] sm:$0xff] %v14807_v30  ;;  %v14816_v19 = vpop.permute.xlu0 %3467  ;;  %21216 = vst [vmem:[#allocation121_spill] sm:$0xff] %v14820_v0  ;;  %v1387_v30 = vcombine.low %v1322_v55, %v1338_v1 }
 0x1aa   : > { %21214 = vst [vmem:[#allocation120_spill] sm:$0xff] %v14816_v19  ;;  %5611 = vperm.xlu0 %13648, %v14811_v52   ;;  %21220 = vst [vmem:[#allocation125_spill] sm:$0xff] %v14832_v54  ;;  %v1427_v24 = vrot.slane %v1419_v33, %v14284_v22  ;;  %v21226_v33 = vld [vmem:[#allocation37_spill] sm:$0xff]  ;;  %v1434_v17 = vrot.slane %v1420_v4, %v14284_v22 }
 0x1ab   : > { %3579 = vperm.xlu1 %13663, %v21215_v60   ;;  %v1395_v25 = vrot.slane %v1387_v30, %v14284_v22  ;;  %v21225_v30 = vld [vmem:[#allocation42_spill] sm:$0xff] }
 0x1ac   : > { %v1883_v58 = vcombine.low %v21226_v33, %v21225_v30 }
 0x1ad   : > { %v14822_v46 = vpop.permute.xlu1 %2850  ;;  %v14824_v27 = vpop.permute.xlu0 %3576  ;;  %v14846_v62 = vcombine.low %v1395_v25, %v1427_v24  ;;  %v14861_v8 = vcombine.high %v1395_v25, %v1427_v24 }
 0x1ae   : > { %21217 = vst [vmem:[#allocation122_spill] sm:$0xff] %v14822_v46  ;;  %21218 = vst [vmem:[#allocation123_spill] sm:$0xff] %v14824_v27  ;;  %5619 = vperm.xlu0 %13648, %v14820_v0   ;;  %v1388_v27 = vcombine.high %v1322_v55, %v1338_v1 }
 0x1af   : > { %13664 = vset.pattern.permute.xlu1 %v21131_v63  ;;  %21224 = vst [vmem:[#allocation128_spill] sm:$0xff] %v14846_v62  ;;  %21230 = vst [vmem:[#allocation131_spill] sm:$0xff] %v14861_v8 }
 0x1b0   : > { %2920 = vperm.xlu1 %13664, %v14505_v44   ;;  %v1402_v1 = vrot.slane %v1388_v27, %v14284_v22  ;;  %v1915_v27 = vcombine.low %v1859_v21, %v1875_v11 }
 0x1b1   : > { %v14836_v19 = vpop.permute.xlu1 %3023  ;;  %v14838_v46 = vpop.permute.xlu0 %3475 }
 0x1b2   : > { %21221 = vst [vmem:[#allocation126_spill] sm:$0xff] %v14836_v19  ;;  %21222 = vst [vmem:[#allocation127_spill] sm:$0xff] %v14838_v46  ;;  %5627 = vperm.xlu0 %13648, %v14832_v54   ;;  %v21227_v19 = vld [vmem:[#allocation40_spill] sm:$0xff]  ;;  %v1891_v54 = vrot.slane %v1883_v58, %v14188_v13  ;;  %v14872_v14 = vcombine.low %v1402_v1, %v1434_v17  ;;  %v1923_v24 = vrot.slane %v1915_v27, %v14284_v22 }
 0x1b3   : > { %v1899_v46 = vcombine.low %v21227_v19, %v14829_v50  ;;  %v1868_v27 = vcombine.high %v14294_v39, %v21223_v42 }
 0x1b4   : > { %3065 = vperm.xlu1 %13664, %v14517_v18   ;;  %21233 = vst [vmem:[#allocation134_spill] sm:$0xff] %v14872_v14 }
 0x1b5   : > { %v14852_v51 = vpop.permute.xlu0 %3582 }
 0x1b6   : > { %21228 = vst [vmem:[#allocation129_spill] sm:$0xff] %v14852_v51  ;;  %v14854_v55 = vpop.permute.xlu1 %3423  ;;  %5635 = vperm.xlu0 %13648, %v14846_v62   ;;  %v1907_v51 = vrot.slane %v1899_v46, %v14188_v13  ;;  %v14880_v46 = vcombine.high %v1402_v1, %v1434_v17  ;;  %v1852_v1 = vcombine.high %v14269_v5, %v21215_v60 }
 0x1b7   : > { %21229 = vst [vmem:[#allocation130_spill] sm:$0xff] %v14854_v55 }
 0x1b8   : > { %13665 = vset.pattern.permute.xlu1 %v21137_v43  ;;  %v1947_v10 = vcombine.low %v1891_v54, %v1907_v51  ;;  %21236 = vst [vmem:[#allocation137_spill] sm:$0xff] %v14880_v46 }
 0x1b9   : > { %3479 = vperm.xlu1 %13665, %v14334_v59   ;;  %v14867_v55 = vpop.permute.xlu0 %3483 }
 0x1ba   : > { %21231 = vst [vmem:[#allocation132_spill] sm:$0xff] %v14867_v55  ;;  %v14869_v62 = vpop.permute.xlu1 %3543  ;;  %5643 = vperm.xlu0 %13648, %v14861_v8   ;;  %v1955_v4 = vrot.slane %v1947_v10, %v14284_v22  ;;  %v1884_v10 = vcombine.high %v21226_v33, %v21225_v30 }
 0x1bb   : > { %21232 = vst [vmem:[#allocation133_spill] sm:$0xff] %v14869_v62 }
 0x1bc   : > { %v14893_v17 = vcombine.low %v1923_v24, %v1955_v4  ;;  %v1898_v8 = vrot.slane %v1884_v10, %v14188_v13 }
 0x1bd   : > { %3585 = vperm.xlu1 %13665, %v21223_v42   ;;  %v14875_v25 = vpop.permute.xlu0 %3588 }
 0x1be   : > { %21234 = vst [vmem:[#allocation135_spill] sm:$0xff] %v14875_v25  ;;  %5651 = vperm.xlu0 %13648, %v14872_v14   ;;  %v1916_v25 = vcombine.high %v1859_v21, %v1875_v11  ;;  %v1948_v14 = vcombine.high %v1891_v54, %v1907_v51  ;;  %21239 = vst [vmem:[#allocation140_spill] sm:$0xff] %v14893_v17  ;;  %v1866_v51 = vrot.slane %v1852_v1, %v14188_v13 }
 0x1bf   : > { %v14878_v58 = vpop.permute.xlu1 %2860 }
 0x1c0   : > { %21235 = vst [vmem:[#allocation136_spill] sm:$0xff] %v14878_v58  ;;  %v1900_v58 = vcombine.high %v21227_v19, %v14829_v50  ;;  %v1930_v11 = vrot.slane %v1916_v25, %v14284_v22  ;;  %v1962_v21 = vrot.slane %v1948_v14, %v14284_v22 }
 0x1c1   : > { %13666 = vset.pattern.permute.xlu1 %v21131_v63  ;;  %v14885_v55 = vpop.permute.xlu0 %3491 }
 0x1c2   : > { %21237 = vst [vmem:[#allocation138_spill] sm:$0xff] %v14885_v55  ;;  %2930 = vperm.xlu1 %13666, %v14525_v57   ;;  %5659 = vperm.xlu0 %13648, %v14880_v46   ;;  %v1882_v46 = vrot.slane %v1868_v27, %v14188_v13  ;;  %v14922_v25 = vcombine.low %v1930_v11, %v1962_v21 }
 0x1c3   : > { %v14889_v62 = vpop.permute.xlu1 %3029 }
 0x1c4   : > { %21238 = vst [vmem:[#allocation139_spill] sm:$0xff] %v14889_v62  ;;  %v14910_v62 = vcombine.high %v1923_v24, %v1955_v4  ;;  %21245 = vst [vmem:[#allocation146_spill] sm:$0xff] %v14922_v25  ;;  %v1931_v24 = vcombine.low %v1866_v51, %v1882_v46 }
 0x1c5   : > { %v14901_v55 = vpop.permute.xlu0 %3594 }
 0x1c6   : > { %21240 = vst [vmem:[#allocation141_spill] sm:$0xff] %v14901_v55  ;;  %3071 = vperm.xlu1 %13666, %v14532_v40   ;;  %5730 = vperm.xlu0 %13648, %v14893_v17   ;;  %21242 = vst [vmem:[#allocation143_spill] sm:$0xff] %v14910_v62  ;;  %v1914_v55 = vrot.slane %v1900_v58, %v14188_v13  ;;  %v14928_v58 = vcombine.high %v1930_v11, %v1962_v21 }
 0x1c7   : > { %v1939_v27 = vrot.slane %v1931_v24, %v14284_v22 }
 0x1c8   : > { %v14908_v54 = vpop.permute.xlu1 %3431  ;;  %v1963_v4 = vcombine.low %v1898_v8, %v1914_v55  ;;  %21247 = vst [vmem:[#allocation148_spill] sm:$0xff] %v14928_v58 }
 0x1c9   : > { %21241 = vst [vmem:[#allocation142_spill] sm:$0xff] %v14908_v54  ;;  %v14915_v0 = vpop.permute.xlu0 %3499 }
 0x1ca   : > { %21243 = vst [vmem:[#allocation144_spill] sm:$0xff] %v14915_v0  ;;  %13667 = vset.pattern.permute.xlu1 %v21137_v43  ;;  %5736 = vperm.xlu0 %13648, %v14910_v62   ;;  %v1971_v10 = vrot.slane %v1963_v4, %v14284_v22  ;;  %v21319_v62 = vld [vmem:[#allocation3_spill] sm:$0xff] }
 0x1cb   : > { %3487 = vperm.xlu1 %13667, %v14351_v53  }
 0x1cc   : > { %v14920_v14 = vpop.permute.xlu1 %3549  ;;  %v14947_v24 = vcombine.high %v1939_v27, %v1971_v10 }
 0x1cd   : > { %21244 = vst [vmem:[#allocation145_spill] sm:$0xff] %v14920_v14  ;;  %v14924_v1 = vpop.permute.xlu0 %3600  ;;  %v1932_v14 = vcombine.high %v1866_v51, %v1882_v46 }
 0x1ce   : > { %21246 = vst [vmem:[#allocation147_spill] sm:$0xff] %v14924_v1  ;;  %5742 = vperm.xlu0 %13648, %v14922_v25   ;;  %v14939_v1 = vcombine.low %v1939_v27, %v1971_v10  ;;  %v1964_v25 = vcombine.high %v1898_v8, %v1914_v55  ;;  %21253 = vst [vmem:[#allocation154_spill] sm:$0xff] %v14947_v24  ;;  %v21263_v10 = vmov 2  }
 0x1cf   : > { %3591 = vperm.xlu1 %13667, %v21226_v33   ;;  %v1946_v4 = vrot.slane %v1932_v14, %v14284_v22 }
 0x1d0   : > { %21250 = vst [vmem:[#allocation151_spill] sm:$0xff] %v14939_v1 }
 0x1d1   : > { %v14932_v0 = vpop.permute.xlu1 %2870  ;;  %v14934_v54 = vpop.permute.xlu0 %3507 }
 0x1d2   : > { %21248 = vst [vmem:[#allocation149_spill] sm:$0xff] %v14932_v0  ;;  %21249 = vst [vmem:[#allocation150_spill] sm:$0xff] %v14934_v54  ;;  %5748 = vperm.xlu0 %13648, %v14928_v58   ;;  %v1978_v0 = vrot.slane %v1964_v25, %v14284_v22 }
 0x1d3   : > { %13668 = vset.pattern.permute.xlu1 %v21131_v63 }
 0x1d4   : > { %2940 = vperm.xlu1 %13668, %v14538_v16   ;;  %v14957_v55 = vcombine.low %v1946_v4, %v1978_v0  ;;  %v14965_v51 = vcombine.high %v1946_v4, %v1978_v0 }
 0x1d5   : > { %v14941_v11 = vpop.permute.xlu1 %3035  ;;  %v14943_v21 = vpop.permute.xlu0 %3606 }
 0x1d6   : > { %21251 = vst [vmem:[#allocation152_spill] sm:$0xff] %v14941_v11  ;;  %21252 = vst [vmem:[#allocation153_spill] sm:$0xff] %v14943_v21  ;;  %5754 = vperm.xlu0 %13648, %v14939_v1  }
 0x1d7   : > { %21256 = vst [vmem:[#allocation157_spill] sm:$0xff] %v14957_v55  ;;  %21259 = vst [vmem:[#allocation160_spill] sm:$0xff] %v14965_v51 }
 0x1d8   : > { %3077 = vperm.xlu1 %13668, %v14545_v41  }
 0x1d9   : > { %v14951_v54 = vpop.permute.xlu0 %3515 }
 0x1da   : > { %21254 = vst [vmem:[#allocation155_spill] sm:$0xff] %v14951_v54  ;;  %v14953_v58 = vpop.permute.xlu1 %3439  ;;  %5760 = vperm.xlu0 %13648, %v14947_v24  }
 0x1db   : > { %21255 = vst [vmem:[#allocation156_spill] sm:$0xff] %v14953_v58 }
 0x1dc   : > { %13669 = vset.pattern.permute.xlu1 %v21137_v43 }
 0x1dd   : > { %3495 = vperm.xlu1 %13669, %v14368_v49   ;;  %v14960_v8 = vpop.permute.xlu0 %3612 }
 0x1de   : > { %21257 = vst [vmem:[#allocation158_spill] sm:$0xff] %v14960_v8  ;;  %v14962_v46 = vpop.permute.xlu1 %3555  ;;  %5766 = vperm.xlu0 %13648, %v14957_v55  }
 0x1df   : > { %21258 = vst [vmem:[#allocation159_spill] sm:$0xff] %v14962_v46  ;;  %v21295_v46 = vld [vmem:[#allocation47_spill] sm:$0xff] }
 0x1e1   : > { %3597 = vperm.xlu1 %13669, %v21227_v19   ;;  %v14968_v14 = vpop.permute.xlu0 %5599 }
 0x1e2   : > { %21260 = vst [vmem:[#allocation161_spill] sm:$0xff] %v14968_v14  ;;  %5772 = vperm.xlu0 %13648, %v14965_v51  }
 0x1e3   : > { %v14971_v25 = vpop.permute.xlu1 %2880 }
 0x1e4   : > { %21261 = vst [vmem:[#allocation162_spill] sm:$0xff] %v14971_v25 }
 0x1e5   : > { %13670 = vset.pattern.permute.xlu1 %v21131_v63  ;;  %v14974_v27 = vpop.permute.xlu0 %5667 }
 0x1e6   : > { %21262 = vst [vmem:[#allocation163_spill] sm:$0xff] %v14974_v27  ;;  %2950 = vperm.xlu1 %13670, %v14555_v6   ;;  %13678 = vset.pattern.permute.xlu0 %v21263_v10 }
 0x1e7   : > { %v14978_v54 = vpop.permute.xlu1 %3041  ;;  %3959 = vperm.xlu0 %13678, %v14176_v9  }
 0x1e8   : > { %21264 = vst [vmem:[#allocation164_spill] sm:$0xff] %v14978_v54 }
 0x1e9   : > { %v14981_v0 = vpop.permute.xlu0 %5675 }
 0x1ea   : > { %21265 = vst [vmem:[#allocation165_spill] sm:$0xff] %v14981_v0  ;;  %3083 = vperm.xlu1 %13670, %v14574_v45  }
 0x1eb   : > { %3967 = vperm.xlu0 %13678, %v14222_v28  }
 0x1ec   : > { %v14985_v4 = vpop.permute.xlu1 %3447 }
 0x1ed   : > { %21266 = vst [vmem:[#allocation166_spill] sm:$0xff] %v14985_v4  ;;  %v14987_v25 = vpop.permute.xlu0 %5683 }
 0x1ee   : > { %21267 = vst [vmem:[#allocation167_spill] sm:$0xff] %v14987_v25  ;;  %13671 = vset.pattern.permute.xlu1 %v21137_v43 }
 0x1ef   : > { %3503 = vperm.xlu1 %13671, %v14384_v3   ;;  %3975 = vperm.xlu0 %13678, %v14240_v36  }
 0x1f0   : > { %v14992_v27 = vpop.permute.xlu1 %3561 }
 0x1f1   : > { %21268 = vst [vmem:[#allocation168_spill] sm:$0xff] %v14992_v27  ;;  %v14994_v14 = vpop.permute.xlu0 %5691 }
 0x1f2   : > { %21269 = vst [vmem:[#allocation169_spill] sm:$0xff] %v14994_v14 }
 0x1f3   : > { %3603 = vperm.xlu1 %13671, %v21225_v30   ;;  %3983 = vperm.xlu0 %13678, %v14230_v32  }
 0x1f5   : > { %v14998_v0 = vpop.permute.xlu1 %2890  ;;  %v15000_v54 = vpop.permute.xlu0 %5699 }
 0x1f6   : > { %21270 = vst [vmem:[#allocation170_spill] sm:$0xff] %v14998_v0  ;;  %21271 = vst [vmem:[#allocation171_spill] sm:$0xff] %v15000_v54 }
 0x1f7   : > { %13672 = vset.pattern.permute.xlu1 %v21131_v63  ;;  %3991 = vperm.xlu0 %13678, %v14247_v47   ;;  %v21338_v63 = vld [vmem:[#allocation6_spill] sm:$0xff] }
 0x1f8   : > { %2960 = vperm.xlu1 %13672, %v14559_v37  }
 0x1f9   : > { %v15005_v25 = vpop.permute.xlu1 %3047  ;;  %v15007_v4 = vpop.permute.xlu0 %5707 }
 0x1fa   : > { %21272 = vst [vmem:[#allocation172_spill] sm:$0xff] %v15005_v25  ;;  %21273 = vst [vmem:[#allocation173_spill] sm:$0xff] %v15007_v4 }
 0x1fb   : > { %3999 = vperm.xlu0 %13678, %v14266_v61  }
 0x1fc   : > { %3089 = vperm.xlu1 %13672, %v14595_v23  }
 0x1fd   : > { %v15011_v14 = vpop.permute.xlu0 %5715 }
 0x1fe   : > { %21274 = vst [vmem:[#allocation174_spill] sm:$0xff] %v15011_v14  ;;  %v15013_v58 = vpop.permute.xlu1 %3455 }
 0x1ff   : > { %21275 = vst [vmem:[#allocation175_spill] sm:$0xff] %v15013_v58  ;;  %4007 = vperm.xlu0 %13678, %v14291_v38   ;;  %v21281_v58 = vld [vmem:[#allocation14_spill] sm:$0xff] }
 0x200   : > { %13673 = vset.pattern.permute.xlu1 %v21137_v43 }
 0x201   : > { %3511 = vperm.xlu1 %13673, %v14399_v31   ;;  %v15018_v54 = vpop.permute.xlu0 %5723 }
 0x202   : > { %21276 = vst [vmem:[#allocation176_spill] sm:$0xff] %v15018_v54  ;;  %v15020_v0 = vpop.permute.xlu1 %3567 }
 0x203   : > { %21277 = vst [vmem:[#allocation177_spill] sm:$0xff] %v15020_v0  ;;  %4015 = vperm.xlu0 %13678, %v14318_v29   ;;  %v21291_v0 = vld [vmem:[#allocation43_spill] sm:$0xff] }
 0x205   : > { %3609 = vperm.xlu1 %13673, %v14829_v50   ;;  %v15024_v4 = vpop.permute.xlu0 %5778 }
 0x206   : > { %21278 = vst [vmem:[#allocation178_spill] sm:$0xff] %v15024_v4 }
 0x207   : > { %v15026_v25 = vpop.permute.xlu1 %2900  ;;  %4023 = vperm.xlu0 %13678, %v14334_v59  }
 0x208   : > { %21279 = vst [vmem:[#allocation179_spill] sm:$0xff] %v15026_v25 }
 0x209   : > { %13674 = vset.pattern.permute.xlu1 %v21263_v10  ;;  %v15030_v14 = vpop.permute.xlu0 %5784 }
 0x20a   : > { %21280 = vst [vmem:[#allocation180_spill] sm:$0xff] %v15030_v14  ;;  %3955 = vperm.xlu1 %13674, %v21281_v58  }
 0x20b   : > { %v15033_v8 = vpop.permute.xlu1 %3053  ;;  %4031 = vperm.xlu0 %13678, %v14351_v53  }
 0x20c   : > { %21282 = vst [vmem:[#allocation14_spill] sm:$0xff] %v15033_v8  ;;  %v21288_v8 = vld [vmem:[#allocation38_spill] sm:$0xff] }
 0x20d   : > { %v15036_v54 = vpop.permute.xlu0 %5790 }
 0x20e   : > { %21283 = vst [vmem:[#allocation181_spill] sm:$0xff] %v15036_v54  ;;  %3963 = vperm.xlu1 %13674, %v14281_v15  }
 0x20f   : > { %4039 = vperm.xlu0 %13678, %v14368_v49  }
 0x210   : > { %v15040_v4 = vpop.permute.xlu1 %3463 }
 0x211   : > { %21284 = vst [vmem:[#allocation182_spill] sm:$0xff] %v15040_v4  ;;  %v15042_v25 = vpop.permute.xlu0 %5796  ;;  %v21292_v4 = vld [vmem:[#allocation5_spill] sm:$0xff] }
 0x212   : > { %21285 = vst [vmem:[#allocation183_spill] sm:$0xff] %v15042_v25  ;;  %3971 = vperm.xlu1 %13674, %v14329_v2  }
 0x213   : > { %4047 = vperm.xlu0 %13678, %v14384_v3  }
 0x214   : > { %v15046_v14 = vpop.permute.xlu1 %3573 }
 0x215   : > { %21286 = vst [vmem:[#allocation184_spill] sm:$0xff] %v15046_v14  ;;  %v15048_v21 = vpop.permute.xlu0 %5802  ;;  %v21296_v14 = vld [vmem:[#allocation30_spill] sm:$0xff] }
 0x216   : > { %21287 = vst [vmem:[#allocation185_spill] sm:$0xff] %v15048_v21  ;;  %3979 = vperm.xlu1 %13674, %v21288_v8  }
 0x217   : > { %4055 = vperm.xlu0 %13678, %v14399_v31  }
 0x219   : > { %v15052_v54 = vpop.permute.xlu1 %2910  ;;  %v15054_v11 = vpop.permute.xlu0 %5808 }
 0x21a   : > { %21289 = vst [vmem:[#allocation38_spill] sm:$0xff] %v15052_v54  ;;  %21290 = vst [vmem:[#allocation186_spill] sm:$0xff] %v15054_v11  ;;  %3987 = vperm.xlu1 %13674, %v21291_v0   ;;  %v21299_v54 = vld [vmem:[#allocation46_spill] sm:$0xff] }
 0x21b   : > { %4063 = vperm.xlu0 %13678, %v21292_v4  }
 0x21d   : > { %v15058_v25 = vpop.permute.xlu1 %3059  ;;  %v15060_v27 = vpop.permute.xlu0 %5814 }
 0x21e   : > { %21293 = vst [vmem:[#allocation43_spill] sm:$0xff] %v15058_v25  ;;  %21294 = vst [vmem:[#allocation5_spill] sm:$0xff] %v15060_v27  ;;  %3995 = vperm.xlu1 %13674, %v21295_v46   ;;  %v21302_v25 = vld [vmem:[#allocation51_spill] sm:$0xff] }
 0x21f   : > { %4069 = vperm.xlu0 %13678, %v21296_v14  }
 0x221   : > { %v15064_v21 = vpop.permute.xlu0 %5820 }
 0x222   : > { %21297 = vst [vmem:[#allocation47_spill] sm:$0xff] %v15064_v21  ;;  %4003 = vperm.xlu1 %13674, %v14445_v26   ;;  %v15067_v10 = vpop.permute.xlu1 %3471  ;;  %v21305_v21 = vld [vmem:[#allocation55_spill] sm:$0xff]  ;;  %v21340_v26 = vld [vmem:[#allocation52_spill] sm:$0xff] }
 0x223   : > { %21298 = vst [vmem:[#allocation30_spill] sm:$0xff] %v15067_v10  ;;  %4075 = vperm.xlu0 %13678, %v21299_v54  }
 0x225   : > { %v15070_v11 = vpop.permute.xlu0 %5611 }
 0x226   : > { %21300 = vst [vmem:[#allocation46_spill] sm:$0xff] %v15070_v11  ;;  %4011 = vperm.xlu1 %13674, %v14468_v56   ;;  %v15073_v43 = vpop.permute.xlu1 %3579  ;;  %v21308_v11 = vld [vmem:[#allocation60_spill] sm:$0xff] }
 0x227   : > { %21301 = vst [vmem:[#allocation187_spill] sm:$0xff] %v15073_v43  ;;  %4081 = vperm.xlu0 %13678, %v21302_v25   ;;  %v21310_v43 = vld [vmem:[#allocation18_spill] sm:$0xff] }
 0x229   : > { %v15076_v27 = vpop.permute.xlu0 %5619 }
 0x22a   : > { %21303 = vst [vmem:[#allocation51_spill] sm:$0xff] %v15076_v27  ;;  %4019 = vperm.xlu1 %13674, %v14489_v7  }
 0x22b   : > { %v15079_v51 = vpop.permute.xlu1 %2920  ;;  %4087 = vperm.xlu0 %13678, %v21305_v21  }
 0x22c   : > { %21304 = vst [vmem:[#allocation188_spill] sm:$0xff] %v15079_v51 }
 0x22d   : > { %v15082_v55 = vpop.permute.xlu0 %5627 }
 0x22e   : > { %21306 = vst [vmem:[#allocation189_spill] sm:$0xff] %v15082_v55  ;;  %4027 = vperm.xlu1 %13674, %v14505_v44   ;;  %v21337_v44 = vld [vmem:[#allocation7_spill] sm:$0xff] }
 0x22f   : > { %v15085_v10 = vpop.permute.xlu1 %3065  ;;  %4093 = vperm.xlu0 %13678, %v21308_v11  }
 0x230   : > { %21307 = vst [vmem:[#allocation190_spill] sm:$0xff] %v15085_v10 }
 0x231   : > { %v15088_v24 = vpop.permute.xlu0 %5635 }
 0x232   : > { %21309 = vst [vmem:[#allocation191_spill] sm:$0xff] %v15088_v24  ;;  %4035 = vperm.xlu1 %13674, %v14525_v57  }
 0x233   : > { %4099 = vperm.xlu0 %13678, %v21310_v43  }
 0x234   : > { %v15092_v27 = vpop.permute.xlu1 %3479 }
 0x235   : > { %21311 = vst [vmem:[#allocation192_spill] sm:$0xff] %v15092_v27  ;;  %v15094_v1 = vpop.permute.xlu0 %5643 }
 0x236   : > { %21312 = vst [vmem:[#allocation193_spill] sm:$0xff] %v15094_v1  ;;  %4043 = vperm.xlu1 %13674, %v14538_v16   ;;  %v21333_v16 = vld [vmem:[#allocation41_spill] sm:$0xff] }
 0x237   : > { %4105 = vperm.xlu0 %13678, %v14250_v48  }
 0x238   : > { %v15098_v51 = vpop.permute.xlu1 %3585 }
 0x239   : > { %21313 = vst [vmem:[#allocation194_spill] sm:$0xff] %v15098_v51  ;;  %v15100_v55 = vpop.permute.xlu0 %5651  ;;  %v21321_v51 = vld [vmem:[#allocation13_spill] sm:$0xff] }
 0x23a   : > { %21314 = vst [vmem:[#allocation195_spill] sm:$0xff] %v15100_v55  ;;  %4051 = vperm.xlu1 %13674, %v14555_v6  }
 0x23b   : > { %4111 = vperm.xlu0 %13678, %v14269_v5  }
 0x23d   : > { %v15104_v24 = vpop.permute.xlu1 %2930  ;;  %v15106_v10 = vpop.permute.xlu0 %5659 }
 0x23e   : > { %21315 = vst [vmem:[#allocation196_spill] sm:$0xff] %v15104_v24  ;;  %21316 = vst [vmem:[#allocation197_spill] sm:$0xff] %v15106_v10  ;;  %4059 = vperm.xlu1 %13674, %v14559_v37   ;;  %v21324_v10 = vld [vmem:[#allocation16_spill] sm:$0xff] }
 0x23f   : > { %4117 = vperm.xlu0 %13678, %v14294_v39  }
 0x241   : > { %v15110_v1 = vpop.permute.xlu1 %3071  ;;  %v15112_v27 = vpop.permute.xlu0 %5730 }
 0x242   : > { %21317 = vst [vmem:[#allocation198_spill] sm:$0xff] %v15110_v1  ;;  %21318 = vst [vmem:[#allocation199_spill] sm:$0xff] %v15112_v27  ;;  %4066 = vperm.xlu1 %13674, %v21319_v62   ;;  %v21327_v1 = vld [vmem:[#allocation27_spill] sm:$0xff] }
 0x243   : > { %4123 = vperm.xlu0 %13678, %v21215_v60  }
 0x245   : > { %v15116_v55 = vpop.permute.xlu0 %5736 }
 0x246   : > { %21320 = vst [vmem:[#allocation3_spill] sm:$0xff] %v15116_v55  ;;  %4072 = vperm.xlu1 %13674, %v21321_v51   ;;  %v15119_v17 = vpop.permute.xlu1 %3487 }
 0x247   : > { %21322 = vst [vmem:[#allocation13_spill] sm:$0xff] %v15119_v17  ;;  %4129 = vperm.xlu0 %13678, %v21223_v42   ;;  %v21330_v17 = vld [vmem:[#allocation35_spill] sm:$0xff]  ;;  %v21343_v42 = vld [vmem:[#allocation28_spill] sm:$0xff] }
 0x249   : > { %v15122_v24 = vpop.permute.xlu0 %5742 }
 0x24a   : > { %21323 = vst [vmem:[#allocation200_spill] sm:$0xff] %v15122_v24  ;;  %4078 = vperm.xlu1 %13674, %v21324_v10   ;;  %v15125_v37 = vpop.permute.xlu1 %3591 }
 0x24b   : > { %21325 = vst [vmem:[#allocation16_spill] sm:$0xff] %v15125_v37  ;;  %4135 = vperm.xlu0 %13678, %v21226_v33   ;;  %v1204_v37 = vcombine.high %v14222_v28, %v14230_v32 }
 0x24d   : > { %v15128_v27 = vpop.permute.xlu0 %5748  ;;  %v1218_v7 = vrot.slane %v1204_v37, %v14188_v13 }
 0x24e   : > { %21326 = vst [vmem:[#allocation201_spill] sm:$0xff] %v15128_v27  ;;  %4084 = vperm.xlu1 %13674, %v21327_v1   ;;  %v1220_v27 = vcombine.high %v14240_v36, %v14247_v47 }
 0x24f   : > { %v15131_v6 = vpop.permute.xlu1 %2940  ;;  %4141 = vperm.xlu0 %13678, %v21227_v19  }
 0x250   : > { %21328 = vst [vmem:[#allocation27_spill] sm:$0xff] %v15131_v6  ;;  %v21334_v6 = vld [vmem:[#allocation8_spill] sm:$0xff]  ;;  %v1234_v56 = vrot.slane %v1220_v27, %v14188_v13 }
 0x251   : > { %v15134_v55 = vpop.permute.xlu0 %5754 }
 0x252   : > { %21329 = vst [vmem:[#allocation202_spill] sm:$0xff] %v15134_v55  ;;  %4090 = vperm.xlu1 %13674, %v21330_v17   ;;  %v1188_v55 = vcombine.high %v21334_v6, %v14176_v9  ;;  %v1284_v39 = vcombine.high %v1218_v7, %v1234_v56 }
 0x253   : > { %v15137_v52 = vpop.permute.xlu1 %3077  ;;  %4147 = vperm.xlu0 %13678, %v21225_v30   ;;  %v21339_v30 = vld [vmem:[#allocation45_spill] sm:$0xff] }
 0x254   : > { %21331 = vst [vmem:[#allocation35_spill] sm:$0xff] %v15137_v52 }
 0x255   : > { %v15140_v24 = vpop.permute.xlu0 %5760 }
 0x256   : > { %21332 = vst [vmem:[#allocation203_spill] sm:$0xff] %v15140_v24  ;;  %4096 = vperm.xlu1 %13674, %v21333_v16   ;;  %v1172_v24 = vcombine.high %v21338_v63, %v21337_v44 }
 0x257   : > { %4153 = vperm.xlu0 %13678, %v14829_v50   ;;  %v1202_v50 = vrot.slane %v1188_v55, %v14188_v13  ;;  %v21346_v55 = vld [vmem:[#allocation29_spill] sm:$0xff] }
 0x258   : > { %v15150_v57 = vpop.permute.xlu1 %3495 }
 0x259   : > { %21335 = vst [vmem:[#allocation41_spill] sm:$0xff] %v15150_v57  ;;  %v15152_v52 = vpop.permute.xlu0 %5766  ;;  %v1186_v57 = vrot.slane %v1172_v24, %v14188_v13 }
 0x25a   : > { %21336 = vst [vmem:[#allocation8_spill] sm:$0xff] %v15152_v52  ;;  %4102 = vperm.xlu1 %13674, %v21339_v30   ;;  %v1283_v52 = vcombine.low %v1218_v7, %v1234_v56  ;;  %v1298_v7 = vrot.slane %v1284_v39, %v14284_v22 }
 0x25b   : > { %6147 = vperm.xlu0 %13678, %v21340_v26   ;;  %v1251_v37 = vcombine.low %v1186_v57, %v1202_v50 }
 0x25c   : > { %v15161_v19 = vpop.permute.xlu1 %3597  ;;  %v1291_v27 = vrot.slane %v1283_v52, %v14284_v22 }
 0x25d   : > { %21341 = vst [vmem:[#allocation45_spill] sm:$0xff] %v15161_v19  ;;  %v15163_v33 = vpop.permute.xlu0 %5772 }
 0x25e   : > { %21342 = vst [vmem:[#allocation204_spill] sm:$0xff] %v15163_v33  ;;  %4108 = vperm.xlu1 %13674, %v14439_v34   ;;  %v1259_v33 = vrot.slane %v1251_v37, %v14284_v22  ;;  %v21350_v37 = vld [vmem:[#allocation10_spill] sm:$0xff] }
 0x25f   : > { %6159 = vperm.xlu0 %13678, %v21343_v42   ;;  %v1475_v42 = vcombine.low %v14329_v2, %v21291_v0 }
 0x260   : > { %v15178_v24 = vcombine.low %v1259_v33, %v1291_v27  ;;  %v15192_v56 = vcombine.high %v1259_v33, %v1291_v27 }
 0x261   : > { %v15168_v60 = vpop.permute.xlu1 %2950  ;;  %v1483_v5 = vrot.slane %v1475_v42, %v14188_v13 }
 0x262   : > { %21344 = vst [vmem:[#allocation205_spill] sm:$0xff] %v15168_v60  ;;  %4114 = vperm.xlu1 %13674, %v14455_v35   ;;  %v15172_v26 = vpop.permute.xlu0 %3959  ;;  %21348 = vst [vmem:[#allocation208_spill] sm:$0xff] %v15178_v24  ;;  %v1491_v60 = vcombine.low %v21288_v8, %v21295_v46 }
 0x263   : > { %21345 = vst [vmem:[#allocation206_spill] sm:$0xff] %v15172_v26  ;;  %6167 = vperm.xlu0 %13678, %v21346_v55   ;;  %v1252_v26 = vcombine.high %v1186_v57, %v1202_v50  ;;  %v1459_v55 = vcombine.low %v21350_v37, %v14281_v15  ;;  %21352 = vst [vmem:[#allocation10_spill] sm:$0xff] %v15192_v56 }
 0x264   : > { %v1499_v63 = vrot.slane %v1491_v60, %v14188_v13 }
 0x265   : > { %v15176_v19 = vpop.permute.xlu1 %3083  ;;  %v1266_v57 = vrot.slane %v1252_v26, %v14284_v22  ;;  %v1467_v50 = vrot.slane %v1459_v55, %v14188_v13 }
 0x266   : > { %21347 = vst [vmem:[#allocation207_spill] sm:$0xff] %v15176_v19  ;;  %4120 = vperm.xlu1 %13674, %v14482_v20   ;;  %v15185_v52 = vpop.permute.xlu0 %3967  ;;  %v21351_v19 = vld [vmem:[#allocation4_spill] sm:$0xff]  ;;  %v1539_v27 = vcombine.low %v1483_v5, %v1499_v63 }
 0x267   : > { %21349 = vst [vmem:[#allocation209_spill] sm:$0xff] %v15185_v52  ;;  %6175 = vperm.xlu0 %13678, %v15178_v24   ;;  %v1443_v35 = vcombine.low %v21351_v19, %v21281_v58  ;;  %v15205_v33 = vcombine.low %v1266_v57, %v1298_v7 }
 0x268   : > { %v1547_v26 = vrot.slane %v1539_v27, %v14284_v22 }
 0x269   : > { %21355 = vst [vmem:[#allocation212_spill] sm:$0xff] %v15205_v33  ;;  %v1451_v39 = vrot.slane %v1443_v35, %v14188_v13 }
 0x26a   : > { %4126 = vperm.xlu1 %13674, %v14495_v12   ;;  %v15198_v52 = vpop.permute.xlu1 %3503  ;;  %v15200_v24 = vpop.permute.xlu0 %3975 }
 0x26b   : > { %21353 = vst [vmem:[#allocation210_spill] sm:$0xff] %v15198_v52  ;;  %21354 = vst [vmem:[#allocation211_spill] sm:$0xff] %v15200_v24  ;;  %6183 = vperm.xlu0 %13678, %v15192_v56   ;;  %v1507_v24 = vcombine.low %v1451_v39, %v1467_v50  ;;  %v15214_v52 = vcombine.high %v1266_v57, %v1298_v7  ;;  %v1492_v7 = vcombine.high %v21288_v8, %v21295_v46 }
 0x26d   : > { %21358 = vst [vmem:[#allocation215_spill] sm:$0xff] %v15214_v52  ;;  %v1515_v35 = vrot.slane %v1507_v24, %v14284_v22  ;;  %v1460_v24 = vcombine.high %v21350_v37, %v14281_v15 }
 0x26e   : > { %4132 = vperm.xlu1 %13674, %v14517_v18   ;;  %v15209_v60 = vpop.permute.xlu1 %3603  ;;  %v15211_v42 = vpop.permute.xlu0 %3983 }
 0x26f   : > { %21356 = vst [vmem:[#allocation213_spill] sm:$0xff] %v15209_v60  ;;  %21357 = vst [vmem:[#allocation214_spill] sm:$0xff] %v15211_v42  ;;  %6191 = vperm.xlu0 %13678, %v15205_v33   ;;  %v15224_v60 = vcombine.low %v1515_v35, %v1547_v26  ;;  %v1540_v42 = vcombine.high %v1483_v5, %v1499_v63  ;;  %v1476_v33 = vcombine.high %v14329_v2, %v21291_v0 }
 0x270   : > { %v1444_v63 = vcombine.high %v21351_v19, %v21281_v58  ;;  %v15240_v5 = vcombine.high %v1515_v35, %v1547_v26 }
 0x272   : > { %4138 = vperm.xlu1 %13674, %v14532_v40   ;;  %v15218_v55 = vpop.permute.xlu0 %3991  ;;  %21363 = vst [vmem:[#allocation220_spill] sm:$0xff] %v15240_v5 }
 0x273   : > { %21359 = vst [vmem:[#allocation216_spill] sm:$0xff] %v15218_v55  ;;  %v15220_v56 = vpop.permute.xlu1 %2960  ;;  %6199 = vperm.xlu0 %13678, %v15214_v52   ;;  %v1554_v55 = vrot.slane %v1540_v42, %v14284_v22  ;;  %v1490_v52 = vrot.slane %v1476_v33, %v14188_v13  ;;  %v1458_v42 = vrot.slane %v1444_v63, %v14188_v13 }
 0x274   : > { %21360 = vst [vmem:[#allocation217_spill] sm:$0xff] %v15220_v56  ;;  %v1508_v56 = vcombine.high %v1451_v39, %v1467_v50  ;;  %v1474_v39 = vrot.slane %v1460_v24, %v14188_v13  ;;  %v20785_v24 = vmov 3  }
 0x276   : > { %4144 = vperm.xlu1 %13674, %v14545_v41   ;;  %v15231_v57 = vpop.permute.xlu0 %3999  ;;  %v1506_v41 = vrot.slane %v1492_v7, %v14188_v13  ;;  %v1522_v50 = vrot.slane %v1508_v56, %v14284_v22  ;;  %v1523_v7 = vcombine.low %v1458_v42, %v1474_v39 }
 0x277   : > { %21361 = vst [vmem:[#allocation218_spill] sm:$0xff] %v15231_v57  ;;  %v15233_v27 = vpop.permute.xlu1 %3089  ;;  %6207 = vperm.xlu0 %13678, %v15224_v60  }
 0x278   : > { %21362 = vst [vmem:[#allocation219_spill] sm:$0xff] %v15233_v27  ;;  %v15253_v26 = vcombine.low %v1522_v50, %v1554_v55  ;;  %v1555_v35 = vcombine.low %v1490_v52, %v1506_v41  ;;  %v1531_v63 = vrot.slane %v1523_v7, %v14284_v22  ;;  %v1731_v7 = vcombine.low %v21296_v14, %v21302_v25 }
 0x27a   : > { %4150 = vperm.xlu1 %13674, %v14574_v45   ;;  %v15246_v57 = vpop.permute.xlu0 %4007  ;;  %21366 = vst [vmem:[#allocation223_spill] sm:$0xff] %v15253_v26  ;;  %v1563_v56 = vrot.slane %v1555_v35, %v14284_v22 }
 0x27b   : > { %21364 = vst [vmem:[#allocation221_spill] sm:$0xff] %v15246_v57  ;;  %6215 = vperm.xlu0 %13678, %v15240_v5   ;;  %v15262_v5 = vcombine.high %v1522_v50, %v1554_v55  ;;  %v1747_v55 = vcombine.low %v21305_v21, %v21310_v43  ;;  %v1763_v50 = vcombine.low %v21308_v11, %v14250_v48 }
 0x27c   : > { %v15251_v27 = vpop.permute.xlu1 %3511 }
 0x27d   : > { %21365 = vst [vmem:[#allocation222_spill] sm:$0xff] %v15251_v27 }
 0x27e   : > { %4156 = vperm.xlu1 %13674, %v14595_v23   ;;  %v15257_v33 = vpop.permute.xlu0 %4015 }
 0x27f   : > { %21367 = vst [vmem:[#allocation224_spill] sm:$0xff] %v15257_v33  ;;  %6223 = vperm.xlu0 %13678, %v15253_v26   ;;  %v15273_v26 = vcombine.low %v1531_v63, %v1563_v56 }
 0x280   : > { %v15260_v57 = vpop.permute.xlu1 %3609 }
 0x281   : > { %21368 = vst [vmem:[#allocation225_spill] sm:$0xff] %v15260_v57  ;;  %21371 = vst [vmem:[#allocation228_spill] sm:$0xff] %v15273_v26  ;;  %v1556_v57 = vcombine.high %v1490_v52, %v1506_v41  ;;  %v15289_v52 = vcombine.high %v1531_v63, %v1563_v56 }
 0x282   : > { %13675 = vset.pattern.permute.xlu1 %v20785_v24  ;;  %v15266_v27 = vpop.permute.xlu0 %4023  ;;  %v1524_v24 = vcombine.high %v1458_v42, %v1474_v39  ;;  %v1739_v42 = vrot.slane %v1731_v7, %v14188_v13 }
 0x283   : > { %21369 = vst [vmem:[#allocation226_spill] sm:$0xff] %v15266_v27  ;;  %4483 = vperm.xlu1 %13675, %v21351_v19   ;;  %6231 = vperm.xlu0 %13678, %v15262_v5   ;;  %v1715_v27 = vcombine.low %v21292_v4, %v21299_v54  ;;  %v1755_v19 = vrot.slane %v1747_v55, %v14188_v13 }
 0x284   : > { %v1538_v39 = vrot.slane %v1524_v24, %v14284_v22 }
 0x285   : > { %v15271_v33 = vpop.permute.xlu1 %3955 }
 0x286   : > { %21370 = vst [vmem:[#allocation227_spill] sm:$0xff] %v15271_v33  ;;  %v15279_v35 = vpop.permute.xlu0 %4031  ;;  %v1570_v33 = vrot.slane %v1556_v57, %v14284_v22  ;;  %v1723_v57 = vrot.slane %v1715_v27, %v14188_v13 }
 0x287   : > { %21372 = vst [vmem:[#allocation229_spill] sm:$0xff] %v15279_v35  ;;  %4487 = vperm.xlu1 %13675, %v21334_v6   ;;  %6239 = vperm.xlu0 %13678, %v15273_v26   ;;  %v1771_v35 = vrot.slane %v1763_v50, %v14188_v13 }
 0x288   : > { %v15302_v56 = vcombine.low %v1538_v39, %v1570_v33  ;;  %v1779_v50 = vcombine.low %v1723_v57, %v1739_v42 }
 0x289   : > { %v15287_v41 = vpop.permute.xlu1 %3963  ;;  %v1811_v63 = vcombine.low %v1755_v19, %v1771_v35 }
 0x28a   : > { %21373 = vst [vmem:[#allocation230_spill] sm:$0xff] %v15287_v41  ;;  %v15294_v6 = vpop.permute.xlu0 %4039  ;;  %v15311_v41 = vcombine.high %v1538_v39, %v1570_v33  ;;  %v1787_v27 = vrot.slane %v1779_v50, %v14284_v22  ;;  %v1764_v33 = vcombine.high %v21308_v11, %v14250_v48  ;;  %v1732_v50 = vcombine.high %v21296_v14, %v21302_v25 }
 0x28b   : > { %21374 = vst [vmem:[#allocation231_spill] sm:$0xff] %v15294_v6  ;;  %4495 = vperm.xlu1 %13675, %v21337_v44   ;;  %6247 = vperm.xlu0 %13678, %v15289_v52   ;;  %v1819_v24 = vrot.slane %v1811_v63, %v14284_v22  ;;  %v1780_v63 = vcombine.high %v1723_v57, %v1739_v42 }
 0x28c   : > { %v1746_v57 = vrot.slane %v1732_v50, %v14188_v13 }
 0x28d   : > { %v15300_v26 = vpop.permute.xlu1 %3971  ;;  %v1794_v42 = vrot.slane %v1780_v63, %v14284_v22 }
 0x28e   : > { %21375 = vst [vmem:[#allocation232_spill] sm:$0xff] %v15300_v26  ;;  %v15305_v55 = vpop.permute.xlu0 %4047  ;;  %v15321_v26 = vcombine.low %v1787_v27, %v1819_v24 }
 0x28f   : > { %21376 = vst [vmem:[#allocation233_spill] sm:$0xff] %v15305_v55  ;;  %4503 = vperm.xlu1 %13675, %v14176_v9   ;;  %6255 = vperm.xlu0 %13678, %v15302_v56   ;;  %v1812_v9 = vcombine.high %v1755_v19, %v1771_v35  ;;  %v15337_v35 = vcombine.high %v1787_v27, %v1819_v24 }
 0x291   : > { %v15309_v6 = vpop.permute.xlu1 %3979 }
 0x292   : > { %21377 = vst [vmem:[#allocation234_spill] sm:$0xff] %v15309_v6  ;;  %v15314_v7 = vpop.permute.xlu0 %4055  ;;  %v1748_v6 = vcombine.high %v21305_v21, %v21310_v43 }
 0x293   : > { %21378 = vst [vmem:[#allocation235_spill] sm:$0xff] %v15314_v7  ;;  %4511 = vperm.xlu1 %13675, %v14222_v28   ;;  %6263 = vperm.xlu0 %13678, %v15311_v41   ;;  %v1716_v7 = vcombine.high %v21292_v4, %v21299_v54 }
 0x294   : > { %v1762_v28 = vrot.slane %v1748_v6, %v14188_v13 }
 0x295   : > { %v15319_v55 = vpop.permute.xlu1 %3987 }
 0x296   : > { %21379 = vst [vmem:[#allocation236_spill] sm:$0xff] %v15319_v55  ;;  %v15327_v39 = vpop.permute.xlu0 %4063  ;;  %v1826_v55 = vrot.slane %v1812_v9, %v14284_v22  ;;  %v1730_v9 = vrot.slane %v1716_v7, %v14188_v13 }
 0x297   : > { %21380 = vst [vmem:[#allocation237_spill] sm:$0xff] %v15327_v39  ;;  %4519 = vperm.xlu1 %13675, %v14240_v36   ;;  %6271 = vperm.xlu0 %13678, %v15321_v26   ;;  %v1778_v39 = vrot.slane %v1764_v33, %v14188_v13 }
 0x298   : > { %v15350_v24 = vcombine.low %v1794_v42, %v1826_v55  ;;  %v1795_v33 = vcombine.low %v1730_v9, %v1746_v57 }
 0x299   : > { %v15335_v19 = vpop.permute.xlu1 %3995  ;;  %v1827_v27 = vcombine.low %v1762_v28, %v1778_v39 }
 0x29a   : > { %21381 = vst [vmem:[#allocation238_spill] sm:$0xff] %v15335_v19  ;;  %v15342_v36 = vpop.permute.xlu0 %4069  ;;  %v1803_v7 = vrot.slane %v1795_v33, %v14284_v22  ;;  %v2003_v33 = vcombine.low %v21321_v51, %v21327_v1 }
 0x29b   : > { %21382 = vst [vmem:[#allocation239_spill] sm:$0xff] %v15342_v36  ;;  %4527 = vperm.xlu1 %13675, %v14230_v32   ;;  %6277 = vperm.xlu0 %13678, %v15337_v35   ;;  %v15359_v36 = vcombine.high %v1794_v42, %v1826_v55  ;;  %v1835_v63 = vrot.slane %v1827_v27, %v14284_v22 }
 0x29c   : > { %v2035_v55 = vcombine.low %v21333_v16, %v14439_v34  ;;  %v1796_v27 = vcombine.high %v1730_v9, %v1746_v57  ;;  %v2011_v9 = vrot.slane %v2003_v33, %v14188_v13 }
 0x29d   : > { %v15348_v44 = vpop.permute.xlu1 %4003  ;;  %21386 = vst [vmem:[#allocation243_spill] sm:$0xff] %v15359_v36 }
 0x29e   : > { %21383 = vst [vmem:[#allocation240_spill] sm:$0xff] %v15348_v44  ;;  %v15353_v6 = vpop.permute.xlu0 %4075  ;;  %v1810_v57 = vrot.slane %v1796_v27, %v14284_v22 }
 0x29f   : > { %21384 = vst [vmem:[#allocation241_spill] sm:$0xff] %v15353_v6  ;;  %4535 = vperm.xlu1 %13675, %v14247_v47   ;;  %6283 = vperm.xlu0 %13678, %v15350_v24   ;;  %v15369_v6 = vcombine.low %v1803_v7, %v1835_v63  ;;  %v1828_v47 = vcombine.high %v1762_v28, %v1778_v39 }
 0x2a0   : > { %v15385_v39 = vcombine.high %v1803_v7, %v1835_v63 }
 0x2a1   : > { %v15357_v19 = vpop.permute.xlu1 %4011 }
 0x2a2   : > { %21385 = vst [vmem:[#allocation242_spill] sm:$0xff] %v15357_v19  ;;  %v15362_v50 = vpop.permute.xlu0 %4081  ;;  %v2019_v19 = vcombine.low %v21330_v17, %v21339_v30 }
 0x2a3   : > { %21387 = vst [vmem:[#allocation244_spill] sm:$0xff] %v15362_v50  ;;  %4543 = vperm.xlu1 %13675, %v14266_v61   ;;  %6289 = vperm.xlu0 %13678, %v15359_v36   ;;  %v1842_v50 = vrot.slane %v1828_v47, %v14284_v22 }
 0x2a4   : > { %v2027_v61 = vrot.slane %v2019_v19, %v14188_v13 }
 0x2a5   : > { %v15367_v44 = vpop.permute.xlu1 %4019  ;;  %v15398_v63 = vcombine.low %v1810_v57, %v1842_v50 }
 0x2a6   : > { %21388 = vst [vmem:[#allocation245_spill] sm:$0xff] %v15367_v44  ;;  %v15375_v42 = vpop.permute.xlu0 %4087  ;;  %v1987_v44 = vcombine.low %v21319_v62, %v21324_v10 }
 0x2a7   : > { %21389 = vst [vmem:[#allocation246_spill] sm:$0xff] %v15375_v42  ;;  %4551 = vperm.xlu1 %13675, %v14291_v38   ;;  %6295 = vperm.xlu0 %13678, %v15369_v6   ;;  %v2043_v42 = vrot.slane %v2035_v55, %v14188_v13 }
 0x2a8   : > { %v1995_v47 = vrot.slane %v1987_v44, %v14188_v13 }
 0x2a9   : > { %v15383_v28 = vpop.permute.xlu1 %4027  ;;  %v2083_v7 = vcombine.low %v2027_v61, %v2043_v42 }
 0x2aa   : > { %21390 = vst [vmem:[#allocation247_spill] sm:$0xff] %v15383_v28  ;;  %v15390_v38 = vpop.permute.xlu0 %4093  ;;  %v2051_v55 = vcombine.low %v1995_v47, %v2011_v9 }
 0x2ab   : > { %21391 = vst [vmem:[#allocation248_spill] sm:$0xff] %v15390_v38  ;;  %4559 = vperm.xlu1 %13675, %v14318_v29   ;;  %6301 = vperm.xlu0 %13678, %v15385_v39   ;;  %v15407_v38 = vcombine.high %v1810_v57, %v1842_v50  ;;  %v2091_v27 = vrot.slane %v2083_v7, %v14284_v22 }
 0x2ac   : > { %v2059_v44 = vrot.slane %v2051_v55, %v14284_v22  ;;  %v2036_v50 = vcombine.high %v21333_v16, %v14439_v34  ;;  %v2052_v7 = vcombine.high %v1995_v47, %v2011_v9  ;;  %v2004_v55 = vcombine.high %v21321_v51, %v21327_v1 }
 0x2ad   : > { %v15396_v32 = vpop.permute.xlu1 %4035 }
 0x2ae   : > { %21392 = vst [vmem:[#allocation249_spill] sm:$0xff] %v15396_v32  ;;  %v15401_v19 = vpop.permute.xlu0 %4099  ;;  %v2066_v9 = vrot.slane %v2052_v7, %v14284_v22  ;;  %v2018_v47 = vrot.slane %v2004_v55, %v14188_v13 }
 0x2af   : > { %21393 = vst [vmem:[#allocation250_spill] sm:$0xff] %v15401_v19  ;;  %4567 = vperm.xlu1 %13675, %v14334_v59   ;;  %6307 = vperm.xlu0 %13678, %v15398_v63   ;;  %v15417_v19 = vcombine.low %v2059_v44, %v2091_v27  ;;  %v2084_v59 = vcombine.high %v2027_v61, %v2043_v42 }
 0x2b0   : > { %v15433_v42 = vcombine.high %v2059_v44, %v2091_v27 }
 0x2b1   : > { %v15405_v28 = vpop.permute.xlu1 %4043  ;;  %21397 = vst [vmem:[#allocation254_spill] sm:$0xff] %v15417_v19 }
 0x2b2   : > { %21394 = vst [vmem:[#allocation251_spill] sm:$0xff] %v15405_v28  ;;  %v15410_v33 = vpop.permute.xlu0 %4105  ;;  %v2020_v28 = vcombine.high %v21330_v17, %v21339_v30  ;;  %21400 = vst [vmem:[#allocation257_spill] sm:$0xff] %v15433_v42 }
 0x2b3   : > { %21395 = vst [vmem:[#allocation252_spill] sm:$0xff] %v15410_v33  ;;  %4575 = vperm.xlu1 %13675, %v14351_v53   ;;  %6313 = vperm.xlu0 %13678, %v15407_v38   ;;  %v2098_v33 = vrot.slane %v2084_v59, %v14284_v22 }
 0x2b4   : > { %v2034_v53 = vrot.slane %v2020_v28, %v14188_v13 }
 0x2b5   : > { %v15415_v32 = vpop.permute.xlu1 %4051  ;;  %v15446_v27 = vcombine.low %v2066_v9, %v2098_v33 }
 0x2b6   : > { %21396 = vst [vmem:[#allocation253_spill] sm:$0xff] %v15415_v32  ;;  %v15423_v57 = vpop.permute.xlu0 %4111  ;;  %v1988_v32 = vcombine.high %v21319_v62, %v21324_v10 }
 0x2b7   : > { %21398 = vst [vmem:[#allocation255_spill] sm:$0xff] %v15423_v57  ;;  %4583 = vperm.xlu1 %13675, %v14368_v49   ;;  %6319 = vperm.xlu0 %13678, %v15417_v19   ;;  %v2050_v57 = vrot.slane %v2036_v50, %v14188_v13 }
 0x2b8   : > { %v2002_v59 = vrot.slane %v1988_v32, %v14188_v13 }
 0x2b9   : > { %v15431_v61 = vpop.permute.xlu1 %4059  ;;  %v2099_v44 = vcombine.low %v2034_v53, %v2050_v57 }
 0x2ba   : > { %21399 = vst [vmem:[#allocation256_spill] sm:$0xff] %v15431_v61  ;;  %v15438_v49 = vpop.permute.xlu0 %4117  ;;  %v2067_v50 = vcombine.low %v2002_v59, %v2018_v47 }
 0x2bb   : > { %21401 = vst [vmem:[#allocation258_spill] sm:$0xff] %v15438_v49  ;;  %4591 = vperm.xlu1 %13675, %v14384_v3   ;;  %6325 = vperm.xlu0 %13678, %v15433_v42   ;;  %v15455_v49 = vcombine.high %v2066_v9, %v2098_v33  ;;  %v2107_v7 = vrot.slane %v2099_v44, %v14284_v22 }
 0x2bc   : > { %v2075_v32 = vrot.slane %v2067_v50, %v14284_v22  ;;  %v2068_v33 = vcombine.high %v2002_v59, %v2018_v47 }
 0x2bd   : > { %v15444_v29 = vpop.permute.xlu1 %4066 }
 0x2be   : > { %21402 = vst [vmem:[#allocation259_spill] sm:$0xff] %v15444_v29  ;;  %v15449_v28 = vpop.permute.xlu0 %4123  ;;  %v2100_v29 = vcombine.high %v2034_v53, %v2050_v57  ;;  %v15473_v44 = vcombine.high %v2075_v32, %v2107_v7  ;;  %v2082_v53 = vrot.slane %v2068_v33, %v14284_v22  ;;  %v21420_v33 = vmov 3  }
 0x2bf   : > { %21403 = vst [vmem:[#allocation260_spill] sm:$0xff] %v15449_v28  ;;  %4599 = vperm.xlu1 %13675, %v14399_v31   ;;  %6331 = vperm.xlu0 %13678, %v15446_v27   ;;  %v15465_v28 = vcombine.low %v2075_v32, %v2107_v7 }
 0x2c0   : > { %21410 = vst [vmem:[#allocation267_spill] sm:$0xff] %v15473_v44 }
 0x2c1   : > { %v15453_v61 = vpop.permute.xlu1 %4072  ;;  %21407 = vst [vmem:[#allocation264_spill] sm:$0xff] %v15465_v28 }
 0x2c2   : > { %21404 = vst [vmem:[#allocation261_spill] sm:$0xff] %v15453_v61  ;;  %v15458_v55 = vpop.permute.xlu0 %4129 }
 0x2c3   : > { %21405 = vst [vmem:[#allocation262_spill] sm:$0xff] %v15458_v55  ;;  %4607 = vperm.xlu1 %13675, %v21292_v4   ;;  %6337 = vperm.xlu0 %13678, %v15455_v49   ;;  %v2114_v55 = vrot.slane %v2100_v29, %v14284_v22  ;;  %v21421_v22 = vld [vmem:[#allocation6_spill] sm:$0xff] }
 0x2c5   : > { %v15463_v13 = vpop.permute.xlu1 %4078  ;;  %v15483_v50 = vcombine.low %v2082_v53, %v2114_v55  ;;  %v15491_v29 = vcombine.high %v2082_v53, %v2114_v55 }
 0x2c6   : > { %21406 = vst [vmem:[#allocation263_spill] sm:$0xff] %v15463_v13  ;;  %v15467_v31 = vpop.permute.xlu0 %4135 }
 0x2c7   : > { %21408 = vst [vmem:[#allocation265_spill] sm:$0xff] %v15467_v31  ;;  %4613 = vperm.xlu1 %13675, %v21296_v14   ;;  %6343 = vperm.xlu0 %13678, %v15465_v28   ;;  %21413 = vst [vmem:[#allocation270_spill] sm:$0xff] %v15483_v50 }
 0x2c8   : > { %21416 = vst [vmem:[#allocation273_spill] sm:$0xff] %v15491_v29 }
 0x2c9   : > { %v15471_v9 = vpop.permute.xlu1 %4084 }
 0x2ca   : > { %21409 = vst [vmem:[#allocation266_spill] sm:$0xff] %v15471_v9  ;;  %v15476_v61 = vpop.permute.xlu0 %4141 }
 0x2cb   : > { %21411 = vst [vmem:[#allocation268_spill] sm:$0xff] %v15476_v61  ;;  %4619 = vperm.xlu1 %13675, %v21299_v54   ;;  %6349 = vperm.xlu0 %13678, %v15473_v44  }
 0x2cd   : > { %v15481_v57 = vpop.permute.xlu1 %4090 }
 0x2ce   : > { %21412 = vst [vmem:[#allocation269_spill] sm:$0xff] %v15481_v57  ;;  %v15485_v31 = vpop.permute.xlu0 %4147 }
 0x2cf   : > { %21414 = vst [vmem:[#allocation271_spill] sm:$0xff] %v15485_v31  ;;  %4625 = vperm.xlu1 %13675, %v21302_v25   ;;  %6355 = vperm.xlu0 %13678, %v15483_v50  }
 0x2d1   : > { %v15489_v47 = vpop.permute.xlu1 %4096 }
 0x2d2   : > { %21415 = vst [vmem:[#allocation272_spill] sm:$0xff] %v15489_v47  ;;  %v15493_v59 = vpop.permute.xlu0 %4153 }
 0x2d3   : > { %21417 = vst [vmem:[#allocation274_spill] sm:$0xff] %v15493_v59  ;;  %4631 = vperm.xlu1 %13675, %v21305_v21   ;;  %6361 = vperm.xlu0 %13678, %v15491_v29  }
 0x2d5   : > { %v15497_v7 = vpop.permute.xlu1 %4102 }
 0x2d6   : > { %21418 = vst [vmem:[#allocation275_spill] sm:$0xff] %v15497_v7  ;;  %v15499_v32 = vpop.permute.xlu0 %6147  ;;  %v21428_v7 = vld [vmem:[#allocation23_spill] sm:$0xff] }
 0x2d7   : > { %21419 = vst [vmem:[#allocation276_spill] sm:$0xff] %v15499_v32  ;;  %4637 = vperm.xlu1 %13675, %v21308_v11   ;;  %13680 = vset.pattern.permute.xlu0 %v21420_v33 }
 0x2d8   : > { %4479 = vperm.xlu0 %13680, %v21421_v22  }
 0x2d9   : > { %v15504_v31 = vpop.permute.xlu1 %4108 }
 0x2da   : > { %21422 = vst [vmem:[#allocation6_spill] sm:$0xff] %v15504_v31  ;;  %v15506_v55 = vpop.permute.xlu0 %6159 }
 0x2db   : > { %21423 = vst [vmem:[#allocation277_spill] sm:$0xff] %v15506_v55  ;;  %4643 = vperm.xlu1 %13675, %v21310_v43  }
 0x2dc   : > { %4491 = vperm.xlu0 %13680, %v21350_v37   ;;  %v21431_v37 = vld [vmem:[#allocation26_spill] sm:$0xff] }
 0x2dd   : > { %v15510_v53 = vpop.permute.xlu1 %4114 }
 0x2de   : > { %21424 = vst [vmem:[#allocation278_spill] sm:$0xff] %v15510_v53  ;;  %v15512_v59 = vpop.permute.xlu0 %6167 }
 0x2df   : > { %21425 = vst [vmem:[#allocation279_spill] sm:$0xff] %v15512_v59  ;;  %4649 = vperm.xlu1 %13675, %v14250_v48  }
 0x2e0   : > { %4499 = vperm.xlu0 %13680, %v21281_v58   ;;  %v21434_v58 = vld [vmem:[#allocation32_spill] sm:$0xff] }
 0x2e1   : > { %v15516_v32 = vpop.permute.xlu1 %4120 }
 0x2e2   : > { %21426 = vst [vmem:[#allocation280_spill] sm:$0xff] %v15516_v32  ;;  %v15518_v61 = vpop.permute.xlu0 %6175 }
 0x2e3   : > { %21427 = vst [vmem:[#allocation281_spill] sm:$0xff] %v15518_v61  ;;  %4655 = vperm.xlu1 %13675, %v21428_v7  }
 0x2e4   : > { %4507 = vperm.xlu0 %13680, %v14281_v15   ;;  %v21437_v15 = vld [vmem:[#allocation34_spill] sm:$0xff] }
 0x2e5   : > { %v15522_v55 = vpop.permute.xlu1 %4126 }
 0x2e6   : > { %21429 = vst [vmem:[#allocation282_spill] sm:$0xff] %v15522_v55  ;;  %v15524_v31 = vpop.permute.xlu0 %6183 }
 0x2e7   : > { %21430 = vst [vmem:[#allocation283_spill] sm:$0xff] %v15524_v31  ;;  %4661 = vperm.xlu1 %13675, %v21431_v37  }
 0x2e8   : > { %4515 = vperm.xlu0 %13680, %v14329_v2   ;;  %v21440_v2 = vld [vmem:[#allocation37_spill] sm:$0xff] }
 0x2e9   : > { %v15528_v59 = vpop.permute.xlu1 %4132 }
 0x2ea   : > { %21432 = vst [vmem:[#allocation284_spill] sm:$0xff] %v15528_v59  ;;  %v15530_v53 = vpop.permute.xlu0 %6191 }
 0x2eb   : > { %21433 = vst [vmem:[#allocation285_spill] sm:$0xff] %v15530_v53  ;;  %4667 = vperm.xlu1 %13675, %v21434_v58  }
 0x2ec   : > { %4523 = vperm.xlu0 %13680, %v21288_v8   ;;  %v21443_v8 = vld [vmem:[#allocation40_spill] sm:$0xff] }
 0x2ed   : > { %v15534_v61 = vpop.permute.xlu1 %4138 }
 0x2ee   : > { %21435 = vst [vmem:[#allocation286_spill] sm:$0xff] %v15534_v61  ;;  %v15536_v32 = vpop.permute.xlu0 %6199  ;;  %v21444_v61 = vld [vmem:[#allocation48_spill] sm:$0xff] }
 0x2ef   : > { %21436 = vst [vmem:[#allocation287_spill] sm:$0xff] %v15536_v32  ;;  %4673 = vperm.xlu1 %13675, %v21437_v15   ;;  %v21516_v15 = vld [vmem:[#allocation59_spill] sm:$0xff] }
 0x2f0   : > { %4531 = vperm.xlu0 %13680, %v21291_v0   ;;  %v21447_v0 = vld [vmem:[#allocation42_spill] sm:$0xff] }
 0x2f1   : > { %v15540_v31 = vpop.permute.xlu1 %4144 }
 0x2f2   : > { %21438 = vst [vmem:[#allocation288_spill] sm:$0xff] %v15540_v31  ;;  %v15542_v55 = vpop.permute.xlu0 %6207  ;;  %v21448_v31 = vld [vmem:[#allocation50_spill] sm:$0xff] }
 0x2f3   : > { %21439 = vst [vmem:[#allocation289_spill] sm:$0xff] %v15542_v55  ;;  %4679 = vperm.xlu1 %13675, %v21440_v2   ;;  %v21500_v2 = vld [vmem:[#allocation49_spill] sm:$0xff] }
 0x2f4   : > { %4539 = vperm.xlu0 %13680, %v21295_v46   ;;  %v21451_v46 = vld [vmem:[#allocation124_spill] sm:$0xff] }
 0x2f5   : > { %v15546_v53 = vpop.permute.xlu1 %4150 }
 0x2f6   : > { %21441 = vst [vmem:[#allocation290_spill] sm:$0xff] %v15546_v53  ;;  %v15548_v59 = vpop.permute.xlu0 %6215  ;;  %v21452_v53 = vld [vmem:[#allocation53_spill] sm:$0xff] }
 0x2f7   : > { %21442 = vst [vmem:[#allocation291_spill] sm:$0xff] %v15548_v59  ;;  %4685 = vperm.xlu1 %13675, %v21443_v8   ;;  %v21472_v8 = vld [vmem:[#allocation62_spill] sm:$0xff] }
 0x2f8   : > { %4547 = vperm.xlu0 %13680, %v21444_v61   ;;  %v21455_v61 = vmov 0  }
 0x2f9   : > { %v15552_v32 = vpop.permute.xlu1 %4156 }
 0x2fa   : > { %21445 = vst [vmem:[#allocation48_spill] sm:$0xff] %v15552_v32  ;;  %v15554_v47 = vpop.permute.xlu0 %6223  ;;  %v21456_v32 = vld [vmem:[#allocation54_spill] sm:$0xff] }
 0x2fb   : > { %21446 = vst [vmem:[#allocation292_spill] sm:$0xff] %v15554_v47  ;;  %4691 = vperm.xlu1 %13675, %v21447_v0   ;;  %v21457_v47 = vld [vmem:[#allocation71_spill] sm:$0xff]  ;;  %v21468_v0 = vld [vmem:[#allocation61_spill] sm:$0xff] }
 0x2fc   : > { %4555 = vperm.xlu0 %13680, %v21448_v31  }
 0x2fe   : > { %v15558_v55 = vpop.permute.xlu1 %4483  ;;  %v15560_v57 = vpop.permute.xlu0 %6231 }
 0x2ff   : > { %21449 = vst [vmem:[#allocation50_spill] sm:$0xff] %v15558_v55  ;;  %21450 = vst [vmem:[#allocation293_spill] sm:$0xff] %v15560_v57  ;;  %4697 = vperm.xlu1 %13675, %v21451_v46   ;;  %v21460_v55 = vld [vmem:[#allocation57_spill] sm:$0xff]  ;;  %v21461_v57 = vld [vmem:[#allocation56_spill] sm:$0xff] }
 0x300   : > { %4563 = vperm.xlu0 %13680, %v21452_v53  }
 0x302   : > { %v15564_v59 = vpop.permute.xlu1 %4487  ;;  %v15566_v9 = vpop.permute.xlu0 %6239 }
 0x303   : > { %21453 = vst [vmem:[#allocation53_spill] sm:$0xff] %v15564_v59  ;;  %21454 = vst [vmem:[#allocation294_spill] sm:$0xff] %v15566_v9  ;;  %13676 = vset.pattern.permute.xlu1 %v21455_v61  ;;  %v21464_v59 = vld [vmem:[#allocation58_spill] sm:$0xff]  ;;  %v21465_v9 = vld [vmem:[#allocation119_spill] sm:$0xff] }
 0x304   : > { %4571 = vperm.xlu0 %13680, %v21456_v32   ;;  %5024 = vperm.xlu1 %13676, %v21457_v47  }
 0x306   : > { %v15571_v13 = vpop.permute.xlu1 %4495  ;;  %v15573_v31 = vpop.permute.xlu0 %6247 }
 0x307   : > { %21458 = vst [vmem:[#allocation54_spill] sm:$0xff] %v15571_v13  ;;  %21459 = vst [vmem:[#allocation71_spill] sm:$0xff] %v15573_v31  ;;  %v21469_v13 = vld [vmem:[#allocation121_spill] sm:$0xff] }
 0x308   : > { %4579 = vperm.xlu0 %13680, %v21460_v55   ;;  %5034 = vperm.xlu1 %13676, %v21461_v57  }
 0x30a   : > { %v15577_v33 = vpop.permute.xlu1 %4503  ;;  %v15579_v53 = vpop.permute.xlu0 %6255 }
 0x30b   : > { %21462 = vst [vmem:[#allocation57_spill] sm:$0xff] %v15577_v33  ;;  %21463 = vst [vmem:[#allocation56_spill] sm:$0xff] %v15579_v53  ;;  %v21473_v33 = vld [vmem:[#allocation125_spill] sm:$0xff] }
 0x30c   : > { %4587 = vperm.xlu0 %13680, %v21464_v59   ;;  %5039 = vperm.xlu1 %13676, %v21465_v9  }
 0x30e   : > { %v15583_v46 = vpop.permute.xlu1 %4511  ;;  %v15585_v32 = vpop.permute.xlu0 %6263 }
 0x30f   : > { %21466 = vst [vmem:[#allocation58_spill] sm:$0xff] %v15583_v46  ;;  %21467 = vst [vmem:[#allocation119_spill] sm:$0xff] %v15585_v32  ;;  %v21476_v46 = vld [vmem:[#allocation128_spill] sm:$0xff] }
 0x310   : > { %4595 = vperm.xlu0 %13680, %v21468_v0   ;;  %5049 = vperm.xlu1 %13676, %v21469_v13  }
 0x312   : > { %v15589_v31 = vpop.permute.xlu1 %4519  ;;  %v15591_v55 = vpop.permute.xlu0 %6271 }
 0x313   : > { %21470 = vst [vmem:[#allocation61_spill] sm:$0xff] %v15589_v31  ;;  %21471 = vst [vmem:[#allocation121_spill] sm:$0xff] %v15591_v55  ;;  %v21479_v31 = vld [vmem:[#allocation131_spill] sm:$0xff] }
 0x314   : > { %4603 = vperm.xlu0 %13680, %v21472_v8   ;;  %5059 = vperm.xlu1 %13676, %v21473_v33  }
 0x316   : > { %v15595_v53 = vpop.permute.xlu1 %4527  ;;  %v15597_v59 = vpop.permute.xlu0 %6277 }
 0x317   : > { %21474 = vst [vmem:[#allocation62_spill] sm:$0xff] %v15595_v53  ;;  %21475 = vst [vmem:[#allocation125_spill] sm:$0xff] %v15597_v59  ;;  %v21482_v53 = vld [vmem:[#allocation134_spill] sm:$0xff] }
 0x318   : > { %4610 = vperm.xlu0 %13680, %v21319_v62   ;;  %5069 = vperm.xlu1 %13676, %v21476_v46  }
 0x31a   : > { %v15601_v32 = vpop.permute.xlu1 %4535  ;;  %v15603_v0 = vpop.permute.xlu0 %6283 }
 0x31b   : > { %21477 = vst [vmem:[#allocation128_spill] sm:$0xff] %v15601_v32  ;;  %21478 = vst [vmem:[#allocation295_spill] sm:$0xff] %v15603_v0  ;;  %v21485_v32 = vld [vmem:[#allocation137_spill] sm:$0xff] }
 0x31c   : > { %4616 = vperm.xlu0 %13680, %v21321_v51   ;;  %5079 = vperm.xlu1 %13676, %v21479_v31  }
 0x31e   : > { %v15607_v55 = vpop.permute.xlu1 %4543  ;;  %v15609_v8 = vpop.permute.xlu0 %6289 }
 0x31f   : > { %21480 = vst [vmem:[#allocation131_spill] sm:$0xff] %v15607_v55  ;;  %21481 = vst [vmem:[#allocation296_spill] sm:$0xff] %v15609_v8  ;;  %v21488_v55 = vld [vmem:[#allocation72_spill] sm:$0xff] }
 0x320   : > { %4622 = vperm.xlu0 %13680, %v21324_v10   ;;  %5089 = vperm.xlu1 %13676, %v21482_v53  }
 0x322   : > { %v15613_v59 = vpop.permute.xlu1 %4551  ;;  %v15615_v62 = vpop.permute.xlu0 %6295 }
 0x323   : > { %21483 = vst [vmem:[#allocation297_spill] sm:$0xff] %v15613_v59  ;;  %21484 = vst [vmem:[#allocation298_spill] sm:$0xff] %v15615_v62  ;;  %v21491_v59 = vld [vmem:[#allocation75_spill] sm:$0xff] }
 0x324   : > { %4628 = vperm.xlu0 %13680, %v21327_v1   ;;  %5099 = vperm.xlu1 %13676, %v21485_v32  }
 0x326   : > { %v15619_v0 = vpop.permute.xlu1 %4559  ;;  %v15621_v51 = vpop.permute.xlu0 %6301 }
 0x327   : > { %21486 = vst [vmem:[#allocation299_spill] sm:$0xff] %v15619_v0  ;;  %21487 = vst [vmem:[#allocation300_spill] sm:$0xff] %v15621_v51  ;;  %v21494_v0 = vld [vmem:[#allocation79_spill] sm:$0xff] }
 0x328   : > { %4634 = vperm.xlu0 %13680, %v21330_v17   ;;  %5109 = vperm.xlu1 %13676, %v21488_v55  }
 0x32a   : > { %v15625_v8 = vpop.permute.xlu1 %4567  ;;  %v15627_v10 = vpop.permute.xlu0 %6307 }
 0x32b   : > { %21489 = vst [vmem:[#allocation301_spill] sm:$0xff] %v15625_v8  ;;  %21490 = vst [vmem:[#allocation302_spill] sm:$0xff] %v15627_v10  ;;  %v21497_v8 = vld [vmem:[#allocation82_spill] sm:$0xff] }
 0x32c   : > { %4640 = vperm.xlu0 %13680, %v21333_v16   ;;  %5119 = vperm.xlu1 %13676, %v21491_v59  }
 0x32e   : > { %v15631_v62 = vpop.permute.xlu1 %4575  ;;  %v15633_v1 = vpop.permute.xlu0 %6313 }
 0x32f   : > { %21492 = vst [vmem:[#allocation303_spill] sm:$0xff] %v15631_v62  ;;  %21493 = vst [vmem:[#allocation304_spill] sm:$0xff] %v15633_v1  ;;  %v21501_v62 = vld [vmem:[#allocation84_spill] sm:$0xff] }
 0x330   : > { %4646 = vperm.xlu0 %13680, %v21339_v30   ;;  %5129 = vperm.xlu1 %13676, %v21494_v0  }
 0x332   : > { %v15637_v51 = vpop.permute.xlu1 %4583  ;;  %v15639_v17 = vpop.permute.xlu0 %6319 }
 0x333   : > { %21495 = vst [vmem:[#allocation305_spill] sm:$0xff] %v15637_v51  ;;  %21496 = vst [vmem:[#allocation306_spill] sm:$0xff] %v15639_v17  ;;  %v21504_v51 = vld [vmem:[#allocation87_spill] sm:$0xff] }
 0x334   : > { %4652 = vperm.xlu0 %13680, %v14439_v34   ;;  %5139 = vperm.xlu1 %13676, %v21497_v8  }
 0x336   : > { %v15643_v10 = vpop.permute.xlu1 %4591  ;;  %v15645_v16 = vpop.permute.xlu0 %6325 }
 0x337   : > { %21498 = vst [vmem:[#allocation82_spill] sm:$0xff] %v15643_v10  ;;  %21499 = vst [vmem:[#allocation307_spill] sm:$0xff] %v15645_v16  ;;  %v21507_v10 = vld [vmem:[#allocation90_spill] sm:$0xff] }
 0x338   : > { %4658 = vperm.xlu0 %13680, %v21500_v2   ;;  %5149 = vperm.xlu1 %13676, %v21501_v62  }
 0x33a   : > { %v15649_v1 = vpop.permute.xlu1 %4599  ;;  %v15651_v30 = vpop.permute.xlu0 %6331 }
 0x33b   : > { %21502 = vst [vmem:[#allocation49_spill] sm:$0xff] %v15649_v1  ;;  %21503 = vst [vmem:[#allocation84_spill] sm:$0xff] %v15651_v30  ;;  %v21510_v1 = vld [vmem:[#allocation93_spill] sm:$0xff] }
 0x33c   : > { %4664 = vperm.xlu0 %13680, %v14482_v20   ;;  %5159 = vperm.xlu1 %13676, %v21504_v51  }
 0x33e   : > { %v15655_v17 = vpop.permute.xlu1 %4607  ;;  %v15657_v34 = vpop.permute.xlu0 %6337 }
 0x33f   : > { %21505 = vst [vmem:[#allocation87_spill] sm:$0xff] %v15655_v17  ;;  %21506 = vst [vmem:[#allocation308_spill] sm:$0xff] %v15657_v34  ;;  %v21513_v17 = vld [vmem:[#allocation140_spill] sm:$0xff] }
 0x340   : > { %4670 = vperm.xlu0 %13680, %v14495_v12   ;;  %5169 = vperm.xlu1 %13676, %v21507_v10  }
 0x342   : > { %v15661_v16 = vpop.permute.xlu1 %4613  ;;  %v15663_v2 = vpop.permute.xlu0 %6343 }
 0x343   : > { %21508 = vst [vmem:[#allocation309_spill] sm:$0xff] %v15661_v16  ;;  %21509 = vst [vmem:[#allocation310_spill] sm:$0xff] %v15663_v2  ;;  %v21517_v16 = vld [vmem:[#allocation143_spill] sm:$0xff] }
 0x344   : > { %4676 = vperm.xlu0 %13680, %v14517_v18   ;;  %5179 = vperm.xlu1 %13676, %v21510_v1  }
 0x346   : > { %v15667_v30 = vpop.permute.xlu1 %4619  ;;  %v15669_v20 = vpop.permute.xlu0 %6349 }
 0x347   : > { %21511 = vst [vmem:[#allocation93_spill] sm:$0xff] %v15667_v30  ;;  %21512 = vst [vmem:[#allocation311_spill] sm:$0xff] %v15669_v20  ;;  %v21520_v30 = vld [vmem:[#allocation146_spill] sm:$0xff] }
 0x348   : > { %4682 = vperm.xlu0 %13680, %v14532_v40   ;;  %5218 = vperm.xlu1 %13676, %v21513_v17  }
 0x34a   : > { %v15673_v34 = vpop.permute.xlu1 %4625  ;;  %v15675_v12 = vpop.permute.xlu0 %6355 }
 0x34b   : > { %21514 = vst [vmem:[#allocation140_spill] sm:$0xff] %v15673_v34  ;;  %21515 = vst [vmem:[#allocation312_spill] sm:$0xff] %v15675_v12  ;;  %v21523_v34 = vld [vmem:[#allocation148_spill] sm:$0xff] }
 0x34c   : > { %4688 = vperm.xlu0 %13680, %v21516_v15   ;;  %5224 = vperm.xlu1 %13676, %v21517_v16  }
 0x34e   : > { %v15679_v2 = vpop.permute.xlu1 %4631  ;;  %v15681_v18 = vpop.permute.xlu0 %6361 }
 0x34f   : > { %21518 = vst [vmem:[#allocation59_spill] sm:$0xff] %v15679_v2  ;;  %21519 = vst [vmem:[#allocation143_spill] sm:$0xff] %v15681_v18  ;;  %v21526_v2 = vld [vmem:[#allocation151_spill] sm:$0xff] }
 0x350   : > { %4694 = vperm.xlu0 %13680, %v14574_v45   ;;  %5230 = vperm.xlu1 %13676, %v21520_v30  }
 0x352   : > { %v15685_v20 = vpop.permute.xlu1 %4637 }
 0x353   : > { %21521 = vst [vmem:[#allocation146_spill] sm:$0xff] %v15685_v20  ;;  %v15687_v40 = vpop.permute.xlu0 %4479  ;;  %v21529_v20 = vld [vmem:[#allocation154_spill] sm:$0xff] }
 0x354   : > { %21522 = vst [vmem:[#allocation313_spill] sm:$0xff] %v15687_v40  ;;  %4700 = vperm.xlu0 %13680, %v14595_v23   ;;  %5236 = vperm.xlu1 %13676, %v21523_v34  }
 0x356   : > { %v15691_v12 = vpop.permute.xlu1 %4643 }
 0x357   : > { %21524 = vst [vmem:[#allocation148_spill] sm:$0xff] %v15691_v12  ;;  %v15693_v15 = vpop.permute.xlu0 %4491  ;;  %v21532_v12 = vld [vmem:[#allocation157_spill] sm:$0xff] }
 0x358   : > { %21525 = vst [vmem:[#allocation314_spill] sm:$0xff] %v15693_v15  ;;  %6687 = vperm.xlu0 %13680, %v21457_v47   ;;  %5242 = vperm.xlu1 %13676, %v21526_v2  }
 0x35a   : > { %v15697_v18 = vpop.permute.xlu1 %4649 }
 0x35b   : > { %21527 = vst [vmem:[#allocation151_spill] sm:$0xff] %v15697_v18  ;;  %v15699_v45 = vpop.permute.xlu0 %4499  ;;  %v21535_v18 = vld [vmem:[#allocation160_spill] sm:$0xff] }
 0x35c   : > { %21528 = vst [vmem:[#allocation315_spill] sm:$0xff] %v15699_v45  ;;  %6699 = vperm.xlu0 %13680, %v21465_v9   ;;  %5248 = vperm.xlu1 %13676, %v21529_v20  }
 0x35e   : > { %v15703_v40 = vpop.permute.xlu1 %4655 }
 0x35f   : > { %21530 = vst [vmem:[#allocation154_spill] sm:$0xff] %v15703_v40  ;;  %v15705_v23 = vpop.permute.xlu0 %4507  ;;  %v21538_v40 = vld [vmem:[#allocation95_spill] sm:$0xff] }
 0x360   : > { %21531 = vst [vmem:[#allocation316_spill] sm:$0xff] %v15705_v23  ;;  %6707 = vperm.xlu0 %13680, %v21469_v13   ;;  %5254 = vperm.xlu1 %13676, %v21532_v12  }
 0x362   : > { %v15709_v15 = vpop.permute.xlu1 %4661 }
 0x363   : > { %21533 = vst [vmem:[#allocation157_spill] sm:$0xff] %v15709_v15  ;;  %v15711_v58 = vpop.permute.xlu0 %4515  ;;  %v21541_v15 = vld [vmem:[#allocation98_spill] sm:$0xff] }
 0x364   : > { %21534 = vst [vmem:[#allocation317_spill] sm:$0xff] %v15711_v58  ;;  %6715 = vperm.xlu0 %13680, %v21473_v33   ;;  %5260 = vperm.xlu1 %13676, %v21535_v18  }
 0x366   : > { %v15715_v45 = vpop.permute.xlu1 %4667 }
 0x367   : > { %21536 = vst [vmem:[#allocation160_spill] sm:$0xff] %v15715_v45  ;;  %v15717_v37 = vpop.permute.xlu0 %4523  ;;  %v21544_v45 = vld [vmem:[#allocation101_spill] sm:$0xff] }
 0x368   : > { %21537 = vst [vmem:[#allocation318_spill] sm:$0xff] %v15717_v37  ;;  %6723 = vperm.xlu0 %13680, %v21476_v46   ;;  %5266 = vperm.xlu1 %13676, %v21538_v40  }
 0x36a   : > { %v15721_v23 = vpop.permute.xlu1 %4673 }
 0x36b   : > { %21539 = vst [vmem:[#allocation95_spill] sm:$0xff] %v15721_v23  ;;  %v15723_v7 = vpop.permute.xlu0 %4531  ;;  %v21547_v23 = vld [vmem:[#allocation104_spill] sm:$0xff] }
 0x36c   : > { %21540 = vst [vmem:[#allocation319_spill] sm:$0xff] %v15723_v7  ;;  %6731 = vperm.xlu0 %13680, %v21479_v31   ;;  %5272 = vperm.xlu1 %13676, %v21541_v15  }
 0x36e   : > { %v15727_v58 = vpop.permute.xlu1 %4679 }
 0x36f   : > { %21542 = vst [vmem:[#allocation98_spill] sm:$0xff] %v15727_v58  ;;  %v15729_v48 = vpop.permute.xlu0 %4539  ;;  %v21550_v58 = vld [vmem:[#allocation107_spill] sm:$0xff] }
 0x370   : > { %21543 = vst [vmem:[#allocation320_spill] sm:$0xff] %v15729_v48  ;;  %6739 = vperm.xlu0 %13680, %v21482_v53   ;;  %5278 = vperm.xlu1 %13676, %v21544_v45  }
 0x372   : > { %v15733_v37 = vpop.permute.xlu1 %4685 }
 0x373   : > { %21545 = vst [vmem:[#allocation101_spill] sm:$0xff] %v15733_v37  ;;  %v15735_v43 = vpop.permute.xlu0 %4547  ;;  %v21553_v37 = vld [vmem:[#allocation110_spill] sm:$0xff] }
 0x374   : > { %21546 = vst [vmem:[#allocation321_spill] sm:$0xff] %v15735_v43  ;;  %6747 = vperm.xlu0 %13680, %v21485_v32   ;;  %5284 = vperm.xlu1 %13676, %v21547_v23  }
 0x376   : > { %v15739_v7 = vpop.permute.xlu1 %4691 }
 0x377   : > { %21548 = vst [vmem:[#allocation104_spill] sm:$0xff] %v15739_v7  ;;  %v15741_v11 = vpop.permute.xlu0 %4555  ;;  %v21556_v7 = vld [vmem:[#allocation113_spill] sm:$0xff] }
 0x378   : > { %21549 = vst [vmem:[#allocation322_spill] sm:$0xff] %v15741_v11  ;;  %6755 = vperm.xlu0 %13680, %v21488_v55   ;;  %5290 = vperm.xlu1 %13676, %v21550_v58  }
 0x37a   : > { %v15745_v48 = vpop.permute.xlu1 %4697 }
 0x37b   : > { %21551 = vst [vmem:[#allocation107_spill] sm:$0xff] %v15745_v48  ;;  %v15747_v21 = vpop.permute.xlu0 %4563  ;;  %v21559_v48 = vld [vmem:[#allocation116_spill] sm:$0xff] }
 0x37c   : > { %21552 = vst [vmem:[#allocation323_spill] sm:$0xff] %v15747_v21  ;;  %6763 = vperm.xlu0 %13680, %v21491_v59   ;;  %5296 = vperm.xlu1 %13676, %v21553_v37  }
 0x37f   : > { %v15751_v43 = vpop.permute.xlu0 %4571  ;;  %v15753_v32 = vpop.permute.xlu1 %5024 }
 0x380   : > { %21554 = vst [vmem:[#allocation110_spill] sm:$0xff] %v15751_v43  ;;  %21555 = vst [vmem:[#allocation324_spill] sm:$0xff] %v15753_v32  ;;  %6771 = vperm.xlu0 %13680, %v21494_v0   ;;  %5302 = vperm.xlu1 %13676, %v21556_v7   ;;  %v21562_v43 = vmov 1   ;;  %v21563_v32 = vld [vmem:[#allocation52_spill] sm:$0xff] }
 0x383   : > { %v15757_v11 = vpop.permute.xlu0 %4579  ;;  %v15759_v55 = vpop.permute.xlu1 %5034 }
 0x384   : > { %21557 = vst [vmem:[#allocation113_spill] sm:$0xff] %v15757_v11  ;;  %21558 = vst [vmem:[#allocation325_spill] sm:$0xff] %v15759_v55  ;;  %6779 = vperm.xlu0 %13680, %v21497_v8   ;;  %5308 = vperm.xlu1 %13676, %v21559_v48  }
 0x387   : > { %v15763_v21 = vpop.permute.xlu0 %4587  ;;  %v15765_v59 = vpop.permute.xlu1 %5039 }
 0x388   : > { %21560 = vst [vmem:[#allocation116_spill] sm:$0xff] %v15763_v21  ;;  %21561 = vst [vmem:[#allocation326_spill] sm:$0xff] %v15765_v59  ;;  %6787 = vperm.xlu0 %13680, %v21501_v62   ;;  %13677 = vset.pattern.permute.xlu1 %v21562_v43  ;;  %v21568_v59 = vld [vmem:[#allocation28_spill] sm:$0xff] }
 0x389   : > { %5603 = vperm.xlu1 %13677, %v21563_v32  }
 0x38b   : > { %v15770_v0 = vpop.permute.xlu0 %4595  ;;  %v15772_v53 = vpop.permute.xlu1 %5049 }
 0x38c   : > { %21564 = vst [vmem:[#allocation327_spill] sm:$0xff] %v15770_v0  ;;  %21565 = vst [vmem:[#allocation328_spill] sm:$0xff] %v15772_v53  ;;  %6795 = vperm.xlu0 %13680, %v21504_v51   ;;  %v21571_v0 = vld [vmem:[#allocation29_spill] sm:$0xff] }
 0x38d   : > { %5607 = vperm.xlu1 %13677, %v21461_v57  }
 0x38f   : > { %v15776_v55 = vpop.permute.xlu0 %4603  ;;  %v15778_v11 = vpop.permute.xlu1 %5059 }
 0x390   : > { %21566 = vst [vmem:[#allocation329_spill] sm:$0xff] %v15776_v55  ;;  %21567 = vst [vmem:[#allocation330_spill] sm:$0xff] %v15778_v11  ;;  %6803 = vperm.xlu0 %13680, %v21507_v10   ;;  %v21574_v55 = vld [vmem:[#allocation208_spill] sm:$0xff] }
 0x391   : > { %5615 = vperm.xlu1 %13677, %v21568_v59  }
 0x393   : > { %v15782_v21 = vpop.permute.xlu0 %4610  ;;  %v15784_v43 = vpop.permute.xlu1 %5069 }
 0x394   : > { %21569 = vst [vmem:[#allocation331_spill] sm:$0xff] %v15782_v21  ;;  %21570 = vst [vmem:[#allocation332_spill] sm:$0xff] %v15784_v43  ;;  %6811 = vperm.xlu0 %13680, %v21510_v1   ;;  %v21577_v21 = vld [vmem:[#allocation10_spill] sm:$0xff] }
 0x395   : > { %5623 = vperm.xlu1 %13677, %v21571_v0  }
 0x397   : > { %v15788_v53 = vpop.permute.xlu0 %4616  ;;  %v15790_v32 = vpop.permute.xlu1 %5079 }
 0x398   : > { %21572 = vst [vmem:[#allocation333_spill] sm:$0xff] %v15788_v53  ;;  %21573 = vst [vmem:[#allocation334_spill] sm:$0xff] %v15790_v32  ;;  %6818 = vperm.xlu0 %13680, %v21513_v17   ;;  %v21580_v53 = vld [vmem:[#allocation212_spill] sm:$0xff] }
 0x399   : > { %5631 = vperm.xlu1 %13677, %v21574_v55  }
 0x39b   : > { %v15794_v11 = vpop.permute.xlu0 %4622  ;;  %v15796_v10 = vpop.permute.xlu1 %5089 }
 0x39c   : > { %21575 = vst [vmem:[#allocation335_spill] sm:$0xff] %v15794_v11  ;;  %21576 = vst [vmem:[#allocation336_spill] sm:$0xff] %v15796_v10  ;;  %6824 = vperm.xlu0 %13680, %v21517_v16   ;;  %v21583_v11 = vld [vmem:[#allocation215_spill] sm:$0xff] }
 0x39d   : > { %5639 = vperm.xlu1 %13677, %v21577_v21  }
 0x39f   : > { %v15800_v43 = vpop.permute.xlu0 %4628  ;;  %v15802_v59 = vpop.permute.xlu1 %5099 }
 0x3a0   : > { %21578 = vst [vmem:[#allocation10_spill] sm:$0xff] %v15800_v43  ;;  %21579 = vst [vmem:[#allocation337_spill] sm:$0xff] %v15802_v59  ;;  %6830 = vperm.xlu0 %13680, %v21520_v30  }
 0x3a1   : > { %5647 = vperm.xlu1 %13677, %v21580_v53  }
 0x3a3   : > { %v15806_v32 = vpop.permute.xlu0 %4634  ;;  %v15808_v0 = vpop.permute.xlu1 %5109 }
 0x3a4   : > { %21581 = vst [vmem:[#allocation338_spill] sm:$0xff] %v15806_v32  ;;  %21582 = vst [vmem:[#allocation339_spill] sm:$0xff] %v15808_v0  ;;  %6836 = vperm.xlu0 %13680, %v21523_v34   ;;  %v21588_v32 = vld [vmem:[#allocation220_spill] sm:$0xff] }
 0x3a5   : > { %5655 = vperm.xlu1 %13677, %v21583_v11  }
 0x3a7   : > { %v15812_v10 = vpop.permute.xlu0 %4640  ;;  %v15814_v55 = vpop.permute.xlu1 %5119 }
 0x3a8   : > { %21584 = vst [vmem:[#allocation340_spill] sm:$0xff] %v15812_v10  ;;  %21585 = vst [vmem:[#allocation341_spill] sm:$0xff] %v15814_v55  ;;  %6842 = vperm.xlu0 %13680, %v21526_v2   ;;  %v21591_v10 = vld [vmem:[#allocation223_spill] sm:$0xff] }
 0x3a9   : > { %5663 = vperm.xlu1 %13677, %v15224_v60  }
 0x3ab   : > { %v15818_v59 = vpop.permute.xlu0 %4646  ;;  %v15820_v43 = vpop.permute.xlu1 %5129 }
 0x3ac   : > { %21586 = vst [vmem:[#allocation342_spill] sm:$0xff] %v15818_v59  ;;  %21587 = vst [vmem:[#allocation343_spill] sm:$0xff] %v15820_v43  ;;  %6848 = vperm.xlu0 %13680, %v21529_v20  }
 0x3ad   : > { %5671 = vperm.xlu1 %13677, %v21588_v32  }
 0x3af   : > { %v15824_v0 = vpop.permute.xlu0 %4652  ;;  %v15826_v53 = vpop.permute.xlu1 %5139 }
 0x3b0   : > { %21589 = vst [vmem:[#allocation344_spill] sm:$0xff] %v15824_v0  ;;  %21590 = vst [vmem:[#allocation345_spill] sm:$0xff] %v15826_v53  ;;  %6854 = vperm.xlu0 %13680, %v21532_v12   ;;  %v21596_v0 = vld [vmem:[#allocation228_spill] sm:$0xff] }
 0x3b1   : > { %5679 = vperm.xlu1 %13677, %v21591_v10  }
 0x3b3   : > { %v15830_v55 = vpop.permute.xlu0 %4658  ;;  %v15832_v11 = vpop.permute.xlu1 %5149 }
 0x3b4   : > { %21592 = vst [vmem:[#allocation223_spill] sm:$0xff] %v15830_v55  ;;  %21593 = vst [vmem:[#allocation346_spill] sm:$0xff] %v15832_v11  ;;  %6860 = vperm.xlu0 %13680, %v21535_v18  }
 0x3b5   : > { %5687 = vperm.xlu1 %13677, %v15262_v5  }
 0x3b7   : > { %v15836_v43 = vpop.permute.xlu0 %4664  ;;  %v15838_v59 = vpop.permute.xlu1 %5159 }
 0x3b8   : > { %21594 = vst [vmem:[#allocation347_spill] sm:$0xff] %v15836_v43  ;;  %21595 = vst [vmem:[#allocation348_spill] sm:$0xff] %v15838_v59  ;;  %6866 = vperm.xlu0 %13680, %v21538_v40  }
 0x3b9   : > { %5695 = vperm.xlu1 %13677, %v21596_v0  }
 0x3bb   : > { %v15842_v53 = vpop.permute.xlu0 %4670  ;;  %v15844_v32 = vpop.permute.xlu1 %5169 }
 0x3bc   : > { %21597 = vst [vmem:[#allocation228_spill] sm:$0xff] %v15842_v53  ;;  %21598 = vst [vmem:[#allocation349_spill] sm:$0xff] %v15844_v32  ;;  %6872 = vperm.xlu0 %13680, %v21541_v15  }
 0x3bd   : > { %5703 = vperm.xlu1 %13677, %v15289_v52  }
 0x3bf   : > { %v15848_v11 = vpop.permute.xlu0 %4676  ;;  %v15850_v55 = vpop.permute.xlu1 %5179 }
 0x3c0   : > { %21599 = vst [vmem:[#allocation350_spill] sm:$0xff] %v15848_v11  ;;  %21600 = vst [vmem:[#allocation351_spill] sm:$0xff] %v15850_v55  ;;  %6878 = vperm.xlu0 %13680, %v21544_v45  }
 0x3c1   : > { %5711 = vperm.xlu1 %13677, %v15302_v56  }
 0x3c3   : > { %v15854_v59 = vpop.permute.xlu0 %4682  ;;  %v15856_v43 = vpop.permute.xlu1 %5218 }
 0x3c4   : > { %21601 = vst [vmem:[#allocation352_spill] sm:$0xff] %v15854_v59  ;;  %21602 = vst [vmem:[#allocation353_spill] sm:$0xff] %v15856_v43  ;;  %6884 = vperm.xlu0 %13680, %v21547_v23  }
 0x3c5   : > { %5719 = vperm.xlu1 %13677, %v15311_v41  }
 0x3c7   : > { %v15860_v32 = vpop.permute.xlu0 %4688  ;;  %v15862_v53 = vpop.permute.xlu1 %5224 }
 0x3c8   : > { %21603 = vst [vmem:[#allocation354_spill] sm:$0xff] %v15860_v32  ;;  %21604 = vst [vmem:[#allocation355_spill] sm:$0xff] %v15862_v53  ;;  %6890 = vperm.xlu0 %13680, %v21550_v58  }
 0x3c9   : > { %5727 = vperm.xlu1 %13677, %v15321_v26  }
 0x3cb   : > { %v15866_v55 = vpop.permute.xlu0 %4694  ;;  %v15868_v11 = vpop.permute.xlu1 %5230 }
 0x3cc   : > { %21605 = vst [vmem:[#allocation356_spill] sm:$0xff] %v15866_v55  ;;  %21606 = vst [vmem:[#allocation357_spill] sm:$0xff] %v15868_v11  ;;  %6896 = vperm.xlu0 %13680, %v21553_v37  }
 0x3cd   : > { %5733 = vperm.xlu1 %13677, %v15337_v35  }
 0x3cf   : > { %v15872_v43 = vpop.permute.xlu0 %4700  ;;  %v15874_v59 = vpop.permute.xlu1 %5236 }
 0x3d0   : > { %21607 = vst [vmem:[#allocation358_spill] sm:$0xff] %v15872_v43  ;;  %21608 = vst [vmem:[#allocation359_spill] sm:$0xff] %v15874_v59  ;;  %6902 = vperm.xlu0 %13680, %v21556_v7  }
 0x3d1   : > { %5739 = vperm.xlu1 %13677, %v15350_v24  }
 0x3d3   : > { %v15878_v53 = vpop.permute.xlu0 %6687  ;;  %v15880_v32 = vpop.permute.xlu1 %5242 }
 0x3d4   : > { %21609 = vst [vmem:[#allocation360_spill] sm:$0xff] %v15878_v53  ;;  %21610 = vst [vmem:[#allocation361_spill] sm:$0xff] %v15880_v32  ;;  %6908 = vperm.xlu0 %13680, %v21559_v48   ;;  %v21615_v53 = vld [vmem:[#allocation4_spill] sm:$0xff] }
 0x3d5   : > { %5745 = vperm.xlu1 %13677, %v15359_v36  }
 0x3d7   : > { %v15884_v11 = vpop.permute.xlu0 %6699  ;;  %v15886_v55 = vpop.permute.xlu1 %5248 }
 0x3d8   : > { %21611 = vst [vmem:[#allocation362_spill] sm:$0xff] %v15884_v11  ;;  %21612 = vst [vmem:[#allocation363_spill] sm:$0xff] %v15886_v55  ;;  %13682 = vset.pattern.permute.xlu0 %v21455_v61  ;;  %v21618_v11 = vld [vmem:[#allocation7_spill] sm:$0xff] }
 0x3d9   : > { %2805 = vperm.xlu0 %13682, %v21421_v22   ;;  %5751 = vperm.xlu1 %13677, %v15369_v6   ;;  %v21621_v55 = vld [vmem:[#allocation11_spill] sm:$0xff] }
 0x3db   : > { %v15891_v59 = vpop.permute.xlu0 %6707  ;;  %v15893_v43 = vpop.permute.xlu1 %5254 }
 0x3dc   : > { %21613 = vst [vmem:[#allocation364_spill] sm:$0xff] %v15891_v59  ;;  %21614 = vst [vmem:[#allocation365_spill] sm:$0xff] %v15893_v43  ;;  %v21624_v43 = vld [vmem:[#allocation15_spill] sm:$0xff] }
 0x3dd   : > { %2810 = vperm.xlu0 %13682, %v21615_v53   ;;  %5757 = vperm.xlu1 %13677, %v15385_v39  }
 0x3df   : > { %v15897_v32 = vpop.permute.xlu0 %6715  ;;  %v15899_v36 = vpop.permute.xlu1 %5260 }
 0x3e0   : > { %21616 = vst [vmem:[#allocation4_spill] sm:$0xff] %v15897_v32  ;;  %21617 = vst [vmem:[#allocation366_spill] sm:$0xff] %v15899_v36  ;;  %v21627_v36 = vld [vmem:[#allocation19_spill] sm:$0xff] }
 0x3e1   : > { %2825 = vperm.xlu0 %13682, %v21618_v11   ;;  %5763 = vperm.xlu1 %13677, %v15398_v63  }
 0x3e3   : > { %v15903_v61 = vpop.permute.xlu0 %6723  ;;  %v15905_v22 = vpop.permute.xlu1 %5266 }
 0x3e4   : > { %21619 = vst [vmem:[#allocation7_spill] sm:$0xff] %v15903_v61  ;;  %21620 = vst [vmem:[#allocation367_spill] sm:$0xff] %v15905_v22  ;;  %v21630_v22 = vld [vmem:[#allocation17_spill] sm:$0xff] }
 0x3e5   : > { %2835 = vperm.xlu0 %13682, %v21621_v55   ;;  %5769 = vperm.xlu1 %13677, %v15407_v38  }
 0x3e7   : > { %v15909_v59 = vpop.permute.xlu0 %6731  ;;  %v15911_v53 = vpop.permute.xlu1 %5272 }
 0x3e8   : > { %21622 = vst [vmem:[#allocation11_spill] sm:$0xff] %v15909_v59  ;;  %21623 = vst [vmem:[#allocation368_spill] sm:$0xff] %v15911_v53  ;;  %v21633_v53 = vld [vmem:[#allocation20_spill] sm:$0xff] }
 0x3e9   : > { %2845 = vperm.xlu0 %13682, %v21624_v43   ;;  %5775 = vperm.xlu1 %13677, %v15417_v19  }
 0x3eb   : > { %v15915_v32 = vpop.permute.xlu0 %6739  ;;  %v15917_v11 = vpop.permute.xlu1 %5278 }
 0x3ec   : > { %21625 = vst [vmem:[#allocation15_spill] sm:$0xff] %v15915_v32  ;;  %21626 = vst [vmem:[#allocation369_spill] sm:$0xff] %v15917_v11  ;;  %v21636_v11 = vld [vmem:[#allocation22_spill] sm:$0xff] }
 0x3ed   : > { %2855 = vperm.xlu0 %13682, %v21627_v36   ;;  %5781 = vperm.xlu1 %13677, %v15433_v42  }
 0x3ef   : > { %v15921_v61 = vpop.permute.xlu0 %6747  ;;  %v15923_v55 = vpop.permute.xlu1 %5284 }
 0x3f0   : > { %21628 = vst [vmem:[#allocation19_spill] sm:$0xff] %v15921_v61  ;;  %21629 = vst [vmem:[#allocation370_spill] sm:$0xff] %v15923_v55  ;;  %v21639_v55 = vld [vmem:[#allocation25_spill] sm:$0xff] }
 0x3f1   : > { %2865 = vperm.xlu0 %13682, %v21630_v22   ;;  %5787 = vperm.xlu1 %13677, %v15446_v27  }
 0x3f3   : > { %v15927_v59 = vpop.permute.xlu0 %6755  ;;  %v15929_v43 = vpop.permute.xlu1 %5290 }
 0x3f4   : > { %21631 = vst [vmem:[#allocation17_spill] sm:$0xff] %v15927_v59  ;;  %21632 = vst [vmem:[#allocation371_spill] sm:$0xff] %v15929_v43  ;;  %v21642_v43 = vld [vmem:[#allocation31_spill] sm:$0xff] }
 0x3f5   : > { %2875 = vperm.xlu0 %13682, %v21633_v53   ;;  %5793 = vperm.xlu1 %13677, %v15455_v49  }
 0x3f7   : > { %v15933_v32 = vpop.permute.xlu0 %6763  ;;  %v15935_v36 = vpop.permute.xlu1 %5296 }
 0x3f8   : > { %21634 = vst [vmem:[#allocation20_spill] sm:$0xff] %v15933_v32  ;;  %21635 = vst [vmem:[#allocation372_spill] sm:$0xff] %v15935_v36  ;;  %v21645_v36 = vld [vmem:[#allocation33_spill] sm:$0xff] }
 0x3f9   : > { %2885 = vperm.xlu0 %13682, %v21636_v11   ;;  %5799 = vperm.xlu1 %13677, %v15465_v28  }
 0x3fb   : > { %v15939_v61 = vpop.permute.xlu0 %6771  ;;  %v15941_v22 = vpop.permute.xlu1 %5302 }
 0x3fc   : > { %21637 = vst [vmem:[#allocation22_spill] sm:$0xff] %v15939_v61  ;;  %21638 = vst [vmem:[#allocation373_spill] sm:$0xff] %v15941_v22  ;;  %v21648_v22 = vld [vmem:[#allocation36_spill] sm:$0xff] }
 0x3fd   : > { %2895 = vperm.xlu0 %13682, %v21639_v55   ;;  %5805 = vperm.xlu1 %13677, %v15473_v44  }
 0x3ff   : > { %v15945_v59 = vpop.permute.xlu0 %6779  ;;  %v15947_v53 = vpop.permute.xlu1 %5308 }
 0x400   : > { %21640 = vst [vmem:[#allocation25_spill] sm:$0xff] %v15945_v59  ;;  %21641 = vst [vmem:[#allocation374_spill] sm:$0xff] %v15947_v53  ;;  %v21649_v59 = vmov 2  }
 0x401   : > { %2905 = vperm.xlu0 %13682, %v21642_v43   ;;  %5811 = vperm.xlu1 %13677, %v15483_v50  }
 0x403   : > { %v15951_v32 = vpop.permute.xlu0 %6787 }
 0x404   : > { %21643 = vst [vmem:[#allocation31_spill] sm:$0xff] %v15951_v32  ;;  %v15953_v11 = vpop.permute.xlu1 %5603  ;;  %v21652_v32 = vld [vmem:[#allocation39_spill] sm:$0xff] }
 0x405   : > { %21644 = vst [vmem:[#allocation375_spill] sm:$0xff] %v15953_v11  ;;  %2915 = vperm.xlu0 %13682, %v21645_v36   ;;  %5817 = vperm.xlu1 %13677, %v15491_v29  }
 0x407   : > { %v15957_v61 = vpop.permute.xlu0 %6795 }
 0x408   : > { %21646 = vst [vmem:[#allocation33_spill] sm:$0xff] %v15957_v61  ;;  %v15959_v55 = vpop.permute.xlu1 %5607 }
 0x409   : > { %21647 = vst [vmem:[#allocation376_spill] sm:$0xff] %v15959_v55  ;;  %2925 = vperm.xlu0 %13682, %v21648_v22   ;;  %13679 = vset.pattern.permute.xlu1 %v21649_v59 }
 0x40a   : > { %6143 = vperm.xlu1 %13679, %v21457_v47   ;;  %v21657_v47 = vld [vmem:[#allocation44_spill] sm:$0xff] }
 0x40b   : > { %v15964_v43 = vpop.permute.xlu0 %6803 }
 0x40c   : > { %21650 = vst [vmem:[#allocation36_spill] sm:$0xff] %v15964_v43  ;;  %v15966_v53 = vpop.permute.xlu1 %5615 }
 0x40d   : > { %21651 = vst [vmem:[#allocation377_spill] sm:$0xff] %v15966_v53  ;;  %2935 = vperm.xlu0 %13682, %v21652_v32   ;;  %v21695_v53 = vld [vmem:[#allocation90_spill] sm:$0xff] }
 0x40e   : > { %6151 = vperm.xlu1 %13679, %v21461_v57  }
 0x40f   : > { %v15970_v36 = vpop.permute.xlu0 %6811 }
 0x410   : > { %21653 = vst [vmem:[#allocation39_spill] sm:$0xff] %v15970_v36  ;;  %v15972_v11 = vpop.permute.xlu1 %5623 }
 0x411   : > { %21654 = vst [vmem:[#allocation378_spill] sm:$0xff] %v15972_v11  ;;  %2945 = vperm.xlu0 %13682, %v14384_v3   ;;  %v21682_v11 = vld [vmem:[#allocation79_spill] sm:$0xff] }
 0x412   : > { %6155 = vperm.xlu1 %13679, %v21465_v9  }
 0x413   : > { %v15976_v22 = vpop.permute.xlu0 %6818 }
 0x414   : > { %21655 = vst [vmem:[#allocation379_spill] sm:$0xff] %v15976_v22  ;;  %v15978_v59 = vpop.permute.xlu1 %5631 }
 0x415   : > { %21656 = vst [vmem:[#allocation380_spill] sm:$0xff] %v15978_v59  ;;  %2955 = vperm.xlu0 %13682, %v21657_v47   ;;  %v21678_v59 = vld [vmem:[#allocation75_spill] sm:$0xff] }
 0x416   : > { %6163 = vperm.xlu1 %13679, %v21469_v13  }
 0x417   : > { %v15982_v43 = vpop.permute.xlu0 %6824 }
 0x418   : > { %21658 = vst [vmem:[#allocation44_spill] sm:$0xff] %v15982_v43  ;;  %v15984_v32 = vpop.permute.xlu1 %5639  ;;  %v21777_v43 = vld [vmem:[#allocation145_spill] sm:$0xff] }
 0x419   : > { %21659 = vst [vmem:[#allocation381_spill] sm:$0xff] %v15984_v32  ;;  %2996 = vperm.xlu0 %13682, %v21292_v4   ;;  %v21674_v32 = vld [vmem:[#allocation72_spill] sm:$0xff] }
 0x41a   : > { %6171 = vperm.xlu1 %13679, %v21473_v33   ;;  %v21666_v33 = vld [vmem:[#allocation134_spill] sm:$0xff] }
 0x41b   : > { %v15988_v36 = vpop.permute.xlu0 %6830 }
 0x41c   : > { %21660 = vst [vmem:[#allocation382_spill] sm:$0xff] %v15988_v36  ;;  %v15990_v3 = vpop.permute.xlu1 %5647 }
 0x41d   : > { %21661 = vst [vmem:[#allocation383_spill] sm:$0xff] %v15990_v3  ;;  %3002 = vperm.xlu0 %13682, %v21296_v14   ;;  %v21670_v3 = vld [vmem:[#allocation137_spill] sm:$0xff] }
 0x41e   : > { %6179 = vperm.xlu1 %13679, %v21476_v46   ;;  %v21669_v46 = vld [vmem:[#allocation55_spill] sm:$0xff] }
 0x41f   : > { %v15994_v9 = vpop.permute.xlu0 %6836 }
 0x420   : > { %21662 = vst [vmem:[#allocation384_spill] sm:$0xff] %v15994_v9  ;;  %v15996_v47 = vpop.permute.xlu1 %5655 }
 0x421   : > { %21663 = vst [vmem:[#allocation385_spill] sm:$0xff] %v15996_v47  ;;  %3008 = vperm.xlu0 %13682, %v21299_v54  }
 0x422   : > { %6187 = vperm.xlu1 %13679, %v21479_v31   ;;  %v21673_v31 = vld [vmem:[#allocation60_spill] sm:$0xff] }
 0x423   : > { %v16000_v13 = vpop.permute.xlu0 %6842 }
 0x424   : > { %21664 = vst [vmem:[#allocation386_spill] sm:$0xff] %v16000_v13  ;;  %v16002_v4 = vpop.permute.xlu1 %5663 }
 0x425   : > { %21665 = vst [vmem:[#allocation387_spill] sm:$0xff] %v16002_v4  ;;  %3014 = vperm.xlu0 %13682, %v21302_v25  }
 0x426   : > { %6195 = vperm.xlu1 %13679, %v21666_v33   ;;  %v21677_v33 = vld [vmem:[#allocation18_spill] sm:$0xff] }
 0x427   : > { %v16006_v61 = vpop.permute.xlu0 %6848 }
 0x428   : > { %21667 = vst [vmem:[#allocation134_spill] sm:$0xff] %v16006_v61  ;;  %v16008_v14 = vpop.permute.xlu1 %5671 }
 0x429   : > { %21668 = vst [vmem:[#allocation388_spill] sm:$0xff] %v16008_v14  ;;  %3020 = vperm.xlu0 %13682, %v21669_v46  }
 0x42a   : > { %6203 = vperm.xlu1 %13679, %v21670_v3   ;;  %v21681_v3 = vld [vmem:[#allocation21_spill] sm:$0xff] }
 0x42b   : > { %v16012_v47 = vpop.permute.xlu0 %6854 }
 0x42c   : > { %21671 = vst [vmem:[#allocation55_spill] sm:$0xff] %v16012_v47  ;;  %v16014_v54 = vpop.permute.xlu1 %5679 }
 0x42d   : > { %21672 = vst [vmem:[#allocation137_spill] sm:$0xff] %v16014_v54  ;;  %3026 = vperm.xlu0 %13682, %v21673_v31  }
 0x42e   : > { %6211 = vperm.xlu1 %13679, %v21674_v32   ;;  %v21685_v32 = vld [vmem:[#allocation23_spill] sm:$0xff] }
 0x42f   : > { %v16018_v4 = vpop.permute.xlu0 %6860 }
 0x430   : > { %21675 = vst [vmem:[#allocation60_spill] sm:$0xff] %v16018_v4  ;;  %v16020_v25 = vpop.permute.xlu1 %5687 }
 0x431   : > { %21676 = vst [vmem:[#allocation72_spill] sm:$0xff] %v16020_v25  ;;  %3032 = vperm.xlu0 %13682, %v21677_v33  }
 0x432   : > { %6219 = vperm.xlu1 %13679, %v21678_v59   ;;  %v21688_v59 = vld [vmem:[#allocation26_spill] sm:$0xff] }
 0x433   : > { %v16024_v14 = vpop.permute.xlu0 %6866 }
 0x434   : > { %21679 = vst [vmem:[#allocation18_spill] sm:$0xff] %v16024_v14  ;;  %v16026_v46 = vpop.permute.xlu1 %5695  ;;  %v21755_v14 = vld [vmem:[#allocation89_spill] sm:$0xff] }
 0x435   : > { %21680 = vst [vmem:[#allocation75_spill] sm:$0xff] %v16026_v46  ;;  %3038 = vperm.xlu0 %13682, %v21681_v3  }
 0x436   : > { %6227 = vperm.xlu1 %13679, %v21682_v11   ;;  %v21691_v11 = vld [vmem:[#allocation32_spill] sm:$0xff] }
 0x437   : > { %v16030_v54 = vpop.permute.xlu0 %6872 }
 0x438   : > { %21683 = vst [vmem:[#allocation21_spill] sm:$0xff] %v16030_v54  ;;  %v16032_v31 = vpop.permute.xlu1 %5703 }
 0x439   : > { %21684 = vst [vmem:[#allocation79_spill] sm:$0xff] %v16032_v31  ;;  %3044 = vperm.xlu0 %13682, %v21685_v32  }
 0x43a   : > { %6235 = vperm.xlu1 %13679, %v21497_v8   ;;  %v21694_v8 = vld [vmem:[#allocation34_spill] sm:$0xff] }
 0x43b   : > { %v16036_v25 = vpop.permute.xlu0 %6878 }
 0x43c   : > { %21686 = vst [vmem:[#allocation23_spill] sm:$0xff] %v16036_v25  ;;  %v16038_v33 = vpop.permute.xlu1 %5711 }
 0x43d   : > { %21687 = vst [vmem:[#allocation389_spill] sm:$0xff] %v16038_v33  ;;  %3050 = vperm.xlu0 %13682, %v21688_v59  }
 0x43e   : > { %6243 = vperm.xlu1 %13679, %v21501_v62   ;;  %v21698_v62 = vld [vmem:[#allocation37_spill] sm:$0xff] }
 0x43f   : > { %v16042_v46 = vpop.permute.xlu0 %6884 }
 0x440   : > { %21689 = vst [vmem:[#allocation26_spill] sm:$0xff] %v16042_v46  ;;  %v16044_v3 = vpop.permute.xlu1 %5719 }
 0x441   : > { %21690 = vst [vmem:[#allocation390_spill] sm:$0xff] %v16044_v3  ;;  %3056 = vperm.xlu0 %13682, %v21691_v11  }
 0x442   : > { %6251 = vperm.xlu1 %13679, %v21504_v51   ;;  %v21701_v51 = vld [vmem:[#allocation40_spill] sm:$0xff] }
 0x443   : > { %v16048_v31 = vpop.permute.xlu0 %6890 }
 0x444   : > { %21692 = vst [vmem:[#allocation32_spill] sm:$0xff] %v16048_v31  ;;  %v16050_v32 = vpop.permute.xlu1 %5727 }
 0x445   : > { %21693 = vst [vmem:[#allocation391_spill] sm:$0xff] %v16050_v32  ;;  %3062 = vperm.xlu0 %13682, %v21694_v8  }
 0x446   : > { %6259 = vperm.xlu1 %13679, %v21695_v53   ;;  %v21704_v53 = vld [vmem:[#allocation42_spill] sm:$0xff] }
 0x447   : > { %v16054_v33 = vpop.permute.xlu0 %6896 }
 0x448   : > { %21696 = vst [vmem:[#allocation34_spill] sm:$0xff] %v16054_v33  ;;  %v16056_v59 = vpop.permute.xlu1 %5733 }
 0x449   : > { %21697 = vst [vmem:[#allocation90_spill] sm:$0xff] %v16056_v59  ;;  %3068 = vperm.xlu0 %13682, %v21698_v62  }
 0x44a   : > { %6267 = vperm.xlu1 %13679, %v21510_v1   ;;  %v21707_v1 = vld [vmem:[#allocation124_spill] sm:$0xff] }
 0x44b   : > { %v16060_v3 = vpop.permute.xlu0 %6902 }
 0x44c   : > { %21699 = vst [vmem:[#allocation37_spill] sm:$0xff] %v16060_v3  ;;  %v16062_v11 = vpop.permute.xlu1 %5739 }
 0x44d   : > { %21700 = vst [vmem:[#allocation392_spill] sm:$0xff] %v16062_v11  ;;  %3074 = vperm.xlu0 %13682, %v21701_v51  }
 0x44e   : > { %6274 = vperm.xlu1 %13679, %v21513_v17   ;;  %v21709_v17 = vld [vmem:[#allocation52_spill] sm:$0xff] }
 0x44f   : > { %v16066_v55 = vpop.permute.xlu0 %6908 }
 0x450   : > { %21702 = vst [vmem:[#allocation40_spill] sm:$0xff] %v16066_v55  ;;  %v16068_v8 = vpop.permute.xlu1 %5745 }
 0x451   : > { %21703 = vst [vmem:[#allocation393_spill] sm:$0xff] %v16068_v8  ;;  %3080 = vperm.xlu0 %13682, %v21704_v53  }
 0x452   : > { %6280 = vperm.xlu1 %13679, %v21517_v16   ;;  %v21711_v16 = vld [vmem:[#allocation28_spill] sm:$0xff] }
 0x454   : > { %v16072_v33 = vpop.permute.xlu0 %2805  ;;  %v16074_v62 = vpop.permute.xlu1 %5751 }
 0x455   : > { %21705 = vst [vmem:[#allocation42_spill] sm:$0xff] %v16072_v33  ;;  %21706 = vst [vmem:[#allocation394_spill] sm:$0xff] %v16074_v62  ;;  %3086 = vperm.xlu0 %13682, %v21707_v1  }
 0x456   : > { %6286 = vperm.xlu1 %13679, %v21520_v30   ;;  %v21713_v30 = vld [vmem:[#allocation29_spill] sm:$0xff] }
 0x458   : > { %v16078_v3 = vpop.permute.xlu0 %2810  ;;  %v16080_v51 = vpop.permute.xlu1 %5757 }
 0x459   : > { %21708 = vst [vmem:[#allocation124_spill] sm:$0xff] %v16080_v51  ;;  %5029 = vperm.xlu0 %13682, %v21709_v17  }
 0x45a   : > { %6292 = vperm.xlu1 %13679, %v21523_v34   ;;  %v21715_v34 = vld [vmem:[#allocation208_spill] sm:$0xff] }
 0x45c   : > { %v16084_v55 = vpop.permute.xlu0 %2825  ;;  %v16086_v53 = vpop.permute.xlu1 %5763 }
 0x45d   : > { %21710 = vst [vmem:[#allocation52_spill] sm:$0xff] %v16086_v53  ;;  %5044 = vperm.xlu0 %13682, %v21711_v16  }
 0x45e   : > { %6298 = vperm.xlu1 %13679, %v21526_v2  }
 0x460   : > { %v16090_v33 = vpop.permute.xlu0 %2835  ;;  %v16092_v1 = vpop.permute.xlu1 %5769 }
 0x461   : > { %21712 = vst [vmem:[#allocation28_spill] sm:$0xff] %v16092_v1  ;;  %5054 = vperm.xlu0 %13682, %v21713_v30  }
 0x462   : > { %6304 = vperm.xlu1 %13679, %v21529_v20   ;;  %v21720_v20 = vld [vmem:[#allocation212_spill] sm:$0xff] }
 0x464   : > { %v16096_v51 = vpop.permute.xlu0 %2845  ;;  %v16098_v62 = vpop.permute.xlu1 %5775 }
 0x465   : > { %21714 = vst [vmem:[#allocation29_spill] sm:$0xff] %v16098_v62  ;;  %5064 = vperm.xlu0 %13682, %v21715_v34  }
 0x466   : > { %6310 = vperm.xlu1 %13679, %v21532_v12   ;;  %v21723_v12 = vld [vmem:[#allocation215_spill] sm:$0xff] }
 0x468   : > { %v16102_v53 = vpop.permute.xlu0 %2855  ;;  %v16104_v31 = vpop.permute.xlu1 %5781 }
 0x469   : > { %21716 = vst [vmem:[#allocation208_spill] sm:$0xff] %v16102_v53  ;;  %21717 = vst [vmem:[#allocation395_spill] sm:$0xff] %v16104_v31  ;;  %5074 = vperm.xlu0 %13682, %v21577_v21  }
 0x46a   : > { %6316 = vperm.xlu1 %13679, %v21535_v18  }
 0x46c   : > { %v16108_v2 = vpop.permute.xlu0 %2865  ;;  %v16110_v1 = vpop.permute.xlu1 %5787 }
 0x46d   : > { %21718 = vst [vmem:[#allocation396_spill] sm:$0xff] %v16108_v2  ;;  %21719 = vst [vmem:[#allocation397_spill] sm:$0xff] %v16110_v1  ;;  %5084 = vperm.xlu0 %13682, %v21720_v20  }
 0x46e   : > { %6322 = vperm.xlu1 %13679, %v21538_v40   ;;  %v21728_v40 = vld [vmem:[#allocation220_spill] sm:$0xff] }
 0x470   : > { %v16114_v62 = vpop.permute.xlu0 %2875  ;;  %v16116_v8 = vpop.permute.xlu1 %5793 }
 0x471   : > { %21721 = vst [vmem:[#allocation212_spill] sm:$0xff] %v16114_v62  ;;  %21722 = vst [vmem:[#allocation398_spill] sm:$0xff] %v16116_v8  ;;  %5094 = vperm.xlu0 %13682, %v21723_v12   ;;  %v21786_v62 = vld [vmem:[#allocation168_spill] sm:$0xff] }
 0x472   : > { %6328 = vperm.xlu1 %13679, %v21541_v15  }
 0x474   : > { %v16120_v31 = vpop.permute.xlu0 %2885  ;;  %v16122_v46 = vpop.permute.xlu1 %5799 }
 0x475   : > { %21724 = vst [vmem:[#allocation215_spill] sm:$0xff] %v16120_v31  ;;  %21725 = vst [vmem:[#allocation399_spill] sm:$0xff] %v16122_v46  ;;  %5104 = vperm.xlu0 %13682, %v15224_v60  }
 0x476   : > { %6334 = vperm.xlu1 %13679, %v21544_v45  }
 0x478   : > { %v16126_v18 = vpop.permute.xlu0 %2895  ;;  %v16128_v1 = vpop.permute.xlu1 %5805 }
 0x479   : > { %21726 = vst [vmem:[#allocation400_spill] sm:$0xff] %v16126_v18  ;;  %21727 = vst [vmem:[#allocation401_spill] sm:$0xff] %v16128_v1  ;;  %5114 = vperm.xlu0 %13682, %v21728_v40   ;;  %v21739_v1 = vmov 3  }
 0x47a   : > { %6340 = vperm.xlu1 %13679, %v21547_v23  }
 0x47c   : > { %v16132_v8 = vpop.permute.xlu0 %2905  ;;  %v16134_v25 = vpop.permute.xlu1 %5811 }
 0x47d   : > { %21729 = vst [vmem:[#allocation220_spill] sm:$0xff] %v16132_v8  ;;  %21730 = vst [vmem:[#allocation402_spill] sm:$0xff] %v16134_v25  ;;  %5124 = vperm.xlu0 %13682, %v21591_v10   ;;  %v21781_v8 = vld [vmem:[#allocation76_spill] sm:$0xff] }
 0x47e   : > { %6346 = vperm.xlu1 %13679, %v21550_v58  }
 0x480   : > { %v16138_v15 = vpop.permute.xlu0 %2915  ;;  %v16140_v46 = vpop.permute.xlu1 %5817 }
 0x481   : > { %21731 = vst [vmem:[#allocation403_spill] sm:$0xff] %v16138_v15  ;;  %21732 = vst [vmem:[#allocation404_spill] sm:$0xff] %v16140_v46  ;;  %5134 = vperm.xlu0 %13682, %v15262_v5  }
 0x482   : > { %6352 = vperm.xlu1 %13679, %v21553_v37  }
 0x484   : > { %v16144_v45 = vpop.permute.xlu0 %2925 }
 0x485   : > { %21733 = vst [vmem:[#allocation405_spill] sm:$0xff] %v16144_v45  ;;  %5144 = vperm.xlu0 %13682, %v21596_v0   ;;  %v16147_v23 = vpop.permute.xlu1 %6143 }
 0x486   : > { %21734 = vst [vmem:[#allocation406_spill] sm:$0xff] %v16147_v23  ;;  %6358 = vperm.xlu1 %13679, %v21556_v7  }
 0x488   : > { %v16150_v25 = vpop.permute.xlu0 %2935 }
 0x489   : > { %21735 = vst [vmem:[#allocation407_spill] sm:$0xff] %v16150_v25  ;;  %5154 = vperm.xlu0 %13682, %v15289_v52   ;;  %v16153_v58 = vpop.permute.xlu1 %6151  ;;  %v21761_v25 = vld [vmem:[#allocation118_spill] sm:$0xff] }
 0x48a   : > { %21736 = vst [vmem:[#allocation408_spill] sm:$0xff] %v16153_v58  ;;  %6364 = vperm.xlu1 %13679, %v21559_v48  }
 0x48c   : > { %v16156_v46 = vpop.permute.xlu0 %2945 }
 0x48d   : > { %21737 = vst [vmem:[#allocation409_spill] sm:$0xff] %v16156_v46  ;;  %5164 = vperm.xlu0 %13682, %v15302_v56   ;;  %v16159_v37 = vpop.permute.xlu1 %6155 }
 0x48e   : > { %21738 = vst [vmem:[#allocation410_spill] sm:$0xff] %v16159_v37  ;;  %13681 = vset.pattern.permute.xlu1 %v21739_v1 }
 0x48f   : > { %6691 = vperm.xlu1 %13681, %v21709_v17  }
 0x490   : > { %v16163_v23 = vpop.permute.xlu0 %2955 }
 0x491   : > { %21740 = vst [vmem:[#allocation411_spill] sm:$0xff] %v16163_v23  ;;  %5174 = vperm.xlu0 %13682, %v15311_v41   ;;  %v16166_v7 = vpop.permute.xlu1 %6163  ;;  %v21746_v23 = vld [vmem:[#allocation243_spill] sm:$0xff] }
 0x492   : > { %21741 = vst [vmem:[#allocation412_spill] sm:$0xff] %v16166_v7 }
 0x493   : > { %6695 = vperm.xlu1 %13681, %v21461_v57  }
 0x494   : > { %v16169_v58 = vpop.permute.xlu0 %2996 }
 0x495   : > { %5215 = vperm.xlu0 %13682, %v15321_v26   ;;  %v16172_v48 = vpop.permute.xlu1 %6171 }
 0x496   : > { %21742 = vst [vmem:[#allocation413_spill] sm:$0xff] %v16172_v48  ;;  %v21745_v48 = vlaneseq }
 0x497   : > { %6703 = vperm.xlu1 %13681, %v21711_v16  }
 0x498   : > { %v16175_v37 = vpop.permute.xlu0 %3002  ;;  %v3092_v16 = vand.u32 127, %v21745_v48 }
 0x499   : > { %5221 = vperm.xlu0 %13682, %v15337_v35   ;;  %v16178_v17 = vpop.permute.xlu1 %6179 }
 0x49a   : > { %21743 = vst [vmem:[#allocation414_spill] sm:$0xff] %v16178_v17 }
 0x49b   : > { %6711 = vperm.xlu1 %13681, %v21713_v30   ;;  %v3097_v30 = vadd.s32 4294967288, %v3092_v16 }
 0x49c   : > { %v16181_v1 = vpop.permute.xlu0 %3008 }
 0x49d   : > { %5227 = vperm.xlu0 %13682, %v15350_v24   ;;  %v16184_v57 = vpop.permute.xlu1 %6187 }
 0x49e   : > { %21744 = vst [vmem:[#allocation415_spill] sm:$0xff] %v16184_v57  ;;  %v21749_v57 = vld [vmem:[#allocation9_spill] sm:$0xff] }
 0x49f   : > { %6719 = vperm.xlu1 %13681, %v21715_v34   ;;  %v16200_v54 = vsub.s32 %v3092_v16, %v21749_v57  ;;  %v16206_v48 = vsub.s32 %v3097_v30, %v21749_v57  ;;  %v21754_v16 = vld [vmem:[#allocation63_spill] sm:$0xff] }
 0x4a0   : > { %v16187_v7 = vpop.permute.xlu0 %3014 }
 0x4a1   : > { %5233 = vperm.xlu0 %13682, %v21746_v23   ;;  %v16191_v46 = vpop.permute.xlu1 %6195  ;;  %21750 = vst [vmem:[#allocation417_spill] sm:$0xff] %v16200_v54  ;;  %21751 = vst [vmem:[#allocation418_spill] sm:$0xff] %v16206_v48  ;;  %v3626_v4 = vrot.slane %v21755_v14, %v16200_v54 }
 0x4a2   : > { %21747 = vst [vmem:[#allocation243_spill] sm:$0xff] %v16191_v46  ;;  %v21753_v46 = vld [vmem:[#allocation67_spill] sm:$0xff] }
 0x4a3   : > { %6727 = vperm.xlu1 %13681, %v21577_v21   ;;  %v3617_v59 = vrot.slane %v21753_v46, %v16200_v54 }
 0x4a4   : > { %v16194_v17 = vpop.permute.xlu0 %3020 }
 0x4a5   : > { %5239 = vperm.xlu0 %13682, %v15369_v6   ;;  %v16197_v11 = vpop.permute.xlu1 %6203 }
 0x4a6   : > { %21748 = vst [vmem:[#allocation416_spill] sm:$0xff] %v16197_v11 }
 0x4a7   : > { %6735 = vperm.xlu1 %13681, %v21720_v20   ;;  %v3621_v20 = vrot.slane %v21754_v16, %v16206_v48  ;;  %v21760_v16 = vld [vmem:[#allocation78_spill] sm:$0xff] }
 0x4a8   : > { %v16203_v34 = vpop.permute.xlu0 %3026  ;;  %v3639_v13 = vrot.slane %v21760_v16, %v16206_v48  ;;  %v21767_v16 = vld [vmem:[#allocation88_spill] sm:$0xff] }
 0x4a9   : > { %5245 = vperm.xlu0 %13682, %v15385_v39   ;;  %v16209_v21 = vpop.permute.xlu1 %6211  ;;  %v3622_v57 = vsel %vm3102_vm1, %v3621_v20, %v3617_v59  ;;  %v3648_v36 = vrot.slane %v21767_v16, %v16206_v48  ;;  %v21770_v20 = vld [vmem:[#allocation86_spill] sm:$0xff] }
 0x4aa   : > { %21752 = vst [vmem:[#allocation419_spill] sm:$0xff] %v16209_v21  ;;  %v21757_v21 = vld [vmem:[#allocation73_spill] sm:$0xff] }
 0x4ab   : > { %6743 = vperm.xlu1 %13681, %v21723_v12   ;;  %v3630_v46 = vrot.slane %v21757_v21, %v16206_v48  ;;  %v21758_v12 = vld [vmem:[#allocation106_spill] sm:$0xff]  ;;  %v21763_v21 = vld [vmem:[#allocation64_spill] sm:$0xff] }
 0x4ac   : > { %v16214_v11 = vpop.permute.xlu0 %3032  ;;  %v3635_v47 = vrot.slane %v21758_v12, %v16200_v54  ;;  %v21764_v12 = vld [vmem:[#allocation66_spill] sm:$0xff] }
 0x4ad   : > { %5251 = vperm.xlu0 %13682, %v15398_v63   ;;  %v16221_v30 = vpop.permute.xlu1 %6219  ;;  %v3631_v14 = vsel %vm3102_vm1, %v3630_v46, %v3626_v4  ;;  %v16242_v32 = vmul.f32 %v3622_v57, %v21764_v12  ;;  %v21771_v12 = vld [vmem:[#allocation70_spill] sm:$0xff] }
 0x4ae   : > { %21756 = vst [vmem:[#allocation67_spill] sm:$0xff] %v16221_v30  ;;  %v3644_v30 = vrot.slane %v21761_v25, %v16200_v54  ;;  %v3640_v4 = vsel %vm3102_vm1, %v3639_v13, %v3635_v47  ;;  %v21768_v25 = vld [vmem:[#allocation133_spill] sm:$0xff]  ;;  %v16256_v22 = vmul.f32 %v3631_v14, %v21770_v20  ;;  %v16259_v45 = vmul.f32 %v3631_v14, %v21771_v12  ;;  %v21775_v47 = vld [vmem:[#allocation99_spill] sm:$0xff] }
 0x4af   : > { %6751 = vperm.xlu1 %13681, %v15224_v60   ;;  %v21765_v60 = vld [vmem:[#allocation68_spill] sm:$0xff]  ;;  %v3653_v46 = vrot.slane %v21768_v25, %v16200_v54  ;;  %v3662_v20 = vrot.slane %v21777_v43, %v16200_v54  ;;  %v21779_v12 = vld [vmem:[#allocation105_spill] sm:$0xff]  ;;  %v16281_v13 = vmul.f32 %v3640_v4, %v21781_v8 }
 0x4b0   : > { %v16229_v61 = vpop.permute.xlu0 %3038  ;;  %v16245_v9 = vmul.f32 %v3622_v57, %v21765_v60  ;;  %21772 = vst [vmem:[#allocation106_spill] sm:$0xff] %v16259_v45  ;;  %v21773_v57 = vld [vmem:[#allocation94_spill] sm:$0xff]  ;;  %v21776_v25 = vld [vmem:[#allocation100_spill] sm:$0xff]  ;;  %v21780_v45 = vld [vmem:[#allocation103_spill] sm:$0xff] }
 0x4b1   : > { %21759 = vst [vmem:[#allocation63_spill] sm:$0xff] %v16229_v61  ;;  %5257 = vperm.xlu0 %13682, %v15407_v38   ;;  %v16237_v59 = vpop.permute.xlu1 %6227  ;;  %v3657_v60 = vrot.slane %v21773_v57, %v16206_v48  ;;  %v3675_v57 = vrot.slane %v21779_v12, %v16206_v48  ;;  %v16278_v15 = vmul.f32 %v3640_v4, %v21780_v45  ;;  %21782 = vst [vmem:[#allocation64_spill] sm:$0xff] %v16281_v13  ;;  %v21785_v43 = vld [vmem:[#allocation112_spill] sm:$0xff]  ;;  %v21787_v45 = vld [vmem:[#allocation117_spill] sm:$0xff] }
 0x4b2   : > { %21762 = vst [vmem:[#allocation89_spill] sm:$0xff] %v16237_v59  ;;  %21766 = vst [vmem:[#allocation73_spill] sm:$0xff] %v16245_v9  ;;  %v21769_v59 = vld [vmem:[#allocation77_spill] sm:$0xff]  ;;  %v3649_v9 = vsel %vm3102_vm1, %v3648_v36, %v3644_v30  ;;  %v21784_v36 = vld [vmem:[#allocation111_spill] sm:$0xff]  ;;  %v3680_v12 = vrot.slane %v21786_v62, %v16200_v54  ;;  %v3693_v8 = vrot.slane %v21787_v45, %v16206_v48 }
 0x4b3   : > { %6759 = vperm.xlu1 %13681, %v21728_v40   ;;  %v3666_v40 = vrot.slane %v21776_v25, %v16206_v48  ;;  %v21783_v25 = vld [vmem:[#allocation159_spill] sm:$0xff]  ;;  %v3684_v30 = vrot.slane %v21784_v36, %v16206_v48  ;;  %v21794_v62 = vld [vmem:[#allocation129_spill] sm:$0xff] }
 0x4b4   : > { %v16263_v16 = vpop.permute.xlu0 %3044  ;;  %v3671_v18 = vrot.slane %v21783_v25, %v16200_v54  ;;  %v21788_v4 = vld [vmem:[#allocation115_spill] sm:$0xff]  ;;  %v21789_v25 = vld [vmem:[#allocation85_spill] sm:$0xff] }
 0x4b5   : > { %21774 = vst [vmem:[#allocation78_spill] sm:$0xff] %v16263_v16  ;;  %5263 = vperm.xlu0 %13682, %v15417_v19   ;;  %v16273_v14 = vpop.permute.xlu1 %6235  ;;  %v16296_v13 = vmul.f32 %v3649_v9, %v21788_v4  ;;  %v16299_v16 = vmul.f32 %v3649_v9, %v21789_v25  ;;  %v21791_v36 = vld [vmem:[#allocation123_spill] sm:$0xff]  ;;  %v3667_v61 = vsel %vm3102_vm1, %v3666_v40, %v3662_v20  ;;  %v21795_v45 = vld [vmem:[#allocation177_spill] sm:$0xff]  ;;  %v21797_v25 = vld [vmem:[#allocation130_spill] sm:$0xff] }
 0x4b6   : > { %21778 = vst [vmem:[#allocation118_spill] sm:$0xff] %v16273_v14  ;;  %v3658_v14 = vsel %vm3102_vm1, %v3657_v60, %v3653_v46  ;;  %v3702_v2 = vrot.slane %v21791_v36, %v16206_v48  ;;  %v21793_v46 = vld [vmem:[#allocation126_spill] sm:$0xff]  ;;  %v3689_v4 = vrot.slane %v21795_v45, %v16200_v54  ;;  %v21799_v36 = vld [vmem:[#allocation91_spill] sm:$0xff]  ;;  %v21803_v45 = vld [vmem:[#allocation141_spill] sm:$0xff] }
 0x4b7   : > { %6767 = vperm.xlu1 %13681, %v21591_v10   ;;  %21790 = vst [vmem:[#allocation66_spill] sm:$0xff] %v16299_v16  ;;  %v3711_v10 = vrot.slane %v21794_v62, %v16206_v48  ;;  %v16316_v16 = vmul.f32 %v3658_v14, %v21797_v25  ;;  %v21801_v60 = vld [vmem:[#allocation135_spill] sm:$0xff]  ;;  %v3676_v62 = vsel %vm3102_vm1, %v3675_v57, %v3671_v18  ;;  %v21814_v40 = vld [vmem:[#allocation156_spill] sm:$0xff] }
 0x4b8   : > { %v16303_v31 = vpop.permute.xlu0 %3050  ;;  %v3720_v53 = vrot.slane %v21801_v60, %v16206_v48  ;;  %v3729_v19 = vrot.slane %v21803_v45, %v16206_v48  ;;  %v21809_v18 = vld [vmem:[#allocation147_spill] sm:$0xff] }
 0x4b9   : > { %21792 = vst [vmem:[#allocation68_spill] sm:$0xff] %v16303_v31  ;;  %5269 = vperm.xlu0 %13682, %v15433_v42   ;;  %v16313_v9 = vpop.permute.xlu1 %6243  ;;  %21798 = vst [vmem:[#allocation133_spill] sm:$0xff] %v16316_v16  ;;  %v16319_v31 = vmul.f32 %v3658_v14, %v21799_v36  ;;  %v3685_v42 = vsel %vm3102_vm1, %v3684_v30, %v3680_v12  ;;  %v21805_v14 = vld [vmem:[#allocation142_spill] sm:$0xff]  ;;  %v3738_v57 = vrot.slane %v21809_v18, %v16206_v48  ;;  %v21812_v30 = vld [vmem:[#allocation153_spill] sm:$0xff] }
 0x4ba   : > { %21796 = vst [vmem:[#allocation88_spill] sm:$0xff] %v16313_v9  ;;  %v21804_v9 = vld [vmem:[#allocation184_spill] sm:$0xff]  ;;  %v16333_v36 = vmul.f32 %v3667_v61, %v21805_v14  ;;  %v3747_v12 = vrot.slane %v21812_v30, %v16206_v48  ;;  %v16349_v14 = vmul.f32 %v3676_v62, %v21814_v40  ;;  %v21817_v18 = vld [vmem:[#allocation102_spill] sm:$0xff] }
 0x4bb   : > { %21800 = vst [vmem:[#allocation77_spill] sm:$0xff] %v16319_v31  ;;  %v3698_v25 = vrot.slane %v21804_v9, %v16200_v54  ;;  %6775 = vperm.xlu1 %13681, %v15262_v5   ;;  %v21807_v31 = vld [vmem:[#allocation97_spill] sm:$0xff]  ;;  %v21813_v9 = vld [vmem:[#allocation158_spill] sm:$0xff]  ;;  %v21819_v16 = vld [vmem:[#allocation164_spill] sm:$0xff] }
 0x4bc   : > { %21806 = vst [vmem:[#allocation86_spill] sm:$0xff] %v16333_v36  ;;  %v16336_v60 = vmul.f32 %v3667_v61, %v21807_v31  ;;  %v16342_v45 = vpop.permute.xlu0 %3056  ;;  %21815 = vst [vmem:[#allocation99_spill] sm:$0xff] %v16349_v14  ;;  %v3694_v61 = vsel %vm3102_vm1, %v3693_v8, %v3689_v4  ;;  %v21820_v36 = vld [vmem:[#allocation166_spill] sm:$0xff]  ;;  %v21822_v5 = vld [vmem:[#allocation187_spill] sm:$0xff] }
 0x4bd   : > { %21811 = vst [vmem:[#allocation94_spill] sm:$0xff] %v16342_v45  ;;  %5275 = vperm.xlu0 %13682, %v15446_v27   ;;  %v16353_v31 = vpop.permute.xlu1 %6251  ;;  %v16361_v30 = vmul.f32 %v3685_v42, %v21820_v36  ;;  %v3707_v20 = vrot.slane %v21822_v5, %v16200_v54  ;;  %v21823_v40 = vld [vmem:[#allocation108_spill] sm:$0xff]  ;;  %v21827_v45 = vld [vmem:[#allocation175_spill] sm:$0xff]  ;;  %v21829_v36 = vld [vmem:[#allocation114_spill] sm:$0xff] }
 0x4be   : > { %21808 = vst [vmem:[#allocation70_spill] sm:$0xff] %v16336_v60  ;;  %21816 = vst [vmem:[#allocation100_spill] sm:$0xff] %v16353_v31  ;;  %v16356_v60 = vmul.f32 %v3676_v62, %v21817_v18  ;;  %v16366_v14 = vmul.f32 %v3685_v42, %v21823_v40  ;;  %v3703_v31 = vsel %vm3102_vm1, %v3702_v2, %v3698_v25  ;;  %v21826_v62 = vld [vmem:[#allocation194_spill] sm:$0xff]  ;;  %v21832_v40 = vld [vmem:[#allocation16_spill] sm:$0xff] }
 0x4bf   : > { %21821 = vst [vmem:[#allocation105_spill] sm:$0xff] %v16361_v30  ;;  %v3716_v18 = vrot.slane %v21826_v62, %v16200_v54  ;;  %6783 = vperm.xlu1 %13681, %v21596_v0   ;;  %v16378_v30 = vmul.f32 %v3694_v61, %v21829_v36  ;;  %v21841_v5 = vld [vmem:[#allocation120_spill] sm:$0xff]  ;;  %v3712_v0 = vsel %vm3102_vm1, %v3711_v10, %v3707_v20  ;;  %v21849_v20 = vld [vmem:[#allocation213_spill] sm:$0xff] }
 0x4c0   : > { %21818 = vst [vmem:[#allocation145_spill] sm:$0xff] %v16356_v60  ;;  %21824 = vst [vmem:[#allocation103_spill] sm:$0xff] %v16366_v14  ;;  %v16375_v60 = vmul.f32 %v3694_v61, %v21827_v45  ;;  %v3725_v14 = vrot.slane %v21832_v40, %v16200_v54  ;;  %v16384_v4 = vpop.permute.xlu0 %3062  ;;  %v3743_v45 = vrot.slane %v21849_v20, %v16200_v54  ;;  %v21851_v61 = vld [vmem:[#allocation30_spill] sm:$0xff] }
 0x4c1   : > { %21830 = vst [vmem:[#allocation159_spill] sm:$0xff] %v16378_v30  ;;  %21833 = vst [vmem:[#allocation111_spill] sm:$0xff] %v16384_v4  ;;  %5281 = vperm.xlu0 %13682, %v15455_v49   ;;  %v16395_v42 = vpop.permute.xlu1 %6259  ;;  %v21839_v30 = vld [vmem:[#allocation182_spill] sm:$0xff]  ;;  %v16401_v4 = vmul.f32 %v3703_v31, %v21841_v5  ;;  %v3721_v62 = vsel %vm3102_vm1, %v3720_v53, %v3716_v18  ;;  %v16424_v53 = vmul.f32 %v3712_v0, %v21851_v61  ;;  %v21853_v18 = vld [vmem:[#allocation127_spill] sm:$0xff] }
 0x4c2   : > { %21828 = vst [vmem:[#allocation76_spill] sm:$0xff] %v16375_v60  ;;  %21838 = vst [vmem:[#allocation112_spill] sm:$0xff] %v16395_v42  ;;  %v16398_v40 = vmul.f32 %v3703_v31, %v21839_v30  ;;  %v21846_v42 = vld [vmem:[#allocation45_spill] sm:$0xff]  ;;  %v3730_v10 = vsel %vm3102_vm1, %v3729_v19, %v3725_v14  ;;  %v21858_v14 = vld [vmem:[#allocation192_spill] sm:$0xff] }
 0x4c3   : > { %21842 = vst [vmem:[#allocation117_spill] sm:$0xff] %v16401_v4  ;;  %v3734_v30 = vrot.slane %v21846_v42, %v16200_v54  ;;  %6791 = vperm.xlu1 %13681, %v15289_v52   ;;  %21852 = vst [vmem:[#allocation85_spill] sm:$0xff] %v16424_v53  ;;  %v16427_v42 = vmul.f32 %v3712_v0, %v21853_v18  ;;  %v21856_v5 = vld [vmem:[#allocation225_spill] sm:$0xff]  ;;  %v16437_v20 = vmul.f32 %v3721_v62, %v21858_v14  ;;  %v21860_v4 = vld [vmem:[#allocation132_spill] sm:$0xff] }
 0x4c4   : > { %21840 = vst [vmem:[#allocation168_spill] sm:$0xff] %v16398_v40  ;;  %v16421_v60 = vpop.permute.xlu0 %3068  ;;  %v3752_v31 = vrot.slane %v21856_v5, %v16200_v54  ;;  %v16440_v2 = vmul.f32 %v3721_v62, %v21860_v4  ;;  %v21866_v40 = vld [vmem:[#allocation13_spill] sm:$0xff]  ;;  %v21868_v4 = vld [vmem:[#allocation138_spill] sm:$0xff]  ;;  %v3748_v53 = vsel %vm3102_vm1, %v3747_v12, %v3743_v45 }
 0x4c5   : > { %21850 = vst [vmem:[#allocation115_spill] sm:$0xff] %v16421_v60  ;;  %21854 = vst [vmem:[#allocation123_spill] sm:$0xff] %v16427_v42  ;;  %5287 = vperm.xlu0 %13682, %v15465_v28   ;;  %v16434_v19 = vpop.permute.xlu1 %6267  ;;  %v3739_v14 = vsel %vm3102_vm1, %v3738_v57, %v3734_v30  ;;  %v16456_v62 = vmul.f32 %v3730_v10, %v21868_v4  ;;  %v21876_v4 = vrot.slane %v21813_v9, %v16206_v48  ;;  %v21878_v12 = vld [vmem:[#allocation41_spill] sm:$0xff]  ;;  %v21887_v0 = vld [vmem:[#allocation150_spill] sm:$0xff] }
 0x4c6   : > { %21857 = vst [vmem:[#allocation126_spill] sm:$0xff] %v16434_v19  ;;  %21859 = vst [vmem:[#allocation129_spill] sm:$0xff] %v16437_v20  ;;  %v16451_v19 = vmul.f32 %v3730_v10, %v21866_v40  ;;  %v16479_v45 = vmul.f32 %v3739_v14, %v21878_v12  ;;  %v21883_v10 = vld [vmem:[#allocation259_spill] sm:$0xff]  ;;  %v21889_v12 = vld [vmem:[#allocation261_spill] sm:$0xff] }
 0x4c7   : > { %21861 = vst [vmem:[#allocation177_spill] sm:$0xff] %v16440_v2  ;;  %6799 = vperm.xlu1 %13681, %v15302_v56   ;;  %21869 = vst [vmem:[#allocation91_spill] sm:$0xff] %v16456_v62  ;;  %v3757_v2 = vsel %vm3102_vm1, %v21876_v4, %v3752_v31  ;;  %v21880_v62 = vld [vmem:[#allocation144_spill] sm:$0xff]  ;;  %v4165_v56 = vrot.slane %v21883_v10, %v16206_v48  ;;  %v21885_v31 = vld [vmem:[#allocation210_spill] sm:$0xff]  ;;  %v4174_v5 = vrot.slane %v21889_v12, %v16206_v48 }
 0x4c8   : > { %21867 = vst [vmem:[#allocation130_spill] sm:$0xff] %v16451_v19  ;;  %v16463_v25 = vpop.permute.xlu0 %3074  ;;  %21879 = vst [vmem:[#allocation184_spill] sm:$0xff] %v16479_v45  ;;  %v16482_v60 = vmul.f32 %v3739_v14, %v21880_v62  ;;  %v16491_v4 = vmul.f32 %v3748_v53, %v21885_v31  ;;  %v21891_v57 = vld [vmem:[#allocation222_spill] sm:$0xff]  ;;  %v21893_v10 = vld [vmem:[#allocation237_spill] sm:$0xff] }
 0x4c9   : > { %21872 = vst [vmem:[#allocation135_spill] sm:$0xff] %v16463_v25  ;;  %5293 = vperm.xlu0 %13682, %v15473_v44   ;;  %v16476_v18 = vpop.permute.xlu1 %6274  ;;  %v4161_v42 = vrot.slane %v21893_v10, %v16200_v54  ;;  %v21894_v31 = vld [vmem:[#allocation263_spill] sm:$0xff]  ;;  %v21903_v45 = vld [vmem:[#allocation248_spill] sm:$0xff] }
 0x4ca   : > { %21877 = vst [vmem:[#allocation141_spill] sm:$0xff] %v16476_v18  ;;  %21881 = vst [vmem:[#allocation142_spill] sm:$0xff] %v16482_v60  ;;  %v16494_v18 = vmul.f32 %v3748_v53, %v21887_v0  ;;  %v16502_v60 = vmul.f32 %v3757_v2, %v21891_v57  ;;  %v4183_v30 = vrot.slane %v21894_v31, %v16206_v48  ;;  %v21896_v53 = vld [vmem:[#allocation155_spill] sm:$0xff]  ;;  %v21900_v57 = vld [vmem:[#allocation244_spill] sm:$0xff] }
 0x4cb   : > { %21886 = vst [vmem:[#allocation97_spill] sm:$0xff] %v16491_v4  ;;  %6807 = vperm.xlu1 %13681, %v15311_v41   ;;  %v16511_v0 = vmul.f32 %v3757_v2, %v21896_v53  ;;  %v21898_v12 = vld [vmem:[#allocation239_spill] sm:$0xff]  ;;  %v21902_v31 = vld [vmem:[#allocation246_spill] sm:$0xff]  ;;  %v4206_v2 = vrot.slane %v21903_v45, %v16200_v54  ;;  %v4166_v53 = vsel %vm3102_vm1, %v4165_v56, %v4161_v42 }
 0x4cc   : > { %21888 = vst [vmem:[#allocation147_spill] sm:$0xff] %v16494_v18  ;;  %21892 = vst [vmem:[#allocation153_spill] sm:$0xff] %v16502_v60  ;;  %v16508_v4 = vpop.permute.xlu0 %3080  ;;  %v4170_v41 = vrot.slane %v21898_v12, %v16200_v54  ;;  %v21899_v18 = vld [vmem:[#allocation241_spill] sm:$0xff]  ;;  %v4188_v60 = vrot.slane %v21900_v57, %v16200_v54  ;;  %v4197_v14 = vrot.slane %v21902_v31, %v16200_v54  ;;  %v21904_v12 = vld [vmem:[#allocation266_spill] sm:$0xff] }
 0x4cd   : > { %21895 = vst [vmem:[#allocation158_spill] sm:$0xff] %v16508_v4  ;;  %21897 = vst [vmem:[#allocation156_spill] sm:$0xff] %v16511_v0  ;;  %v4179_v62 = vrot.slane %v21899_v18, %v16200_v54  ;;  %5299 = vperm.xlu0 %13682, %v15483_v50   ;;  %v16520_v10 = vpop.permute.xlu1 %6280  ;;  %v4192_v0 = vrot.slane %v21904_v12, %v16206_v48  ;;  %v21905_v18 = vld [vmem:[#allocation250_spill] sm:$0xff]  ;;  %v21906_v57 = vld [vmem:[#allocation252_spill] sm:$0xff] }
 0x4ce   : > { %21901 = vst [vmem:[#allocation102_spill] sm:$0xff] %v16520_v10  ;;  %v4215_v9 = vrot.slane %v21905_v18, %v16200_v54  ;;  %v4224_v19 = vrot.slane %v21906_v57, %v16200_v54  ;;  %v4175_v4 = vsel %vm3102_vm1, %v4174_v5, %v4170_v41  ;;  %v21907_v10 = vld [vmem:[#allocation269_spill] sm:$0xff]  ;;  %v21908_v45 = vld [vmem:[#allocation255_spill] sm:$0xff]  ;;  %v21909_v42 = vld [vmem:[#allocation258_spill] sm:$0xff] }
 0x4cf   : > { %v4201_v40 = vrot.slane %v21907_v10, %v16206_v48  ;;  %6815 = vperm.xlu1 %13681, %v15321_v26   ;;  %v4233_v31 = vrot.slane %v21908_v45, %v16200_v54  ;;  %v4242_v56 = vrot.slane %v21909_v42, %v16200_v54  ;;  %v4184_v12 = vsel %vm3102_vm1, %v4183_v30, %v4179_v62  ;;  %v21910_v18 = vld [vmem:[#allocation272_spill] sm:$0xff]  ;;  %v21912_v57 = vld [vmem:[#allocation69_spill] sm:$0xff]  ;;  %v21916_v45 = vld [vmem:[#allocation262_spill] sm:$0xff] }
 0x4d0   : > { %v4210_v20 = vrot.slane %v21910_v18, %v16206_v48  ;;  %v16544_v25 = vpop.permute.xlu0 %3086  ;;  %v16547_v5 = vmul.f32 %v4166_v53, %v21912_v57  ;;  %v21914_v41 = vld [vmem:[#allocation65_spill] sm:$0xff]  ;;  %v21915_v26 = vld [vmem:[#allocation260_spill] sm:$0xff]  ;;  %v4260_v50 = vrot.slane %v21916_v45, %v16200_v54  ;;  %v4193_v57 = vsel %vm3102_vm1, %v4192_v0, %v4188_v60 }
 0x4d1   : > { %21911 = vst [vmem:[#allocation164_spill] sm:$0xff] %v16544_v25  ;;  %v16550_v10 = vmul.f32 %v4166_v53, %v21914_v41  ;;  %v4251_v61 = vrot.slane %v21915_v26, %v16200_v54  ;;  %5305 = vperm.xlu0 %13682, %v15491_v29   ;;  %v16557_v30 = vpop.permute.xlu1 %6286  ;;  %v21918_v62 = vld [vmem:[#allocation92_spill] sm:$0xff]  ;;  %v21921_v53 = vld [vmem:[#allocation275_spill] sm:$0xff]  ;;  %v21923_v45 = vld [vmem:[#allocation265_spill] sm:$0xff]  ;;  %v4202_v29 = vsel %vm3102_vm1, %v4201_v40, %v4197_v14 }
 0x4d2   : > { %21913 = vst [vmem:[#allocation166_spill] sm:$0xff] %v16547_v5  ;;  %21917 = vst [vmem:[#allocation187_spill] sm:$0xff] %v16557_v30  ;;  %v16560_v42 = vmul.f32 %v4175_v4, %v21918_v62  ;;  %v21919_v18 = vld [vmem:[#allocation80_spill] sm:$0xff]  ;;  %v4219_v41 = vrot.slane %v21921_v53, %v16206_v48  ;;  %v21922_v5 = vld [vmem:[#allocation81_spill] sm:$0xff]  ;;  %v4269_v52 = vrot.slane %v21923_v45, %v16200_v54 }
 0x4d3   : > { %v16563_v25 = vmul.f32 %v4175_v4, %v21919_v18  ;;  %v16569_v26 = vmul.f32 %v4184_v12, %v21922_v5  ;;  %v21924_v30 = vld [vmem:[#allocation6_spill] sm:$0xff]  ;;  %6821 = vperm.xlu1 %13681, %v15337_v35   ;;  %v21925_v4 = vld [vmem:[#allocation227_spill] sm:$0xff]  ;;  %v21927_v60 = vld [vmem:[#allocation268_spill] sm:$0xff]  ;;  %v4211_v53 = vsel %vm3102_vm1, %v4210_v20, %v4206_v2 }
 0x4d4   : > { %v4228_v62 = vrot.slane %v21924_v30, %v16206_v48  ;;  %v16578_v18 = vmul.f32 %v4184_v12, %v21925_v4  ;;  %v4278_v0 = vrot.slane %v21927_v60, %v16200_v54  ;;  %v21928_v5 = vld [vmem:[#allocation278_spill] sm:$0xff]  ;;  %v16585_v36 = vpop.permute.xlu0 %5029  ;;  %v21933_v35 = vld [vmem:[#allocation271_spill] sm:$0xff]  ;;  %v21934_v4 = vld [vmem:[#allocation280_spill] sm:$0xff] }
 0x4d5   : > { %21920 = vst [vmem:[#allocation108_spill] sm:$0xff] %v16563_v25  ;;  %v4237_v25 = vrot.slane %v21928_v5, %v16206_v48  ;;  %21929 = vst [vmem:[#allocation175_spill] sm:$0xff] %v16585_v36  ;;  %v21930_v45 = vld [vmem:[#allocation206_spill] sm:$0xff]  ;;  %v4287_v12 = vrot.slane %v21933_v35, %v16200_v54  ;;  %v16597_v60 = vpop.permute.xlu1 %6292  ;;  %v21936_v20 = vld [vmem:[#allocation209_spill] sm:$0xff] }
 0x4d6   : > { %21926 = vst [vmem:[#allocation194_spill] sm:$0xff] %v16578_v18  ;;  %v16588_v40 = vmul.f32 %v4193_v57, %v21930_v45  ;;  %v21931_v14 = vld [vmem:[#allocation230_spill] sm:$0xff]  ;;  %v4246_v18 = vrot.slane %v21934_v4, %v16206_v48  ;;  %21935 = vst [vmem:[#allocation16_spill] sm:$0xff] %v16597_v60  ;;  %v16600_v2 = vmul.f32 %v4202_v29, %v21936_v20  ;;  %v21937_v5 = vld [vmem:[#allocation232_spill] sm:$0xff] }
 0x4d7   : > { %v16591_v30 = vmul.f32 %v4193_v57, %v21931_v14  ;;  %v16603_v44 = vmul.f32 %v4202_v29, %v21937_v5  ;;  %v4220_v45 = vsel %vm3102_vm1, %v4219_v41, %v4215_v9  ;;  %v21939_v36 = vld [vmem:[#allocation282_spill] sm:$0xff]  ;;  %v21940_v14 = vld [vmem:[#allocation211_spill] sm:$0xff]  ;;  %v4229_v4 = vsel %vm3102_vm1, %v4228_v62, %v4224_v19  ;;  %v21942_v60 = vld [vmem:[#allocation284_spill] sm:$0xff]  ;;  %6827 = vperm.xlu1 %13681, %v15350_v24  }
 0x4d8   : > { %v4255_v57 = vrot.slane %v21939_v36, %v16206_v48  ;;  %v21941_v35 = vld [vmem:[#allocation274_spill] sm:$0xff]  ;;  %v4264_v20 = vrot.slane %v21942_v60, %v16206_v48  ;;  %v4238_v9 = vsel %vm3102_vm1, %v4237_v25, %v4233_v31  ;;  %v4247_v62 = vsel %vm3102_vm1, %v4246_v18, %v4242_v56  ;;  %v21949_v24 = vld [vmem:[#allocation288_spill] sm:$0xff] }
 0x4d9   : > { %21932 = vst [vmem:[#allocation114_spill] sm:$0xff] %v16591_v30  ;;  %21938 = vst [vmem:[#allocation182_spill] sm:$0xff] %v16603_v44  ;;  %v16609_v30 = vmul.f32 %v4211_v53, %v21940_v14  ;;  %v4296_v28 = vrot.slane %v21941_v35, %v16200_v54  ;;  %v21943_v29 = vld [vmem:[#allocation234_spill] sm:$0xff]  ;;  %v3096_v14 = vrot.slane %v16169_v58, %v16200_v54  ;;  %v16625_v44 = vpop.permute.xlu0 %5044  ;;  %v16635_v25 = vpop.permute.xlu1 %6298  ;;  %v21952_v31 = vld [vmem:[#allocation236_spill] sm:$0xff] }
 0x4da   : > { %v16618_v5 = vmul.f32 %v4211_v53, %v21943_v29  ;;  %v21945_v36 = vld [vmem:[#allocation286_spill] sm:$0xff]  ;;  %21946 = vst [vmem:[#allocation45_spill] sm:$0xff] %v16625_v44  ;;  %v4282_v60 = vrot.slane %v21949_v24, %v16206_v48  ;;  %21951 = vst [vmem:[#allocation30_spill] sm:$0xff] %v16635_v25  ;;  %v4256_v44 = vsel %vm3102_vm1, %v4255_v57, %v4251_v61  ;;  %v21958_v61 = vld [vmem:[#allocation221_spill] sm:$0xff] }
 0x4db   : > { %v4273_v41 = vrot.slane %v21945_v36, %v16206_v48  ;;  %v21947_v35 = vld [vmem:[#allocation214_spill] sm:$0xff]  ;;  %v16638_v36 = vmul.f32 %v4220_v45, %v21952_v31  ;;  %6833 = vperm.xlu1 %13681, %v21746_v23   ;;  %v16660_v57 = vmul.f32 %v4247_v62, %v21958_v61  ;;  %v21963_v23 = vld [vmem:[#allocation224_spill] sm:$0xff]  ;;  %v21989_v25 = vld [vmem:[#allocation83_spill] sm:$0xff] }
 0x4dc   : > { %21944 = vst [vmem:[#allocation120_spill] sm:$0xff] %v16618_v5  ;;  %v16628_v19 = vmul.f32 %v4220_v45, %v21947_v35  ;;  %v21950_v53 = vld [vmem:[#allocation290_spill] sm:$0xff]  ;;  %v21953_v5 = vld [vmem:[#allocation216_spill] sm:$0xff]  ;;  %v3107_v45 = vrot.slane %v16175_v37, %v16200_v54 }
 0x4dd   : > { %v4291_v29 = vrot.slane %v21950_v53, %v16206_v48  ;;  %v16641_v58 = vmul.f32 %v4229_v4, %v21953_v5  ;;  %v21954_v35 = vld [vmem:[#allocation48_spill] sm:$0xff]  ;;  %v21955_v56 = vld [vmem:[#allocation238_spill] sm:$0xff]  ;;  %v4265_v53 = vsel %vm3102_vm1, %v4264_v20, %v4260_v50  ;;  %v16669_v50 = vpop.permute.xlu0 %5054  ;;  %v16679_v61 = vpop.permute.xlu1 %6304 }
 0x4de   : > { %21948 = vst [vmem:[#allocation213_spill] sm:$0xff] %v16628_v19  ;;  %v4300_v19 = vrot.slane %v21954_v35, %v16206_v48  ;;  %v16647_v18 = vmul.f32 %v4229_v4, %v21955_v56  ;;  %v21956_v24 = vld [vmem:[#allocation218_spill] sm:$0xff]  ;;  %v21957_v5 = vld [vmem:[#allocation240_spill] sm:$0xff]  ;;  %v4274_v35 = vsel %vm3102_vm1, %v4273_v41, %v4269_v52  ;;  %v21959_v4 = vrot.slane %v21763_v21, %v16206_v48  ;;  %v21965_v52 = vld [vmem:[#allocation245_spill] sm:$0xff] }
 0x4df   : > { %v16650_v8 = vmul.f32 %v4238_v9, %v21956_v24  ;;  %v16657_v31 = vmul.f32 %v4238_v9, %v21957_v5  ;;  %21960 = vst [vmem:[#allocation127_spill] sm:$0xff] %v16669_v50  ;;  %v21961_v20 = vld [vmem:[#allocation242_spill] sm:$0xff]  ;;  %v16675_v24 = vmul.f32 %v4256_v44, %v21963_v23  ;;  %v4283_v9 = vsel %vm3102_vm1, %v4282_v60, %v4278_v0 }
 0x4e0   : > { %v16667_v56 = vsel %vm3102_vm1, %v21959_v4, %v3096_v14  ;;  %v16672_v37 = vmul.f32 %v4247_v62, %v21961_v20  ;;  %v4292_v5 = vsel %vm3102_vm1, %v4291_v29, %v4287_v12  ;;  %21964 = vst [vmem:[#allocation192_spill] sm:$0xff] %v16679_v61  ;;  %v16682_v41 = vmul.f32 %v4256_v44, %v21965_v52  ;;  %v21967_v21 = vld [vmem:[#allocation226_spill] sm:$0xff]  ;;  %v21968_v4 = vld [vmem:[#allocation247_spill] sm:$0xff]  ;;  %v21970_v20 = vld [vmem:[#allocation229_spill] sm:$0xff] }
 0x4e1   : > { %v16685_v14 = vmul.f32 %v4265_v53, %v21967_v21  ;;  %v16688_v50 = vmul.f32 %v4265_v53, %v21968_v4  ;;  %v4301_v62 = vsel %vm3102_vm1, %v4300_v19, %v4296_v28  ;;  %v16692_v23 = vmul.f32 %v4274_v35, %v21970_v20  ;;  %6839 = vperm.xlu1 %13681, %v15369_v6   ;;  %v21972_v29 = vld [vmem:[#allocation249_spill] sm:$0xff]  ;;  %v21974_v28 = vld [vmem:[#allocation231_spill] sm:$0xff]  ;;  %v21982_v6 = vld [vmem:[#allocation256_spill] sm:$0xff]  ;;  %v16730_v61 = vpop.permute.xlu1 %6310 }
 0x4e2   : > { %21962 = vst [vmem:[#allocation225_spill] sm:$0xff] %v16672_v37  ;;  %21966 = vst [vmem:[#allocation132_spill] sm:$0xff] %v16682_v41  ;;  %v3359_v0 = vmul.f32 %v16667_v56, %v16078_v3  ;;  %v21971_v12 = vrot.slane %v21769_v59, %v16206_v48  ;;  %v3116_v60 = vrot.slane %v16181_v1, %v16200_v54  ;;  %v21975_v52 = vld [vmem:[#allocation251_spill] sm:$0xff]  ;;  %v21977_v3 = vld [vmem:[#allocation233_spill] sm:$0xff]  ;;  %v16717_v59 = vpop.permute.xlu0 %5064 }
 0x4e3   : > { %21969 = vst [vmem:[#allocation13_spill] sm:$0xff] %v16688_v50  ;;  %v16706_v53 = vmul.f32 %v4274_v35, %v21972_v29  ;;  %v16709_v19 = vmul.f32 %v4283_v9, %v21974_v28  ;;  %v16712_v21 = vmul.f32 %v4283_v9, %v21975_v52  ;;  %v16715_v4 = vmul.f32 %v4292_v5, %v21977_v3  ;;  %v21981_v1 = vld [vmem:[#allocation235_spill] sm:$0xff]  ;;  %v22039_v9 = vld [vmem:[#allocation340_spill] sm:$0xff] }
 0x4e4   : > { %v16700_v44 = vsel %vm3102_vm1, %v21971_v12, %v3107_v45  ;;  %21978 = vst [vmem:[#allocation144_spill] sm:$0xff] %v16717_v59  ;;  %v21979_v45 = vld [vmem:[#allocation253_spill] sm:$0xff]  ;;  %v16723_v12 = vmul.f32 %v4301_v62, %v21981_v1  ;;  %v16726_v35 = vmul.f32 %v4301_v62, %v21982_v6  ;;  %21985 = vst [vmem:[#allocation150_spill] sm:$0xff] %v16730_v61  ;;  %v22017_v62 = vld [vmem:[#allocation146_spill] sm:$0xff] }
 0x4e5   : > { %21973 = vst [vmem:[#allocation138_spill] sm:$0xff] %v16706_v53  ;;  %21976 = vst [vmem:[#allocation41_spill] sm:$0xff] %v16712_v21  ;;  %v16720_v20 = vmul.f32 %v4292_v5, %v21979_v45  ;;  %v21988_v5 = vld [vmem:[#allocation331_spill] sm:$0xff]  ;;  %v3360_v1 = vmul.f32 %v16700_v44, %v21989_v25  ;;  %v21991_v28 = vrot.slane %v21775_v47, %v16206_v48  ;;  %6845 = vperm.xlu1 %13681, %v15385_v39   ;;  %v16770_v25 = vpop.permute.xlu1 %6316  ;;  %v22058_v41 = vld [vmem:[#allocation396_spill] sm:$0xff] }
 0x4e6   : > { %21983 = vst [vmem:[#allocation210_spill] sm:$0xff] %v16726_v35  ;;  %v4709_v45 = vrot.slane %v21988_v5, %v16206_v48  ;;  %v3125_v52 = vrot.slane %v16187_v7, %v16200_v54  ;;  %v3903_v59 = vadd.f32 %v16242_v32, %v3359_v0  ;;  %v21995_v47 = vld [vmem:[#allocation87_spill] sm:$0xff]  ;;  %v22000_v5 = vld [vmem:[#allocation333_spill] sm:$0xff]  ;;  %22001 = vst [vmem:[#allocation222_spill] sm:$0xff] %v16770_v25 }
 0x4e7   : > { %21980 = vst [vmem:[#allocation259_spill] sm:$0xff] %v16720_v20  ;;  %v16746_v61 = vsel %vm3102_vm1, %v21991_v28, %v3116_v60  ;;  %v4705_v60 = vrot.slane %v21995_v47, %v16200_v54  ;;  %v16760_v28 = vpop.permute.xlu0 %5074  ;;  %v4718_v20 = vrot.slane %v22000_v5, %v16206_v48  ;;  %v22004_v35 = vld [vmem:[#allocation309_spill] sm:$0xff]  ;;  %v22005_v5 = vrot.slane %v21785_v43, %v16206_v48  ;;  %v22038_v25 = vld [vmem:[#allocation338_spill] sm:$0xff] }
 0x4e8   : > { %21996 = vst [vmem:[#allocation261_spill] sm:$0xff] %v16760_v28  ;;  %v3362_v3 = vmul.f32 %v16746_v61, %v16084_v55  ;;  %v3904_v28 = vadd.f32 %v16256_v22, %v3360_v1  ;;  %v4714_v0 = vrot.slane %v22004_v35, %v16200_v54  ;;  %v22007_v22 = vld [vmem:[#allocation93_spill] sm:$0xff]  ;;  %v3134_v35 = vrot.slane %v16194_v17, %v16200_v54  ;;  %v22013_v55 = vld [vmem:[#allocation50_spill] sm:$0xff] }
 0x4e9   : > { %v16775_v47 = vsel %vm3102_vm1, %v4709_v45, %v4705_v60  ;;  %v16788_v7 = vsel %vm3102_vm1, %v22005_v5, %v3125_v52  ;;  %6851 = vperm.xlu1 %13681, %v15398_v63   ;;  %v4447_v45 = vadd.f32 %v16550_v10, %v3903_v59  ;;  %v4723_v1 = vrot.slane %v22007_v22, %v16200_v54  ;;  %v22010_v52 = vld [vmem:[#allocation140_spill] sm:$0xff]  ;;  %v22011_v10 = vld [vmem:[#allocation335_spill] sm:$0xff]  ;;  %v16807_v60 = vpop.permute.xlu1 %6322 }
 0x4ea   : > { %v4732_v5 = vrot.slane %v22010_v52, %v16200_v54  ;;  %v4719_v63 = vsel %vm3102_vm1, %v4718_v20, %v4714_v0  ;;  %v4727_v59 = vrot.slane %v22011_v10, %v16206_v48  ;;  %22012 = vst [vmem:[#allocation263_spill] sm:$0xff] %v16807_v60  ;;  %v4959_v22 = vmul.f32 %v16775_v47, %v22013_v55  ;;  %v22015_v20 = vld [vmem:[#allocation59_spill] sm:$0xff] }
 0x4eb   : > { %v16800_v43 = vpop.permute.xlu0 %5084  ;;  %v3364_v17 = vmul.f32 %v16788_v7, %v16090_v33  ;;  %v3906_v52 = vadd.f32 %v16278_v15, %v3362_v3  ;;  %v4741_v0 = vrot.slane %v22015_v20, %v16200_v54  ;;  %v4750_v60 = vrot.slane %v22017_v62, %v16200_v54  ;;  %v22022_v62 = vld [vmem:[#allocation148_spill] sm:$0xff] }
 0x4ec   : > { %22009 = vst [vmem:[#allocation237_spill] sm:$0xff] %v16800_v43  ;;  %v4448_v43 = vadd.f32 %v16560_v42, %v3904_v28  ;;  %v16824_v55 = vadd.f32 %v4959_v22, %v4447_v45  ;;  %v22019_v33 = vrot.slane %v21793_v46, %v16206_v48  ;;  %v3143_v15 = vrot.slane %v16203_v34, %v16200_v54  ;;  %v22021_v28 = vld [vmem:[#allocation53_spill] sm:$0xff]  ;;  %v22024_v22 = vld [vmem:[#allocation154_spill] sm:$0xff] }
 0x4ed   : > { %6857 = vperm.xlu1 %13681, %v15407_v38   ;;  %v4960_v20 = vmul.f32 %v4719_v63, %v22021_v28  ;;  %v4759_v32 = vrot.slane %v22022_v62, %v16200_v54  ;;  %v22023_v38 = vld [vmem:[#allocation151_spill] sm:$0xff]  ;;  %v22026_v34 = vld [vmem:[#allocation10_spill] sm:$0xff]  ;;  %v4450_v28 = vadd.f32 %v16569_v26, %v3906_v52  ;;  %v22028_v62 = vld [vmem:[#allocation157_spill] sm:$0xff] }
 0x4ee   : > { %22018 = vst [vmem:[#allocation155_spill] sm:$0xff] %v16824_v55  ;;  %v16830_v42 = vsel %vm3102_vm1, %v22019_v33, %v3134_v35  ;;  %v4728_v35 = vsel %vm3102_vm1, %v4727_v59, %v4723_v1  ;;  %v16844_v33 = vpop.permute.xlu1 %6328  ;;  %v4736_v39 = vrot.slane %v22026_v34, %v16206_v48  ;;  %v3152_v1 = vrot.slane %v16214_v11, %v16200_v54  ;;  %v22029_v59 = vld [vmem:[#allocation254_spill] sm:$0xff]  ;;  %v22031_v26 = vld [vmem:[#allocation95_spill] sm:$0xff] }
 0x4ef   : > { %v16834_v3 = vpop.permute.xlu0 %5094  ;;  %22025 = vst [vmem:[#allocation241_spill] sm:$0xff] %v16844_v33  ;;  %v16848_v10 = vadd.f32 %v4960_v20, %v4448_v43  ;;  %v3366_v45 = vmul.f32 %v16830_v42, %v16096_v51  ;;  %v7268_v34 = vsel %vm7264_vm2, %v16824_v55, -inf  ;;  %v22030_v43 = vld [vmem:[#allocation160_spill] sm:$0xff]  ;;  %v22035_v11 = vld [vmem:[#allocation54_spill] sm:$0xff]  ;;  %v22037_v33 = vld [vmem:[#allocation101_spill] sm:$0xff] }
 0x4f0   : > { %22020 = vst [vmem:[#allocation239_spill] sm:$0xff] %v16834_v3  ;;  %v3908_v3 = vadd.f32 %v16296_v13, %v3364_v17  ;;  %v22032_v17 = vld [vmem:[#allocation139_spill] sm:$0xff]  ;;  %7269 = vmax.xlane.f32.xlu0 %v7268_v34  ;;  %v22036_v46 = vld [vmem:[#allocation98_spill] sm:$0xff]  ;;  %v4745_v13 = vrot.slane %v22038_v25, %v16206_v48  ;;  %v22042_v55 = vld [vmem:[#allocation208_spill] sm:$0xff] }
 0x4f1   : > { %22027 = vst [vmem:[#allocation244_spill] sm:$0xff] %v16848_v10  ;;  %6863 = vperm.xlu1 %13681, %v22029_v59   ;;  %v22033_v52 = vrot.slane %v22032_v17, %v16206_v48  ;;  %v4962_v59 = vmul.f32 %v4728_v35, %v22035_v11  ;;  %v4754_v17 = vrot.slane %v22039_v9, %v16206_v48  ;;  %v7271_v34 = vsel %vm7264_vm2, %v16848_v10, -inf  ;;  %v22045_v9 = vld [vmem:[#allocation63_spill] sm:$0xff] }
 0x4f2   : > { %v16882_v21 = vpop.permute.xlu1 %6334  ;;  %v4452_v11 = vadd.f32 %v16588_v40, %v3908_v3  ;;  %v22049_v40 = vld [vmem:[#allocation107_spill] sm:$0xff]  ;;  %v22055_v3 = vld [vmem:[#allocation57_spill] sm:$0xff] }
 0x4f3   : > { %v16869_v6 = vsel %vm3102_vm1, %v22033_v52, %v3143_v15  ;;  %v16871_v51 = vpop.permute.xlu0 %5104  ;;  %22040 = vst [vmem:[#allocation248_spill] sm:$0xff] %v16882_v21  ;;  %v4737_v15 = vsel %vm3102_vm1, %v4736_v39, %v4732_v5  ;;  %v16887_v52 = vadd.f32 %v4962_v59, %v4450_v28  ;;  %v3161_v21 = vrot.slane %v22045_v9, %v16200_v54  ;;  %v22046_v39 = vld [vmem:[#allocation257_spill] sm:$0xff]  ;;  %v22048_v28 = vld [vmem:[#allocation104_spill] sm:$0xff] }
 0x4f4   : > { %22034 = vst [vmem:[#allocation246_spill] sm:$0xff] %v16871_v51  ;;  %v3368_v20 = vmul.f32 %v16869_v6, %v22042_v55  ;;  %v22043_v51 = vld [vmem:[#allocation152_spill] sm:$0xff]  ;;  %v22047_v5 = vld [vmem:[#allocation133_spill] sm:$0xff]  ;;  %7272 = vmax.xlane.f32.xlu0 %v7271_v34  ;;  %v4746_v9 = vsel %vm3102_vm1, %v4745_v13, %v4741_v0  ;;  %v4964_v34 = vmul.f32 %v4737_v15, %v22055_v3 }
 0x4f5   : > { %22041 = vst [vmem:[#allocation266_spill] sm:$0xff] %v16887_v52  ;;  %v22044_v25 = vrot.slane %v22043_v51, %v16206_v48  ;;  %6869 = vperm.xlu1 %13681, %v22046_v39   ;;  %v3910_v10 = vadd.f32 %v22047_v5, %v3366_v45  ;;  %v22051_v51 = vld [vmem:[#allocation313_spill] sm:$0xff]  ;;  %v4755_v45 = vsel %vm3102_vm1, %v4754_v17, %v4750_v60  ;;  %v22053_v39 = vld [vmem:[#allocation342_spill] sm:$0xff]  ;;  %v7277_v0 = vsel %vm7264_vm2, %v16887_v52, -inf }
 0x4f6   : > { %v4763_v5 = vrot.slane %v22053_v39, %v16206_v48  ;;  %v16919_v59 = vpop.permute.xlu1 %6340  ;;  %v22059_v60 = vrot.slane %v21819_v16, %v16206_v48  ;;  %v16937_v17 = vadd.f32 %v4964_v34, %v4452_v11  ;;  %v22062_v39 = vld [vmem:[#allocation78_spill] sm:$0xff]  ;;  %v22065_v16 = vld [vmem:[#allocation315_spill] sm:$0xff]  ;;  %v22069_v11 = vld [vmem:[#allocation61_spill] sm:$0xff] }
 0x4f7   : > { %v16896_v53 = vsel %vm3102_vm1, %v22044_v25, %v3152_v1  ;;  %v16906_v55 = vpop.permute.xlu0 %5114  ;;  %v16910_v1 = vmul.f32 %v16775_v47, %v22051_v51  ;;  %v22052_v25 = vld [vmem:[#allocation314_spill] sm:$0xff]  ;;  %22054 = vst [vmem:[#allocation252_spill] sm:$0xff] %v16919_v59  ;;  %v22057_v47 = vld [vmem:[#allocation223_spill] sm:$0xff]  ;;  %v4454_v3 = vadd.f32 %v16600_v2, %v3910_v10  ;;  %v16947_v37 = vmul.f32 %v4728_v35, %v22065_v16 }
 0x4f8   : > { %22050 = vst [vmem:[#allocation250_spill] sm:$0xff] %v16906_v55  ;;  %v16913_v29 = vmul.f32 %v4719_v63, %v22052_v25  ;;  %v22056_v55 = vld [vmem:[#allocation344_spill] sm:$0xff]  ;;  %v4781_v51 = vrot.slane %v22057_v47, %v16206_v48  ;;  %v3370_v63 = vmul.f32 %v16896_v53, %v22058_v41  ;;  %v16934_v13 = vsel %vm3102_vm1, %v22059_v60, %v3161_v21  ;;  %v22064_v52 = vld [vmem:[#allocation58_spill] sm:$0xff]  ;;  %v22067_v2 = vld [vmem:[#allocation347_spill] sm:$0xff] }
 0x4f9   : > { %v4772_v50 = vrot.slane %v22056_v55, %v16206_v48  ;;  %6875 = vperm.xlu1 %13681, %v15446_v27   ;;  %22060 = vst [vmem:[#allocation269_spill] sm:$0xff] %v16937_v17  ;;  %v22061_v55 = vld [vmem:[#allocation86_spill] sm:$0xff]  ;;  %v3170_v41 = vrot.slane %v22062_v39, %v16200_v54  ;;  %7278 = vmax.xlane.f32.xlu0 %v7277_v0  ;;  %v22066_v21 = vld [vmem:[#allocation316_spill] sm:$0xff]  ;;  %v22070_v0 = vld [vmem:[#allocation317_spill] sm:$0xff] }
 0x4fa   : > { %v3912_v25 = vadd.f32 %v22061_v55, %v3368_v20  ;;  %v4966_v59 = vmul.f32 %v4746_v9, %v22064_v52  ;;  %v16950_v60 = vmul.f32 %v4737_v15, %v22066_v21  ;;  %v4764_v27 = vsel %vm3102_vm1, %v4763_v5, %v4759_v32  ;;  %v16955_v20 = vpop.permute.xlu1 %6346  ;;  %v22072_v39 = vld [vmem:[#allocation212_spill] sm:$0xff]  ;;  %v22073_v16 = vld [vmem:[#allocation99_spill] sm:$0xff]  ;;  %v22074_v5 = vld [vmem:[#allocation318_spill] sm:$0xff] }
 0x4fb   : > { %v16943_v47 = vpop.permute.xlu0 %5124  ;;  %v4790_v10 = vrot.slane %v22067_v2, %v16206_v48  ;;  %22068 = vst [vmem:[#allocation258_spill] sm:$0xff] %v16955_v20  ;;  %v4968_v34 = vmul.f32 %v4755_v45, %v22069_v11  ;;  %v16959_v55 = vmul.f32 %v4746_v9, %v22070_v0  ;;  %v22071_v52 = vrot.slane %v22023_v38, %v16200_v54  ;;  %v22077_v0 = vld [vmem:[#allocation172_spill] sm:$0xff]  ;;  %v22113_v20 = vld [vmem:[#allocation267_spill] sm:$0xff] }
 0x4fc   : > { %22063 = vst [vmem:[#allocation255_spill] sm:$0xff] %v16943_v47  ;;  %v3372_v15 = vmul.f32 %v16934_v13, %v22072_v39  ;;  %v3914_v32 = vadd.f32 %v22073_v16, %v3370_v63  ;;  %v16969_v21 = vmul.f32 %v4755_v45, %v22074_v5  ;;  %v22075_v2 = vrot.slane %v22024_v22, %v16200_v54 }
 0x4fd   : > { %v4773_v35 = vsel %vm3102_vm1, %v4772_v50, %v22071_v52  ;;  %6881 = vperm.xlu1 %13681, %v15455_v49   ;;  %v7283_v38 = vsel %vm7264_vm2, %v16937_v17, -inf  ;;  %v16978_v9 = vadd.f32 %v4966_v59, %v4454_v3  ;;  %v4456_v50 = vadd.f32 %v16609_v30, %v3912_v25  ;;  %v22079_v52 = vld [vmem:[#allocation68_spill] sm:$0xff]  ;;  %v22081_v49 = vld [vmem:[#allocation319_spill] sm:$0xff] }
 0x4fe   : > { %v4782_v11 = vsel %vm3102_vm1, %v4781_v51, %v22075_v2  ;;  %v22078_v63 = vrot.slane %v22077_v0, %v16206_v48  ;;  %v3179_v22 = vrot.slane %v22079_v52, %v16200_v54  ;;  %7284 = vmax.xlane.f32.xlu0 %v7283_v38  ;;  %v22080_v51 = vld [vmem:[#allocation62_spill] sm:$0xff]  ;;  %v16991_v16 = vmul.f32 %v4764_v27, %v22081_v49  ;;  %v22083_v3 = vld [vmem:[#allocation228_spill] sm:$0xff]  ;;  %v17001_v2 = vpop.permute.xlu1 %6352  ;;  %v22088_v52 = vld [vmem:[#allocation213_spill] sm:$0xff] }
 0x4ff   : > { %22076 = vst [vmem:[#allocation272_spill] sm:$0xff] %v16978_v9  ;;  %v4970_v39 = vmul.f32 %v4764_v27, %v22080_v51  ;;  %v22082_v59 = vrot.slane %v22028_v62, %v16200_v54  ;;  %v4799_v25 = vrot.slane %v22083_v3, %v16206_v48  ;;  %22085 = vst [vmem:[#allocation69_spill] sm:$0xff] %v17001_v2  ;;  %v22086_v0 = vld [vmem:[#allocation128_spill] sm:$0xff]  ;;  %v22089_v51 = vld [vmem:[#allocation105_spill] sm:$0xff] }
 0x500   : > { %v16985_v45 = vsel %vm3102_vm1, %v22078_v63, %v3170_v41  ;;  %v22084_v41 = vld [vmem:[#allocation350_spill] sm:$0xff]  ;;  %v4972_v38 = vmul.f32 %v4773_v35, %v22086_v0  ;;  %v17004_v63 = vpop.permute.xlu0 %5134  ;;  %v4458_v27 = vadd.f32 %v22088_v52, %v3914_v32  ;;  %v3916_v49 = vadd.f32 %v22089_v51, %v3372_v15  ;;  %v22090_v17 = vld [vmem:[#allocation131_spill] sm:$0xff] }
 0x501   : > { %v4791_v30 = vsel %vm3102_vm1, %v4790_v10, %v22082_v59  ;;  %v4808_v5 = vrot.slane %v22084_v41, %v16206_v48  ;;  %22087 = vst [vmem:[#allocation65_spill] sm:$0xff] %v17004_v63  ;;  %v17009_v62 = vmul.f32 %v4782_v11, %v22090_v17  ;;  %v22091_v10 = vld [vmem:[#allocation320_spill] sm:$0xff]  ;;  %v22092_v3 = vld [vmem:[#allocation215_spill] sm:$0xff]  ;;  %v7289_v0 = vsel %vm7264_vm2, %v16978_v9, -inf  ;;  %v22095_v63 = vld [vmem:[#allocation321_spill] sm:$0xff] }
 0x502   : > { %v17012_v59 = vmul.f32 %v4773_v35, %v22091_v10  ;;  %v3374_v47 = vmul.f32 %v16985_v45, %v22092_v3  ;;  %v22093_v41 = vld [vmem:[#allocation264_spill] sm:$0xff]  ;;  %v17019_v2 = vadd.f32 %v4968_v34, %v4456_v50  ;;  %v17022_v32 = vmul.f32 %v4782_v11, %v22095_v63  ;;  %v22097_v15 = vld [vmem:[#allocation14_spill] sm:$0xff]  ;;  %7290 = vmax.xlane.f32.xlu0 %v7289_v0  ;;  %v22100_v10 = vld [vmem:[#allocation297_spill] sm:$0xff] }
 0x503   : > { %6887 = vperm.xlu1 %13681, %v22093_v41   ;;  %v22098_v17 = vrot.slane %v22097_v15, %v16206_v48  ;;  %v22099_v35 = vld [vmem:[#allocation94_spill] sm:$0xff]  ;;  %v17033_v3 = vmul.f32 %v4791_v30, %v22100_v10  ;;  %v22103_v34 = vrot.slane %v22030_v43, %v16200_v54  ;;  %v22104_v50 = vrot.slane %v22031_v26, %v16200_v54  ;;  %v22105_v63 = vld [vmem:[#allocation352_spill] sm:$0xff] }
 0x504   : > { %22094 = vst [vmem:[#allocation260_spill] sm:$0xff] %v17019_v2  ;;  %22096 = vst [vmem:[#allocation262_spill] sm:$0xff] %v17022_v32  ;;  %v3188_v51 = vrot.slane %v22099_v35, %v16200_v54  ;;  %v22101_v41 = vld [vmem:[#allocation322_spill] sm:$0xff]  ;;  %v4817_v15 = vrot.slane %v22105_v63, %v16206_v48  ;;  %v17050_v35 = vpop.permute.xlu1 %6358  ;;  %v4460_v26 = vadd.f32 %v16641_v58, %v3916_v49  ;;  %v17073_v58 = vpop.permute.xlu0 %5144 }
 0x505   : > { %v17028_v52 = vsel %vm3102_vm1, %v22098_v17, %v3179_v22  ;;  %v17036_v9 = vmul.f32 %v4791_v30, %v22101_v41  ;;  %v4800_v11 = vsel %vm3102_vm1, %v4799_v25, %v22103_v34  ;;  %v4809_v22 = vsel %vm3102_vm1, %v4808_v5, %v22104_v50  ;;  %v22106_v0 = vld [vmem:[#allocation354_spill] sm:$0xff]  ;;  %22107 = vst [vmem:[#allocation80_spill] sm:$0xff] %v17050_v35  ;;  %v22108_v30 = vld [vmem:[#allocation356_spill] sm:$0xff]  ;;  %v22112_v50 = vld [vmem:[#allocation111_spill] sm:$0xff] }
 0x506   : > { %v4826_v17 = vrot.slane %v22106_v0, %v16206_v48  ;;  %v4835_v10 = vrot.slane %v22108_v30, %v16206_v48  ;;  %v22109_v43 = vld [vmem:[#allocation358_spill] sm:$0xff]  ;;  %v17056_v25 = vadd.f32 %v4970_v39, %v4458_v27  ;;  %v22111_v34 = vld [vmem:[#allocation400_spill] sm:$0xff]  ;;  %v3197_v63 = vrot.slane %v22112_v50, %v16200_v54  ;;  %22117 = vst [vmem:[#allocation81_spill] sm:$0xff] %v17073_v58  ;;  %v22118_v27 = vld [vmem:[#allocation299_spill] sm:$0xff] }
 0x507   : > { %22102 = vst [vmem:[#allocation92_spill] sm:$0xff] %v17036_v9  ;;  %v4844_v41 = vrot.slane %v22109_v43, %v16206_v48  ;;  %v3376_v5 = vmul.f32 %v17028_v52, %v22111_v34  ;;  %6893 = vperm.xlu1 %13681, %v22113_v20   ;;  %v7295_v0 = vsel %vm7264_vm2, %v17019_v2, -inf  ;;  %v22114_v35 = vld [vmem:[#allocation76_spill] sm:$0xff]  ;;  %v22115_v9 = vld [vmem:[#allocation43_spill] sm:$0xff]  ;;  %v17076_v49 = vmul.f32 %v4800_v11, %v22118_v27  ;;  %v22119_v34 = vld [vmem:[#allocation301_spill] sm:$0xff] }
 0x508   : > { %22110 = vst [vmem:[#allocation275_spill] sm:$0xff] %v17056_v25  ;;  %v3918_v30 = vadd.f32 %v22114_v35, %v3374_v47  ;;  %v22116_v43 = vrot.slane %v22115_v9, %v16206_v48  ;;  %7296 = vmax.xlane.f32.xlu0 %v7295_v0  ;;  %v17079_v50 = vmul.f32 %v4809_v22, %v22119_v34  ;;  %v22120_v20 = vld [vmem:[#allocation323_spill] sm:$0xff]  ;;  %v17094_v27 = vpop.permute.xlu1 %6364  ;;  %v22125_v34 = vld [vmem:[#allocation110_spill] sm:$0xff] }
 0x509   : > { %v17082_v32 = vmul.f32 %v4800_v11, %v22120_v20  ;;  %v22121_v47 = vrot.slane %v22036_v46, %v16200_v54  ;;  %v22123_v0 = vrot.slane %v22037_v33, %v16200_v54  ;;  %22124 = vst [vmem:[#allocation265_spill] sm:$0xff] %v17094_v27  ;;  %v17097_v2 = vmul.f32 %v4809_v22, %v22125_v34  ;;  %v22130_v22 = vld [vmem:[#allocation190_spill] sm:$0xff] }
 0x50a   : > { %v17071_v39 = vsel %vm3102_vm1, %v22116_v43, %v3188_v51  ;;  %v22126_v11 = vrot.slane %v22048_v28, %v16200_v54  ;;  %v7301_v33 = vsel %vm7264_vm2, %v17056_v25, -inf  ;;  %v22131_v34 = vrot.slane %v22130_v22, %v16206_v48  ;;  %v22137_v22 = vld [vmem:[#allocation113_spill] sm:$0xff] }
 0x50b   : > { %v4818_v9 = vsel %vm3102_vm1, %v4817_v15, %v22121_v47  ;;  %v4827_v43 = vsel %vm3102_vm1, %v4826_v17, %v22123_v0  ;;  %v22127_v15 = vrot.slane %v22049_v40, %v16200_v54  ;;  %v17109_v47 = vadd.f32 %v4972_v38, %v4460_v26  ;;  %v22129_v17 = vld [vmem:[#allocation220_spill] sm:$0xff]  ;;  %v22135_v38 = vld [vmem:[#allocation115_spill] sm:$0xff] }
 0x50c   : > { %v4836_v46 = vsel %vm3102_vm1, %v4835_v10, %v22126_v11  ;;  %v3378_v0 = vmul.f32 %v17071_v39, %v22129_v17  ;;  %v17117_v28 = vsel %vm3102_vm1, %v22131_v34, %v3197_v63  ;;  %v22132_v10 = vld [vmem:[#allocation270_spill] sm:$0xff]  ;;  %v4462_v40 = vadd.f32 %v16650_v8, %v3918_v30  ;;  %v22133_v11 = vld [vmem:[#allocation168_spill] sm:$0xff]  ;;  %7302 = vmax.xlane.f32.xlu0 %v7301_v33  ;;  %v22136_v17 = vld [vmem:[#allocation303_spill] sm:$0xff] }
 0x50d   : > { %v4845_v20 = vsel %vm3102_vm1, %v4844_v41, %v22127_v15  ;;  %22128 = vst [vmem:[#allocation6_spill] sm:$0xff] %v17109_v47  ;;  %6899 = vperm.xlu1 %13681, %v22132_v10   ;;  %v3920_v41 = vadd.f32 %v22133_v11, %v3376_v5  ;;  %v3206_v26 = vrot.slane %v22135_v38, %v16200_v54  ;;  %v22139_v10 = vld [vmem:[#allocation305_spill] sm:$0xff]  ;;  %v22140_v5 = vld [vmem:[#allocation82_spill] sm:$0xff]  ;;  %v22141_v11 = vld [vmem:[#allocation116_spill] sm:$0xff] }
 0x50e   : > { %v17127_v25 = vmul.f32 %v4818_v9, %v22136_v17  ;;  %v17130_v58 = vmul.f32 %v4818_v9, %v22137_v22  ;;  %v17135_v8 = vmul.f32 %v4827_v43, %v22139_v10  ;;  %v17138_v30 = vmul.f32 %v4836_v46, %v22140_v5  ;;  %v22143_v17 = vld [vmem:[#allocation403_spill] sm:$0xff]  ;;  %v17147_v9 = vpop.permute.xlu0 %5154  ;;  %v17149_v22 = vpop.permute.xlu1 %6691  ;;  %v22146_v34 = vld [vmem:[#allocation49_spill] sm:$0xff] }
 0x50f   : > { %v17141_v35 = vmul.f32 %v4827_v43, %v22141_v11  ;;  %v3380_v27 = vmul.f32 %v17117_v28, %v22143_v17  ;;  %22144 = vst [vmem:[#allocation227_spill] sm:$0xff] %v17147_v9  ;;  %22145 = vst [vmem:[#allocation268_spill] sm:$0xff] %v17149_v22  ;;  %v17152_v63 = vmul.f32 %v4845_v20, %v22146_v34  ;;  %v22147_v10 = vld [vmem:[#allocation327_spill] sm:$0xff]  ;;  %v22148_v5 = vld [vmem:[#allocation273_spill] sm:$0xff]  ;;  %v7307_v43 = vsel %vm7264_vm2, %v17109_v47, -inf }
 0x510   : > { %v17155_v15 = vmul.f32 %v4836_v46, %v22147_v10  ;;  %v17161_v11 = vadd.f32 %v17009_v62, %v4462_v40  ;;  %v4464_v17 = vadd.f32 %v16660_v57, %v3920_v41  ;;  %v22150_v38 = vld [vmem:[#allocation85_spill] sm:$0xff]  ;;  %v22152_v34 = vld [vmem:[#allocation198_spill] sm:$0xff]  ;;  %v22154_v10 = vld [vmem:[#allocation135_spill] sm:$0xff]  ;;  %7308 = vmax.xlane.f32.xlu0 %v7307_v43 }
 0x511   : > { %6905 = vperm.xlu1 %13681, %v22148_v5   ;;  %v3922_v9 = vadd.f32 %v22150_v38, %v3378_v0  ;;  %v22153_v51 = vrot.slane %v22152_v34, %v16206_v48  ;;  %v3215_v5 = vrot.slane %v22154_v10, %v16200_v54  ;;  %v22155_v47 = vld [vmem:[#allocation329_spill] sm:$0xff] }
 0x512   : > { %22149 = vst [vmem:[#allocation278_spill] sm:$0xff] %v17161_v11  ;;  %v17176_v62 = vmul.f32 %v4845_v20, %v22155_v47  ;;  %v22165_v40 = vld [vmem:[#allocation129_spill] sm:$0xff]  ;;  %v7313_v33 = vsel %vm7264_vm2, %v17161_v11, -inf  ;;  %v22173_v11 = vld [vmem:[#allocation158_spill] sm:$0xff]  ;;  %v22183_v47 = vld [vmem:[#allocation407_spill] sm:$0xff] }
 0x513   : > { %v17171_v46 = vsel %vm3102_vm1, %v22153_v51, %v3206_v26  ;;  %v3924_v57 = vadd.f32 %v22165_v40, %v3380_v27  ;;  %v22166_v41 = vld [vmem:[#allocation405_spill] sm:$0xff]  ;;  %v17200_v51 = vadd.f32 %v17033_v3, %v4464_v17  ;;  %v4466_v22 = vadd.f32 %v16675_v24, %v3922_v9  ;;  %v22171_v27 = vld [vmem:[#allocation35_spill] sm:$0xff]  ;;  %v17216_v17 = vpop.permute.xlu0 %5164 }
 0x514   : > { %22156 = vst [vmem:[#allocation206_spill] sm:$0xff] %v17176_v62  ;;  %v17192_v62 = vpop.permute.xlu1 %6695  ;;  %v3382_v0 = vmul.f32 %v17171_v46, %v22166_v41  ;;  %v22168_v26 = vmov 0   ;;  %v22172_v40 = vrot.slane %v22171_v27, %v16206_v48  ;;  %v3224_v3 = vrot.slane %v22173_v11, %v16200_v54  ;;  %22174 = vst [vmem:[#allocation280_spill] sm:$0xff] %v17216_v17  ;;  %7314 = vmax.xlane.f32.xlu0 %v7313_v33  ;;  %v22181_v33 = vld [vmem:[#allocation391_spill] sm:$0xff]  ;;  %v22202_v11 = vld [vmem:[#allocation409_spill] sm:$0xff] }
 0x515   : > { %22164 = vst [vmem:[#allocation230_spill] sm:$0xff] %v17192_v62  ;;  %22167 = vst [vmem:[#allocation271_spill] sm:$0xff] %v17200_v51  ;;  %13683 = vset.pattern.permute.xlu1 %v22168_v26  ;;  %v5825_v17 = vrot.slane %v22181_v33, %v16200_v54  ;;  %v4468_v9 = vadd.f32 %v16685_v14, %v3924_v57  ;;  %v7319_v20 = vsel %vm7264_vm2, %v17200_v51, -inf }
 0x516   : > { %v17212_v41 = vsel %vm3102_vm1, %v22172_v40, %v3215_v5  ;;  %v17240_v10 = vadd.f32 %v17076_v49, %v4466_v22  ;;  %v22185_v40 = vld [vmem:[#allocation130_spill] sm:$0xff] }
 0x517   : > { %v3384_v26 = vmul.f32 %v17212_v41, %v22183_v47  ;;  %v3926_v24 = vadd.f32 %v22185_v40, %v3382_v0  ;;  %v22190_v47 = vld [vmem:[#allocation164_spill] sm:$0xff]  ;;  %v22194_v5 = vld [vmem:[#allocation90_spill] sm:$0xff]  ;;  %v17271_v49 = vpop.permute.xlu0 %5174  ;;  %v17276_v34 = vadd.f32 %v17079_v50, %v4468_v9  ;;  %v22207_v9 = vld [vmem:[#allocation219_spill] sm:$0xff] }
 0x518   : > { %v17232_v38 = vpop.permute.xlu1 %6703  ;;  %22184 = vst [vmem:[#allocation232_spill] sm:$0xff] %v17240_v10  ;;  %v3233_v51 = vrot.slane %v22190_v47, %v16200_v54  ;;  %7320 = vmax.xlane.f32.xlu0 %v7319_v20  ;;  %v5834_v33 = vrot.slane %v22194_v5, %v16200_v54  ;;  %v22198_v47 = vld [vmem:[#allocation392_spill] sm:$0xff]  ;;  %22199 = vst [vmem:[#allocation282_spill] sm:$0xff] %v17271_v49  ;;  %v22208_v27 = vrot.slane %v22207_v9, %v16206_v48 }
 0x519   : > { %22182 = vst [vmem:[#allocation209_spill] sm:$0xff] %v17232_v38  ;;  %v22188_v38 = vld [vmem:[#allocation207_spill] sm:$0xff]  ;;  %v5843_v22 = vrot.slane %v22198_v47, %v16200_v54  ;;  %22201 = vst [vmem:[#allocation274_spill] sm:$0xff] %v17276_v34 }
 0x51a   : > { %v22189_v14 = vrot.slane %v22188_v38, %v16206_v48  ;;  %v22203_v38 = vld [vmem:[#allocation184_spill] sm:$0xff]  ;;  %v22211_v47 = vld [vmem:[#allocation3_spill] sm:$0xff] }
 0x51c   : > { %v17251_v57 = vsel %vm3102_vm1, %v22189_v14, %v3224_v3  ;;  %v22196_v14 = vld [vmem:[#allocation199_spill] sm:$0xff]  ;;  %v17273_v40 = vpop.permute.xlu1 %6711  ;;  %v7325_v3 = vsel %vm7264_vm2, %v17240_v10, -inf  ;;  %v22212_v10 = vrot.slane %v22211_v47, %v16206_v48  ;;  %v7331_v47 = vsel %vm7264_vm2, %v17276_v34, -inf  ;;  %v22227_v34 = vld [vmem:[#allocation201_spill] sm:$0xff] }
 0x51d   : > { %v22197_v62 = vrot.slane %v22196_v14, %v16206_v48  ;;  %22200 = vst [vmem:[#allocation211_spill] sm:$0xff] %v17273_v40  ;;  %v3386_v5 = vmul.f32 %v17251_v57, %v22202_v11  ;;  %v4470_v14 = vadd.f32 %v16692_v23, %v3926_v24  ;;  %v22206_v40 = vld [vmem:[#allocation393_spill] sm:$0xff]  ;;  %v17294_v11 = vsel %vm3102_vm1, %v22208_v27, %v3233_v51  ;;  %v22223_v51 = vld [vmem:[#allocation376_spill] sm:$0xff] }
 0x51e   : > { %v5852_v50 = vrot.slane %v22206_v40, %v16200_v54  ;;  %7326 = vmax.xlane.f32.xlu0 %v7325_v3  ;;  %v5839_v0 = vsel %vm3102_vm1, %v22212_v10, %v5834_v33  ;;  %v22213_v40 = vld [vmem:[#allocation394_spill] sm:$0xff]  ;;  %v22217_v3 = vld [vmem:[#allocation200_spill] sm:$0xff]  ;;  %v22220_v10 = vld [vmem:[#allocation411_spill] sm:$0xff]  ;;  %v22228_v43 = vrot.slane %v22227_v34, %v16206_v48 }
 0x51f   : > { %v5830_v20 = vsel %vm3102_vm1, %v22197_v62, %v5825_v17  ;;  %v3928_v62 = vadd.f32 %v22203_v38, %v3384_v26  ;;  %v22210_v26 = vld [vmem:[#allocation161_spill] sm:$0xff]  ;;  %v5861_v49 = vrot.slane %v22213_v40, %v16200_v54  ;;  %v22214_v17 = vld [vmem:[#allocation375_spill] sm:$0xff]  ;;  %v22218_v24 = vrot.slane %v22217_v3, %v16206_v48  ;;  %v22224_v3 = vld [vmem:[#allocation46_spill] sm:$0xff] }
 0x520   : > { %v17299_v38 = vmul.f32 %v5830_v20, %v22210_v26  ;;  %v17308_v9 = vmul.f32 %v5830_v20, %v22214_v17  ;;  %v17316_v23 = vpop.permute.xlu1 %6719  ;;  %v3388_v33 = vmul.f32 %v17294_v11, %v22220_v10  ;;  %v17323_v40 = vadd.f32 %v17127_v25, %v4470_v14  ;;  %v22222_v17 = vld [vmem:[#allocation97_spill] sm:$0xff]  ;;  %v17339_v25 = vpop.permute.xlu0 %5215 }
 0x521   : > { %v5848_v26 = vsel %vm3102_vm1, %v22218_v24, %v5843_v22  ;;  %22219 = vst [vmem:[#allocation234_spill] sm:$0xff] %v17316_v23  ;;  %v4472_v20 = vadd.f32 %v16709_v19, %v3928_v62  ;;  %v3930_v27 = vadd.f32 %v22222_v17, %v3386_v5  ;;  %v17331_v22 = vmul.f32 %v5839_v0, %v22224_v3  ;;  %v22229_v19 = vld [vmem:[#allocation202_spill] sm:$0xff]  ;;  %v22231_v62 = vld [vmem:[#allocation124_spill] sm:$0xff]  ;;  %v22234_v34 = vld [vmem:[#allocation377_spill] sm:$0xff] }
 0x522   : > { %22215 = vst [vmem:[#allocation284_spill] sm:$0xff] %v17308_v9  ;;  %22221 = vst [vmem:[#allocation286_spill] sm:$0xff] %v17323_v40  ;;  %v17328_v9 = vmul.f32 %v5839_v0, %v22223_v51  ;;  %v5857_v10 = vsel %vm3102_vm1, %v22228_v43, %v5852_v50  ;;  %7332 = vmax.xlane.f32.xlu0 %v7331_v47  ;;  %v22230_v5 = vrot.slane %v22229_v19, %v16206_v48  ;;  %v22232_v51 = vld [vmem:[#allocation52_spill] sm:$0xff]  ;;  %v22233_v3 = vld [vmem:[#allocation42_spill] sm:$0xff] }
 0x523   : > { %22225 = vst [vmem:[#allocation214_spill] sm:$0xff] %v17331_v22  ;;  %v5870_v0 = vrot.slane %v22231_v62, %v16200_v54  ;;  %v5879_v17 = vrot.slane %v22232_v51, %v16200_v54  ;;  %v3358_v23 = vmul.f32 %v16667_v56, %v22233_v3  ;;  %v17352_v24 = vmul.f32 %v5848_v26, %v22234_v34  ;;  %v22236_v43 = vld [vmem:[#allocation51_spill] sm:$0xff]  ;;  %v22242_v3 = vld [vmem:[#allocation153_spill] sm:$0xff]  ;;  %v22247_v47 = vld [vmem:[#allocation380_spill] sm:$0xff] }
 0x524   : > { %v5866_v14 = vsel %vm3102_vm1, %v22230_v5, %v5861_v49  ;;  %v17355_v50 = vmul.f32 %v5848_v26, %v22236_v43  ;;  %v22239_v49 = vld [vmem:[#allocation28_spill] sm:$0xff]  ;;  %v17361_v22 = vpop.permute.xlu1 %6727  ;;  %v7337_v62 = vsel %vm7264_vm2, %v17323_v40, -inf  ;;  %v17366_v51 = vadd.f32 %v17135_v8, %v4472_v20  ;;  %v22243_v26 = vld [vmem:[#allocation378_spill] sm:$0xff]  ;;  %v22250_v40 = vld [vmem:[#allocation203_spill] sm:$0xff] }
 0x525   : > { %22235 = vst [vmem:[#allocation288_spill] sm:$0xff] %v17352_v24  ;;  %v5888_v5 = vrot.slane %v22239_v49, %v16200_v54  ;;  %22240 = vst [vmem:[#allocation236_spill] sm:$0xff] %v17361_v22  ;;  %v4474_v56 = vadd.f32 %v16715_v4, %v3930_v27  ;;  %v3932_v34 = vadd.f32 %v22242_v3, %v3388_v33  ;;  %v22249_v22 = vld [vmem:[#allocation29_spill] sm:$0xff]  ;;  %v22252_v27 = vld [vmem:[#allocation8_spill] sm:$0xff] }
 0x526   : > { %22237 = vst [vmem:[#allocation290_spill] sm:$0xff] %v17355_v50  ;;  %22241 = vst [vmem:[#allocation216_spill] sm:$0xff] %v17366_v51  ;;  %v17371_v43 = vmul.f32 %v5857_v10, %v22243_v26  ;;  %v22245_v50 = vld [vmem:[#allocation189_spill] sm:$0xff]  ;;  %v17377_v49 = vmul.f32 %v5866_v14, %v22247_v47  ;;  %v5897_v24 = vrot.slane %v22249_v22, %v16200_v54  ;;  %7338 = vmax.xlane.f32.xlu0 %v7337_v62  ;;  %v22256_v26 = vld [vmem:[#allocation204_spill] sm:$0xff] }
 0x527   : > { %v17374_v19 = vmul.f32 %v5857_v10, %v22245_v50  ;;  %v22251_v8 = vrot.slane %v22250_v40, %v16206_v48  ;;  %v22253_v33 = vrot.slane %v22252_v27, %v16206_v48  ;;  %v22254_v10 = vld [vmem:[#allocation395_spill] sm:$0xff]  ;;  %v22255_v3 = vld [vmem:[#allocation73_spill] sm:$0xff] }
 0x528   : > { %22244 = vst [vmem:[#allocation48_spill] sm:$0xff] %v17371_v43  ;;  %22248 = vst [vmem:[#allocation218_spill] sm:$0xff] %v17377_v49  ;;  %v5906_v50 = vrot.slane %v22254_v10, %v16200_v54  ;;  %v3902_v47 = vadd.f32 %v22255_v3, %v3358_v23  ;;  %v22258_v62 = vld [vmem:[#allocation397_spill] sm:$0xff]  ;;  %v22260_v49 = vld [vmem:[#allocation74_spill] sm:$0xff]  ;;  %v7343_v3 = vsel %vm7264_vm2, %v17366_v51, -inf }
 0x529   : > { %22246 = vst [vmem:[#allocation238_spill] sm:$0xff] %v17374_v19  ;;  %v5875_v4 = vsel %vm3102_vm1, %v22251_v8, %v5870_v0  ;;  %v5884_v20 = vsel %vm3102_vm1, %v22253_v33, %v5879_v17  ;;  %v22257_v19 = vrot.slane %v22256_v26, %v16206_v48  ;;  %v5915_v40 = vrot.slane %v22258_v62, %v16200_v54  ;;  %v22259_v0 = vld [vmem:[#allocation398_spill] sm:$0xff]  ;;  %v17402_v17 = vpop.permute.xlu0 %5221  ;;  %v17404_v33 = vpop.permute.xlu1 %6735  ;;  %v22262_v10 = vld [vmem:[#allocation191_spill] sm:$0xff]  ;;  %v22264_v26 = vld [vmem:[#allocation381_spill] sm:$0xff] }
 0x52a   : > { %v5924_v8 = vrot.slane %v22259_v0, %v16200_v54  ;;  %v3361_v27 = vmul.f32 %v16700_v44, %v22260_v49  ;;  %22261 = vst [vmem:[#allocation240_spill] sm:$0xff] %v17404_v33  ;;  %v17407_v23 = vmul.f32 %v5866_v14, %v22262_v10  ;;  %v17416_v62 = vmul.f32 %v5875_v4, %v22264_v26  ;;  %v22265_v0 = vld [vmem:[#allocation193_spill] sm:$0xff]  ;;  %v22267_v49 = vld [vmem:[#allocation383_spill] sm:$0xff]  ;;  %v22269_v33 = vld [vmem:[#allocation178_spill] sm:$0xff] }
 0x52b   : > { %v5893_v22 = vsel %vm3102_vm1, %v22257_v19, %v5888_v5  ;;  %v17412_v19 = vadd.f32 %v17138_v30, %v4474_v56  ;;  %v4476_v5 = vadd.f32 %v16723_v12, %v3932_v34  ;;  %v17419_v44 = vmul.f32 %v5875_v4, %v22265_v0  ;;  %7344 = vmax.xlane.f32.xlu0 %v7343_v3  ;;  %v22271_v51 = vld [vmem:[#allocation195_spill] sm:$0xff]  ;;  %v22273_v56 = vld [vmem:[#allocation385_spill] sm:$0xff]  ;;  %v22274_v34 = vld [vmem:[#allocation180_spill] sm:$0xff] }
 0x52c   : > { %v17422_v43 = vmul.f32 %v5884_v20, %v22267_v49  ;;  %v22270_v14 = vrot.slane %v22269_v33, %v16206_v48  ;;  %v17429_v30 = vmul.f32 %v5884_v20, %v22271_v51  ;;  %v17432_v12 = vmul.f32 %v5893_v22, %v22273_v56  ;;  %v22276_v0 = vld [vmem:[#allocation166_spill] sm:$0xff]  ;;  %v22281_v20 = vld [vmem:[#allocation96_spill] sm:$0xff] }
 0x52d   : > { %22263 = vst [vmem:[#allocation221_spill] sm:$0xff] %v17412_v19  ;;  %22266 = vst [vmem:[#allocation242_spill] sm:$0xff] %v17419_v44  ;;  %v22275_v26 = vrot.slane %v22274_v34, %v16206_v48  ;;  %v4446_v49 = vadd.f32 %v22276_v0, %v3902_v47  ;;  %v22277_v44 = vld [vmem:[#allocation181_spill] sm:$0xff]  ;;  %v17449_v56 = vpop.permute.xlu1 %6743  ;;  %v22283_v34 = vld [vmem:[#allocation106_spill] sm:$0xff] }
 0x52e   : > { %22268 = vst [vmem:[#allocation224_spill] sm:$0xff] %v17422_v43  ;;  %v5902_v10 = vsel %vm3102_vm1, %v22270_v14, %v5897_v24  ;;  %22272 = vst [vmem:[#allocation245_spill] sm:$0xff] %v17429_v30  ;;  %v22278_v43 = vrot.slane %v22277_v44, %v16206_v48  ;;  %v22279_v24 = vld [vmem:[#allocation183_spill] sm:$0xff]  ;;  %v3363_v14 = vmul.f32 %v16746_v61, %v22281_v20  ;;  %v22290_v61 = vld [vmem:[#allocation388_spill] sm:$0xff] }
 0x52f   : > { %v5911_v4 = vsel %vm3102_vm1, %v22275_v26, %v5906_v50  ;;  %v22280_v3 = vrot.slane %v22279_v24, %v16206_v48  ;;  %22282 = vst [vmem:[#allocation226_spill] sm:$0xff] %v17449_v56  ;;  %v3905_v30 = vadd.f32 %v22283_v34, %v3361_v27  ;;  %v22284_v50 = vld [vmem:[#allocation197_spill] sm:$0xff]  ;;  %v22286_v47 = vld [vmem:[#allocation387_spill] sm:$0xff]  ;;  %v17474_v34 = vpop.permute.xlu0 %5227 }
 0x530   : > { %v5920_v33 = vsel %vm3102_vm1, %v22278_v43, %v5915_v40  ;;  %v17453_v26 = vmul.f32 %v5893_v22, %v22284_v50  ;;  %v17456_v0 = vmul.f32 %v5902_v10, %v22286_v47  ;;  %v7349_v43 = vsel %vm7264_vm2, %v17412_v19, -inf  ;;  %v22294_v22 = vld [vmem:[#allocation399_spill] sm:$0xff]  ;;  %v22295_v50 = vld [vmem:[#allocation137_spill] sm:$0xff]  ;;  %v22303_v19 = vld [vmem:[#allocation122_spill] sm:$0xff] }
 0x531   : > { %v5929_v51 = vsel %vm3102_vm1, %v22280_v3, %v5924_v8  ;;  %v17461_v40 = vadd.f32 %v17152_v63, %v4476_v5  ;;  %v22288_v8 = vld [vmem:[#allocation163_spill] sm:$0xff]  ;;  %v17467_v24 = vmul.f32 %v5911_v4, %v22290_v61  ;;  %v22292_v3 = vld [vmem:[#allocation165_spill] sm:$0xff]  ;;  %v5933_v20 = vrot.slane %v22294_v22, %v16200_v54  ;;  %7350 = vmax.xlane.f32.xlu0 %v7349_v43  ;;  %v22305_v43 = vld [vmem:[#allocation108_spill] sm:$0xff] }
 0x532   : > { %22285 = vst [vmem:[#allocation247_spill] sm:$0xff] %v17453_v26  ;;  %v17464_v44 = vmul.f32 %v5902_v10, %v22288_v8  ;;  %v17470_v27 = vmul.f32 %v5911_v4, %v22292_v3  ;;  %v17477_v47 = vmul.f32 %v5920_v33, %v22295_v50  ;;  %v22297_v63 = vld [vmem:[#allocation167_spill] sm:$0xff]  ;;  %v22299_v10 = vld [vmem:[#allocation72_spill] sm:$0xff]  ;;  %v17486_v61 = vadd.f32 %v16910_v1, %v4446_v49  ;;  %v22302_v4 = vld [vmem:[#allocation109_spill] sm:$0xff] }
 0x533   : > { %22287 = vst [vmem:[#allocation229_spill] sm:$0xff] %v17461_v40  ;;  %22291 = vst [vmem:[#allocation231_spill] sm:$0xff] %v17467_v24  ;;  %v17480_v5 = vmul.f32 %v5920_v33, %v22297_v63  ;;  %v17483_v8 = vmul.f32 %v5929_v51, %v22299_v10  ;;  %v3365_v3 = vmul.f32 %v16788_v7, %v22302_v4  ;;  %v22307_v33 = vld [vmem:[#allocation136_spill] sm:$0xff]  ;;  %v22308_v10 = vld [vmem:[#allocation149_spill] sm:$0xff]  ;;  %v7355_v7 = vsel %vm7264_vm2, %v17461_v40, -inf }
 0x534   : > { %22289 = vst [vmem:[#allocation249_spill] sm:$0xff] %v17464_v44  ;;  %22293 = vst [vmem:[#allocation251_spill] sm:$0xff] %v17470_v27  ;;  %v3367_v22 = vmul.f32 %v16830_v42, %v22303_v19  ;;  %v17492_v27 = vpop.permute.xlu1 %6751  ;;  %v4449_v50 = vadd.f32 %v22305_v43, %v3905_v30  ;;  %v22306_v44 = vld [vmem:[#allocation64_spill] sm:$0xff]  ;;  %v3369_v63 = vmul.f32 %v16869_v6, %v22307_v33  ;;  %v22309_v1 = vld [vmem:[#allocation162_spill] sm:$0xff] }
 0x535   : > { %22296 = vst [vmem:[#allocation233_spill] sm:$0xff] %v17477_v47  ;;  %22298 = vst [vmem:[#allocation253_spill] sm:$0xff] %v17480_v5  ;;  %v3907_v26 = vadd.f32 %v22306_v44, %v3363_v14  ;;  %v3371_v5 = vmul.f32 %v16896_v53, %v22308_v10  ;;  %v3373_v49 = vmul.f32 %v16934_v13, %v22309_v1  ;;  %v22310_v4 = vld [vmem:[#allocation185_spill] sm:$0xff]  ;;  %v22314_v6 = vld [vmem:[#allocation402_spill] sm:$0xff]  ;;  %7356 = vmax.xlane.f32.xlu0 %v7355_v7 }
 0x536   : > { %22300 = vst [vmem:[#allocation235_spill] sm:$0xff] %v17483_v8  ;;  %22301 = vst [vmem:[#allocation256_spill] sm:$0xff] %v17486_v61  ;;  %v22311_v42 = vrot.slane %v22310_v4, %v16206_v48  ;;  %v22313_v30 = vld [vmem:[#allocation401_spill] sm:$0xff]  ;;  %v5951_v44 = vrot.slane %v22314_v6, %v16200_v54  ;;  %v22315_v53 = vld [vmem:[#allocation404_spill] sm:$0xff]  ;;  %v17529_v6 = vadd.f32 %v16913_v29, %v4449_v50 }
 0x537   : > { %22304 = vst [vmem:[#allocation331_spill] sm:$0xff] %v17492_v27  ;;  %v5942_v14 = vrot.slane %v22313_v30, %v16200_v54  ;;  %v5960_v43 = vrot.slane %v22315_v53, %v16200_v54  ;;  %v22316_v13 = vld [vmem:[#allocation170_spill] sm:$0xff]  ;;  %v22317_v10 = vld [vmem:[#allocation179_spill] sm:$0xff]  ;;  %v17524_v30 = vpop.permute.xlu0 %5233 }
 0x538   : > { %v17508_v19 = vsel %vm3102_vm1, %v22311_v42, %v5933_v20  ;;  %v3375_v33 = vmul.f32 %v16985_v45, %v22316_v13  ;;  %v3377_v1 = vmul.f32 %v17028_v52, %v22317_v10  ;;  %v22318_v4 = vld [vmem:[#allocation38_spill] sm:$0xff]  ;;  %v7265_v42 = vsel %vm7264_vm2, %v17486_v61, -inf  ;;  %v17526_v40 = vpop.permute.xlu1 %6759  ;;  %22320 = vst [vmem:[#allocation333_spill] sm:$0xff] %v17529_v6  ;;  %v22323_v13 = vld [vmem:[#allocation77_spill] sm:$0xff]  ;;  %v22328_v24 = vld [vmem:[#allocation103_spill] sm:$0xff] }
 0x539   : > { %22312 = vst [vmem:[#allocation83_spill] sm:$0xff] %v17508_v19  ;;  %v3379_v20 = vmul.f32 %v17071_v39, %v22318_v4  ;;  %22319 = vst [vmem:[#allocation87_spill] sm:$0xff] %v17526_v40  ;;  %v22321_v7 = vld [vmem:[#allocation194_spill] sm:$0xff]  ;;  %v3911_v47 = vadd.f32 %v22323_v13, %v3367_v22  ;;  %v22324_v52 = vld [vmem:[#allocation169_spill] sm:$0xff]  ;;  %7266 = vmax.xlane.f32.xlu1 %v7265_v42  ;;  %v3917_v56 = vadd.f32 %v22328_v24, %v3373_v49 }
 0x53a   : > { %v4451_v53 = vadd.f32 %v22321_v7, %v3907_v26  ;;  %v22322_v8 = vld [vmem:[#allocation66_spill] sm:$0xff]  ;;  %v17535_v10 = vmul.f32 %v5929_v51, %v22324_v52  ;;  %v22327_v61 = vld [vmem:[#allocation145_spill] sm:$0xff]  ;;  %v22329_v40 = vld [vmem:[#allocation75_spill] sm:$0xff] }
 0x53b   : > { %v3909_v45 = vadd.f32 %v22322_v8, %v3365_v3  ;;  %v22326_v39 = vld [vmem:[#allocation70_spill] sm:$0xff]  ;;  %v3915_v27 = vadd.f32 %v22327_v61, %v3371_v5  ;;  %v17542_v29 = vmul.f32 %v17508_v19, %v22329_v40  ;;  %v22333_v3 = vld [vmem:[#allocation5_spill] sm:$0xff]  ;;  %v22337_v24 = vld [vmem:[#allocation47_spill] sm:$0xff] }
 0x53c   : > { %22325 = vst [vmem:[#allocation309_spill] sm:$0xff] %v17535_v10  ;;  %v3913_v4 = vadd.f32 %v22326_v39, %v3369_v63  ;;  %v22330_v50 = vld [vmem:[#allocation186_spill] sm:$0xff]  ;;  %v22334_v51 = vrot.slane %v22333_v3, %v16206_v48  ;;  %v22336_v63 = vld [vmem:[#allocation188_spill] sm:$0xff]  ;;  %v22338_v61 = vrot.slane %v22337_v24, %v16206_v48  ;;  %v22340_v49 = vld [vmem:[#allocation159_spill] sm:$0xff]  ;;  %v17567_v39 = vpop.permute.xlu1 %6767  ;;  %v4461_v24 = vadd.f32 %v16647_v18, %v3917_v56 }
 0x53d   : > { %v22331_v26 = vrot.slane %v22330_v50, %v16206_v48  ;;  %v3381_v5 = vmul.f32 %v17117_v28, %v22336_v63  ;;  %v3919_v42 = vadd.f32 %v22340_v49, %v3375_v33  ;;  %v22341_v7 = vld [vmem:[#allocation117_spill] sm:$0xff]  ;;  %v22342_v13 = vld [vmem:[#allocation123_spill] sm:$0xff]  ;;  %v17572_v50 = vadd.f32 %v16947_v37, %v4451_v53  ;;  %v22344_v28 = vld [vmem:[#allocation114_spill] sm:$0xff] }
 0x53e   : > { %v17554_v22 = vsel %vm3102_vm1, %v22334_v51, %v5951_v44  ;;  %v17562_v40 = vsel %vm3102_vm1, %v22338_v61, %v5960_v43  ;;  %v3923_v52 = vadd.f32 %v22342_v13, %v3379_v20  ;;  %v7274_v44 = vsel %vm7264_vm2, %v17529_v6, -inf  ;;  %v22345_v3 = vld [vmem:[#allocation182_spill] sm:$0xff]  ;;  %v22346_v43 = vld [vmem:[#allocation79_spill] sm:$0xff]  ;;  %v22348_v33 = vld [vmem:[#allocation120_spill] sm:$0xff] }
 0x53f   : > { %v17548_v8 = vsel %vm3102_vm1, %v22331_v26, %v5942_v14  ;;  %22335 = vst [vmem:[#allocation140_spill] sm:$0xff] %v17554_v22  ;;  %22339 = vst [vmem:[#allocation335_spill] sm:$0xff] %v17562_v40  ;;  %v3921_v14 = vadd.f32 %v22341_v7, %v3377_v1  ;;  %v4453_v26 = vadd.f32 %v22344_v28, %v3909_v45  ;;  %7275 = vmax.xlane.f32.xlu1 %v7274_v44  ;;  %v22349_v61 = vld [vmem:[#allocation389_spill] sm:$0xff]  ;;  %v22351_v37 = vld [vmem:[#allocation196_spill] sm:$0xff]  ;;  %v17591_v7 = vpop.permute.xlu0 %5239 }
 0x540   : > { %22332 = vst [vmem:[#allocation93_spill] sm:$0xff] %v17548_v8  ;;  %22343 = vst [vmem:[#allocation50_spill] sm:$0xff] %v17572_v50  ;;  %v4455_v51 = vadd.f32 %v22345_v3, %v3911_v47  ;;  %v17578_v63 = vmul.f32 %v17548_v8, %v22346_v43  ;;  %v4457_v1 = vadd.f32 %v22348_v33, %v3913_v4  ;;  %v22352_v45 = vld [vmem:[#allocation27_spill] sm:$0xff]  ;;  %v22353_v13 = vld [vmem:[#allocation177_spill] sm:$0xff]  ;;  %v17603_v33 = vpop.permute.xlu1 %6775 }
 0x541   : > { %v4459_v20 = vadd.f32 %v16638_v36, %v3915_v27  ;;  %v17585_v49 = vmul.f32 %v17554_v22, %v22349_v61  ;;  %v3383_v53 = vmul.f32 %v17171_v46, %v22351_v37  ;;  %v3385_v47 = vmul.f32 %v17212_v41, %v22352_v45  ;;  %v22354_v28 = vld [vmem:[#allocation390_spill] sm:$0xff]  ;;  %v22356_v18 = vld [vmem:[#allocation225_spill] sm:$0xff]  ;;  %v22357_v27 = vld [vmem:[#allocation132_spill] sm:$0xff]  ;;  %22359 = vst [vmem:[#allocation148_spill] sm:$0xff] %v17603_v33 }
 0x542   : > { %22347 = vst [vmem:[#allocation59_spill] sm:$0xff] %v17578_v63  ;;  %v3925_v44 = vadd.f32 %v22353_v13, %v3381_v5  ;;  %v17596_v4 = vmul.f32 %v17562_v40, %v22354_v28  ;;  %v4463_v36 = vadd.f32 %v16657_v31, %v3919_v42  ;;  %v4465_v56 = vadd.f32 %v22356_v18, %v3921_v14  ;;  %v22358_v43 = vld [vmem:[#allocation205_spill] sm:$0xff]  ;;  %v22369_v13 = vld [vmem:[#allocation142_spill] sm:$0xff]  ;;  %v22465_v63 = vld [vmem:[#allocation291_spill] sm:$0xff] }
 0x543   : > { %22350 = vst [vmem:[#allocation146_spill] sm:$0xff] %v17585_v49  ;;  %v4467_v3 = vadd.f32 %v22357_v27, %v3923_v52  ;;  %v3387_v46 = vmul.f32 %v17251_v57, %v22358_v43  ;;  %v7280_v41 = vsel %vm7264_vm2, %v17572_v50, -inf  ;;  %v17608_v5 = vadd.f32 %v16950_v60, %v4453_v26  ;;  %v22362_v37 = vld [vmem:[#allocation217_spill] sm:$0xff]  ;;  %v22378_v43 = vld [vmem:[#allocation147_spill] sm:$0xff]  ;;  %v22424_v50 = vld [vmem:[#allocation414_spill] sm:$0xff] }
 0x544   : > { %22355 = vst [vmem:[#allocation53_spill] sm:$0xff] %v17596_v4  ;;  %v17611_v61 = vadd.f32 %v16959_v55, %v4455_v51  ;;  %v3389_v31 = vmul.f32 %v17294_v11, %v22362_v37  ;;  %7281 = vmax.xlane.f32.xlu1 %v7280_v41  ;;  %v17616_v42 = vadd.f32 %v16969_v21, %v4457_v1  ;;  %v22366_v52 = vld [vmem:[#allocation141_spill] sm:$0xff]  ;;  %v22368_v55 = vld [vmem:[#allocation91_spill] sm:$0xff]  ;;  %v22370_v11 = vld [vmem:[#allocation102_spill] sm:$0xff] }
 0x545   : > { %22360 = vst [vmem:[#allocation151_spill] sm:$0xff] %v17608_v5  ;;  %v17619_v57 = vadd.f32 %v16991_v16, %v4459_v20  ;;  %v17622_v14 = vadd.f32 %v17012_v59, %v4461_v24  ;;  %v6373_v60 = vrot.slane %v22366_v52, %v16206_v48  ;;  %v22367_v26 = vld [vmem:[#allocation13_spill] sm:$0xff]  ;;  %v3927_v51 = vadd.f32 %v22368_v55, %v3383_v53  ;;  %v22371_v21 = vld [vmem:[#allocation262_spill] sm:$0xff]  ;;  %v22373_v16 = vld [vmem:[#allocation92_spill] sm:$0xff]  ;;  %v17644_v53 = vpop.permute.xlu1 %6783 }
 0x546   : > { %22361 = vst [vmem:[#allocation154_spill] sm:$0xff] %v17611_v61  ;;  %22363 = vst [vmem:[#allocation10_spill] sm:$0xff] %v17616_v42  ;;  %v4469_v45 = vadd.f32 %v22367_v26, %v3925_v44  ;;  %v3929_v28 = vadd.f32 %v22369_v13, %v3385_v47  ;;  %v6382_v18 = vrot.slane %v22370_v11, %v16206_v48  ;;  %v22376_v24 = vld [vmem:[#allocation187_spill] sm:$0xff]  ;;  %v17642_v44 = vpop.permute.xlu0 %5245  ;;  %v7286_v47 = vsel %vm7264_vm2, %v17608_v5, -inf  ;;  %v22379_v37 = vld [vmem:[#allocation156_spill] sm:$0xff] }
 0x547   : > { %22364 = vst [vmem:[#allocation157_spill] sm:$0xff] %v17619_v57  ;;  %22365 = vst [vmem:[#allocation254_spill] sm:$0xff] %v17622_v14  ;;  %v17632_v1 = vadd.f32 %v22371_v21, %v4463_v36  ;;  %v17635_v20 = vadd.f32 %v22373_v16, %v4465_v56  ;;  %v17638_v59 = vadd.f32 %v17082_v32, %v4467_v3  ;;  %v7292_v36 = vsel %vm7264_vm2, %v17611_v61, -inf  ;;  %v22380_v26 = vld [vmem:[#allocation121_spill] sm:$0xff]  ;;  %v22383_v11 = vld [vmem:[#allocation138_spill] sm:$0xff] }
 0x548   : > { %v6391_v27 = vrot.slane %v22376_v24, %v16206_v48  ;;  %22377 = vst [vmem:[#allocation54_spill] sm:$0xff] %v17644_v53  ;;  %v3931_v41 = vadd.f32 %v22378_v43, %v3387_v46  ;;  %7287 = vmax.xlane.f32.xlu1 %v7286_v47  ;;  %v7298_v32 = vsel %vm7264_vm2, %v17616_v42, -inf  ;;  %v7304_v56 = vsel %vm7264_vm2, %v17619_v57, -inf  ;;  %v22384_v16 = vld [vmem:[#allocation41_spill] sm:$0xff] }
 0x549   : > { %22372 = vst [vmem:[#allocation160_spill] sm:$0xff] %v17632_v1  ;;  %22374 = vst [vmem:[#allocation95_spill] sm:$0xff] %v17635_v20  ;;  %v17657_v3 = vsel %vm7264_vm2, %v17622_v14, -inf  ;;  %v3933_v52 = vadd.f32 %v22379_v37, %v3389_v31  ;;  %v22381_v55 = vrot.slane %v22380_v26, %v16200_v54  ;;  %v17665_v46 = vadd.f32 %v17097_v2, %v4469_v45  ;;  %v22385_v47 = vld [vmem:[#allocation125_spill] sm:$0xff] }
 0x54a   : > { %22375 = vst [vmem:[#allocation139_spill] sm:$0xff] %v17638_v59  ;;  %v4471_v21 = vadd.f32 %v22383_v11, %v3927_v51  ;;  %v4473_v24 = vadd.f32 %v22384_v16, %v3929_v28  ;;  %v22386_v43 = vrot.slane %v22385_v47, %v16200_v54  ;;  %v17675_v31 = vsel %vm7264_vm2, %v17632_v1, -inf  ;;  %v22389_v28 = vld [vmem:[#allocation16_spill] sm:$0xff]  ;;  %v22391_v11 = vld [vmem:[#allocation259_spill] sm:$0xff]  ;;  %v22392_v47 = vld [vmem:[#allocation406_spill] sm:$0xff] }
 0x54b   : > { %v6374_v13 = vsel %vm3102_vm1, %v6373_v60, %v22381_v55  ;;  %22382 = vst [vmem:[#allocation98_spill] sm:$0xff] %v17665_v46  ;;  %v17679_v37 = vsel %vm7264_vm2, %v17635_v20, -inf  ;;  %v17683_v2 = vsel %vm7264_vm2, %v17638_v59, -inf  ;;  %v22387_v60 = vld [vmem:[#allocation295_spill] sm:$0xff]  ;;  %v5313_v26 = vrot.slane %v17339_v25, %v16200_v54  ;;  %v17693_v55 = vpop.permute.xlu1 %6791  ;;  %v22393_v20 = vld [vmem:[#allocation276_spill] sm:$0xff]  ;;  %v17707_v25 = vpop.permute.xlu0 %5251  ;;  %v22423_v61 = vld [vmem:[#allocation281_spill] sm:$0xff] }
 0x54c   : > { %v6383_v6 = vsel %vm3102_vm1, %v6382_v18, %v22386_v43  ;;  %v22388_v45 = vrot.slane %v22387_v60, %v16200_v54  ;;  %v6400_v18 = vrot.slane %v22389_v28, %v16206_v48  ;;  %22390 = vst [vmem:[#allocation101_spill] sm:$0xff] %v17693_v55  ;;  %v4475_v16 = vadd.f32 %v22391_v11, %v3931_v41  ;;  %v22394_v60 = vld [vmem:[#allocation30_spill] sm:$0xff]  ;;  %v22396_v28 = vld [vmem:[#allocation192_spill] sm:$0xff] }
 0x54d   : > { %v17697_v43 = vmul.f32 %v6374_v13, %v22392_v47  ;;  %v17700_v14 = vmul.f32 %v6374_v13, %v22393_v20  ;;  %v6409_v42 = vrot.slane %v22394_v60, %v16206_v48  ;;  %7293 = vmax.xlane.f32.xlu1 %v7292_v36  ;;  %v6418_v5 = vrot.slane %v22396_v28, %v16206_v48  ;;  %v22399_v13 = vld [vmem:[#allocation408_spill] sm:$0xff]  ;;  %v22400_v36 = vld [vmem:[#allocation410_spill] sm:$0xff]  ;;  %v22401_v60 = vld [vmem:[#allocation277_spill] sm:$0xff] }
 0x54e   : > { %v6392_v51 = vsel %vm3102_vm1, %v6391_v27, %v22388_v45  ;;  %v22395_v27 = vld [vmem:[#allocation210_spill] sm:$0xff]  ;;  %v17711_v41 = vsel %vm7264_vm2, %v17665_v46, -inf  ;;  %v17714_v11 = vadd.f32 %v17130_v58, %v4471_v21  ;;  %v17717_v20 = vadd.f32 %v17141_v35, %v4473_v24  ;;  %v22403_v46 = vld [vmem:[#allocation412_spill] sm:$0xff]  ;;  %v22406_v24 = vld [vmem:[#allocation353_spill] sm:$0xff] }
 0x54f   : > { %v4477_v45 = vadd.f32 %v22395_v27, %v3933_v52  ;;  %v17720_v47 = vmul.f32 %v6383_v6, %v22399_v13  ;;  %v17723_v52 = vmul.f32 %v6383_v6, %v22400_v36  ;;  %v17726_v27 = vmul.f32 %v6392_v51, %v22401_v60  ;;  %v22402_v28 = vld [vmem:[#allocation150_spill] sm:$0xff]  ;;  %v22404_v58 = vld [vmem:[#allocation296_spill] sm:$0xff]  ;;  %v17743_v36 = vpop.permute.xlu1 %6799  ;;  %v17793_v40 = vpop.permute.xlu0 %5257 }
 0x550   : > { %22397 = vst [vmem:[#allocation338_spill] sm:$0xff] %v17714_v11  ;;  %22398 = vst [vmem:[#allocation340_spill] sm:$0xff] %v17717_v20  ;;  %v6427_v59 = vrot.slane %v22402_v28, %v16206_v48  ;;  %v17731_v1 = vmul.f32 %v6392_v51, %v22403_v46  ;;  %v22405_v21 = vrot.slane %v22404_v58, %v16200_v54  ;;  %v22410_v28 = vld [vmem:[#allocation298_spill] sm:$0xff] }
 0x551   : > { %v22407_v13 = vrot.slane %v22406_v24, %v16206_v48  ;;  %22408 = vst [vmem:[#allocation208_spill] sm:$0xff] %v17743_v36  ;;  %v17746_v60 = vadd.f32 %v17155_v15, %v4475_v16  ;;  %v22411_v46 = vrot.slane %v22410_v28, %v16200_v54  ;;  %v22412_v58 = vld [vmem:[#allocation222_spill] sm:$0xff]  ;;  %7299 = vmax.xlane.f32.xlu1 %v7298_v32  ;;  %v22415_v24 = vld [vmem:[#allocation300_spill] sm:$0xff]  ;;  %v22417_v16 = vld [vmem:[#allocation263_spill] sm:$0xff] }
 0x552   : > { %v6401_v35 = vsel %vm3102_vm1, %v6400_v18, %v22405_v21  ;;  %v6436_v57 = vrot.slane %v22412_v58, %v16206_v48  ;;  %v5322_v18 = vrot.slane %v17402_v17, %v16200_v54  ;;  %v22413_v21 = vld [vmem:[#allocation206_spill] sm:$0xff]  ;;  %v6445_v28 = vrot.slane %v22417_v16, %v16206_v48  ;;  %v22418_v17 = vld [vmem:[#allocation279_spill] sm:$0xff]  ;;  %v22422_v16 = vld [vmem:[#allocation413_spill] sm:$0xff] }
 0x553   : > { %v17741_v6 = vsel %vm3102_vm1, %v22407_v13, %v5313_v26  ;;  %22409 = vst [vmem:[#allocation152_spill] sm:$0xff] %v17746_v60  ;;  %v6410_v51 = vsel %vm3102_vm1, %v6409_v42, %v22411_v46  ;;  %v17757_v26 = vadd.f32 %v22413_v21, %v4477_v45  ;;  %v22416_v13 = vrot.slane %v22415_v24, %v16200_v54  ;;  %v22419_v45 = vld [vmem:[#allocation302_spill] sm:$0xff]  ;;  %v17872_v53 = vpop.permute.xlu0 %5263 }
 0x554   : > { %v17767_v42 = vsel %vm7264_vm2, %v17714_v11, -inf  ;;  %v17771_v46 = vsel %vm7264_vm2, %v17717_v20, -inf  ;;  %v17774_v32 = vmul.f32 %v6401_v35, %v22418_v17  ;;  %v22420_v58 = vrot.slane %v22419_v45, %v16200_v54  ;;  %v17795_v45 = vpop.permute.xlu1 %6807 }
 0x555   : > { %22414 = vst [vmem:[#allocation63_spill] sm:$0xff] %v17757_v26  ;;  %v6419_v15 = vsel %vm3102_vm1, %v6418_v5, %v22416_v13  ;;  %v22421_v5 = vld [vmem:[#allocation324_spill] sm:$0xff]  ;;  %v5331_v13 = vrot.slane %v17474_v34, %v16200_v54  ;;  %v17785_v11 = vmul.f32 %v6401_v35, %v22422_v16  ;;  %v17788_v20 = vmul.f32 %v6410_v51, %v22423_v61  ;;  %v22429_v16 = vld [vmem:[#allocation355_spill] sm:$0xff] }
 0x556   : > { %v6428_v21 = vsel %vm3102_vm1, %v6427_v59, %v22420_v58  ;;  %v5566_v24 = vmul.f32 %v17741_v6, %v22421_v5  ;;  %v17791_v17 = vmul.f32 %v6410_v51, %v22424_v50  ;;  %22425 = vst [vmem:[#allocation257_spill] sm:$0xff] %v17795_v45  ;;  %v17799_v59 = vsel %vm7264_vm2, %v17746_v60, -inf  ;;  %v22426_v58 = vld [vmem:[#allocation283_spill] sm:$0xff]  ;;  %v22427_v34 = vld [vmem:[#allocation304_spill] sm:$0xff]  ;;  %7305 = vmax.xlane.f32.xlu1 %v7304_v56 }
 0x557   : > { %v17802_v5 = vmul.f32 %v6419_v15, %v22426_v58  ;;  %v22428_v35 = vrot.slane %v22427_v34, %v16200_v54  ;;  %v22430_v50 = vrot.slane %v22429_v16, %v16206_v48  ;;  %v17816_v22 = vsel %vm7264_vm2, %v17757_v26, -inf  ;;  %v22431_v60 = vld [vmem:[#allocation415_spill] sm:$0xff]  ;;  %v22432_v58 = vld [vmem:[#allocation285_spill] sm:$0xff]  ;;  %v22433_v34 = vld [vmem:[#allocation306_spill] sm:$0xff] }
 0x558   : > { %v17819_v8 = vmul.f32 %v6419_v15, %v22431_v60  ;;  %v17822_v19 = vmul.f32 %v6428_v21, %v22432_v58  ;;  %v22435_v16 = vld [vmem:[#allocation241_spill] sm:$0xff]  ;;  %v22436_v56 = vld [vmem:[#allocation248_spill] sm:$0xff]  ;;  %v6110_v60 = vadd.f32 %v17299_v38, %v5566_v24  ;;  %v6816_v4 = vpop.permute.xlu1 %6815 }
 0x559   : > { %v6437_v61 = vsel %vm3102_vm1, %v6436_v57, %v22428_v35  ;;  %v17812_v51 = vsel %vm3102_vm1, %v22430_v50, %v5322_v18  ;;  %v22434_v57 = vrot.slane %v22433_v34, %v16200_v54  ;;  %v6454_v18 = vrot.slane %v22435_v16, %v16206_v48  ;;  %v22437_v26 = vld [vmem:[#allocation252_spill] sm:$0xff]  ;;  %v22438_v15 = vld [vmem:[#allocation357_spill] sm:$0xff]  ;;  %v22440_v34 = vld [vmem:[#allocation243_spill] sm:$0xff] }
 0x55a   : > { %v6463_v50 = vrot.slane %v22436_v56, %v16206_v48  ;;  %v6472_v10 = vrot.slane %v22437_v26, %v16206_v48  ;;  %v22439_v58 = vrot.slane %v22438_v15, %v16206_v48  ;;  %v17842_v36 = vmul.f32 %v6428_v21, %v22440_v34  ;;  %v22443_v16 = vld [vmem:[#allocation325_spill] sm:$0xff]  ;;  %v22444_v38 = vld [vmem:[#allocation416_spill] sm:$0xff]  ;;  %7311 = vmax.xlane.f32.xlu1 %v17657_v3  ;;  %v22448_v34 = vld [vmem:[#allocation419_spill] sm:$0xff] }
 0x55b   : > { %v6446_v35 = vsel %vm3102_vm1, %v6445_v28, %v22434_v57  ;;  %v22442_v28 = vld [vmem:[#allocation287_spill] sm:$0xff]  ;;  %v5568_v56 = vmul.f32 %v17812_v51, %v22443_v16  ;;  %v5340_v26 = vrot.slane %v17524_v30, %v16200_v54  ;;  %v17852_v24 = vmul.f32 %v6437_v61, %v22444_v38  ;;  %v22446_v15 = vld [vmem:[#allocation289_spill] sm:$0xff] }
 0x55c   : > { %v17839_v45 = vsel %vm3102_vm1, %v22439_v58, %v5331_v13  ;;  %22441 = vst [vmem:[#allocation133_spill] sm:$0xff] %v17842_v36  ;;  %v17845_v57 = vmul.f32 %v6437_v61, %v22442_v28  ;;  %v17855_v55 = vmul.f32 %v6446_v35, %v22446_v15  ;;  %v22447_v13 = vld [vmem:[#allocation258_spill] sm:$0xff]  ;;  %v6913_v58 = vrot.slane %v6816_v4, %v16200_v54  ;;  %v22450_v16 = vld [vmem:[#allocation307_spill] sm:$0xff]  ;;  %v22452_v61 = vld [vmem:[#allocation69_spill] sm:$0xff] }
 0x55d   : > { %22445 = vst [vmem:[#allocation104_spill] sm:$0xff] %v17852_v24  ;;  %v6481_v21 = vrot.slane %v22447_v13, %v16206_v48  ;;  %v17862_v28 = vmul.f32 %v6446_v35, %v22448_v34  ;;  %v22451_v30 = vrot.slane %v22450_v16, %v16200_v54  ;;  %v6490_v38 = vrot.slane %v22452_v61, %v16206_v48  ;;  %v22453_v15 = vld [vmem:[#allocation45_spill] sm:$0xff]  ;;  %v22454_v13 = vld [vmem:[#allocation84_spill] sm:$0xff] }
 0x55e   : > { %v5570_v24 = vmul.f32 %v17839_v45, %v22453_v15  ;;  %v22455_v4 = vrot.slane %v22454_v13, %v16200_v54  ;;  %v22457_v35 = vld [vmem:[#allocation308_spill] sm:$0xff]  ;;  %v6654_v15 = vadd.f32 %v17697_v43, %v6110_v60  ;;  %v22462_v13 = vld [vmem:[#allocation359_spill] sm:$0xff]  ;;  %7317 = vmax.xlane.f32.xlu1 %v17675_v31 }
 0x55f   : > { %22449 = vst [vmem:[#allocation107_spill] sm:$0xff] %v17862_v28  ;;  %v6455_v49 = vsel %vm3102_vm1, %v6454_v18, %v22451_v30  ;;  %v22458_v34 = vrot.slane %v22457_v35, %v16200_v54  ;;  %v22460_v18 = vld [vmem:[#allocation379_spill] sm:$0xff]  ;;  %v6112_v28 = vadd.f32 %v17328_v9, %v5568_v56  ;;  %v22464_v35 = vld [vmem:[#allocation360_spill] sm:$0xff]  ;;  %v22468_v9 = vld [vmem:[#allocation310_spill] sm:$0xff] }
 0x560   : > { %v17878_v3 = vsel %vm3102_vm1, %v6463_v50, %v22455_v4  ;;  %v22461_v30 = vrot.slane %v22460_v18, %v16206_v48  ;;  %v22463_v50 = vrot.slane %v22462_v13, %v16206_v48  ;;  %v6822_v18 = vpop.permute.xlu1 %6821  ;;  %v22469_v60 = vrot.slane %v22468_v9, %v16200_v54  ;;  %v22477_v9 = vld [vmem:[#allocation293_spill] sm:$0xff] }
 0x561   : > { %22456 = vst [vmem:[#allocation313_spill] sm:$0xff] %v17878_v3  ;;  %v17884_v16 = vsel %vm3102_vm1, %v6472_v10, %v22458_v34  ;;  %v5349_v10 = vrot.slane %v17591_v7, %v16200_v54  ;;  %v22471_v7 = vld [vmem:[#allocation311_spill] sm:$0xff]  ;;  %v6656_v33 = vadd.f32 %v17720_v47, %v6112_v28 }
 0x562   : > { %22459 = vst [vmem:[#allocation314_spill] sm:$0xff] %v17884_v16  ;;  %v17890_v61 = vsel %vm3102_vm1, %v22461_v30, %v6913_v58  ;;  %v17898_v4 = vsel %vm3102_vm1, %v22463_v50, %v5340_v26  ;;  %v17905_v58 = vmul.f32 %v6455_v49, %v22465_v63  ;;  %v22466_v30 = vld [vmem:[#allocation67_spill] sm:$0xff]  ;;  %v17914_v56 = vsel %vm3102_vm1, %v6481_v21, %v22469_v60  ;;  %v22474_v63 = vld [vmem:[#allocation80_spill] sm:$0xff] }
 0x563   : > { %v7166_v34 = vmul.f32 %v17890_v61, %v22464_v35  ;;  %v17908_v43 = vmul.f32 %v6455_v49, %v22466_v30  ;;  %22470 = vst [vmem:[#allocation57_spill] sm:$0xff] %v17914_v56  ;;  %v6922_v26 = vrot.slane %v6822_v18, %v16200_v54  ;;  %v22472_v13 = vrot.slane %v22471_v7, %v16200_v54  ;;  %v22475_v35 = vld [vmem:[#allocation288_spill] sm:$0xff]  ;;  %v17930_v21 = vld [vmem:[%s20580_s2] sm:$0xff] }
 0x564   : > { %v6499_v49 = vrot.slane %v22474_v63, %v16206_v48  ;;  %v6114_v30 = vadd.f32 %v22475_v35, %v5570_v24  ;;  %v22476_v18 = vld [vmem:[#allocation292_spill] sm:$0xff]  ;;  %v17938_v60 = vmul.f32 %v17884_v16, %v22477_v9  ;;  %v22483_v9 = vld [vmem:[#allocation230_spill] sm:$0xff]  ;;  %7323 = vmax.xlane.f32.xlu1 %v17679_v37  ;;  %v22492_v28 = vld [vmem:[#allocation175_spill] sm:$0xff] }
 0x565   : > { %22467 = vst [vmem:[#allocation342_spill] sm:$0xff] %v17908_v43  ;;  %v17922_v50 = vsel %vm3102_vm1, %v6490_v38, %v22472_v13  ;;  %v7198_v43 = vadd.f32 %v7166_v34, %v6654_v15  ;;  %v17934_v31 = vmul.f32 %v17878_v3, %v22476_v18  ;;  %v22478_v38 = vld [vmem:[#allocation127_spill] sm:$0xff]  ;;  %v22479_v13 = vld [vmem:[#allocation44_spill] sm:$0xff]  ;;  %v22481_v34 = vld [vmem:[#allocation361_spill] sm:$0xff]  ;;  %v5358_v18 = vrot.slane %v17642_v44, %v16200_v54  ;;  %v17954_v3 = vpop.permute.xlu0 %5269 }
 0x566   : > { %22473 = vst [vmem:[#allocation344_spill] sm:$0xff] %v17922_v50  ;;  %v5572_v7 = vmul.f32 %v17898_v4, %v22478_v38  ;;  %v22480_v24 = vrot.slane %v22479_v13, %v16206_v48  ;;  %v22482_v63 = vrot.slane %v22481_v34, %v16206_v48  ;;  %v6828_v38 = vpop.permute.xlu1 %6827  ;;  %v22484_v13 = vld [vmem:[#allocation294_spill] sm:$0xff] }
 0x567   : > { %v17970_v44 = vadd.f32 %v17930_v21, %v7198_v43  ;;  %v22495_v37 = vld [vmem:[#allocation382_spill] sm:$0xff] }
 0x568   : > { %v17946_v15 = vsel %vm3102_vm1, %v22480_v24, %v6922_v26  ;;  %v5354_v35 = vsel %vm3102_vm1, %v22482_v63, %v5349_v10  ;;  %v17961_v26 = vmul.f32 %v17914_v56, %v22484_v13  ;;  %v22486_v24 = vld [vmem:[#allocation71_spill] sm:$0xff]  ;;  %v6931_v10 = vrot.slane %v6828_v38, %v16200_v54  ;;  %v22489_v63 = vld [vmem:[#allocation312_spill] sm:$0xff]  ;;  %7329 = vmax.xlane.f32.xlu1 %v17683_v2 }
 0x569   : > { %v7168_v16 = vmul.f32 %v17946_v15, %v22483_v9  ;;  %v17965_v34 = vmul.f32 %v17922_v50, %v22486_v24  ;;  %22488 = vst [vmem:[#allocation86_spill] sm:$0xff] %v17970_v44  ;;  %v22490_v9 = vrot.slane %v22489_v63, %v16200_v54  ;;  %v5567_v13 = vmul.f32 %v17741_v6, %v22492_v28  ;;  %v22493_v50 = vld [vmem:[#allocation48_spill] sm:$0xff]  ;;  %v22497_v63 = vld [vmem:[#allocation363_spill] sm:$0xff]  ;;  %v22499_v6 = vld [vmem:[#allocation209_spill] sm:$0xff] }
 0x56a   : > { %22485 = vst [vmem:[#allocation223_spill] sm:$0xff] %v17961_v26  ;;  %v6658_v24 = vadd.f32 %v17726_v27, %v6114_v30  ;;  %v22494_v38 = vld [vmem:[#allocation144_spill] sm:$0xff]  ;;  %v22496_v43 = vrot.slane %v22495_v37, %v16206_v48  ;;  %v5367_v27 = vrot.slane %v17707_v25, %v16200_v54  ;;  %v22502_v28 = vld [vmem:[#allocation265_spill] sm:$0xff] }
 0x56b   : > { %22487 = vst [vmem:[#allocation396_spill] sm:$0xff] %v17965_v34  ;;  %v17976_v47 = vsel %vm3102_vm1, %v6499_v49, %v22490_v9  ;;  %v7200_v56 = vadd.f32 %v7168_v16, %v6656_v33  ;;  %v6116_v34 = vadd.f32 %v22493_v50, %v5572_v7  ;;  %v5574_v26 = vmul.f32 %v5354_v35, %v22494_v38  ;;  %v6834_v50 = vpop.permute.xlu1 %6833  ;;  %v22501_v7 = vld [vmem:[#allocation56_spill] sm:$0xff] }
 0x56c   : > { %22491 = vst [vmem:[#allocation78_spill] sm:$0xff] %v17976_v47  ;;  %v17987_v36 = vsel %vm3102_vm1, %v22496_v43, %v6931_v10  ;;  %v7361_v49 = vsel %vm7264_vm2, %v17970_v44, -inf  ;;  %v22498_v9 = vrot.slane %v22497_v63, %v16206_v48  ;;  %v18006_v10 = vmul.f32 %v17976_v47, %v22501_v7  ;;  %v22504_v43 = vld [vmem:[#allocation284_spill] sm:$0xff]  ;;  %v22506_v44 = vld [vmem:[#allocation218_spill] sm:$0xff]  ;;  %v22507_v47 = vld [vmem:[#allocation261_spill] sm:$0xff]  ;;  %7335 = vmax.xlane.f32.xlu1 %v17711_v41 }
 0x56d   : > { %v7170_v16 = vmul.f32 %v17987_v36, %v22499_v6  ;;  %7362 = vmax.xlane.f32.xlu0 %v7361_v49  ;;  %v18002_v30 = vadd.f32 %v17930_v21, %v7200_v56  ;;  %v6940_v25 = vrot.slane %v6834_v50, %v16200_v54  ;;  %v6111_v49 = vadd.f32 %v22504_v43, %v5567_v13  ;;  %v22505_v63 = vld [vmem:[#allocation328_spill] sm:$0xff] }
 0x56e   : > { %v17995_v33 = vsel %vm3102_vm1, %v22498_v9, %v5358_v18  ;;  %v22503_v18 = vld [vmem:[#allocation326_spill] sm:$0xff]  ;;  %v5571_v56 = vmul.f32 %v17839_v45, %v22505_v63  ;;  %v18017_v9 = vpop.permute.xlu0 %5275  ;;  %v6118_v38 = vadd.f32 %v22506_v44, %v5574_v26  ;;  %v6660_v13 = vadd.f32 %v17774_v32, %v6116_v34  ;;  %v22510_v45 = vld [vmem:[#allocation365_spill] sm:$0xff]  ;;  %v22512_v44 = vld [vmem:[#allocation211_spill] sm:$0xff] }
 0x56f   : > { %22500 = vst [vmem:[#allocation58_spill] sm:$0xff] %v18002_v30  ;;  %v5569_v37 = vmul.f32 %v17812_v51, %v22503_v18  ;;  %v7367_v6 = vsel %vm7264_vm2, %v18002_v30, -inf  ;;  %v7202_v7 = vadd.f32 %v7170_v16, %v6658_v24  ;;  %v5576_v51 = vmul.f32 %v17995_v33, %v22507_v47  ;;  %v22508_v18 = vld [vmem:[#allocation384_spill] sm:$0xff]  ;;  %v6840_v24 = vpop.permute.xlu1 %6839  ;;  %v22515_v32 = vld [vmem:[#allocation330_spill] sm:$0xff] }
 0x570   : > { %v22509_v50 = vrot.slane %v22508_v18, %v16206_v48  ;;  %v22511_v43 = vrot.slane %v22510_v45, %v16206_v48  ;;  %v5376_v26 = vrot.slane %v17793_v40, %v16200_v54  ;;  %v5573_v34 = vmul.f32 %v17898_v4, %v22515_v32  ;;  %v22517_v40 = vld [vmem:[#allocation290_spill] sm:$0xff]  ;;  %7341 = vmax.xlane.f32.xlu1 %v17767_v42 }
 0x571   : > { %7368 = vmax.xlane.f32.xlu0 %v7367_v6  ;;  %v18042_v16 = vadd.f32 %v17930_v21, %v7202_v7  ;;  %v6655_v7 = vadd.f32 %v17700_v14, %v6111_v49  ;;  %v6120_v30 = vadd.f32 %v17416_v62, %v5576_v51  ;;  %v22519_v4 = vld [vmem:[#allocation386_spill] sm:$0xff]  ;;  %v6662_v41 = vadd.f32 %v17788_v20, %v6118_v38 }
 0x572   : > { %v18028_v2 = vsel %vm3102_vm1, %v22509_v50, %v6940_v25  ;;  %v18035_v63 = vsel %vm3102_vm1, %v22511_v43, %v5367_v27  ;;  %v22514_v25 = vld [vmem:[#allocation214_spill] sm:$0xff]  ;;  %v22516_v50 = vld [vmem:[#allocation332_spill] sm:$0xff]  ;;  %v6949_v27 = vrot.slane %v6840_v24, %v16200_v54  ;;  %v6115_v43 = vadd.f32 %v22517_v40, %v5571_v56  ;;  %v18072_v14 = vpop.permute.xlu0 %5281 }
 0x573   : > { %v7172_v47 = vmul.f32 %v18028_v2, %v22512_v44  ;;  %22513 = vst [vmem:[#allocation315_spill] sm:$0xff] %v18042_v16  ;;  %v6113_v18 = vadd.f32 %v22514_v25, %v5569_v37  ;;  %v5575_v45 = vmul.f32 %v5354_v35, %v22516_v50  ;;  %v7373_v6 = vsel %vm7264_vm2, %v18042_v16, -inf  ;;  %v22518_v37 = vld [vmem:[#allocation237_spill] sm:$0xff]  ;;  %v22521_v56 = vld [vmem:[#allocation366_spill] sm:$0xff] }
 0x574   : > { %v5578_v25 = vmul.f32 %v18035_v63, %v22518_v37  ;;  %v22520_v35 = vrot.slane %v22519_v4, %v16206_v48  ;;  %v22522_v32 = vrot.slane %v22521_v56, %v16206_v48  ;;  %v5385_v62 = vrot.slane %v17872_v53, %v16200_v54  ;;  %v22523_v49 = vld [vmem:[#allocation234_spill] sm:$0xff]  ;;  %v22526_v4 = vld [vmem:[#allocation239_spill] sm:$0xff]  ;;  %7347 = vmax.xlane.f32.xlu1 %v17771_v46 }
 0x575   : > { %v7204_v44 = vadd.f32 %v7172_v47, %v6660_v13  ;;  %7374 = vmax.xlane.f32.xlu0 %v7373_v6  ;;  %v6846_v47 = vpop.permute.xlu1 %6845  ;;  %v22525_v20 = vld [vmem:[#allocation238_spill] sm:$0xff]  ;;  %v6657_v53 = vadd.f32 %v17723_v52, %v6113_v18  ;;  %v5394_v40 = vrot.slane %v17954_v3, %v16200_v54  ;;  %v6664_v3 = vadd.f32 %v17802_v5, %v6120_v30  ;;  %v22530_v18 = vld [vmem:[#allocation224_spill] sm:$0xff] }
 0x576   : > { %v18061_v24 = vsel %vm3102_vm1, %v22520_v35, %v6949_v27  ;;  %v18068_v13 = vsel %vm3102_vm1, %v22522_v32, %v5376_v26  ;;  %v6117_v38 = vadd.f32 %v22525_v20, %v5573_v34  ;;  %v6119_v27 = vadd.f32 %v17407_v23, %v5575_v45  ;;  %v22527_v23 = vld [vmem:[#allocation268_spill] sm:$0xff]  ;;  %v22528_v35 = vld [vmem:[#allocation134_spill] sm:$0xff] }
 0x577   : > { %v7174_v51 = vmul.f32 %v18061_v24, %v22523_v49  ;;  %v18077_v50 = vadd.f32 %v17930_v21, %v7204_v44  ;;  %v6958_v26 = vrot.slane %v6846_v47, %v16200_v54  ;;  %v18089_v44 = vadd.f32 %v17731_v1, %v6115_v43  ;;  %v22533_v32 = vld [vmem:[#allocation236_spill] sm:$0xff]  ;;  %v22535_v47 = vld [vmem:[#allocation334_spill] sm:$0xff] }
 0x578   : > { %v5580_v34 = vmul.f32 %v18068_v13, %v22526_v4  ;;  %v7167_v45 = vmul.f32 %v17890_v61, %v22527_v23  ;;  %v22529_v42 = vrot.slane %v22528_v35, %v16206_v48  ;;  %v6122_v56 = vadd.f32 %v22530_v18, %v5578_v25  ;;  %v22542_v18 = vld [vmem:[#allocation240_spill] sm:$0xff]  ;;  %7353 = vmax.xlane.f32.xlu1 %v17799_v59 }
 0x579   : > { %22524 = vst [vmem:[#allocation316_spill] sm:$0xff] %v18077_v50  ;;  %v7379_v6 = vsel %vm7264_vm2, %v18077_v50, -inf  ;;  %v7206_v37 = vadd.f32 %v7174_v51, %v6662_v41  ;;  %v22531_v41 = vld [vmem:[#allocation367_spill] sm:$0xff]  ;;  %v6852_v61 = vpop.permute.xlu1 %6851  ;;  %v5577_v20 = vmul.f32 %v17995_v33, %v22535_v47  ;;  %v18119_v30 = vadd.f32 %v17785_v11, %v6117_v38  ;;  %v5288_v33 = vpop.permute.xlu0 %5287  ;;  %v22538_v38 = vld [vmem:[#allocation246_spill] sm:$0xff] }
 0x57a   : > { %v18099_v52 = vsel %vm3102_vm1, %v22529_v42, %v6958_v26  ;;  %v22532_v1 = vrot.slane %v22531_v41, %v16206_v48  ;;  %7380 = vmax.xlane.f32.xlu0 %v7379_v6  ;;  %v6967_v5 = vrot.slane %v6852_v61, %v16200_v54  ;;  %v18122_v25 = vadd.f32 %v17791_v17, %v6119_v27  ;;  %v22539_v27 = vld [vmem:[#allocation55_spill] sm:$0xff]  ;;  %v22541_v42 = vld [vmem:[#allocation362_spill] sm:$0xff] }
 0x57b   : > { %v7176_v49 = vmul.f32 %v18099_v52, %v22533_v32  ;;  %v18112_v51 = vadd.f32 %v17930_v21, %v7206_v37  ;;  %v5403_v37 = vrot.slane %v18017_v9, %v16200_v54  ;;  %v6124_v11 = vadd.f32 %v17432_v12, %v5580_v34  ;;  %v22544_v32 = vld [vmem:[#allocation242_spill] sm:$0xff] }
 0x57c   : > { %v18107_v43 = vsel %vm3102_vm1, %v22532_v1, %v5385_v62  ;;  %v22536_v62 = vld [vmem:[#allocation368_spill] sm:$0xff]  ;;  %v22540_v23 = vrot.slane %v22539_v27, %v16206_v48  ;;  %v7169_v9 = vmul.f32 %v17946_v15, %v22541_v42  ;;  %v6666_v34 = vadd.f32 %v17822_v19, %v6122_v56  ;;  %v22553_v42 = vld [vmem:[#allocation226_spill] sm:$0xff]  ;;  %7359 = vmax.xlane.f32.xlu1 %v17816_v22 }
 0x57d   : > { %22534 = vst [vmem:[#allocation347_spill] sm:$0xff] %v18112_v51  ;;  %v22537_v26 = vrot.slane %v22536_v62, %v16206_v48  ;;  %v7385_v4 = vsel %vm7264_vm2, %v18112_v51, -inf  ;;  %v7208_v46 = vadd.f32 %v7176_v49, %v6664_v3  ;;  %v5582_v17 = vmul.f32 %v18107_v43, %v22538_v38  ;;  %v6858_v3 = vpop.permute.xlu1 %6857  ;;  %v18154_v1 = vld [vmem:[%s20580_s2 + $0x8] sm:$0xff]  ;;  %v22546_v49 = vld [vmem:[#allocation250_spill] sm:$0xff]  ;;  %v5294_v27 = vpop.permute.xlu0 %5293 }
 0x57e   : > { %v18141_v35 = vsel %vm3102_vm1, %v22540_v23, %v6967_v5  ;;  %7386 = vmax.xlane.f32.xlu0 %v7385_v4  ;;  %v6976_v47 = vrot.slane %v6858_v3, %v16200_v54  ;;  %v22547_v5 = vld [vmem:[#allocation369_spill] sm:$0xff]  ;;  %v5412_v62 = vrot.slane %v18072_v14, %v16200_v54  ;;  %v22549_v4 = vld [vmem:[#allocation60_spill] sm:$0xff]  ;;  %v22555_v3 = vld [vmem:[#allocation231_spill] sm:$0xff] }
 0x57f   : > { %v18128_v6 = vsel %vm3102_vm1, %v22537_v26, %v5394_v40  ;;  %v7199_v40 = vadd.f32 %v7167_v45, %v6655_v7  ;;  %v7178_v41 = vmul.f32 %v18141_v35, %v22542_v18  ;;  %v18148_v12 = vadd.f32 %v17930_v21, %v7208_v46  ;;  %v22545_v45 = vld [vmem:[#allocation336_spill] sm:$0xff] }
 0x580   : > { %v6121_v7 = vadd.f32 %v22544_v32, %v5577_v20  ;;  %v5579_v15 = vmul.f32 %v18035_v63, %v22545_v45  ;;  %v5584_v61 = vmul.f32 %v18128_v6, %v22546_v49  ;;  %v22548_v19 = vrot.slane %v22547_v5, %v16206_v48  ;;  %v22552_v23 = vld [vmem:[#allocation364_spill] sm:$0xff]  ;;  %v22556_v32 = vld [vmem:[#allocation255_spill] sm:$0xff] }
 0x581   : > { %22543 = vst [vmem:[#allocation61_spill] sm:$0xff] %v18148_v12  ;;  %v7391_v20 = vsel %vm7264_vm2, %v18148_v12, -inf  ;;  %v7210_v63 = vadd.f32 %v7178_v41, %v6666_v34  ;;  %v6126_v26 = vadd.f32 %v17456_v0, %v5582_v17  ;;  %v22550_v46 = vrot.slane %v22549_v4, %v16206_v48  ;;  %v6864_v0 = vpop.permute.xlu1 %6863 }
 0x582   : > { %v18167_v56 = vsel %vm3102_vm1, %v22548_v19, %v5403_v37  ;;  %v18181_v38 = vadd.f32 %v18154_v1, %v7199_v40  ;;  %v6668_v37 = vadd.f32 %v17845_v57, %v6124_v11  ;;  %v7171_v14 = vmul.f32 %v17987_v36, %v22552_v23  ;;  %7392 = vmax.xlane.f32.xlu0 %v7391_v20  ;;  %v22557_v11 = vld [vmem:[#allocation370_spill] sm:$0xff]  ;;  %v22562_v20 = vld [vmem:[#allocation331_spill] sm:$0xff] }
 0x583   : > { %v18178_v59 = vsel %vm3102_vm1, %v22550_v46, %v6976_v47  ;;  %v18189_v17 = vadd.f32 %v17930_v21, %v7210_v63  ;;  %v7201_v41 = vadd.f32 %v7169_v9, %v6657_v53  ;;  %v6128_v34 = vadd.f32 %v22555_v3, %v5584_v61  ;;  %v22559_v47 = vld [vmem:[#allocation4_spill] sm:$0xff]  ;;  %v22560_v19 = vld [vmem:[#allocation18_spill] sm:$0xff] }
 0x584   : > { %22551 = vst [vmem:[#allocation317_spill] sm:$0xff] %v18181_v38  ;;  %v7180_v18 = vmul.f32 %v18178_v59, %v22553_v42  ;;  %v5586_v40 = vmul.f32 %v18167_v56, %v22556_v32  ;;  %v6985_v57 = vrot.slane %v6864_v0, %v16200_v54  ;;  %v18197_v36 = vadd.f32 %v17819_v8, %v6121_v7  ;;  %v22566_v42 = vld [vmem:[#allocation65_spill] sm:$0xff]  ;;  %v22568_v32 = vld [vmem:[#allocation371_spill] sm:$0xff] }
 0x585   : > { %22554 = vst [vmem:[#allocation212_spill] sm:$0xff] %v18189_v17  ;;  %v22558_v45 = vrot.slane %v22557_v11, %v16206_v48  ;;  %v5421_v53 = vrot.slane %v5288_v33, %v16200_v54  ;;  %v7397_v9 = vsel %vm7264_vm2, %v18189_v17, -inf  ;;  %v7173_v5 = vmul.f32 %v18028_v2, %v22559_v47  ;;  %v6870_v63 = vpop.permute.xlu1 %6869  ;;  %v22567_v0 = vld [vmem:[#allocation233_spill] sm:$0xff]  ;;  %v5300_v11 = vpop.permute.xlu0 %5299 }
 0x586   : > { %v7212_v61 = vadd.f32 %v7180_v18, %v6668_v37  ;;  %v22561_v22 = vrot.slane %v22560_v19, %v16206_v48  ;;  %v7364_v7 = vsel %vm7264_vm2, %v18181_v38, -inf  ;;  %7398 = vmax.xlane.f32.xlu0 %v7397_v9  ;;  %v18225_v2 = vadd.f32 %v18154_v1, %v7201_v41  ;;  %v22565_v37 = vld [vmem:[#allocation245_spill] sm:$0xff] }
 0x587   : > { %v18203_v49 = vsel %vm3102_vm1, %v22558_v45, %v5412_v62  ;;  %v6670_v62 = vadd.f32 %v17855_v55, %v6126_v26  ;;  %v7203_v46 = vadd.f32 %v7171_v14, %v18089_v44  ;;  %v6123_v23 = vadd.f32 %v22565_v37, %v5579_v15  ;;  %7365 = vmax.xlane.f32.xlu1 %v7364_v7  ;;  %v22570_v45 = vld [vmem:[#allocation7_spill] sm:$0xff]  ;;  %v22576_v7 = vld [vmem:[#allocation337_spill] sm:$0xff] }
 0x588   : > { %v18214_v8 = vsel %vm3102_vm1, %v22561_v22, %v6985_v57  ;;  %v18222_v4 = vadd.f32 %v17930_v21, %v7212_v61  ;;  %22564 = vst [vmem:[#allocation318_spill] sm:$0xff] %v18225_v2  ;;  %v5588_v18 = vmul.f32 %v18203_v49, %v22566_v42  ;;  %v6994_v55 = vrot.slane %v6870_v63, %v16200_v54  ;;  %v22571_v61 = vld [vmem:[#allocation21_spill] sm:$0xff] }
 0x589   : > { %v7182_v33 = vmul.f32 %v18214_v8, %v22562_v20  ;;  %v6672_v26 = vadd.f32 %v17905_v58, %v6128_v34  ;;  %v6130_v3 = vadd.f32 %v22567_v0, %v5586_v40  ;;  %v22569_v57 = vrot.slane %v22568_v32, %v16206_v48  ;;  %v6876_v19 = vpop.permute.xlu1 %6875  ;;  %v22577_v20 = vld [vmem:[#allocation235_spill] sm:$0xff]  ;;  %v22579_v0 = vld [vmem:[#allocation372_spill] sm:$0xff] }
 0x58a   : > { %22563 = vst [vmem:[#allocation99_spill] sm:$0xff] %v18222_v4  ;;  %v7403_v44 = vsel %vm7264_vm2, %v18222_v4, -inf  ;;  %v5430_v14 = vrot.slane %v5294_v27, %v16200_v54  ;;  %v7175_v9 = vmul.f32 %v18061_v24, %v22570_v45  ;;  %v22572_v58 = vrot.slane %v22571_v61, %v16206_v48  ;;  %v22584_v45 = vld [vmem:[#allocation11_spill] sm:$0xff] }
 0x58b   : > { %v18238_v41 = vsel %vm3102_vm1, %v22569_v57, %v5421_v53  ;;  %v7214_v15 = vadd.f32 %v7182_v33, %v6670_v62  ;;  %v7205_v40 = vadd.f32 %v7173_v5, %v18119_v30  ;;  %v22573_v53 = vld [vmem:[#allocation87_spill] sm:$0xff]  ;;  %7404 = vmax.xlane.f32.xlu0 %v7403_v44  ;;  %v7370_v22 = vsel %vm7264_vm2, %v18225_v2, -inf  ;;  %v22578_v30 = vld [vmem:[#allocation81_spill] sm:$0xff] }
 0x58c   : > { %v18249_v34 = vsel %vm3102_vm1, %v22572_v58, %v6994_v55  ;;  %v18260_v24 = vadd.f32 %v18154_v1, %v7203_v46  ;;  %v5581_v62 = vmul.f32 %v18068_v13, %v22576_v7  ;;  %v6132_v33 = vadd.f32 %v22577_v20, %v5588_v18  ;;  %7371 = vmax.xlane.f32.xlu1 %v7370_v22  ;;  %v22581_v18 = vld [vmem:[#allocation23_spill] sm:$0xff] }
 0x58d   : > { %v7184_v47 = vmul.f32 %v18249_v34, %v22573_v53  ;;  %v18257_v27 = vadd.f32 %v17930_v21, %v7214_v15  ;;  %v5590_v5 = vmul.f32 %v18238_v41, %v22578_v30  ;;  %v7003_v63 = vrot.slane %v6876_v19, %v16200_v54  ;;  %v22588_v19 = vld [vmem:[#allocation373_spill] sm:$0xff] }
 0x58e   : > { %22575 = vst [vmem:[#allocation68_spill] sm:$0xff] %v18260_v24  ;;  %v5439_v37 = vrot.slane %v5300_v11, %v16200_v54  ;;  %v6674_v46 = vadd.f32 %v17934_v31, %v6130_v3  ;;  %v22580_v32 = vrot.slane %v22579_v0, %v16206_v48  ;;  %v22582_v57 = vrot.slane %v22581_v18, %v16206_v48 }
 0x58f   : > { %22574 = vst [vmem:[#allocation172_spill] sm:$0xff] %v18257_v27  ;;  %v7409_v42 = vsel %vm7264_vm2, %v18257_v27, -inf  ;;  %v7216_v55 = vadd.f32 %v7184_v47, %v6672_v26  ;;  %v18285_v11 = vadd.f32 %v18154_v1, %v7205_v40  ;;  %v7207_v15 = vadd.f32 %v7175_v9, %v18122_v25  ;;  %v5306_v26 = vpop.permute.xlu0 %5305  ;;  %v22586_v9 = vld [vmem:[#allocation133_spill] sm:$0xff]  ;;  %v22587_v47 = vld [vmem:[#allocation227_spill] sm:$0xff] }
 0x590   : > { %v18276_v13 = vsel %vm3102_vm1, %v22580_v32, %v5430_v14  ;;  %v18282_v44 = vsel %vm3102_vm1, %v22582_v57, %v7003_v63  ;;  %v7177_v31 = vmul.f32 %v18099_v52, %v22584_v45  ;;  %7410 = vmax.xlane.f32.xlu0 %v7409_v42  ;;  %v6882_v14 = vpop.permute.xlu1 %6881  ;;  %v7376_v61 = vsel %vm7264_vm2, %v18260_v24, -inf  ;;  %v22596_v57 = vld [vmem:[#allocation247_spill] sm:$0xff] }
 0x591   : > { %22583 = vst [vmem:[#allocation62_spill] sm:$0xff] %v18285_v11  ;;  %v7186_v3 = vmul.f32 %v18282_v44, %v17567_v39  ;;  %v18295_v58 = vadd.f32 %v17930_v21, %v7216_v55  ;;  %v6134_v40 = vadd.f32 %v17542_v29, %v5590_v5  ;;  %v7012_v53 = vrot.slane %v6882_v14, %v16200_v54  ;;  %v22590_v5 = vld [vmem:[#allocation26_spill] sm:$0xff]  ;;  %v22594_v55 = vld [vmem:[#allocation148_spill] sm:$0xff]  ;;  %v22597_v45 = vld [vmem:[#allocation339_spill] sm:$0xff] }
 0x592   : > { %7377 = vmax.xlane.f32.xlu1 %v7376_v61  ;;  %v6676_v25 = vadd.f32 %v17938_v60, %v6132_v33  ;;  %v6667_v52 = vadd.f32 %v22586_v9, %v6123_v23  ;;  %v5592_v39 = vmul.f32 %v18276_v13, %v22587_v47  ;;  %v22589_v22 = vrot.slane %v22588_v19, %v16206_v48  ;;  %v22598_v14 = vld [vmem:[#allocation223_spill] sm:$0xff]  ;;  %v22600_v9 = vld [vmem:[#allocation280_spill] sm:$0xff] }
 0x593   : > { %22585 = vst [vmem:[#allocation319_spill] sm:$0xff] %v18295_v58  ;;  %v7415_v20 = vsel %vm7264_vm2, %v18295_v58, -inf  ;;  %v7218_v29 = vadd.f32 %v7186_v3, %v6674_v46  ;;  %v5448_v30 = vrot.slane %v5306_v26, %v16200_v54  ;;  %v22591_v60 = vrot.slane %v22590_v5, %v16206_v48  ;;  %v22599_v61 = vld [vmem:[#allocation59_spill] sm:$0xff] }
 0x594   : > { %v18307_v7 = vsel %vm3102_vm1, %v22589_v22, %v5439_v37  ;;  %v7382_v33 = vsel %vm7264_vm2, %v18285_v11, -inf  ;;  %v18321_v63 = vadd.f32 %v18154_v1, %v7207_v15  ;;  %v22593_v37 = vld [vmem:[#allocation15_spill] sm:$0xff]  ;;  %7416 = vmax.xlane.f32.xlu0 %v7415_v20  ;;  %v6888_v0 = vpop.permute.xlu1 %6887  ;;  %v7209_v18 = vadd.f32 %v7177_v31, %v18197_v36  ;;  %v22601_v36 = vld [vmem:[#allocation374_spill] sm:$0xff] }
 0x595   : > { %v18316_v23 = vsel %vm3102_vm1, %v22591_v60, %v7012_v53  ;;  %v7179_v42 = vmul.f32 %v18141_v35, %v22593_v37  ;;  %v18328_v32 = vadd.f32 %v17930_v21, %v7218_v29  ;;  %v6125_v26 = vadd.f32 %v22596_v57, %v5581_v62  ;;  %v22604_v29 = vld [vmem:[#allocation32_spill] sm:$0xff]  ;;  %v22606_v60 = vld [vmem:[#allocation54_spill] sm:$0xff] }
 0x596   : > { %22592 = vst [vmem:[#allocation228_spill] sm:$0xff] %v18321_v63  ;;  %v7188_v46 = vmul.f32 %v18316_v23, %v22594_v55  ;;  %v5583_v3 = vmul.f32 %v18107_v43, %v22597_v45  ;;  %v7021_v15 = vrot.slane %v6888_v0, %v16200_v54  ;;  %7383 = vmax.xlane.f32.xlu1 %v7382_v33  ;;  %v22603_v43 = vld [vmem:[#allocation19_spill] sm:$0xff]  ;;  %v7388_v5 = vsel %vm7264_vm2, %v18321_v63, -inf  ;;  %v22609_v55 = vld [vmem:[#allocation249_spill] sm:$0xff] }
 0x597   : > { %22595 = vst [vmem:[#allocation350_spill] sm:$0xff] %v18328_v32  ;;  %v6678_v35 = vadd.f32 %v22598_v14, %v6134_v40  ;;  %v6136_v53 = vadd.f32 %v22599_v61, %v5592_v39  ;;  %v5594_v47 = vmul.f32 %v18307_v7, %v22600_v9  ;;  %v7421_v19 = vsel %vm7264_vm2, %v18328_v32, -inf  ;;  %v22610_v0 = vld [vmem:[#allocation341_spill] sm:$0xff]  ;;  %v22612_v61 = vld [vmem:[#allocation146_spill] sm:$0xff] }
 0x598   : > { %v7220_v22 = vadd.f32 %v7188_v46, %v6676_v25  ;;  %v22602_v62 = vrot.slane %v22601_v36, %v16206_v48  ;;  %v7181_v20 = vmul.f32 %v18178_v59, %v22603_v43  ;;  %v22605_v40 = vrot.slane %v22604_v29, %v16206_v48  ;;  %7422 = vmax.xlane.f32.xlu0 %v7421_v19  ;;  %v6894_v33 = vpop.permute.xlu1 %6893  ;;  %v22613_v36 = vld [vmem:[#allocation396_spill] sm:$0xff]  ;;  %v22616_v43 = vld [vmem:[#allocation34_spill] sm:$0xff] }
 0x599   : > { %v18363_v37 = vadd.f32 %v18154_v1, %v7209_v18  ;;  %v7211_v59 = vadd.f32 %v7179_v42, %v6667_v52  ;;  %v6127_v46 = vadd.f32 %v22609_v55, %v5583_v3  ;;  %v5585_v57 = vmul.f32 %v18128_v6, %v22610_v0  ;;  %v22615_v42 = vld [vmem:[#allocation17_spill] sm:$0xff]  ;;  %v18378_v6 = vpop.xlane.xlu0 %7269  ;;  %v22624_v0 = vld [vmem:[#allocation343_spill] sm:$0xff] }
 0x59a   : > { %v18345_v31 = vsel %vm3102_vm1, %v22602_v62, %v5448_v30  ;;  %v18353_v39 = vsel %vm3102_vm1, %v22605_v40, %v7021_v15  ;;  %v18360_v30 = vadd.f32 %v17930_v21, %v7220_v22  ;;  %v7030_v45 = vrot.slane %v6894_v33, %v16200_v54  ;;  %7389 = vmax.xlane.f32.xlu1 %v7388_v5  ;;  %v22611_v15 = vld [vmem:[#allocation104_spill] sm:$0xff]  ;;  %v22614_v62 = vld [vmem:[#allocation282_spill] sm:$0xff]  ;;  %v22618_v40 = vld [vmem:[#allocation101_spill] sm:$0xff] }
 0x59b   : > { %v7190_v25 = vmul.f32 %v18353_v39, %v22606_v60  ;;  %22608 = vst [vmem:[#allocation213_spill] sm:$0xff] %v18363_v37  ;;  %v6669_v14 = vadd.f32 %v22611_v15, %v6125_v26  ;;  %v6138_v9 = vadd.f32 %v22612_v61, %v5594_v47  ;;  %v6680_v18 = vadd.f32 %v22613_v36, %v6136_v53 }
 0x59c   : > { %22607 = vst [vmem:[#allocation128_spill] sm:$0xff] %v18360_v30  ;;  %v7427_v19 = vsel %vm7264_vm2, %v18360_v30, -inf  ;;  %v5596_v52 = vmul.f32 %v18345_v31, %v22614_v62  ;;  %v7183_v3 = vmul.f32 %v18214_v8, %v22615_v42  ;;  %v22617_v29 = vrot.slane %v22616_v43, %v16206_v48  ;;  %v6900_v53 = vpop.permute.xlu1 %6899  ;;  %v22628_v43 = vld [vmem:[#allocation37_spill] sm:$0xff] }
 0x59d   : > { %v7222_v22 = vadd.f32 %v7190_v25, %v6678_v35  ;;  %v7213_v47 = vadd.f32 %v7181_v20, %v6669_v14  ;;  %7428 = vmax.xlane.f32.xlu0 %v7427_v19  ;;  %v7394_v5 = vsel %vm7264_vm2, %v18363_v37, -inf  ;;  %v18394_v8 = vadd.f32 %v18154_v1, %v7211_v59  ;;  %v22621_v25 = vld [vmem:[#allocation143_spill] sm:$0xff] }
 0x59e   : > { %v18384_v26 = vsel %vm3102_vm1, %v22617_v29, %v7030_v45  ;;  %v22622_v33 = vrot.slane %v22621_v25, %v16200_v54  ;;  %v22623_v20 = vrot.slane %v22502_v28, %v16206_v48  ;;  %v5587_v45 = vmul.f32 %v18167_v56, %v22624_v0  ;;  %7395 = vmax.xlane.f32.xlu1 %v7394_v5  ;;  %v22625_v14 = vld [vmem:[#allocation107_spill] sm:$0xff]  ;;  %v22627_v28 = vld [vmem:[#allocation53_spill] sm:$0xff]  ;;  %v22632_v5 = vld [vmem:[#allocation208_spill] sm:$0xff] }
 0x59f   : > { %v7192_v35 = vmul.f32 %v18384_v26, %v22618_v40  ;;  %v18391_v60 = vadd.f32 %v17930_v21, %v7222_v22  ;;  %22620 = vst [vmem:[#allocation131_spill] sm:$0xff] %v18394_v8  ;;  %v7039_v15 = vrot.slane %v6900_v53, %v16200_v54  ;;  %v6671_v61 = vadd.f32 %v22625_v14, %v6127_v46  ;;  %v22626_v19 = vld [vmem:[#allocation251_spill] sm:$0xff]  ;;  %v22631_v53 = vld [vmem:[#allocation20_spill] sm:$0xff]  ;;  %v22635_v25 = vld [vmem:[#allocation313_spill] sm:$0xff] }
 0x5a0   : > { %v18403_v55 = vsel %vm3102_vm1, %v22623_v20, %v22622_v33  ;;  %v6129_v59 = vadd.f32 %v22626_v19, %v5585_v57  ;;  %v6682_v62 = vadd.f32 %v18006_v10, %v6138_v9  ;;  %v6140_v42 = vadd.f32 %v22627_v28, %v5596_v52  ;;  %v6906_v10 = vpop.permute.xlu1 %6905  ;;  %v22637_v20 = vld [vmem:[#allocation253_spill] sm:$0xff] }
 0x5a1   : > { %22619 = vst [vmem:[#allocation105_spill] sm:$0xff] %v18391_v60  ;;  %v7433_v22 = vsel %vm7264_vm2, %v18391_v60, -inf  ;;  %v7224_v36 = vadd.f32 %v7192_v35, %v6680_v18  ;;  %v22629_v29 = vrot.slane %v22628_v43, %v16206_v48  ;;  %v18421_v40 = vadd.f32 %v18154_v1, %v7213_v47  ;;  %v22634_v35 = vld [vmem:[#allocation89_spill] sm:$0xff]  ;;  %v22636_v47 = vld [vmem:[#allocation119_spill] sm:$0xff]  ;;  %v22640_v43 = vld [vmem:[#allocation40_spill] sm:$0xff] }
 0x5a2   : > { %v7215_v46 = vadd.f32 %v7183_v3, %v6671_v61  ;;  %v7185_v57 = vmul.f32 %v18249_v34, %v22631_v53  ;;  %7434 = vmax.xlane.f32.xlu0 %v7433_v22  ;;  %v7400_v9 = vsel %vm7264_vm2, %v18394_v8, -inf  ;;  %v6643_v33 = vmul.f32 %v22635_v25, %v22634_v35  ;;  %v18437_v34 = vpop.xlane.xlu0 %7272  ;;  %v22638_v14 = vld [vmem:[#allocation345_spill] sm:$0xff] }
 0x5a3   : > { %v18418_v56 = vsel %vm3102_vm1, %v22629_v29, %v7039_v15  ;;  %22630 = vst [vmem:[#allocation320_spill] sm:$0xff] %v18421_v40  ;;  %v18430_v52 = vadd.f32 %v17930_v21, %v7224_v36  ;;  %v6652_v3 = vmul.f32 %v18403_v55, %v22636_v47  ;;  %v6131_v0 = vadd.f32 %v22637_v20, %v5587_v45  ;;  %v22639_v36 = vld [vmem:[#allocation342_spill] sm:$0xff]  ;;  %v22644_v35 = vld [vmem:[#allocation257_spill] sm:$0xff] }
 0x5a4   : > { %v7194_v18 = vmul.f32 %v18418_v56, %v22632_v5  ;;  %v7048_v15 = vrot.slane %v6906_v10, %v16200_v54  ;;  %7401 = vmax.xlane.f32.xlu1 %v7400_v9  ;;  %v5589_v61 = vmul.f32 %v18203_v49, %v22638_v14  ;;  %v6673_v28 = vadd.f32 %v22639_v36, %v6129_v59  ;;  %v22643_v9 = vld [vmem:[#allocation22_spill] sm:$0xff]  ;;  %v22646_v47 = vld [vmem:[#allocation309_spill] sm:$0xff] }
 0x5a5   : > { %22633 = vst [vmem:[#allocation215_spill] sm:$0xff] %v18430_v52  ;;  %v7439_v19 = vsel %vm7264_vm2, %v18430_v52, -inf  ;;  %v22641_v29 = vrot.slane %v22640_v43, %v16206_v48  ;;  %v7406_v45 = vsel %vm7264_vm2, %v18421_v40, -inf  ;;  %v18452_v5 = vadd.f32 %v18154_v1, %v7215_v46  ;;  %v22650_v43 = vld [vmem:[#allocation118_spill] sm:$0xff] }
 0x5a6   : > { %v7226_v22 = vadd.f32 %v7194_v18, %v6682_v62  ;;  %v6684_v10 = vadd.f32 %v6652_v3, %v6140_v42  ;;  %v7187_v49 = vmul.f32 %v18282_v44, %v22643_v9  ;;  %7440 = vmax.xlane.f32.xlu0 %v7439_v19  ;;  %v7217_v62 = vadd.f32 %v7185_v57, %v6673_v28  ;;  %v22648_v3 = vld [vmem:[#allocation171_spill] sm:$0xff]  ;;  %v22651_v19 = vld [vmem:[#allocation314_spill] sm:$0xff] }
 0x5a7   : > { %v7053_v53 = vsel %vm3102_vm1, %v22641_v29, %v7048_v15  ;;  %22642 = vst [vmem:[#allocation264_spill] sm:$0xff] %v18452_v5  ;;  %v6675_v18 = vadd.f32 %v6643_v33, %v6131_v0  ;;  %v6133_v20 = vadd.f32 %v22646_v47, %v5589_v61  ;;  %v22647_v15 = vld [vmem:[#allocation346_spill] sm:$0xff]  ;;  %v22649_v44 = vld [vmem:[#allocation83_spill] sm:$0xff]  ;;  %v6645_v29 = vmul.f32 %v22651_v19, %v22650_v43  ;;  %v22652_v33 = vld [vmem:[#allocation25_spill] sm:$0xff] }
 0x5a8   : > { %v7196_v25 = vmul.f32 %v7053_v53, %v22644_v35  ;;  %v18458_v59 = vadd.f32 %v17930_v21, %v7226_v22  ;;  %7407 = vmax.xlane.f32.xlu1 %v7406_v45  ;;  %v5591_v14 = vmul.f32 %v18238_v41, %v22647_v15  ;;  %v6103_v36 = vmul.f32 %v22649_v44, %v22648_v3  ;;  %v18469_v22 = vpop.xlane.xlu0 %7278  ;;  %v22656_v47 = vld [vmem:[#allocation173_spill] sm:$0xff]  ;;  %v22663_v19 = vld [vmem:[#allocation174_spill] sm:$0xff] }
 0x5a9   : > { %v7412_v57 = vsel %vm7264_vm2, %v18452_v5, -inf  ;;  %v7189_v0 = vmul.f32 %v18316_v23, %v22652_v33  ;;  %v18479_v61 = vadd.f32 %v18154_v1, %v7217_v62  ;;  %v7219_v28 = vadd.f32 %v7187_v49, %v6675_v18  ;;  %v22657_v15 = vld [vmem:[#allocation93_spill] sm:$0xff]  ;;  %v22666_v33 = vld [vmem:[#allocation344_spill] sm:$0xff] }
 0x5aa   : > { %22645 = vst [vmem:[#allocation321_spill] sm:$0xff] %v18458_v59  ;;  %v7445_v42 = vsel %vm7264_vm2, %v18458_v59, -inf  ;;  %v7228_v46 = vadd.f32 %v7196_v25, %v6684_v10  ;;  %v6135_v45 = vadd.f32 %v6103_v36, %v5591_v14  ;;  %v22655_v10 = vld [vmem:[#allocation348_spill] sm:$0xff]  ;;  %v6677_v25 = vadd.f32 %v6645_v29, %v6133_v20  ;;  %v22659_v3 = vld [vmem:[#allocation57_spill] sm:$0xff] }
 0x5ab   : > { %7446 = vmax.xlane.f32.xlu0 %v7445_v42  ;;  %22654 = vst [vmem:[#allocation94_spill] sm:$0xff] %v18479_v61  ;;  %v5593_v9 = vmul.f32 %v18276_v13, %v22655_v10  ;;  %v6105_v23 = vmul.f32 %v22657_v15, %v22656_v47  ;;  %v22658_v42 = vld [vmem:[#allocation88_spill] sm:$0xff]  ;;  %v7418_v49 = vsel %vm7264_vm2, %v18479_v61, -inf  ;;  %v18494_v18 = vadd.f32 %v18154_v1, %v7219_v28  ;;  %v22662_v44 = vld [vmem:[#allocation349_spill] sm:$0xff] }
 0x5ac   : > { %v18476_v41 = vadd.f32 %v17930_v21, %v7228_v46  ;;  %7413 = vmax.xlane.f32.xlu1 %v7412_v57  ;;  %v6647_v21 = vmul.f32 %v22659_v3, %v22658_v42  ;;  %v22660_v46 = vld [vmem:[#allocation31_spill] sm:$0xff]  ;;  %v7221_v13 = vadd.f32 %v7189_v0, %v6677_v25  ;;  %v18496_v14 = vpop.xlane.xlu0 %7284  ;;  %v5595_v36 = vmul.f32 %v18307_v7, %v22662_v44  ;;  %v22664_v29 = vld [vmem:[#allocation140_spill] sm:$0xff] }
 0x5ad   : > { %v7191_v62 = vmul.f32 %v18353_v39, %v22660_v46  ;;  %22661 = vst [vmem:[#allocation297_spill] sm:$0xff] %v18494_v18  ;;  %v6137_v20 = vadd.f32 %v6105_v23, %v5593_v9  ;;  %v6107_v57 = vmul.f32 %v22664_v29, %v22663_v19  ;;  %v22665_v39 = vld [vmem:[#allocation100_spill] sm:$0xff]  ;;  %v7424_v0 = vsel %vm7264_vm2, %v18494_v18, -inf  ;;  %v22669_v7 = vld [vmem:[#allocation351_spill] sm:$0xff]  ;;  %v22673_v46 = vld [vmem:[#allocation78_spill] sm:$0xff] }
 0x5ae   : > { %22653 = vst [vmem:[#allocation14_spill] sm:$0xff] %v18476_v41  ;;  %v7451_v35 = vsel %vm7264_vm2, %v18476_v41, -inf  ;;  %v6679_v43 = vadd.f32 %v6647_v21, %v6135_v45  ;;  %v6649_v10 = vmul.f32 %v22666_v33, %v22665_v39  ;;  %v18509_v28 = vadd.f32 %v18154_v1, %v7221_v13  ;;  %v22670_v23 = vld [vmem:[#allocation176_spill] sm:$0xff]  ;;  %v22671_v42 = vld [vmem:[#allocation335_spill] sm:$0xff] }
 0x5af   : > { %7452 = vmax.xlane.f32.xlu0 %v7451_v35  ;;  %v22667_v35 = vld [vmem:[#allocation33_spill] sm:$0xff]  ;;  %v6139_v25 = vadd.f32 %v6107_v57, %v5595_v36  ;;  %v5597_v45 = vmul.f32 %v18345_v31, %v22669_v7  ;;  %v6109_v3 = vmul.f32 %v22671_v42, %v22670_v23  ;;  %v22672_v21 = vld [vmem:[#allocation112_spill] sm:$0xff]  ;;  %v22677_v57 = vld [vmem:[#allocation39_spill] sm:$0xff] }
 0x5b0   : > { %7419 = vmax.xlane.f32.xlu1 %v7418_v49  ;;  %v7193_v47 = vmul.f32 %v18384_v26, %v22667_v35  ;;  %22668 = vst [vmem:[#allocation322_spill] sm:$0xff] %v18509_v28  ;;  %v7223_v9 = vadd.f32 %v7191_v62, %v6679_v43  ;;  %v6681_v15 = vadd.f32 %v6649_v10, %v6137_v20  ;;  %v18517_v26 = vpop.xlane.xlu0 %7290  ;;  %v22674_v44 = vld [vmem:[#allocation36_spill] sm:$0xff]  ;;  %v7430_v62 = vsel %vm7264_vm2, %v18509_v28, -inf  ;;  %v22676_v43 = vld [vmem:[#allocation126_spill] sm:$0xff] }
 0x5b1   : > { %v6651_v49 = vmul.f32 %v22673_v46, %v22672_v21  ;;  %v7195_v19 = vmul.f32 %v18418_v56, %v22674_v44  ;;  %v6141_v31 = vadd.f32 %v6109_v3, %v5597_v45  ;;  %v6653_v29 = vmul.f32 %v18403_v55, %v22676_v43 }
 0x5b2   : > { %v18524_v13 = vadd.f32 %v18154_v1, %v7223_v9  ;;  %v7225_v36 = vadd.f32 %v7193_v47, %v6681_v15  ;;  %v7197_v39 = vmul.f32 %v7053_v53, %v22677_v57 }
 0x5b3   : > { %v6683_v20 = vadd.f32 %v6651_v49, %v6139_v25 }
 0x5b4   : > { %7425 = vmax.xlane.f32.xlu1 %v7424_v0  ;;  %22675 = vst [vmem:[#allocation352_spill] sm:$0xff] %v18524_v13  ;;  %v7436_v33 = vsel %vm7264_vm2, %v18524_v13, -inf  ;;  %v18532_v56 = vadd.f32 %v18154_v1, %v7225_v36  ;;  %v18534_v35 = vpop.xlane.xlu0 %7296  ;;  %v6685_v0 = vadd.f32 %v6653_v29, %v6141_v31 }
 0x5b5   : > { %v7227_v10 = vadd.f32 %v7195_v19, %v6683_v20 }
 0x5b6   : > { %22678 = vst [vmem:[#allocation354_spill] sm:$0xff] %v18532_v56  ;;  %v7442_v47 = vsel %vm7264_vm2, %v18532_v56, -inf  ;;  %v7229_v55 = vadd.f32 %v7197_v39, %v6685_v0 }
 0x5b7   : > { %v18539_v9 = vadd.f32 %v18154_v1, %v7227_v10 }
 0x5b8   : > { %7431 = vmax.xlane.f32.xlu1 %v7430_v62  ;;  %v18541_v53 = vpop.xlane.xlu0 %7302  ;;  %v18546_v7 = vadd.f32 %v18154_v1, %v7229_v55 }
 0x5b9   : > { %22679 = vst [vmem:[#allocation356_spill] sm:$0xff] %v18539_v9  ;;  %v7448_v25 = vsel %vm7264_vm2, %v18539_v9, -inf }
 0x5ba   : > { %22680 = vst [vmem:[#allocation358_spill] sm:$0xff] %v18546_v7  ;;  %v7454_v45 = vsel %vm7264_vm2, %v18546_v7, -inf }
 0x5bc   : > { %7437 = vmax.xlane.f32.xlu1 %v7436_v33  ;;  %v18550_v15 = vpop.xlane.xlu0 %7308 }
 0x5c0   : > { %7443 = vmax.xlane.f32.xlu1 %v7442_v47  ;;  %v18552_v23 = vpop.xlane.xlu0 %7314 }
 0x5c2   : > { %v18556_v3 = vpop.xlane.xlu1 %7266 }
 0x5c4   : > { %7449 = vmax.xlane.f32.xlu1 %v7448_v25  ;;  %v18554_v42 = vpop.xlane.xlu0 %7320 }
 0x5c8   : > { %7455 = vmax.xlane.f32.xlu1 %v7454_v45  ;;  %v18558_v21 = vpop.xlane.xlu1 %7275  ;;  %v18560_v46 = vpop.xlane.xlu0 %7326 }
 0x5cc   : > { %v18564_v1 = vpop.xlane.xlu0 %7332 }
 0x5cd   : > { %v18562_v49 = vpop.xlane.xlu1 %7281 }
 0x5d0   : > { %v18570_v62 = vpop.xlane.xlu0 %7338 }
 0x5d1   : > { %v18566_v44 = vpop.xlane.xlu1 %7287 }
 0x5d4   : > { %v18574_v31 = vpop.xlane.xlu0 %7344 }
 0x5d6   : > { %v18568_v19 = vpop.xlane.xlu1 %7293 }
 0x5d8   : > { %v18580_v29 = vpop.xlane.xlu0 %7350 }
 0x5da   : > { %v18572_v36 = vpop.xlane.xlu1 %7299 }
 0x5dc   : > { %v18584_v39 = vpop.xlane.xlu0 %7356 }
 0x5df   : > { %v18576_v20 = vpop.xlane.xlu1 %7305 }
 0x5e3   : > { %v18578_v43 = vpop.xlane.xlu1 %7311 }
 0x5e7   : > { %v18582_v57 = vpop.xlane.xlu1 %7317 }
 0x5ed   : > { %v18586_v33 = vpop.xlane.xlu1 %7323 }
 0x5f1   : > { %v18588_v0 = vpop.xlane.xlu1 %7329 }
 0x5f5   : > { %v18590_v55 = vpop.xlane.xlu1 %7335 }
 0x5f6   : > { %v7363_v10 = vpop.xlane.xlu0 %7362 }
 0x5f7   : > { %v7492_v51 = vrot.slane %v7363_v10, %v16200_v54 }
 0x5f9   : > { %v18592_v45 = vpop.xlane.xlu1 %7341 }
 0x5fa   : > { %v7369_v47 = vpop.xlane.xlu0 %7368 }
 0x5fb   : > { %v7501_v4 = vrot.slane %v7369_v47, %v16200_v54 }
 0x5fd   : > { %v18594_v7 = vpop.xlane.xlu1 %7347 }
 0x5fe   : > { %v7375_v25 = vpop.xlane.xlu0 %7374 }
 0x5ff   : > { %v7510_v12 = vrot.slane %v7375_v25, %v16200_v54 }
 0x601   : > { %v18596_v9 = vpop.xlane.xlu1 %7353 }
 0x603   : > { %v7381_v41 = vpop.xlane.xlu0 %7380 }
 0x604   : > { %v7519_v11 = vrot.slane %v7381_v41, %v16200_v54 }
 0x605   : > { %v18598_v52 = vpop.xlane.xlu1 %7359 }
 0x607   : > { %v7387_v59 = vpop.xlane.xlu0 %7386 }
 0x608   : > { %v7528_v47 = vrot.slane %v7387_v59, %v16200_v54 }
 0x60b   : > { %v7393_v56 = vpop.xlane.xlu0 %7392 }
 0x60c   : > { %v7537_v25 = vrot.slane %v7393_v56, %v16200_v54 }
 0x60f   : > { %v7399_v13 = vpop.xlane.xlu0 %7398 }
 0x610   : > { %v7366_v60 = vpop.xlane.xlu1 %7365  ;;  %v7546_v41 = vrot.slane %v7399_v13, %v16200_v54 }
 0x611   : > { %v7496_v8 = vrot.slane %v7366_v60, %v16206_v48 }
 0x613   : > { %v7497_v50 = vsel %vm3102_vm1, %v7496_v8, %v7492_v51 }
 0x614   : > { %v7405_v28 = vpop.xlane.xlu0 %7404 }
 0x615   : > { %v7372_v30 = vpop.xlane.xlu1 %7371 }
 0x616   : > { %v7505_v61 = vrot.slane %v7372_v30, %v16206_v48 }
 0x618   : > { %v7506_v30 = vsel %vm3102_vm1, %v7505_v61, %v7501_v4 }
 0x619   : > { %v18600_v18 = vpop.xlane.xlu0 %7410  ;;  %v7633_v4 = vsel %vm3239_vm3, %v7506_v30, %v7497_v50 }
 0x61b   : > { %v7378_v32 = vpop.xlane.xlu1 %7377 }
 0x61c   : > { %v7514_v27 = vrot.slane %v7378_v32, %v16206_v48 }
 0x61d   : > { %v7417_v63 = vpop.xlane.xlu0 %7416 }
 0x61e   : > { %v7515_v60 = vsel %vm3102_vm1, %v7514_v27, %v7510_v12 }
 0x61f   : > { %v7384_v58 = vpop.xlane.xlu1 %7383  ;;  %v7634_v59 = vsel %vm3240_vm4, %v7515_v60, %v7633_v4 }
 0x620   : > { %v7523_v17 = vrot.slane %v7384_v58, %v16206_v48 }
 0x621   : > { %v7423_v61 = vpop.xlane.xlu0 %7422 }
 0x623   : > { %v7390_v5 = vpop.xlane.xlu1 %7389 }
 0x624   : > { %v7532_v37 = vrot.slane %v7390_v5, %v16206_v48  ;;  %v7524_v5 = vsel %vm3102_vm1, %v7523_v17, %v7519_v11  ;;  %v7555_v11 = vrot.slane %v7405_v28, %v16200_v54 }
 0x625   : > { %v7635_v27 = vsel %vm3242_vm5, %v7524_v5, %v7634_v59 }
 0x627   : > { %v7396_v40 = vpop.xlane.xlu1 %7395 }
 0x628   : > { %v7541_v32 = vrot.slane %v7396_v40, %v16206_v48  ;;  %v7533_v40 = vsel %vm3102_vm1, %v7532_v37, %v7528_v47  ;;  %v7429_v47 = vpop.xlane.xlu0 %7428 }
 0x629   : > { %v7636_v8 = vsel %vm3244_vm6, %v7533_v40, %v7635_v27 }
 0x62a   : > { %v7542_v12 = vsel %vm3102_vm1, %v7541_v32, %v7537_v25 }
 0x62b   : > { %v7637_v37 = vsel %vm3246_vm7, %v7542_v12, %v7636_v8  ;;  %v7573_v12 = vrot.slane %v7417_v63, %v16200_v54  ;;  %v7564_v8 = vrot.slane %v18600_v18, %v16200_v54 }
 0x62d   : > { %v7402_v58 = vpop.xlane.xlu1 %7401 }
 0x62e   : > { %v7550_v10 = vrot.slane %v7402_v58, %v16206_v48  ;;  %v7435_v58 = vpop.xlane.xlu0 %7434 }
 0x630   : > { %v7551_v51 = vsel %vm3102_vm1, %v7550_v10, %v7546_v41 }
 0x631   : > { %v7408_v17 = vpop.xlane.xlu1 %7407  ;;  %v7638_v56 = vsel %vm3248_vm8, %v7551_v51, %v7637_v37 }
 0x632   : > { %v7559_v50 = vrot.slane %v7408_v17, %v16206_v48  ;;  %v7441_v5 = vpop.xlane.xlu0 %7440  ;;  %v7582_v17 = vrot.slane %v7423_v61, %v16200_v54 }
 0x634   : > { %v7560_v13 = vsel %vm3102_vm1, %v7559_v50, %v7555_v11  ;;  %v7591_v50 = vrot.slane %v7429_v47, %v16200_v54 }
 0x635   : > { %v7414_v30 = vpop.xlane.xlu1 %7413  ;;  %v7639_v32 = vsel %vm3250_vm9, %v7560_v13, %v7638_v56  ;;  %v7600_v56 = vrot.slane %v7435_v58, %v16200_v54 }
 0x636   : > { %7649 = vxpose.xlu0.b32.start [1/2] (short) (narrow) %v7639_v32, 16  ;;  %v7447_v4 = vpop.xlane.xlu0 %7446  ;;  %v7568_v27 = vrot.slane %v7414_v30, %v16206_v48  ;;  %v7609_v32 = vrot.slane %v7441_v5, %v16200_v54 }
 0x637   : > { %v7618_v18 = vrot.slane %v7447_v4, %v16200_v54 }
 0x638   : > { %v7569_v61 = vsel %vm3102_vm1, %v7568_v27, %v7564_v8 }
 0x639   : > { %v7420_v60 = vpop.xlane.xlu1 %7419 }
 0x63a   : > { %v7577_v41 = vrot.slane %v7420_v60, %v16206_v48  ;;  %v7453_v47 = vpop.xlane.xlu0 %7452 }
 0x63c   : > { %v7578_v37 = vsel %vm3102_vm1, %v7577_v41, %v7573_v12  ;;  %v7627_v12 = vrot.slane %v7453_v47, %v16200_v54  ;;  %v18713_v47 = vld [vmem:[%s14016_s10 + $0x40] sm:$0xff] }
 0x63d   : > { %v7426_v25 = vpop.xlane.xlu1 %7425  ;;  %22688 = vst [vmem:[#allocation323_spill] sm:$0xff] %v18713_v47 }
 0x63e   : > { %v7586_v40 = vrot.slane %v7426_v25, %v16206_v48 }
 0x640   : > { %v7587_v63 = vsel %vm3102_vm1, %v7586_v40, %v7582_v17 }
 0x641   : > { %v7432_v28 = vpop.xlane.xlu1 %7431 }
 0x642   : > { %v7595_v51 = vrot.slane %v7432_v28, %v16206_v48  ;;  %v7640_v28 = vsel %vm3239_vm3, %v7578_v37, %v7569_v61  ;;  %v937_v37 = vld [vmem:[%s20585_s7 + $0x10] sm:$0xff]  ;;  %v18693_v61 = vld [vmem:[%s14016_s10 + $0x20] sm:$0xff] }
 0x643   : > { %v7641_v58 = vsel %vm3240_vm4, %v7587_v63, %v7640_v28  ;;  %v18678_v63 = vld [vmem:[%s14016_s10 + $0x8] sm:$0xff]  ;;  %22684 = vst [vmem:[#allocation76_spill] sm:$0xff] %v18693_v61 }
 0x644   : > { %v7596_v60 = vsel %vm3102_vm1, %v7595_v51, %v7591_v50  ;;  %v938_v50 = vld [vmem:[%s20585_s7 + $0x18] sm:$0xff]  ;;  %22681 = vst [vmem:[#allocation400_spill] sm:$0xff] %v18678_v63  ;;  %v18718_v28 = vld [vmem:[%s14016_s10 + $0x48] sm:$0xff] }
 0x645   : > { %v7438_v10 = vpop.xlane.xlu1 %7437  ;;  %v7642_v40 = vsel %vm3242_vm5, %v7596_v60, %v7641_v58  ;;  %13338 = vmatprep.subr.mxu0 %v938_v50  ;;  %v18698_v60 = vld [vmem:[%s14016_s10 + $0x28] sm:$0xff]  ;;  %22689 = vst [vmem:[#allocation110_spill] sm:$0xff] %v18718_v28  ;;  %v18728_v58 = vld [vmem:[%s14016_s10 + $0x58] sm:$0xff] }
 0x646   : > { %v7604_v11 = vrot.slane %v7438_v10, %v16206_v48  ;;  %13339 = vmatpush3.msra.mxu0 %v938_v50  ;;  %22685 = vst [vmem:[#allocation43_spill] sm:$0xff] %v18698_v60  ;;  %22691 = vst [vmem:[#allocation190_spill] sm:$0xff] %v18728_v58  ;;  %v18788_v50 = vld [vmem:[%s14016_s10 + $0xb8] sm:$0xff] }
 0x647   : > { %13340 = vmatprep.subr.mxu0 %v937_v37  ;;  %22703 = vst [vmem:[#allocation273_spill] sm:$0xff] %v18788_v50 }
 0x648   : > { %v7605_v10 = vsel %vm3102_vm1, %v7604_v11, %v7600_v56  ;;  %13341 = vmatpush3.msra.mxu0 %v937_v37  ;;  %v935_v56 = vld [vmem:[%s20585_s7] sm:$0xff] }
 0x649   : > { %v7444_v59 = vpop.xlane.xlu1 %7443  ;;  %v7643_v27 = vsel %vm3244_vm6, %v7605_v10, %v7642_v40  ;;  %v18723_v10 = vld [vmem:[%s14016_s10 + $0x50] sm:$0xff]  ;;  %v18738_v40 = vld [vmem:[%s14016_s10 + $0x68] sm:$0xff]  ;;  %v18793_v37 = vld [vmem:[%s14016_s10 + $0xc0] sm:$0xff] }
 0x64a   : > { %v7613_v13 = vrot.slane %v7444_v59, %v16206_v48  ;;  %22690 = vst [vmem:[#allocation220_spill] sm:$0xff] %v18723_v10  ;;  %22693 = vst [vmem:[#allocation168_spill] sm:$0xff] %v18738_v40 }
 0x64b   : > { %22704 = vst [vmem:[#allocation85_spill] sm:$0xff] %v18793_v37 }
 0x64c   : > { %v7614_v41 = vsel %vm3102_vm1, %v7613_v13, %v7609_v32  ;;  %v936_v13 = vld [vmem:[%s20585_s7 + $0x8] sm:$0xff]  ;;  %v18688_v32 = vld [vmem:[%s14016_s10 + $0x18] sm:$0xff] }
 0x64d   : > { %v7450_v30 = vpop.xlane.xlu1 %7449  ;;  %v7644_v51 = vsel %vm3246_vm7, %v7614_v41, %v7643_v27  ;;  %13342 = vmatprep.subr.mxu0 %v936_v13  ;;  %22683 = vst [vmem:[#allocation267_spill] sm:$0xff] %v18688_v32  ;;  %v18733_v41 = vld [vmem:[%s14016_s10 + $0x60] sm:$0xff]  ;;  %v18758_v27 = vld [vmem:[%s14016_s10 + $0x88] sm:$0xff] }
 0x64e   : > { %v7622_v25 = vrot.slane %v7450_v30, %v16206_v48  ;;  %13343 = vmatpush3.msra.mxu0 %v936_v13  ;;  %v18683_v30 = vld [vmem:[%s14016_s10 + $0x10] sm:$0xff]  ;;  %22692 = vst [vmem:[#allocation270_spill] sm:$0xff] %v18733_v41  ;;  %22697 = vst [vmem:[#allocation305_spill] sm:$0xff] %v18758_v27  ;;  %v18798_v13 = vld [vmem:[%s14016_s10 + $0xc8] sm:$0xff] }
 0x64f   : > { %13344 = vmatprep.subr.mxu0 %v935_v56  ;;  %22682 = vst [vmem:[#allocation111_spill] sm:$0xff] %v18683_v30  ;;  %22705 = vst [vmem:[#allocation198_spill] sm:$0xff] %v18798_v13 }
 0x650   : > { %v7623_v5 = vsel %vm3102_vm1, %v7622_v25, %v7618_v18  ;;  %13345 = vmatpush3.msra.mxu0 %v935_v56  ;;  %v18703_v25 = vld [vmem:[%s14016_s10 + $0x30] sm:$0xff]  ;;  %v18708_v18 = vld [vmem:[%s14016_s10 + $0x38] sm:$0xff] }
 0x651   : > { %v7456_v59 = vpop.xlane.xlu1 %7455  ;;  %v7645_v11 = vsel %vm3248_vm8, %v7623_v5, %v7644_v51  ;;  %13347 = vmatmul.mubr.msk.f32.vlgmr.msra.gmra.mxu0 %vm377_vm0, %v18678_v63  ;;  %22686 = vst [vmem:[#allocation299_spill] sm:$0xff] %v18703_v25  ;;  %22687 = vst [vmem:[#allocation301_spill] sm:$0xff] %v18708_v18  ;;  %v18743_v5 = vld [vmem:[%s14016_s10 + $0x70] sm:$0xff]  ;;  %v18768_v51 = vld [vmem:[%s14016_s10 + $0x98] sm:$0xff] }
 0x652   : > { %v7631_v4 = vrot.slane %v7456_v59, %v16206_v48  ;;  %13349 = vmatprep.mubr.msk.f32.mxu0 %vm377_vm0, %v18683_v30  ;;  %22694 = vst [vmem:[#allocation115_spill] sm:$0xff] %v18743_v5  ;;  %v18748_v59 = vld [vmem:[%s14016_s10 + $0x78] sm:$0xff]  ;;  %22699 = vst [vmem:[#allocation116_spill] sm:$0xff] %v18768_v51  ;;  %v18803_v56 = vld [vmem:[%s14016_s10 + $0xd0] sm:$0xff] }
 0x653   : > { %22695 = vst [vmem:[#allocation303_spill] sm:$0xff] %v18748_v59  ;;  %22706 = vst [vmem:[#allocation135_spill] sm:$0xff] %v18803_v56 }
 0x654   : > { %v7632_v17 = vsel %vm3102_vm1, %v7631_v4, %v7627_v12  ;;  %v18753_v12 = vld [vmem:[%s14016_s10 + $0x80] sm:$0xff]  ;;  %v18763_v4 = vld [vmem:[%s14016_s10 + $0x90] sm:$0xff] }
 0x655   : > { %v7646_v8 = vsel %vm3250_vm9, %v7632_v17, %v7645_v11  ;;  %13350 = vmatmul.mubr.msk.f32.gmra.mxu0 %vm377_vm0, %v18688_v32  ;;  %22696 = vst [vmem:[#allocation113_spill] sm:$0xff] %v18753_v12  ;;  %22698 = vst [vmem:[#allocation82_spill] sm:$0xff] %v18763_v4  ;;  %v18773_v17 = vld [vmem:[%s14016_s10 + $0xa0] sm:$0xff]  ;;  %v18778_v11 = vld [vmem:[%s14016_s10 + $0xa8] sm:$0xff] }
 0x656   : > { %7650 = vxpose.xlu0.b32.end [2/2] (short) (narrow) %v7646_v8, 16  ;;  %13352 = vmatprep.mubr.msk.f32.mxu0 %vm377_vm0, %v18693_v61  ;;  %22700 = vst [vmem:[#allocation403_spill] sm:$0xff] %v18773_v17  ;;  %22701 = vst [vmem:[#allocation49_spill] sm:$0xff] %v18778_v11  ;;  %v18783_v8 = vld [vmem:[%s14016_s10 + $0xb0] sm:$0xff] }
 0x657   : > { %22702 = vst [vmem:[#allocation327_spill] sm:$0xff] %v18783_v8 }
 0x659   : > { %13353 = vmatmul.mubr.msk.f32.gmra.mxu0 %vm377_vm0, %v18698_v60 }
 0x65a   : > { %13355 = vmatprep.mubr.msk.f32.mxu0 %vm377_vm0, %v18703_v25 }
 0x65d   : > { %13356 = vmatmul.mubr.msk.f32.gmra.mxu0 %vm377_vm0, %v18708_v18 }
 0x65e   : > { %13358 = vmatprep.mubr.msk.f32.mxu0 %vm377_vm0, %v18713_v47 }
 0x661   : > { %13359 = vmatmul.mubr.msk.f32.gmra.mxu0 %vm377_vm0, %v18718_v28 }
 0x662   : > { %13361 = vmatprep.mubr.msk.f32.mxu0 %vm377_vm0, %v18723_v10 }
 0x665   : > { %13362 = vmatmul.mubr.msk.f32.gmra.mxu0 %vm377_vm0, %v18728_v58 }
 0x666   : > { %13364 = vmatprep.mubr.msk.f32.mxu0 %vm377_vm0, %v18733_v41 }
 0x669   : > { %13365 = vmatmul.mubr.msk.f32.gmra.mxu0 %vm377_vm0, %v18738_v40 }
 0x66a   : > { %13367 = vmatprep.mubr.msk.f32.mxu0 %vm377_vm0, %v18743_v5 }
 0x66d   : > { %13368 = vmatmul.mubr.msk.f32.gmra.mxu0 %vm377_vm0, %v18748_v59 }
 0x66e   : > { %13370 = vmatprep.mubr.msk.f32.mxu0 %vm377_vm0, %v18753_v12 }
 0x671   : > { %13371 = vmatmul.mubr.msk.f32.gmra.mxu0 %vm377_vm0, %v18758_v27 }
 0x672   : > { %13373 = vmatprep.mubr.msk.f32.mxu0 %vm377_vm0, %v18763_v4 }
 0x675   : > { %13374 = vmatmul.mubr.msk.f32.gmra.mxu0 %vm377_vm0, %v18768_v51 }
 0x676   : > { %13376 = vmatprep.mubr.msk.f32.mxu0 %vm377_vm0, %v18773_v17  ;;  %v18834_v17 = vld [vmem:[%s14016_s10 + $0xf8] sm:$0xff] }
 0x677   : > { %22714 = vst [vmem:[#allocation407_spill] sm:$0xff] %v18834_v17 }
 0x679   : > { %13377 = vmatmul.mubr.msk.f32.gmra.mxu0 %vm377_vm0, %v18778_v11 }
 0x67a   : > { %13379 = vmatprep.mubr.msk.f32.mxu0 %vm377_vm0, %v18783_v8  ;;  %v18808_v8 = vld [vmem:[%s14016_s10 + $0xd8] sm:$0xff] }
 0x67b   : > { %22707 = vst [vmem:[#allocation329_spill] sm:$0xff] %v18808_v8 }
 0x67d   : > { %13380 = vmatmul.mubr.msk.f32.gmra.mxu0 %vm377_vm0, %v18788_v50  ;;  %v18813_v50 = vld [vmem:[%s14016_s10 + $0xe0] sm:$0xff] }
 0x67e   : > { %13382 = vmatprep.mubr.msk.f32.mxu0 %vm377_vm0, %v18793_v37  ;;  %22708 = vst [vmem:[#allocation129_spill] sm:$0xff] %v18813_v50  ;;  %v18818_v37 = vld [vmem:[%s14016_s10 + $0xe8] sm:$0xff] }
 0x67f   : > { %22709 = vst [vmem:[#allocation405_spill] sm:$0xff] %v18818_v37 }
 0x681   : > { %13383 = vmatmul.mubr.msk.f32.gmra.mxu0 %vm377_vm0, %v18798_v13  ;;  %v18823_v13 = vld [vmem:[%s14016_s10 + $0xf0] sm:$0xff] }
 0x682   : > { %13385 = vmatprep.mubr.msk.f32.mxu0 %vm377_vm0, %v18803_v56  ;;  %22710 = vst [vmem:[#allocation35_spill] sm:$0xff] %v18823_v13  ;;  %v22711_v56 = vld [vmem:[#allocation9_spill] sm:$0xff] }
 0x683   : > { %v18828_v11 = vsub.s32 4, %v22711_v56  ;;  %v18845_v12 = vsub.s32 1, %v22711_v56  ;;  %v18848_v59 = vsub.s32 3, %v22711_v56  ;;  %v18854_v41 = vsub.s32 5, %v22711_v56 }
 0x684   : > { %v18863_v47 = vsub.s32 7, %v22711_v56 }
 0x685   : > { %13386 = vmatmul.mubr.msk.f32.gmra.mxu0 %vm377_vm0, %v18808_v8  ;;  %22712 = vst [vmem:[#allocation158_spill] sm:$0xff] %v18828_v11  ;;  %v18831_v8 = vsub.s32 0, %v22711_v56  ;;  %22716 = vst [vmem:[#allocation207_spill] sm:$0xff] %v18845_v12 }
 0x686   : > { %13388 = vmatprep.mubr.msk.f32.mxu0 %vm377_vm0, %v18813_v50  ;;  %22717 = vst [vmem:[#allocation164_spill] sm:$0xff] %v18848_v59  ;;  %22718 = vst [vmem:[#allocation90_spill] sm:$0xff] %v18854_v41 }
 0x687   : > { %22713 = vst [vmem:[#allocation391_spill] sm:$0xff] %v18831_v8  ;;  %22720 = vst [vmem:[#allocation392_spill] sm:$0xff] %v18863_v47 }
 0x689   : > { %13389 = vmatmul.mubr.msk.f32.gmra.mxu0 %vm377_vm0, %v18818_v37 }
 0x68a   : > { %13391 = vmatprep.mubr.msk.f32.mxu0 %vm377_vm0, %v18823_v13  ;;  %v18841_v13 = vsub.s32 2, %v22711_v56 }
 0x68c   : > { %22715 = vst [vmem:[#allocation130_spill] sm:$0xff] %v18841_v13 }
 0x68d   : > { %13392 = vmatmul.mubr.msk.f32.gmra.mxu0 %vm377_vm0, %v18834_v17 }
 0x6ce   : > { %v7665_v50 = vpop.trf.xlu0 }
 0x6cf   : > { %v7730_v51 = vrot.slane %v7665_v50, %v18828_v11  ;;  %v7686_v37 = vrot.slane %v7665_v50, %v18831_v8  ;;  %v7697_v5 = vrot.slane %v7665_v50, %v18845_v12  ;;  %v7708_v10 = vrot.slane %v7665_v50, %v18841_v13 }
 0x6d0   : > { %v7741_v25 = vrot.slane %v7665_v50, %v18854_v41 }
 0x6d1   : > { %7736 = vbcast.lane.b32.xlu0 %v7730_v51, 264  ;;  %7688 = vbcast.lane.b32.xlu1 %v7686_v37, 256 }
 0x6d2   : > { %v7666_v4 = vpop.trf.xlu0 }
 0x6d3   : > { %v7796_v27 = vrot.slane %v7666_v4, %v18841_v13  ;;  %v7807_v17 = vrot.slane %v7666_v4, %v18848_v59  ;;  %v7818_v40 = vrot.slane %v7666_v4, %v18828_v11  ;;  %v7829_v58 = vrot.slane %v7666_v4, %v18854_v41 }
 0x6d4   : > { %v7851_v18 = vrot.slane %v7666_v4, %v18863_v47  ;;  %v7785_v61 = vrot.slane %v7666_v4, %v18845_v12 }
 0x6d5   : > { %7692 = vbcast.lane.b32.xlu1 %v7686_v37, 264  ;;  %7798 = vbcast.lane.b32.xlu0 %v7796_v27, 256  ;;  %v18859_v37 = vsub.s32 6, %v22711_v56  ;;  %v7763_v56 = vrot.slane %v7665_v50, %v18863_v47 }
 0x6d7   : > { %22719 = vst [vmem:[#allocation199_spill] sm:$0xff] %v18859_v37  ;;  %v7840_v28 = vrot.slane %v7666_v4, %v18859_v37  ;;  %v7752_v60 = vrot.slane %v7665_v50, %v18859_v37 }
 0x6d9   : > { %7699 = vbcast.lane.b32.xlu1 %v7697_v5, 256  ;;  %7809 = vbcast.lane.b32.xlu0 %v7807_v17, 256 }
 0x6dd   : > { %7703 = vbcast.lane.b32.xlu1 %v7697_v5, 264  ;;  %7820 = vbcast.lane.b32.xlu0 %v7818_v40, 256  ;;  %v7719_v5 = vrot.slane %v7665_v50, %v18848_v59 }
 0x6e1   : > { %7710 = vbcast.lane.b32.xlu1 %v7708_v10, 256  ;;  %7831 = vbcast.lane.b32.xlu0 %v7829_v58, 256 }
 0x6e5   : > { %7714 = vbcast.lane.b32.xlu1 %v7708_v10, 264  ;;  %7842 = vbcast.lane.b32.xlu0 %v7840_v28, 256  ;;  %v7774_v10 = vrot.slane %v7666_v4, %v18831_v8 }
 0x6e9   : > { %7721 = vbcast.lane.b32.xlu1 %v7719_v5, 256  ;;  %7853 = vbcast.lane.b32.xlu0 %v7851_v18, 256 }
 0x6ed   : > { %7725 = vbcast.lane.b32.xlu1 %v7719_v5, 264 }
 0x6f1   : > { %7732 = vbcast.lane.b32.xlu1 %v7730_v51, 256 }
 0x6f5   : > { %7743 = vbcast.lane.b32.xlu1 %v7741_v25, 256 }
 0x6f9   : > { %7747 = vbcast.lane.b32.xlu1 %v7741_v25, 264 }
 0x6fd   : > { %7754 = vbcast.lane.b32.xlu1 %v7752_v60, 256 }
 0x701   : > { %7758 = vbcast.lane.b32.xlu1 %v7752_v60, 264 }
 0x705   : > { %7765 = vbcast.lane.b32.xlu1 %v7763_v56, 256 }
 0x709   : > { %7769 = vbcast.lane.b32.xlu1 %v7763_v56, 264 }
 0x70d   : > { %7776 = vbcast.lane.b32.xlu1 %v7774_v10, 256 }
 0x711   : > { %7780 = vbcast.lane.b32.xlu1 %v7774_v10, 264 }
 0x715   : > { %7787 = vbcast.lane.b32.xlu1 %v7785_v61, 256 }
 0x719   : > { %7791 = vbcast.lane.b32.xlu1 %v7785_v61, 264 }
 0x71d   : > { %7802 = vbcast.lane.b32.xlu1 %v7796_v27, 264 }
 0x721   : > { %7813 = vbcast.lane.b32.xlu1 %v7807_v17, 264 }
 0x725   : > { %7824 = vbcast.lane.b32.xlu1 %v7818_v40, 264  ;;  %v13348_v40 = vpop.f32.mrf.mxu0 }
 0x729   : > { %7835 = vbcast.lane.b32.xlu1 %v7829_v58, 264 }
 0x72d   : > { %7846 = vbcast.lane.b32.xlu1 %v7840_v28, 264 }
 0x731   : > { %7857 = vbcast.lane.b32.xlu1 %v7851_v18, 264  ;;  %v18879_v18 = vld [vmem:[%s20586_s8] ss:$0 sm:$0xff] }
 0x732   : > { %v18882_v28 = vadd.f32 %v13348_v40, %v18879_v18 }
 0x734   : > { %13506 = vmatprep.subr.mxu0 %v18882_v28 }
 0x735   : > { %13507 = vmatpush3.msra.mxu0 %v18882_v28 }
 0x743   : > { %v7689_v25 = vpop.permute.xlu1 %7688 }
 0x744   : > { %v7891_v60 = vmax.f32 %v18556_v3, %v7689_v25 }
 0x746   : > { %7925 = vperm.xlu0 %13682, %v7891_v60  }
 0x747   : > { %v7693_v51 = vpop.permute.xlu1 %7692 }
 0x748   : > { %v7892_v50 = vmax.f32 %v18378_v6, %v7693_v51  ;;  %v7737_v51 = vpop.permute.xlu0 %7736 }
 0x74a   : > { %7930 = vperm.xlu1 %13683, %v7892_v50  }
 0x74b   : > { %v7700_v5 = vpop.permute.xlu1 %7699 }
 0x74c   : > { %v7893_v56 = vmax.f32 %v18437_v34, %v7700_v5  ;;  %v1012_v34 = vpop.f32.mrf.mxu0 }
 0x74d   : > { %v18888_v58 = vadd.f32 %v18879_v18, %v1012_v34 }
 0x74e   : > { %7935 = vperm.xlu1 %13683, %v7893_v56   ;;  %v13351_v10 = vpop.f32.mrf.mxu0 }
 0x74f   : > { %v7704_v4 = vpop.permute.xlu1 %7703  ;;  %13508 = vmatprep.subr.mxu0 %v18888_v58 }
 0x750   : > { %v7894_v61 = vmax.f32 %v18558_v21, %v7704_v4  ;;  %13509 = vmatpush3.msra.mxu0 %v18888_v58  ;;  %v18895_v50 = vpop.f32.mrf.mxu0 }
 0x752   : > { %7940 = vperm.xlu0 %13682, %v7894_v61   ;;  %v13354_v4 = vpop.f32.mrf.mxu0 }
 0x753   : > { %v7711_v3 = vpop.permute.xlu1 %7710  ;;  %v18900_v61 = vadd.f32 %v13354_v4, %v18879_v18  ;;  %v7799_v4 = vpop.permute.xlu0 %7798 }
 0x754   : > { %v7895_v6 = vmax.f32 %v18469_v22, %v7711_v3 }
 0x755   : > { %13520 = vmatprep.subr.mxu0 %v18900_v61 }
 0x756   : > { %7945 = vperm.xlu1 %13683, %v7895_v6   ;;  %v18905_v6 = vpop.f32.mrf.mxu0 }
 0x757   : > { %v7715_v21 = vpop.permute.xlu1 %7714 }
 0x758   : > { %v7896_v27 = vmax.f32 %v18562_v49, %v7715_v21  ;;  %v7900_v49 = vmax.f32 %v18568_v19, %v7737_v51  ;;  %v18908_v19 = vadd.f32 %v13351_v10, %v18879_v18 }
 0x75a   : > { %7950 = vperm.xlu0 %13682, %v7896_v27  }
 0x75b   : > { %v7722_v17 = vpop.permute.xlu1 %7721 }
 0x75c   : > { %v7897_v22 = vmax.f32 %v18496_v14, %v7722_v17 }
 0x75e   : > { %7955 = vperm.xlu1 %13683, %v7897_v22  }
 0x75f   : > { %v7726_v25 = vpop.permute.xlu1 %7725 }
 0x760   : > { %v7898_v60 = vmax.f32 %v18566_v44, %v7726_v25 }
 0x762   : > { %7960 = vperm.xlu0 %13682, %v7898_v60  }
 0x763   : > { %v7733_v5 = vpop.permute.xlu1 %7732 }
 0x764   : > { %v7899_v56 = vmax.f32 %v18517_v26, %v7733_v5  ;;  %v13357_v26 = vpop.f32.mrf.mxu0 }
 0x765   : > { %v18911_v21 = vadd.f32 %v13357_v26, %v18879_v18 }
 0x766   : > { %7965 = vperm.xlu1 %13683, %v7899_v56   ;;  %7970 = vperm.xlu0 %13682, %v7900_v49  }
 0x767   : > { %v7744_v14 = vpop.permute.xlu1 %7743 }
 0x768   : > { %v7901_v44 = vmax.f32 %v18534_v35, %v7744_v14 }
 0x76a   : > { %7975 = vperm.xlu1 %13683, %v7901_v44  }
 0x76b   : > { %v7748_v40 = vpop.permute.xlu1 %7747 }
 0x76c   : > { %v7902_v3 = vmax.f32 %v18572_v36, %v7748_v40  ;;  %v18918_v36 = vpop.f32.mrf.mxu0 }
 0x76e   : > { %7980 = vperm.xlu0 %13682, %v7902_v3   ;;  %v18921_v25 = vpop.f32.mrf.mxu0 }
 0x76f   : > { %v7755_v34 = vpop.permute.xlu1 %7754 }
 0x770   : > { %v7903_v27 = vmax.f32 %v18541_v53, %v7755_v34  ;;  %v18924_v53 = vpop.f32.mrf.mxu0 }
 0x772   : > { %7985 = vperm.xlu1 %13683, %v7903_v27   ;;  %v13363_v56 = vpop.f32.mrf.mxu0 }
 0x773   : > { %v7759_v22 = vpop.permute.xlu1 %7758 }
 0x774   : > { %v7904_v10 = vmax.f32 %v18576_v20, %v7759_v22  ;;  %v18928_v40 = vpop.f32.mrf.mxu0  ;;  %v18937_v22 = vadd.f32 %v13363_v56, %v18879_v18 }
 0x776   : > { %7990 = vperm.xlu0 %13682, %v7904_v10   ;;  %v18931_v26 = vpop.f32.mrf.mxu0 }
 0x777   : > { %v7766_v60 = vpop.permute.xlu1 %7765 }
 0x778   : > { %v7905_v51 = vmax.f32 %v18550_v15, %v7766_v60  ;;  %v7810_v15 = vpop.permute.xlu0 %7809 }
 0x77a   : > { %7995 = vperm.xlu1 %13683, %v7905_v51  }
 0x77b   : > { %v7770_v5 = vpop.permute.xlu1 %7769 }
 0x77c   : > { %v7906_v49 = vmax.f32 %v18578_v43, %v7770_v5  ;;  %v18934_v43 = vpop.f32.mrf.mxu0  ;;  %v7821_v10 = vpop.permute.xlu0 %7820 }
 0x77e   : > { %8000 = vperm.xlu0 %13682, %v7906_v49  }
 0x77f   : > { %v7777_v14 = vpop.permute.xlu1 %7776 }
 0x780   : > { %v7907_v44 = vmax.f32 %v18552_v23, %v7777_v14  ;;  %v13369_v23 = vpop.f32.mrf.mxu0  ;;  %v7913_v14 = vmax.f32 %v18564_v1, %v7810_v15 }
 0x781   : > { %v18940_v51 = vadd.f32 %v13369_v23, %v18879_v18 }
 0x782   : > { %8005 = vperm.xlu1 %13683, %v7907_v44  }
 0x783   : > { %v7781_v20 = vpop.permute.xlu1 %7780  ;;  %22721 = vst [vmem:[#allocation409_spill] sm:$0xff] %v18940_v51 }
 0x784   : > { %v7908_v3 = vmax.f32 %v18582_v57, %v7781_v20  ;;  %v7911_v57 = vmax.f32 %v18560_v46, %v7799_v4  ;;  %v7832_v20 = vpop.permute.xlu0 %7831  ;;  %v7915_v46 = vmax.f32 %v18570_v62, %v7821_v10 }
 0x786   : > { %8010 = vperm.xlu0 %13682, %v7908_v3  }
 0x787   : > { %v7788_v34 = vpop.permute.xlu1 %7787 }
 0x788   : > { %v7909_v27 = vmax.f32 %v18554_v42, %v7788_v34  ;;  %v7843_v4 = vpop.permute.xlu0 %7842 }
 0x78a   : > { %8015 = vperm.xlu1 %13683, %v7909_v27   ;;  %v7917_v27 = vmax.f32 %v18574_v31, %v7832_v20 }
 0x78b   : > { %v7792_v60 = vpop.permute.xlu1 %7791 }
 0x78c   : > { %v7910_v5 = vmax.f32 %v18586_v33, %v7792_v60  ;;  %v7854_v60 = vpop.permute.xlu0 %7853 }
 0x78e   : > { %8020 = vperm.xlu0 %13682, %v7910_v5   ;;  %8025 = vperm.xlu1 %13683, %v7911_v57  }
 0x78f   : > { %v7803_v56 = vpop.permute.xlu1 %7802 }
 0x790   : > { %v7912_v44 = vmax.f32 %v18588_v0, %v7803_v56  ;;  %v7919_v0 = vmax.f32 %v18580_v29, %v7843_v4  ;;  %v22722_v29 = vld [vmem:[#allocation256_spill] sm:$0xff] }
 0x792   : > { %8030 = vperm.xlu0 %13682, %v7912_v44   ;;  %8035 = vperm.xlu1 %13683, %v7913_v14   ;;  %v22723_v14 = vld [vmem:[#allocation155_spill] sm:$0xff] }
 0x793   : > { %v7814_v3 = vpop.permute.xlu1 %7813 }
 0x794   : > { %v7914_v33 = vmax.f32 %v18590_v55, %v7814_v3  ;;  %v7921_v55 = vmax.f32 %v18584_v39, %v7854_v60  ;;  %v22726_v3 = vld [vmem:[#allocation266_spill] sm:$0xff]  ;;  %v18993_v60 = vadd.f32 %v18921_v25, %v18879_v18 }
 0x796   : > { %8040 = vperm.xlu0 %13682, %v7914_v33   ;;  %8045 = vperm.xlu1 %13683, %v7915_v46  }
 0x797   : > { %v7825_v34 = vpop.permute.xlu1 %7824 }
 0x798   : > { %v7916_v23 = vmax.f32 %v18592_v45, %v7825_v34 }
 0x79a   : > { %8050 = vperm.xlu0 %13682, %v7916_v23   ;;  %8055 = vperm.xlu1 %13683, %v7917_v27   ;;  %v22728_v27 = vld [vmem:[#allocation50_spill] sm:$0xff] }
 0x79b   : > { %v7836_v1 = vpop.permute.xlu1 %7835 }
 0x79c   : > { %v7918_v15 = vmax.f32 %v18594_v7, %v7836_v1  ;;  %v18985_v1 = vadd.f32 %v18879_v18, %v18905_v6 }
 0x79e   : > { %8060 = vperm.xlu0 %13682, %v7918_v15   ;;  %8065 = vperm.xlu1 %13683, %v7919_v0  }
 0x79f   : > { %v7847_v62 = vpop.permute.xlu1 %7846 }
 0x7a0   : > { %v7920_v10 = vmax.f32 %v18596_v9, %v7847_v62 }
 0x7a2   : > { %8070 = vperm.xlu0 %13682, %v7920_v10   ;;  %8075 = vperm.xlu1 %13683, %v7921_v55  }
 0x7a3   : > { %v7858_v31 = vpop.permute.xlu1 %7857 }
 0x7a4   : > { %v7922_v45 = vmax.f32 %v18598_v52, %v7858_v31  ;;  %v22730_v31 = vld [vmem:[#allocation272_spill] sm:$0xff] }
 0x7a6   : > { %8080 = vperm.xlu0 %13682, %v7922_v45  }
 0x7c1   : > { %v18959_v57 = vpop.permute.xlu0 %7925 }
 0x7c2   : > { %v8083_v5 = vsub.f32 %v22722_v29, %v18959_v57  ;;  %v22731_v29 = vld [vmem:[#allocation154_spill] sm:$0xff] }
 0x7c4   : > { %v8115_v7 = vmul.f32 1.442695, %v8083_v5 }
 0x7c5   : > { %v18963_v56 = vpop.permute.xlu1 %7930 }
 0x7c6   : > { %13684 = vpow2.f32 %v8115_v7  ;;  %v8084_v39 = vsub.f32 %v22723_v14, %v18963_v56 }
 0x7c8   : > { %v8117_v44 = vmul.f32 1.442695, %v8084_v39  ;;  %v19011_v39 = vadd.f32 %v18879_v18, %v18924_v53  ;;  %v19027_v53 = vpop.f32.mrf.mxu0 }
 0x7c9   : > { %v18967_v9 = vpop.permute.xlu1 %7935 }
 0x7ca   : > { %13686 = vpow2.f32 %v8117_v44  ;;  %22724 = vst [vmem:[#allocation184_spill] sm:$0xff] %v18967_v9  ;;  %22733 = vst [vmem:[#allocation394_spill] sm:$0xff] %v19011_v39  ;;  %v8191_v42 = vrot.slane %v18967_v9, %v16200_v54 }
 0x7cd   : > { %v18969_v20 = vpop.permute.xlu0 %7940 }
 0x7ce   : > { %22725 = vst [vmem:[#allocation393_spill] sm:$0xff] %v18969_v20 }
 0x7d1   : > { %v18971_v52 = vpop.permute.xlu1 %7945 }
 0x7d2   : > { %v8087_v46 = vsub.f32 %v22726_v3, %v18971_v52  ;;  %v19019_v3 = vadd.f32 %v18931_v26, %v18879_v18  ;;  %v8195_v26 = vrot.slane %v18969_v20, %v16206_v48 }
 0x7d3   : > { %v18975_v33 = vpop.eup %13684 }
 0x7d4   : > { %22727 = vst [vmem:[#allocation219_spill] sm:$0xff] %v18975_v33  ;;  %v8123_v4 = vmul.f32 1.442695, %v8087_v46  ;;  %13510 = vmatprep.mubr.msk.f32.mxu0 %vm7264_vm2, %v18975_v33  ;;  %v8196_v30 = vsel %vm3102_vm1, %v8195_v26, %v8191_v42 }
 0x7d5   : > { %v18979_v34 = vpop.permute.xlu0 %7950 }
 0x7d6   : > { %13688 = vpow2.f32 %v8123_v4  ;;  %v8088_v23 = vsub.f32 %v22728_v27, %v18979_v34 }
 0x7d7   : > { %v18987_v0 = vpop.eup %13686 }
 0x7d8   : > { %v8125_v15 = vmul.f32 1.442695, %v8088_v23  ;;  %13511 = vmatmul.mubr.msk.f32.vlgmr.msra.gmra.mxu0 %vm7264_vm2, %v18987_v0  ;;  %v22735_v23 = vld [vmem:[#allocation275_spill] sm:$0xff] }
 0x7d9   : > { %13521 = vmatpush3.msra.mxu0 %v18900_v61  ;;  %v18999_v6 = vpop.permute.xlu1 %7955 }
 0x7da   : > { %13690 = vpow2.f32 %v8125_v15  ;;  %13522 = vmatprep.subr.mxu0 %v18985_v1  ;;  %22729 = vst [vmem:[#allocation161_spill] sm:$0xff] %v18999_v6 }
 0x7db   : > { %13523 = vmatpush3.msra.mxu0 %v18985_v1 }
 0x7dc   : > { %13534 = vmatprep.subr.mxu0 %v18993_v60 }
 0x7dd   : > { %v19001_v62 = vpop.permute.xlu0 %7960 }
 0x7e1   : > { %v7966_v55 = vpop.permute.xlu1 %7965  ;;  %v7971_v10 = vpop.permute.xlu0 %7970 }
 0x7e2   : > { %v8091_v45 = vsub.f32 %v22730_v31, %v7966_v55  ;;  %v8092_v25 = vsub.f32 %v22731_v29, %v7971_v10  ;;  %v8186_v29 = vrot.slane %v18963_v56, %v16206_v48  ;;  %v8182_v56 = vrot.slane %v18959_v57, %v16200_v54 }
 0x7e3   : > { %v19005_v5 = vpop.eup %13688  ;;  %v8222_v35 = vrot.slane %v7971_v10, %v16206_v48 }
 0x7e4   : > { %22732 = vst [vmem:[#allocation3_spill] sm:$0xff] %v19005_v5  ;;  %v8131_v7 = vmul.f32 1.442695, %v8091_v45  ;;  %v8133_v14 = vmul.f32 1.442695, %v8092_v25  ;;  %13524 = vmatprep.mubr.msk.f32.mxu0 %vm7264_vm2, %v19005_v5  ;;  %v13372_v45 = vpop.f32.mrf.mxu0  ;;  %v8204_v25 = vrot.slane %v18979_v34, %v16206_v48  ;;  %v8200_v34 = vrot.slane %v18971_v52, %v16200_v54 }
 0x7e5   : > { %v19021_v46 = vpop.permute.xlu1 %7975  ;;  %v19069_v42 = vadd.f32 %v13372_v45, %v18879_v18  ;;  %v8187_v10 = vsel %vm3102_vm1, %v8186_v29, %v8182_v56 }
 0x7e6   : > { %13692 = vpow2.f32 %v8131_v7  ;;  %22734 = vst [vmem:[#allocation375_spill] sm:$0xff] %v19021_v46  ;;  %v1092_v57 = vpop.f32.mrf.mxu0  ;;  %v8205_v52 = vsel %vm3102_vm1, %v8204_v25, %v8200_v34  ;;  %v8323_v25 = vsel %vm3239_vm3, %v8196_v30, %v8187_v10 }
 0x7e7   : > { %v19013_v44 = vpop.eup %13690  ;;  %13694 = vpow2.f32 %v8133_v14  ;;  %v19040_v14 = vadd.f32 %v18879_v18, %v18934_v43  ;;  %v8218_v43 = vrot.slane %v7966_v55, %v16200_v54  ;;  %22740 = vst [vmem:[#allocation376_spill] sm:$0xff] %v19069_v42  ;;  %v8324_v29 = vsel %vm3240_vm4, %v8205_v52, %v8323_v25 }
 0x7e8   : > { %13525 = vmatmul.mubr.msk.f32.vlgmr.msra.gmra.mxu0 %vm7264_vm2, %v19013_v44 }
 0x7e9   : > { %13535 = vmatpush3.msra.mxu0 %v18993_v60  ;;  %v19029_v4 = vpop.permute.xlu0 %7980  ;;  %22736 = vst [vmem:[#allocation200_spill] sm:$0xff] %v19040_v14 }
 0x7ea   : > { %13536 = vmatprep.subr.mxu0 %v19011_v39 }
 0x7eb   : > { %13537 = vmatpush3.msra.mxu0 %v19011_v39 }
 0x7ec   : > { %13548 = vmatprep.subr.mxu0 %v19019_v3 }
 0x7ed   : > { %v7986_v27 = vpop.permute.xlu1 %7985 }
 0x7ee   : > { %v8095_v15 = vsub.f32 %v22735_v23, %v7986_v27  ;;  %v8213_v23 = vrot.slane %v19001_v62, %v16206_v48  ;;  %v8236_v34 = vrot.slane %v7986_v27, %v16200_v54 }
 0x7f0   : > { %v8139_v31 = vmul.f32 1.442695, %v8095_v15  ;;  %v22737_v15 = vld [vmem:[#allocation157_spill] sm:$0xff] }
 0x7f1   : > { %v7991_v7 = vpop.permute.xlu0 %7990 }
 0x7f2   : > { %13696 = vpow2.f32 %v8139_v31  ;;  %v8096_v17 = vsub.f32 %v22737_v15, %v7991_v7  ;;  %v8209_v31 = vrot.slane %v18999_v6, %v16200_v54  ;;  %v8231_v15 = vrot.slane %v19029_v4, %v16206_v48  ;;  %v22762_v6 = vld [vmem:[#allocation221_spill] sm:$0xff] }
 0x7f3   : > { %v19047_v49 = vpop.eup %13692  ;;  %v8240_v55 = vrot.slane %v7991_v7, %v16206_v48  ;;  %v8223_v7 = vsel %vm3102_vm1, %v8222_v35, %v8218_v43 }
 0x7f4   : > { %22738 = vst [vmem:[#allocation411_spill] sm:$0xff] %v19047_v49  ;;  %v19055_v32 = vpop.eup %13694  ;;  %v8141_v63 = vmul.f32 1.442695, %v8096_v17  ;;  %13538 = vmatprep.mubr.msk.f32.mxu0 %vm7264_vm2, %v19047_v49  ;;  %v8214_v26 = vsel %vm3102_vm1, %v8213_v23, %v8209_v31  ;;  %v8227_v17 = vrot.slane %v19021_v46, %v16200_v54  ;;  %v19076_v49 = vpop.f32.mrf.mxu0 }
 0x7f5   : > { %22739 = vst [vmem:[#allocation97_spill] sm:$0xff] %v19055_v32  ;;  %13539 = vmatmul.mubr.msk.f32.vlgmr.msra.gmra.mxu0 %vm7264_vm2, %v19055_v32  ;;  %22741 = vst [vmem:[#allocation46_spill] sm:$0xff] %v19076_v49  ;;  %v19081_v45 = vpop.permute.xlu1 %7995  ;;  %v8241_v30 = vsel %vm3102_vm1, %v8240_v55, %v8236_v34 }
 0x7f6   : > { %13698 = vpow2.f32 %v8141_v63  ;;  %13549 = vmatpush3.msra.mxu0 %v19019_v3  ;;  %22742 = vst [vmem:[#allocation201_spill] sm:$0xff] %v19081_v45  ;;  %v8232_v23 = vsel %vm3102_vm1, %v8231_v15, %v8227_v17  ;;  %v8325_v63 = vsel %vm3242_vm5, %v8214_v26, %v8324_v29  ;;  %v8245_v35 = vrot.slane %v19081_v45, %v16200_v54  ;;  %v19097_v31 = vpop.f32.mrf.mxu0  ;;  %v22743_v17 = vld [vmem:[#allocation278_spill] sm:$0xff] }
 0x7f7   : > { %13550 = vmatprep.subr.mxu0 %v19040_v14  ;;  %v8326_v43 = vsel %vm3244_vm6, %v8223_v7, %v8325_v63  ;;  %v22745_v63 = vld [vmem:[#allocation160_spill] sm:$0xff] }
 0x7f8   : > { %13551 = vmatpush3.msra.mxu0 %v19040_v14  ;;  %v8327_v15 = vsel %vm3246_vm7, %v8232_v23, %v8326_v43  ;;  %v13378_v34 = vpop.f32.mrf.mxu0 }
 0x7f9   : > { %v19088_v56 = vpop.permute.xlu0 %8000  ;;  %13562 = vmatprep.subr.mxu0 %v19069_v42  ;;  %v8328_v10 = vsel %vm3248_vm8, %v8241_v30, %v8327_v15 }
 0x7fa   : > { %v8249_v27 = vrot.slane %v19088_v56, %v16206_v48 }
 0x7fc   : > { %v8250_v52 = vsel %vm3102_vm1, %v8249_v27, %v8245_v35  ;;  %v19116_v35 = vadd.f32 %v18879_v18, %v1092_v57  ;;  %v1112_v27 = vpop.f32.mrf.mxu0 }
 0x7fd   : > { %v19102_v26 = vpop.permute.xlu1 %8005  ;;  %v8329_v55 = vsel %vm3250_vm9, %v8250_v52, %v8328_v10  ;;  %v19123_v52 = vadd.f32 %v13378_v34, %v18879_v18 }
 0x7fe   : > { %v8099_v25 = vsub.f32 %v22743_v17, %v19102_v26  ;;  %8339 = vxpose.xlu1.b32.start [1/2] (short) (narrow) %v8329_v55, 16  ;;  %v19129_v55 = vpop.f32.mrf.mxu0 }
 0x7ff   : > { %v19107_v29 = vpop.eup %13696  ;;  %22747 = vst [vmem:[#allocation52_spill] sm:$0xff] %v19123_v52  ;;  %22749 = vst [vmem:[#allocation377_spill] sm:$0xff] %v19129_v55  ;;  %v22753_v55 = vld [vmem:[#allocation139_spill] sm:$0xff] }
 0x800   : > { %22744 = vst [vmem:[#allocation202_spill] sm:$0xff] %v19107_v29  ;;  %v8147_v7 = vmul.f32 1.442695, %v8099_v25  ;;  %13552 = vmatprep.mubr.msk.f32.mxu0 %vm7264_vm2, %v19107_v29  ;;  %v22750_v25 = vld [vmem:[#allocation232_spill] sm:$0xff]  ;;  %v19136_v34 = vpop.f32.mrf.mxu0 }
 0x801   : > { %v19111_v23 = vpop.permute.xlu0 %8010 }
 0x802   : > { %13700 = vpow2.f32 %v8147_v7  ;;  %v8100_v30 = vsub.f32 %v22745_v63, %v19111_v23 }
 0x803   : > { %v19118_v43 = vpop.eup %13698 }
 0x804   : > { %22746 = vst [vmem:[#allocation124_spill] sm:$0xff] %v19118_v43  ;;  %v8149_v15 = vmul.f32 1.442695, %v8100_v30  ;;  %13553 = vmatmul.mubr.msk.f32.vlgmr.msra.gmra.mxu0 %vm7264_vm2, %v19118_v43 }
 0x805   : > { %v19125_v10 = vpop.permute.xlu1 %8015  ;;  %13563 = vmatpush3.msra.mxu0 %v19069_v42 }
 0x806   : > { %22748 = vst [vmem:[#allocation42_spill] sm:$0xff] %v19125_v10  ;;  %13702 = vpow2.f32 %v8149_v15  ;;  %13564 = vmatprep.subr.mxu0 %v19116_v35  ;;  %v13384_v15 = vpop.f32.mrf.mxu0 }
 0x807   : > { %13565 = vmatpush3.msra.mxu0 %v19116_v35 }
 0x808   : > { %13576 = vmatprep.subr.mxu0 %v19123_v52  ;;  %v1132_v2 = vpop.f32.mrf.mxu0 }
 0x809   : > { %v8026_v57 = vpop.permute.xlu1 %8025  ;;  %v19133_v17 = vpop.permute.xlu0 %8020 }
 0x80a   : > { %v8103_v7 = vsub.f32 %v22750_v25, %v8026_v57  ;;  %v22755_v25 = vld [vmem:[#allocation286_spill] sm:$0xff] }
 0x80c   : > { %v8155_v63 = vmul.f32 1.442695, %v8103_v7  ;;  %v19149_v7 = vadd.f32 %v18879_v18, %v1112_v27  ;;  %v19162_v27 = vpop.f32.mrf.mxu0 }
 0x80d   : > { %v19138_v30 = vpop.permute.xlu1 %8035  ;;  %v8031_v42 = vpop.permute.xlu0 %8030  ;;  %22759 = vst [vmem:[#allocation29_spill] sm:$0xff] %v19162_v27  ;;  %v8263_v27 = vrot.slane %v19125_v10, %v16200_v54 }
 0x80e   : > { %22751 = vst [vmem:[#allocation51_spill] sm:$0xff] %v19138_v30  ;;  %13704 = vpow2.f32 %v8155_v63  ;;  %v8104_v29 = vsub.f32 %v22753_v55, %v8031_v42  ;;  %v19156_v55 = vadd.f32 %v13384_v15, %v18879_v18  ;;  %v8276_v15 = vrot.slane %v8031_v42, %v16206_v48  ;;  %v19179_v9 = vpop.f32.mrf.mxu0 }
 0x80f   : > { %v19140_v49 = vpop.eup %13700  ;;  %v8281_v10 = vrot.slane %v19138_v30, %v16200_v54 }
 0x810   : > { %22752 = vst [vmem:[#allocation28_spill] sm:$0xff] %v19140_v49  ;;  %13566 = vmatprep.mubr.msk.f32.mxu0 %vm7264_vm2, %v19140_v49  ;;  %v8157_v24 = vmul.f32 1.442695, %v8104_v29  ;;  %22757 = vst [vmem:[#allocation189_spill] sm:$0xff] %v19156_v55 }
 0x811   : > { %v8046_v5 = vpop.permute.xlu1 %8045  ;;  %v19145_v16 = vpop.permute.xlu0 %8040 }
 0x812   : > { %22754 = vst [vmem:[#allocation153_spill] sm:$0xff] %v19145_v16  ;;  %v8107_v45 = vsub.f32 %v22755_v25, %v8046_v5  ;;  %13706 = vpow2.f32 %v8157_v24  ;;  %v22760_v25 = vld [vmem:[#allocation338_spill] sm:$0xff]  ;;  %v8267_v24 = vrot.slane %v19133_v17, %v16206_v48 }
 0x813   : > { %v19151_v33 = vpop.eup %13702 }
 0x814   : > { %22756 = vst [vmem:[#allocation378_spill] sm:$0xff] %v19151_v33  ;;  %v8163_v63 = vmul.f32 1.442695, %v8107_v45  ;;  %13567 = vmatmul.mubr.msk.f32.vlgmr.msra.gmra.mxu0 %vm7264_vm2, %v19151_v33  ;;  %v8258_v45 = vrot.slane %v19111_v23, %v16206_v48  ;;  %v8254_v23 = vrot.slane %v19102_v26, %v16200_v54  ;;  %v8268_v43 = vsel %vm3102_vm1, %v8267_v24, %v8263_v27  ;;  %v22764_v24 = vld [vmem:[#allocation152_spill] sm:$0xff] }
 0x815   : > { %v19158_v29 = vpop.permute.xlu1 %8055  ;;  %v8051_v49 = vpop.permute.xlu0 %8050  ;;  %13577 = vmatpush3.msra.mxu0 %v19123_v52 }
 0x816   : > { %22758 = vst [vmem:[#allocation380_spill] sm:$0xff] %v19158_v29  ;;  %13708 = vpow2.f32 %v8163_v63  ;;  %13578 = vmatprep.subr.mxu0 %v19149_v7  ;;  %v8108_v46 = vsub.f32 %v22760_v25, %v8051_v49  ;;  %v8285_v25 = vrot.slane %v19145_v16, %v16206_v48  ;;  %v8294_v42 = vrot.slane %v8051_v49, %v16206_v48 }
 0x817   : > { %13579 = vmatpush3.msra.mxu0 %v19149_v7  ;;  %v8259_v32 = vsel %vm3102_vm1, %v8258_v45, %v8254_v23  ;;  %v19198_v49 = vadd.f32 %v18879_v18, %v1132_v2 }
 0x818   : > { %13590 = vmatprep.subr.mxu0 %v19156_v55  ;;  %v8165_v52 = vmul.f32 1.442695, %v8108_v46  ;;  %v8272_v46 = vrot.slane %v8026_v57, %v16200_v54  ;;  %v8286_v27 = vsel %vm3102_vm1, %v8285_v25, %v8281_v10 }
 0x819   : > { %v8066_v63 = vpop.permute.xlu1 %8065  ;;  %v19172_v38 = vpop.permute.xlu0 %8060 }
 0x81a   : > { %22761 = vst [vmem:[#allocation203_spill] sm:$0xff] %v19172_v38  ;;  %v8111_v20 = vsub.f32 %v22762_v6, %v8066_v63  ;;  %13710 = vpow2.f32 %v8165_v52  ;;  %v8303_v6 = vrot.slane %v19172_v38, %v16206_v48  ;;  %v8277_v26 = vsel %vm3102_vm1, %v8276_v15, %v8272_v46  ;;  %v13390_v38 = vpop.f32.mrf.mxu0 }
 0x81b   : > { %v19181_v33 = vpop.eup %13704  ;;  %v8290_v52 = vrot.slane %v8046_v5, %v16200_v54  ;;  %v8308_v15 = vrot.slane %v8066_v63, %v16200_v54  ;;  %v19221_v63 = vadd.f32 %v13390_v38, %v18879_v18 }
 0x81c   : > { %22763 = vst [vmem:[#allocation8_spill] sm:$0xff] %v19181_v33  ;;  %v8171_v16 = vmul.f32 1.442695, %v8111_v20  ;;  %13580 = vmatprep.mubr.msk.f32.mxu0 %vm7264_vm2, %v19181_v33  ;;  %v8299_v20 = vrot.slane %v19158_v29, %v16200_v54  ;;  %v8330_v33 = vsel %vm3239_vm3, %v8268_v43, %v8259_v32 }
 0x81d   : > { %v8071_v57 = vpop.permute.xlu0 %8070  ;;  %v8295_v45 = vsel %vm3102_vm1, %v8294_v42, %v8290_v52  ;;  %v19207_v5 = vpop.permute.xlu1 %8075  ;;  %v8331_v10 = vsel %vm3240_vm4, %v8277_v26, %v8330_v33  ;;  %22766 = vst [vmem:[#allocation73_spill] sm:$0xff] %v19221_v63 }
 0x81e   : > { %13712 = vpow2.f32 %v8171_v16  ;;  %v8112_v30 = vsub.f32 %v22764_v24, %v8071_v57  ;;  %22765 = vst [vmem:[#allocation395_spill] sm:$0xff] %v19207_v5  ;;  %v8312_v2 = vrot.slane %v8071_v57, %v16206_v48  ;;  %v8304_v25 = vsel %vm3102_vm1, %v8303_v6, %v8299_v20  ;;  %v1152_v57 = vpop.f32.mrf.mxu0 }
 0x81f   : > { %v19210_v23 = vpop.eup %13706  ;;  %v8332_v46 = vsel %vm3242_vm5, %v8286_v27, %v8331_v10  ;;  %v8317_v42 = vrot.slane %v19207_v5, %v16200_v54  ;;  %v19241_v20 = vadd.f32 %v18879_v18, %v1152_v57 }
 0x820   : > { %v8173_v16 = vmul.f32 1.442695, %v8112_v30  ;;  %13581 = vmatmul.mubr.msk.f32.vlgmr.msra.gmra.mxu0 %vm7264_vm2, %v19210_v23  ;;  %v8313_v43 = vsel %vm3102_vm1, %v8312_v2, %v8308_v15  ;;  %v8333_v30 = vsel %vm3244_vm6, %v8295_v45, %v8332_v46  ;;  %v19258_v2 = vpop.f32.mrf.mxu0  ;;  %v19270_v46 = vadd.f32 %v18879_v18, %v19097_v31 }
 0x821   : > { %v19217_v32 = vpop.permute.xlu0 %8080  ;;  %13591 = vmatpush3.msra.mxu0 %v19156_v55  ;;  %v8334_v26 = vsel %vm3246_vm7, %v8304_v25, %v8333_v30  ;;  %22769 = vst [vmem:[#allocation398_spill] sm:$0xff] %v19258_v2  ;;  %v2427_v57 = vcombine.low %v19198_v49, %v19241_v20 }
 0x822   : > { %v8321_v33 = vrot.slane %v19217_v32, %v16206_v48  ;;  %13714 = vpow2.f32 %v8173_v16  ;;  %13592 = vmatprep.subr.mxu0 %v19198_v49  ;;  %v8335_v52 = vsel %vm3248_vm8, %v8313_v43, %v8334_v26  ;;  %22770 = vst [vmem:[#allocation74_spill] sm:$0xff] %v19270_v46  ;;  %v19274_v43 = vadd.f32 %v18879_v18, %v19136_v34 }
 0x823   : > { %v19229_v6 = vpop.eup %13708  ;;  %13593 = vmatpush3.msra.mxu0 %v19198_v49  ;;  %v19292_v34 = vadd.f32 %v18879_v18, %v18895_v50  ;;  %v2259_v48 = vcombine.low %v18888_v58, %v18985_v1 }
 0x824   : > { %22767 = vst [vmem:[#allocation204_spill] sm:$0xff] %v19229_v6  ;;  %13594 = vmatprep.mubr.msk.f32.mxu0 %vm7264_vm2, %v19229_v6  ;;  %v8322_v38 = vsel %vm3102_vm1, %v8321_v33, %v8317_v42  ;;  %13604 = vmatprep.subr.mxu0 %v19221_v63  ;;  %22771 = vst [vmem:[#allocation191_spill] sm:$0xff] %v19274_v43  ;;  %v1162_v42 = vpop.f32.mrf.mxu0  ;;  %v19279_v33 = vadd.f32 %v18879_v18, %v19179_v9 }
 0x825   : > { %v8336_v27 = vsel %vm3250_vm9, %v8322_v38, %v8335_v52  ;;  %v19282_v30 = vadd.f32 %v18879_v18, %v1162_v42  ;;  %22774 = vst [vmem:[#allocation383_spill] sm:$0xff] %v19292_v34  ;;  %v19296_v38 = vadd.f32 %v18879_v18, %v18918_v36  ;;  %v2395_v9 = vcombine.low %v19116_v35, %v19149_v7 }
 0x826   : > { %8340 = vxpose.xlu1.b32.end [2/2] (short) (narrow) %v8336_v27, 16  ;;  %22772 = vst [vmem:[#allocation381_spill] sm:$0xff] %v19279_v33  ;;  %v2411_v52 = vcombine.low %v19270_v46, %v19274_v43  ;;  %v19311_v36 = vadd.f32 %v18879_v18, %v18928_v40  ;;  %v19315_v27 = vadd.f32 %v18879_v18, %v19027_v53  ;;  %v22778_v18 = vld [vmem:[#allocation12_spill] sm:$0xff] }
 0x827   : > { %v19243_v24 = vpop.eup %13710  ;;  %22773 = vst [vmem:[#allocation193_spill] sm:$0xff] %v19282_v30  ;;  %22775 = vst [vmem:[#allocation178_spill] sm:$0xff] %v19296_v38  ;;  %v2443_v42 = vcombine.low %v19279_v33, %v19282_v30  ;;  %v2275_v54 = vcombine.low %v19292_v34, %v19296_v38  ;;  %v2403_v53 = vrot.slane %v2395_v9, %v22778_v18  ;;  %v22779_v9 = vld [vmem:[#allocation24_spill] sm:$0xff] }
 0x828   : > { %13595 = vmatmul.mubr.msk.f32.vlgmr.msra.gmra.mxu0 %vm7264_vm2, %v19243_v24  ;;  %22776 = vst [vmem:[#allocation195_spill] sm:$0xff] %v19311_v36  ;;  %22777 = vst [vmem:[#allocation385_spill] sm:$0xff] %v19315_v27  ;;  %v2435_v6 = vrot.slane %v2427_v57, %v22778_v18  ;;  %v2307_v55 = vcombine.low %v19311_v36, %v19315_v27  ;;  %v2267_v57 = vrot.slane %v2259_v48, %v22778_v18 }
 0x829   : > { %13605 = vmatpush3.msra.mxu0 %v19221_v63  ;;  %v2451_v63 = vrot.slane %v2443_v42, %v22778_v18 }
 0x82a   : > { %13606 = vmatprep.subr.mxu0 %v19241_v20  ;;  %v2315_v42 = vrot.slane %v2307_v55, %v22778_v18 }
 0x82b   : > { %v19248_v45 = vpop.eup %13712  ;;  %13607 = vmatpush3.msra.mxu0 %v19241_v20  ;;  %v2491_v29 = vcombine.low %v2435_v6, %v2451_v63 }
 0x82c   : > { %22768 = vst [vmem:[#allocation397_spill] sm:$0xff] %v19248_v45  ;;  %13608 = vmatprep.mubr.msk.f32.mxu0 %vm7264_vm2, %v19248_v45  ;;  %v2419_v45 = vrot.slane %v2411_v52, %v22778_v18 }
 0x82e   : > { %v2459_v5 = vcombine.low %v2403_v53, %v2419_v45 }
 0x82f   : > { %v19254_v15 = vpop.eup %13714 }
 0x830   : > { %13609 = vmatmul.mubr.msk.f32.vlgmr.msra.gmra.mxu0 %vm7264_vm2, %v19254_v15  ;;  %v2467_v52 = vrot.slane %v2459_v5, %v22779_v9 }
 0x89e   : > { %v19260_v10 = vpop.trf.xlu1 }
 0x89f   : > { %v19264_v25 = vrot.slane %v19260_v10, %v18854_v41  ;;  %v8374_v16 = vrot.slane %v19260_v10, %v18831_v8  ;;  %v8396_v27 = vrot.slane %v19260_v10, %v18841_v13 }
 0x8a1   : > { %8435 = vbcast.lane.b32.xlu1 %v19264_v25, 264  ;;  %8376 = vbcast.lane.b32.xlu0 %v8374_v16, 256 }
 0x8a2   : > { %v19284_v26 = vpop.trf.xlu1 }
 0x8a3   : > { %v19288_v31 = vrot.slane %v19284_v26, %v18845_v12  ;;  %v19307_v50 = vrot.slane %v19284_v26, %v18841_v13  ;;  %v19327_v40 = vrot.slane %v19284_v26, %v18848_v59  ;;  %v19340_v2 = vrot.slane %v19284_v26, %v18828_v11 }
 0x8a4   : > { %v19354_v48 = vrot.slane %v19284_v26, %v18854_v41  ;;  %v19363_v5 = vrot.slane %v19284_v26, %v18859_v37 }
 0x8a5   : > { %8380 = vbcast.lane.b32.xlu0 %v8374_v16, 264  ;;  %8479 = vbcast.lane.b32.xlu1 %v19288_v31, 264  ;;  %v8385_v16 = vrot.slane %v19260_v10, %v18845_v12  ;;  %v2291_v12 = vcombine.low %v19011_v39, %v19040_v14  ;;  %v2283_v39 = vrot.slane %v2275_v54, %v22778_v18 }
 0x8a6   : > { %v2499_v14 = vrot.slane %v2491_v29, %v22779_v9 }
 0x8a7   : > { %v2299_v36 = vrot.slane %v2291_v12, %v22778_v18  ;;  %v2323_v34 = vcombine.low %v2267_v57, %v2283_v39 }
 0x8a8   : > { %v2523_v38 = vcombine.low %v2467_v52, %v2499_v14  ;;  %v19358_v29 = vcombine.high %v2467_v52, %v2499_v14  ;;  %v19373_v14 = vrot.slane %v19284_v26, %v18863_v47 }
 0x8a9   : > { %8387 = vbcast.lane.b32.xlu0 %v8385_v16, 256  ;;  %8490 = vbcast.lane.b32.xlu1 %v19307_v50, 264  ;;  %v2331_v54 = vrot.slane %v2323_v34, %v22779_v9  ;;  %v8407_v34 = vrot.slane %v19260_v10, %v18848_v59  ;;  %v2356_v41 = vcombine.high %v2299_v36, %v2315_v42 }
 0x8aa   : > { %13394 = vmatprep.subr.mxu1 %v2523_v38 }
 0x8ab   : > { %13395 = vmatpush3.msra.mxu1 %v2523_v38  ;;  %v2460_v38 = vcombine.high %v2403_v53, %v2419_v45  ;;  %v8418_v45 = vrot.slane %v19260_v10, %v18828_v11 }
 0x8ad   : > { %8391 = vbcast.lane.b32.xlu0 %v8385_v16, 264  ;;  %8501 = vbcast.lane.b32.xlu1 %v19327_v40, 264  ;;  %v2355_v16 = vcombine.low %v2299_v36, %v2315_v42  ;;  %v22780_v36 = vld [vmem:[#allocation151_spill] sm:$0xff] }
 0x8af   : > { %v2363_v12 = vrot.slane %v2355_v16, %v22779_v9  ;;  %v2492_v16 = vcombine.high %v2435_v6, %v2451_v63  ;;  %v2370_v6 = vrot.slane %v2356_v41, %v22779_v9  ;;  %v8090_v41 = vsub.f32 %v22780_v36, %v19001_v62 }
 0x8b1   : > { %8398 = vbcast.lane.b32.xlu0 %v8396_v27, 256  ;;  %8512 = vbcast.lane.b32.xlu1 %v19340_v2, 264  ;;  %v2387_v55 = vcombine.low %v2331_v54, %v2363_v12  ;;  %v19365_v13 = vcombine.high %v2331_v54, %v2363_v12  ;;  %v2506_v52 = vrot.slane %v2492_v16, %v22779_v9  ;;  %v8129_v42 = vmul.f32 1.442695, %v8090_v41 }
 0x8b2   : > { %v2324_v12 = vcombine.high %v2267_v57, %v2283_v39  ;;  %v8440_v39 = vrot.slane %v19260_v10, %v18859_v37  ;;  %v8451_v57 = vrot.slane %v19260_v10, %v18863_v47  ;;  %v2531_v10 = vcombine.low %v18882_v28, %v18900_v61  ;;  %v22830_v47 = vld [vmem:[#allocation51_spill] sm:$0xff]  ;;  %v22831_v37 = vld [vmem:[#allocation274_spill] sm:$0xff] }
 0x8b3   : > { %13396 = vmatprep.subr.mxu1 %v2387_v55  ;;  %13716 = vpow2.f32 %v8129_v42 }
 0x8b4   : > { %13397 = vmatpush3.msra.mxu1 %v2387_v55  ;;  %v2338_v63 = vrot.slane %v2324_v12, %v22779_v9  ;;  %v8646_v12 = vsel %vm7264_vm2, %v18987_v0, 0.0 }
 0x8b5   : > { %8402 = vbcast.lane.b32.xlu0 %v8396_v27, 264  ;;  %8523 = vbcast.lane.b32.xlu1 %v19354_v48, 264  ;;  %v2474_v27 = vrot.slane %v2460_v38, %v22779_v9 }
 0x8b6   : > { %13401 = vmatprep.subr.mxu1 %v19358_v29  ;;  %v19384_v53 = vcombine.low %v2338_v63, %v2370_v6  ;;  %v19388_v38 = vcombine.high %v2338_v63, %v2370_v6 }
 0x8b7   : > { %v19377_v54 = vcombine.low %v2474_v27, %v2506_v52  ;;  %v19386_v55 = vcombine.high %v2474_v27, %v2506_v52  ;;  %v22782_v52 = vld [vmem:[#allocation254_spill] sm:$0xff] }
 0x8b8   : > { %v8098_v62 = vsub.f32 %v22782_v52, %v19088_v56  ;;  %v22783_v56 = vld [vmem:[#allocation95_spill] sm:$0xff] }
 0x8b9   : > { %8409 = vbcast.lane.b32.xlu0 %v8407_v34, 256  ;;  %8534 = vbcast.lane.b32.xlu1 %v19363_v5, 264  ;;  %v8102_v0 = vsub.f32 %v22783_v56, %v19133_v17  ;;  %v22785_v17 = vcombine.low %v18937_v22, %v18940_v51 }
 0x8ba   : > { %v8145_v63 = vmul.f32 1.442695, %v8098_v62 }
 0x8bb   : > { %v8153_v42 = vmul.f32 1.442695, %v8102_v0 }
 0x8bd   : > { %8413 = vbcast.lane.b32.xlu0 %v8407_v34, 264  ;;  %8545 = vbcast.lane.b32.xlu1 %v19373_v14, 264  ;;  %v22781_v34 = vld [vmem:[#allocation10_spill] sm:$0xff] }
 0x8be   : > { %v8094_v16 = vsub.f32 %v22781_v34, %v19029_v4  ;;  %v8658_v4 = vsel %vm7264_vm2, %v19013_v44, 0.0  ;;  %v22784_v44 = vcombine.low %v18908_v19, %v18911_v21 }
 0x8c0   : > { %v8137_v27 = vmul.f32 1.442695, %v8094_v16  ;;  %v19409_v6 = vpop.eup %13716  ;;  %v2555_v36 = vrot.slane %v22784_v44, %v22778_v18  ;;  %v22786_v16 = vld [vmem:[#allocation97_spill] sm:$0xff] }
 0x8c1   : > { %8420 = vbcast.lane.b32.xlu0 %v8418_v45, 256 }
 0x8c2   : > { %13718 = vpow2.f32 %v8137_v27 }
 0x8c3   : > { %13720 = vpow2.f32 %v8145_v63  ;;  %v22788_v63 = vld [vmem:[#allocation98_spill] sm:$0xff] }
 0x8c4   : > { %13722 = vpow2.f32 %v8153_v42  ;;  %v22789_v42 = vld [vmem:[#allocation124_spill] sm:$0xff] }
 0x8c5   : > { %8424 = vbcast.lane.b32.xlu0 %v8418_v45, 264  ;;  %v8664_v45 = vsel %vm7264_vm2, %v19409_v6, 0.0 }
 0x8c9   : > { %8431 = vbcast.lane.b32.xlu0 %v19264_v25, 256  ;;  %v8462_v25 = vrot.slane %v19284_v26, %v18831_v8  ;;  %v2563_v26 = vcombine.low %v18993_v60, %v19019_v3 }
 0x8cb   : > { %v2571_v41 = vrot.slane %v2563_v26, %v22778_v18 }
 0x8cd   : > { %8442 = vbcast.lane.b32.xlu0 %v8440_v39, 256 }
 0x8cf   : > { %v19432_v52 = vpop.eup %13718 }
 0x8d0   : > { %v8676_v26 = vsel %vm7264_vm2, %v19432_v52, 0.0 }
 0x8d1   : > { %8446 = vbcast.lane.b32.xlu0 %v8440_v39, 264  ;;  %v2539_v39 = vrot.slane %v2531_v10, %v22778_v18  ;;  %v22787_v10 = vld [vmem:[#allocation153_spill] sm:$0xff] }
 0x8d3   : > { %v2596_v56 = vcombine.high %v2539_v39, %v2555_v36 }
 0x8d5   : > { %8453 = vbcast.lane.b32.xlu0 %v8451_v57, 256  ;;  %v2610_v44 = vrot.slane %v2596_v56, %v22779_v9 }
 0x8d9   : > { %8457 = vbcast.lane.b32.xlu0 %v8451_v57, 264  ;;  %v2595_v57 = vcombine.low %v2539_v39, %v2555_v36  ;;  %v19457_v36 = vpop.eup %13720 }
 0x8da   : > { %22790 = vst [vmem:[#allocation180_spill] sm:$0xff] %v19457_v36 }
 0x8db   : > { %v2603_v27 = vrot.slane %v2595_v57, %v22779_v9 }
 0x8dd   : > { %8464 = vbcast.lane.b32.xlu0 %v8462_v25, 256 }
 0x8e1   : > { %8647 = vadd.xlane.f32.xlu1 %v8646_v12  ;;  %8468 = vbcast.lane.b32.xlu0 %v8462_v25, 264  ;;  %v8670_v25 = vsel %vm7264_vm2, %v22786_v16, 0.0 }
 0x8e5   : > { %8659 = vadd.xlane.f32.xlu1 %v8658_v4  ;;  %8475 = vbcast.lane.b32.xlu0 %v19288_v31, 256  ;;  %v2587_v31 = vrot.slane %v22785_v17, %v22778_v18  ;;  %v8106_v4 = vsub.f32 %v22788_v63, %v22787_v10 }
 0x8e7   : > { %v2627_v34 = vcombine.low %v2571_v41, %v2587_v31  ;;  %v2628_v0 = vcombine.high %v2571_v41, %v2587_v31  ;;  %v8161_v57 = vmul.f32 1.442695, %v8106_v4  ;;  %v22793_v31 = vld [vmem:[#allocation203_spill] sm:$0xff] }
 0x8e9   : > { %8665 = vadd.xlane.f32.xlu1 %v8664_v45  ;;  %8486 = vbcast.lane.b32.xlu0 %v19307_v50, 256  ;;  %v2635_v50 = vrot.slane %v2627_v34, %v22779_v9  ;;  %v2564_v45 = vcombine.high %v18993_v60, %v19019_v3  ;;  %v2642_v17 = vrot.slane %v2628_v0, %v22779_v9  ;;  %v8682_v34 = vsel %vm7264_vm2, %v22789_v42, 0.0  ;;  %v22796_v0 = vld [vmem:[#allocation378_spill] sm:$0xff] }
 0x8ea   : > { %13724 = vpow2.f32 %v8161_v57 }
 0x8eb   : > { %v19436_v62 = vcombine.low %v2603_v27, %v2635_v50  ;;  %v19438_v12 = vcombine.high %v2603_v27, %v2635_v50  ;;  %v19453_v16 = vcombine.low %v2610_v44, %v2642_v17  ;;  %v19455_v39 = vcombine.high %v2610_v44, %v2642_v17  ;;  %v22797_v17 = vld [vmem:[#allocation63_spill] sm:$0xff] }
 0x8ec   : > { %v2578_v3 = vrot.slane %v2564_v45, %v22778_v18  ;;  %v8114_v57 = vsub.f32 %v22797_v17, %v19217_v32  ;;  %v22800_v32 = vld [vmem:[#allocation244_spill] sm:$0xff] }
 0x8ed   : > { %8671 = vadd.xlane.f32.xlu1 %v8670_v25  ;;  %8497 = vbcast.lane.b32.xlu0 %v19327_v40, 256  ;;  %v2532_v40 = vcombine.high %v18882_v28, %v18900_v61  ;;  %v22791_v61 = vcombine.high %v18908_v19, %v18911_v21  ;;  %v22794_v25 = vld [vmem:[#allocation340_spill] sm:$0xff] }
 0x8ee   : > { %v8110_v27 = vsub.f32 %v22794_v25, %v22793_v31  ;;  %v8177_v31 = vmul.f32 1.442695, %v8114_v57 }
 0x8ef   : > { %v2546_v28 = vrot.slane %v2532_v40, %v22778_v18  ;;  %v2562_v60 = vrot.slane %v22791_v61, %v22778_v18  ;;  %v8694_v40 = vsel %vm7264_vm2, %v22796_v0, 0.0 }
 0x8f0   : > { %v8169_v56 = vmul.f32 1.442695, %v8110_v27 }
 0x8f1   : > { %8677 = vadd.xlane.f32.xlu1 %v8676_v26  ;;  %8508 = vbcast.lane.b32.xlu0 %v19340_v2, 256  ;;  %v22792_v2 = vcombine.high %v18937_v22, %v18940_v51  ;;  %v2611_v50 = vcombine.low %v2546_v28, %v2562_v60  ;;  %v19477_v26 = vpop.eup %13722  ;;  %v2612_v42 = vcombine.high %v2546_v28, %v2562_v60 }
 0x8f2   : > { %22795 = vst [vmem:[#allocation166_spill] sm:$0xff] %v19477_v26  ;;  %13726 = vpow2.f32 %v8169_v56 }
 0x8f3   : > { %v2594_v41 = vrot.slane %v22792_v2, %v22778_v18  ;;  %v2619_v63 = vrot.slane %v2611_v50, %v22779_v9  ;;  %v2626_v61 = vrot.slane %v2612_v42, %v22779_v9  ;;  %v22799_v50 = vld [vmem:[#allocation184_spill] sm:$0xff]  ;;  %13728 = vpow2.f32 %v8177_v31  ;;  %v22806_v42 = vld [vmem:[#allocation86_spill] sm:$0xff] }
 0x8f4   : > { %v8085_v28 = vsub.f32 %v22800_v32, %v22799_v50  ;;  %v22808_v50 = vld [vmem:[#allocation317_spill] sm:$0xff] }
 0x8f5   : > { %8683 = vadd.xlane.f32.xlu1 %v8682_v34  ;;  %8519 = vbcast.lane.b32.xlu0 %v19354_v48, 256  ;;  %v8688_v48 = vsel %vm7264_vm2, %v19457_v36, 0.0  ;;  %v2643_v10 = vcombine.low %v2578_v3, %v2594_v41  ;;  %v2644_v34 = vcombine.high %v2578_v3, %v2594_v41  ;;  %v22801_v41 = vld [vmem:[#allocation393_spill] sm:$0xff] }
 0x8f6   : > { %v8119_v3 = vmul.f32 1.442695, %v8085_v28 }
 0x8f7   : > { %v2651_v4 = vrot.slane %v2643_v10, %v22779_v9  ;;  %v2658_v2 = vrot.slane %v2644_v34, %v22779_v9  ;;  %v19496_v27 = vpop.eup %13724  ;;  %v22802_v10 = vld [vmem:[#allocation333_spill] sm:$0xff] }
 0x8f8   : > { %22798 = vst [vmem:[#allocation181_spill] sm:$0xff] %v19496_v27  ;;  %v8712_v60 = vsel %vm7264_vm2, %v19496_v27, 0.0  ;;  %13730 = vpow2.f32 %v8119_v3  ;;  %v22810_v3 = vld [vmem:[#allocation260_spill] sm:$0xff] }
 0x8f9   : > { %8689 = vadd.xlane.f32.xlu1 %v8688_v48  ;;  %8530 = vbcast.lane.b32.xlu0 %v19363_v5, 256  ;;  %v19482_v45 = vcombine.low %v2619_v63, %v2651_v4  ;;  %v19484_v44 = vcombine.high %v2619_v63, %v2651_v4  ;;  %v8700_v5 = vsel %vm7264_vm2, %v19477_v26, 0.0  ;;  %v19494_v25 = vcombine.low %v2626_v61, %v2658_v2 }
 0x8fa   : > { %v19498_v48 = vcombine.high %v2626_v61, %v2658_v2  ;;  %v8086_v63 = vsub.f32 %v22802_v10, %v22801_v41  ;;  %v8730_v61 = vsel %vm7264_vm2, %v19254_v15, 0.0  ;;  %v22811_v15 = vld [vmem:[#allocation219_spill] sm:$0xff] }
 0x8fc   : > { %v8121_v56 = vmul.f32 1.442695, %v8086_v63 }
 0x8fd   : > { %8695 = vadd.xlane.f32.xlu1 %v8694_v40  ;;  %8541 = vbcast.lane.b32.xlu0 %v19373_v14, 256  ;;  %v8706_v14 = vsel %vm7264_vm2, %v19210_v23, 0.0  ;;  %v8718_v23 = vsel %vm7264_vm2, %v19243_v24, 0.0  ;;  %v22804_v40 = vld [vmem:[#allocation161_spill] sm:$0xff] }
 0x8fe   : > { %13732 = vpow2.f32 %v8121_v56 }
 0x8ff   : > { %v19508_v4 = vpop.eup %13726 }
 0x900   : > { %22803 = vst [vmem:[#allocation183_spill] sm:$0xff] %v19508_v4  ;;  %v8724_v0 = vsel %vm7264_vm2, %v19508_v4, 0.0  ;;  %v19517_v24 = vpop.eup %13728 }
 0x901   : > { %8701 = vadd.xlane.f32.xlu1 %v8700_v5  ;;  %v22805_v5 = vld [vmem:[#allocation269_spill] sm:$0xff]  ;;  %22807 = vst [vmem:[#allocation96_spill] sm:$0xff] %v19517_v24  ;;  %v8736_v28 = vsel %vm7264_vm2, %v19517_v24, 0.0  ;;  %v22837_v24 = vld [vmem:[#allocation380_spill] sm:$0xff] }
 0x902   : > { %v8089_v17 = vsub.f32 %v22805_v5, %v22804_v40 }
 0x904   : > { %v8127_v31 = vmul.f32 1.442695, %v8089_v17 }
 0x905   : > { %8707 = vadd.xlane.f32.xlu1 %v8706_v14  ;;  %v19526_v56 = vpop.eup %13730 }
 0x909   : > { %8713 = vadd.xlane.f32.xlu1 %v8712_v60  ;;  %v22809_v60 = vld [vmem:[#allocation375_spill] sm:$0xff] }
 0x90a   : > { %v8093_v41 = vsub.f32 %v22810_v3, %v22809_v60  ;;  %v22816_v3 = vld [vmem:[#allocation315_spill] sm:$0xff] }
 0x90c   : > { %v8135_v5 = vmul.f32 1.442695, %v8093_v41 }
 0x90d   : > { %8719 = vadd.xlane.f32.xlu1 %v8718_v23  ;;  %v8643_v23 = vsel %vm7264_vm2, %v22811_v15, 0.0 }
 0x911   : > { %8725 = vadd.xlane.f32.xlu1 %v8724_v0  ;;  %v22812_v0 = vld [vmem:[#allocation58_spill] sm:$0xff] }
 0x913   : > { %v8377_v57 = vpop.permute.xlu0 %8376 }
 0x914   : > { %v8547_v34 = vsub.f32 %v22806_v42, %v8377_v57  ;;  %v8649_v42 = vsel %vm7264_vm2, %v19526_v56, 0.0 }
 0x915   : > { %8731 = vadd.xlane.f32.xlu1 %v8730_v61  ;;  %v22813_v61 = vld [vmem:[#allocation318_spill] sm:$0xff] }
 0x916   : > { %v8579_v2 = vmul.f32 1.442695, %v8547_v34  ;;  %v19531_v34 = vpop.eup %13732 }
 0x917   : > { %v8381_v14 = vpop.permute.xlu0 %8380  ;;  %v8652_v60 = vsel %vm7264_vm2, %v19531_v34, 0.0 }
 0x918   : > { %13734 = vpow2.f32 %v8579_v2  ;;  %v8548_v32 = vsub.f32 %v22808_v50, %v8381_v14  ;;  %v22815_v14 = vld [vmem:[#allocation6_spill] sm:$0xff] }
 0x919   : > { %8737 = vadd.xlane.f32.xlu1 %v8736_v28  ;;  %13736 = vpow2.f32 %v8127_v31  ;;  %v22814_v31 = vld [vmem:[#allocation201_spill] sm:$0xff] }
 0x91a   : > { %v8581_v10 = vmul.f32 1.442695, %v8548_v32  ;;  %v8097_v50 = vsub.f32 %v22815_v14, %v22814_v31  ;;  %v2428_v31 = vcombine.high %v19198_v49, %v19241_v20  ;;  %v2444_v14 = vcombine.high %v19279_v33, %v19282_v30  ;;  %v22838_v30 = vld [vmem:[#allocation216_spill] sm:$0xff] }
 0x91b   : > { %v8388_v63 = vpop.permute.xlu0 %8387  ;;  %v8109_v4 = vsub.f32 %v22838_v30, %v22837_v24 }
 0x91c   : > { %13738 = vpow2.f32 %v8581_v10  ;;  %v8549_v40 = vsub.f32 %v22812_v0, %v8388_v63  ;;  %8644 = vadd.xlane.f32.xlu0 %v8643_v23  ;;  %v8143_v63 = vmul.f32 1.442695, %v8097_v50  ;;  %v22817_v0 = vld [vmem:[#allocation3_spill] sm:$0xff] }
 0x91e   : > { %v8583_v17 = vmul.f32 1.442695, %v8549_v40  ;;  %v8655_v40 = vsel %vm7264_vm2, %v22817_v0, 0.0  ;;  %v22822_v0 = vld [vmem:[#allocation178_spill] sm:$0xff] }
 0x91f   : > { %v8392_v57 = vpop.permute.xlu0 %8391 }
 0x920   : > { %13740 = vpow2.f32 %v8583_v17  ;;  %v8550_v2 = vsub.f32 %v22813_v61, %v8392_v57  ;;  %8650 = vadd.xlane.f32.xlu0 %v8649_v42  ;;  %v22818_v17 = vld [vmem:[#allocation68_spill] sm:$0xff]  ;;  %v2396_v61 = vcombine.high %v19116_v35, %v19149_v7 }
 0x921   : > { %13742 = vpow2.f32 %v8135_v5  ;;  %v22821_v7 = vld [vmem:[#allocation316_spill] sm:$0xff] }
 0x922   : > { %v8585_v32 = vmul.f32 1.442695, %v8550_v2  ;;  %v2412_v2 = vcombine.high %v19270_v46, %v19274_v43 }
 0x923   : > { %v8399_v28 = vpop.permute.xlu0 %8398 }
 0x924   : > { %13744 = vpow2.f32 %v8585_v32  ;;  %v8551_v41 = vsub.f32 %v22816_v3, %v8399_v28  ;;  %8653 = vadd.xlane.f32.xlu0 %v8652_v60  ;;  %v22819_v28 = vld [vmem:[#allocation42_spill] sm:$0xff]  ;;  %v22820_v60 = vld [vmem:[#allocation271_spill] sm:$0xff] }
 0x925   : > { %v19539_v10 = vpop.eup %13734  ;;  %v8101_v3 = vsub.f32 %v22820_v60, %v22819_v28 }
 0x926   : > { %v8587_v15 = vmul.f32 1.442695, %v8551_v41  ;;  %13398 = vmatprep.mubr.msk.f32.mxu1 %vm7264_vm2, %v19539_v10  ;;  %v19545_v5 = vpop.eup %13736 }
 0x927   : > { %v8403_v23 = vpop.permute.xlu0 %8402  ;;  %v8661_v35 = vsel %vm7264_vm2, %v19545_v5, 0.0 }
 0x928   : > { %13746 = vpow2.f32 %v8587_v15  ;;  %v8552_v57 = vsub.f32 %v22818_v17, %v8403_v23  ;;  %8656 = vadd.xlane.f32.xlu0 %v8655_v40  ;;  %v19571_v15 = vrot.slane %v2396_v61, %v22778_v18  ;;  %v19574_v23 = vrot.slane %v2412_v2, %v22778_v18  ;;  %v22823_v40 = vld [vmem:[#allocation383_spill] sm:$0xff] }
 0x929   : > { %v13739_v42 = vpop.eup %13738  ;;  %13748 = vpow2.f32 %v8143_v63  ;;  %v2260_v63 = vcombine.high %v18888_v58, %v18985_v1  ;;  %v2276_v17 = vcombine.high %v22823_v40, %v22822_v0  ;;  %v19584_v58 = vrot.slane %v2428_v31, %v22778_v18  ;;  %v22824_v1 = vld [vmem:[#allocation200_spill] sm:$0xff] }
 0x92a   : > { %v8589_v50 = vmul.f32 1.442695, %v8552_v57  ;;  %13399 = vmatmul.mubr.msk.f32.vlgmr.msra.gmra.mxu1 %vm7264_vm2, %v13739_v42  ;;  %v8742_v32 = vsel %vm7264_vm2, %v13739_v42, 0.0  ;;  %v22825_v42 = vld [vmem:[#allocation394_spill] sm:$0xff]  ;;  %v8151_v2 = vmul.f32 1.442695, %v8101_v3  ;;  %v2475_v3 = vcombine.low %v19571_v15, %v19574_v23 }
 0x92b   : > { %v8410_v41 = vpop.permute.xlu0 %8409  ;;  %8743 = vadd.xlane.f32.xlu1 %v8742_v32  ;;  %13402 = vmatpush3.msra.mxu1 %v19358_v29  ;;  %v2292_v61 = vcombine.high %v22825_v42, %v22824_v1  ;;  %v22827_v32 = vld [vmem:[#allocation195_spill] sm:$0xff] }
 0x92c   : > { %13750 = vpow2.f32 %v8589_v50  ;;  %v8553_v49 = vsub.f32 %v22821_v7, %v8410_v41  ;;  %8662 = vadd.xlane.f32.xlu0 %v8661_v35  ;;  %13403 = vmatprep.subr.mxu1 %v19365_v13  ;;  %v22826_v50 = vld [vmem:[#allocation385_spill] sm:$0xff]  ;;  %v22828_v41 = vld [vmem:[#allocation411_spill] sm:$0xff]  ;;  %v22829_v7 = vld [vmem:[#allocation62_spill] sm:$0xff] }
 0x92d   : > { %v19565_v20 = vpop.eup %13740  ;;  %13404 = vmatpush3.msra.mxu1 %v19365_v13  ;;  %v19587_v13 = vrot.slane %v2444_v14, %v22778_v18  ;;  %v2308_v28 = vcombine.high %v22827_v32, %v22826_v50  ;;  %v8667_v35 = vsel %vm7264_vm2, %v22828_v41, 0.0  ;;  %v8105_v14 = vsub.f32 %v22831_v37, %v22830_v47  ;;  %v8436_v41 = vpop.permute.xlu1 %8435 }
 0x92e   : > { %v19576_v29 = vpop.eup %13742  ;;  %v8591_v57 = vmul.f32 1.442695, %v8553_v49  ;;  %13405 = vmatprep.mubr.msk.f32.mxu1 %vm7264_vm2, %v19565_v20  ;;  %13408 = vmatprep.subr.mxu1 %v19377_v54  ;;  %v19611_v37 = vrot.slane %v2276_v17, %v22778_v18  ;;  %v22834_v17 = vld [vmem:[#allocation213_spill] sm:$0xff] }
 0x92f   : > { %v8414_v60 = vpop.permute.xlu0 %8413  ;;  %v8673_v59 = vsel %vm7264_vm2, %v19576_v29, 0.0 }
 0x930   : > { %13752 = vpow2.f32 %v8591_v57  ;;  %v8554_v49 = vsub.f32 %v22829_v7, %v8414_v60  ;;  %8668 = vadd.xlane.f32.xlu0 %v8667_v35  ;;  %v2507_v57 = vcombine.low %v19584_v58, %v19587_v13  ;;  %v19607_v60 = vrot.slane %v2260_v63, %v22778_v18 }
 0x931   : > { %v13745_v31 = vpop.eup %13744  ;;  %13754 = vpow2.f32 %v8151_v2  ;;  %v19614_v35 = vrot.slane %v2292_v61, %v22778_v18  ;;  %v19617_v7 = vrot.slane %v2308_v28, %v22778_v18  ;;  %v8558_v2 = vsub.f32 %v22834_v17, %v8436_v41 }
 0x932   : > { %v8593_v1 = vmul.f32 1.442695, %v8554_v49  ;;  %13406 = vmatmul.mubr.msk.f32.vlgmr.msra.gmra.mxu1 %vm7264_vm2, %v13745_v31  ;;  %v8748_v42 = vsel %vm7264_vm2, %v13745_v31, 0.0  ;;  %v22832_v49 = vld [vmem:[#allocation347_spill] sm:$0xff]  ;;  %v2483_v61 = vrot.slane %v2475_v3, %v22779_v9  ;;  %v8159_v28 = vmul.f32 1.442695, %v8105_v14 }
 0x933   : > { %v8421_v47 = vpop.permute.xlu0 %8420  ;;  %8749 = vadd.xlane.f32.xlu1 %v8748_v42  ;;  %13409 = vmatpush3.msra.mxu1 %v19377_v54  ;;  %v2371_v41 = vcombine.low %v19614_v35, %v19617_v7 }
 0x934   : > { %13756 = vpow2.f32 %v8593_v1  ;;  %v8555_v31 = vsub.f32 %v22832_v49, %v8421_v47  ;;  %8674 = vadd.xlane.f32.xlu0 %v8673_v59  ;;  %13410 = vmatprep.subr.mxu1 %v19384_v53  ;;  %v2515_v59 = vrot.slane %v2507_v57, %v22779_v9  ;;  %v22835_v47 = vld [vmem:[#allocation202_spill] sm:$0xff]  ;;  %v8601_v57 = vmul.f32 1.442695, %v8558_v2  ;;  %v22839_v2 = vld [vmem:[#allocation61_spill] sm:$0xff] }
 0x935   : > { %v19621_v63 = vpop.eup %13746  ;;  %13411 = vmatpush3.msra.mxu1 %v19384_v53  ;;  %v8679_v49 = vsel %vm7264_vm2, %v22835_v47, 0.0  ;;  %v2339_v53 = vcombine.low %v19607_v60, %v19611_v37 }
 0x936   : > { %v19624_v54 = vpop.eup %13748  ;;  %v8595_v42 = vmul.f32 1.442695, %v8555_v31  ;;  %13412 = vmatprep.mubr.msk.f32.mxu1 %vm7264_vm2, %v19621_v63  ;;  %13415 = vmatprep.subr.mxu1 %v19386_v55  ;;  %v22836_v31 = vld [vmem:[#allocation228_spill] sm:$0xff]  ;;  %v2527_v11 = vcombine.low %v2483_v61, %v2515_v59 }
 0x937   : > { %22833 = vst [vmem:[#allocation106_spill] sm:$0xff] %v19624_v54  ;;  %v8425_v1 = vpop.permute.xlu0 %8424  ;;  %v8685_v3 = vsel %vm7264_vm2, %v19624_v54, 0.0 }
 0x938   : > { %13758 = vpow2.f32 %v8595_v42  ;;  %v8556_v17 = vsub.f32 %v22836_v31, %v8425_v1  ;;  %8680 = vadd.xlane.f32.xlu0 %v8679_v49  ;;  %v2347_v42 = vrot.slane %v2339_v53, %v22779_v9  ;;  %v2379_v1 = vrot.slane %v2371_v41, %v22779_v9  ;;  %v22842_v31 = vld [vmem:[#allocation212_spill] sm:$0xff] }
 0x939   : > { %v13751_v8 = vpop.eup %13750  ;;  %13760 = vpow2.f32 %v8159_v28  ;;  %v22840_v28 = vld [vmem:[#allocation28_spill] sm:$0xff] }
 0x93a   : > { %v8597_v14 = vmul.f32 1.442695, %v8556_v17  ;;  %13413 = vmatmul.mubr.msk.f32.vlgmr.msra.gmra.mxu1 %vm7264_vm2, %v13751_v8  ;;  %v8754_v47 = vsel %vm7264_vm2, %v13751_v8, 0.0  ;;  %v8691_v53 = vsel %vm7264_vm2, %v22840_v28, 0.0  ;;  %v2391_v41 = vcombine.low %v2347_v42, %v2379_v1  ;;  %v22846_v28 = vld [vmem:[#allocation398_spill] sm:$0xff] }
 0x93b   : > { %v8432_v33 = vpop.permute.xlu0 %8431  ;;  %8755 = vadd.xlane.f32.xlu1 %v8754_v47  ;;  %13416 = vmatpush3.msra.mxu1 %v19386_v55  ;;  %v8167_v55 = vmul.f32 1.442695, %v8109_v4  ;;  %v13907_v4 = vld [vmem:[%s20586_s8] ss:$0 sm:$0xff] }
 0x93c   : > { %13762 = vpow2.f32 %v8597_v14  ;;  %v8557_v49 = vsub.f32 %v22839_v2, %v8432_v33  ;;  %8686 = vadd.xlane.f32.xlu0 %v8685_v3  ;;  %13417 = vmatprep.subr.mxu1 %v19388_v38  ;;  %v2508_v3 = vcombine.high %v19584_v58, %v19587_v13  ;;  %v22843_v14 = vld [vmem:[#allocation46_spill] sm:$0xff]  ;;  %v22844_v2 = vld [vmem:[#allocation377_spill] sm:$0xff]  ;;  %v2528_v58 = vcombine.high %v2483_v61, %v2515_v59  ;;  %v22847_v13 = vld [vmem:[#allocation395_spill] sm:$0xff] }
 0x93d   : > { %v19650_v8 = vpop.eup %13752  ;;  %13418 = vmatpush3.msra.mxu1 %v19388_v38  ;;  %13764 = vpow2.f32 %v8601_v57  ;;  %v2476_v38 = vcombine.high %v19571_v15, %v19574_v23  ;;  %v19668_v47 = vadd.f32 %v13907_v4, %v22843_v14  ;;  %v22850_v59 = vld [vmem:[#allocation52_spill] sm:$0xff] }
 0x93e   : > { %v8599_v30 = vmul.f32 1.442695, %v8557_v49  ;;  %13419 = vmatprep.mubr.msk.f32.mxu1 %vm7264_vm2, %v19650_v8  ;;  %13422 = vmatprep.subr.mxu1 %v2527_v11  ;;  %v19657_v33 = vpop.eup %13754  ;;  %v19671_v49 = vadd.f32 %v13907_v4, %v22844_v2 }
 0x93f   : > { %v8443_v24 = vpop.permute.xlu0 %8442  ;;  %22841 = vst [vmem:[#allocation197_spill] sm:$0xff] %v19657_v33  ;;  %v8697_v2 = vsel %vm7264_vm2, %v19657_v33, 0.0  ;;  %v8480_v33 = vpop.permute.xlu1 %8479 }
 0x940   : > { %13766 = vpow2.f32 %v8599_v30  ;;  %v8559_v17 = vsub.f32 %v22842_v31, %v8443_v24  ;;  %8692 = vadd.xlane.f32.xlu0 %v8691_v53  ;;  %v22845_v30 = vld [vmem:[#allocation29_spill] sm:$0xff]  ;;  %v19677_v53 = vadd.f32 %v13907_v4, %v22846_v28 }
 0x941   : > { %v13757_v57 = vpop.eup %13756  ;;  %v19674_v24 = vadd.f32 %v13907_v4, %v22845_v30  ;;  %13768 = vpow2.f32 %v8167_v55  ;;  %v22848_v31 = vld [vmem:[#allocation229_spill] sm:$0xff]  ;;  %v22849_v30 = vld [vmem:[#allocation131_spill] sm:$0xff]  ;;  %v22851_v55 = vld [vmem:[#allocation376_spill] sm:$0xff] }
 0x942   : > { %v8603_v15 = vmul.f32 1.442695, %v8559_v17  ;;  %13420 = vmatmul.mubr.msk.f32.vlgmr.msra.gmra.mxu1 %vm7264_vm2, %v13757_v57  ;;  %v8760_v23 = vsel %vm7264_vm2, %v13757_v57, 0.0  ;;  %v8113_v14 = vsub.f32 %v22848_v31, %v22847_v13  ;;  %v2490_v17 = vrot.slane %v2476_v38, %v22779_v9  ;;  %v22853_v13 = vld [vmem:[#allocation189_spill] sm:$0xff] }
 0x943   : > { %v8447_v27 = vpop.permute.xlu0 %8446  ;;  %8761 = vadd.xlane.f32.xlu1 %v8760_v23  ;;  %13423 = vmatpush3.msra.mxu1 %v2527_v11  ;;  %v2522_v57 = vrot.slane %v2508_v3, %v22779_v9  ;;  %v2667_v28 = vcombine.low %v22851_v55, %v22850_v59  ;;  %v2683_v23 = vcombine.low %v19668_v47, %v19671_v49 }
 0x944   : > { %13770 = vpow2.f32 %v8603_v15  ;;  %v8560_v4 = vsub.f32 %v22849_v30, %v8447_v27  ;;  %8698 = vadd.xlane.f32.xlu0 %v8697_v2  ;;  %13424 = vmatprep.subr.mxu1 %v2391_v41  ;;  %v2340_v11 = vcombine.high %v19607_v60, %v19611_v37  ;;  %v2372_v27 = vcombine.high %v19614_v35, %v19617_v7  ;;  %v22852_v15 = vld [vmem:[#allocation73_spill] sm:$0xff]  ;;  %v22856_v37 = vld [vmem:[#allocation99_spill] sm:$0xff] }
 0x945   : > { %v19688_v61 = vpop.eup %13758  ;;  %13425 = vmatpush3.msra.mxu1 %v2391_v41  ;;  %v2699_v38 = vcombine.low %v22853_v13, %v22852_v15  ;;  %v2715_v3 = vcombine.low %v19674_v24, %v19677_v53  ;;  %v8175_v2 = vmul.f32 1.442695, %v8113_v14  ;;  %v22854_v41 = vld [vmem:[#allocation8_spill] sm:$0xff]  ;;  %v2392_v7 = vcombine.high %v2347_v42, %v2379_v1 }
 0x946   : > { %v8605_v31 = vmul.f32 1.442695, %v8560_v4  ;;  %13426 = vmatprep.mubr.msk.f32.mxu1 %vm7264_vm2, %v19688_v61  ;;  %13429 = vmatprep.subr.mxu1 %v2528_v58  ;;  %v8703_v43 = vsel %vm7264_vm2, %v22854_v41, 0.0  ;;  %v19706_v60 = vpop.eup %13760  ;;  %v2529_v26 = vcombine.low %v2490_v17, %v2522_v57  ;;  %v2354_v4 = vrot.slane %v2340_v11, %v22779_v9 }
 0x947   : > { %v8454_v30 = vpop.permute.xlu0 %8453  ;;  %22855 = vst [vmem:[#allocation387_spill] sm:$0xff] %v19706_v60  ;;  %v2386_v36 = vrot.slane %v2372_v27, %v22779_v9  ;;  %v19712_v14 = vrot.slane %v2667_v28, %v22778_v18  ;;  %v19715_v50 = vrot.slane %v2683_v23, %v22778_v18  ;;  %v19723_v42 = vrot.slane %v2715_v3, %v22778_v18  ;;  %v22857_v23 = vld [vmem:[#allocation320_spill] sm:$0xff] }
 0x948   : > { %13772 = vpow2.f32 %v8605_v31  ;;  %v8561_v35 = vsub.f32 %v22856_v37, %v8454_v30  ;;  %8704 = vadd.xlane.f32.xlu0 %v8703_v43  ;;  %v19720_v43 = vrot.slane %v2699_v38, %v22778_v18  ;;  %v8709_v28 = vsel %vm7264_vm2, %v19706_v60, 0.0  ;;  %v8491_v37 = vpop.permute.xlu1 %8490  ;;  %v22861_v60 = vld [vmem:[#allocation94_spill] sm:$0xff] }
 0x949   : > { %v13763_v46 = vpop.eup %13762  ;;  %13774 = vpow2.f32 %v8175_v2  ;;  %v2393_v38 = vcombine.low %v2354_v4, %v2386_v36  ;;  %v8566_v54 = vsub.f32 %v22861_v60, %v8480_v33 }
 0x94a   : > { %v8607_v41 = vmul.f32 1.442695, %v8561_v35  ;;  %13427 = vmatmul.mubr.msk.f32.vlgmr.msra.gmra.mxu1 %vm7264_vm2, %v13763_v46  ;;  %v8766_v31 = vsel %vm7264_vm2, %v13763_v46, 0.0  ;;  %v13765_v1 = vpop.eup %13764  ;;  %v2763_v2 = vcombine.low %v19720_v43, %v19723_v42 }
 0x94b   : > { %v8458_v11 = vpop.permute.xlu0 %8457  ;;  %8767 = vadd.xlane.f32.xlu1 %v8766_v31  ;;  %13430 = vmatpush3.msra.mxu1 %v2528_v58  ;;  %v8772_v3 = vsel %vm7264_vm2, %v13765_v1, 0.0  ;;  %v2731_v58 = vcombine.low %v19712_v14, %v19715_v50  ;;  %v2530_v31 = vcombine.high %v2490_v17, %v2522_v57 }
 0x94c   : > { %13776 = vpow2.f32 %v8607_v41  ;;  %v8562_v27 = vsub.f32 %v22857_v23, %v8458_v11  ;;  %8710 = vadd.xlane.f32.xlu0 %v8709_v28  ;;  %13431 = vmatprep.subr.mxu1 %v2392_v7  ;;  %v22860_v28 = vld [vmem:[#allocation172_spill] sm:$0xff]  ;;  %v2771_v17 = vrot.slane %v2763_v2, %v22779_v9  ;;  %v8502_v60 = vpop.permute.xlu1 %8501  ;;  %v22863_v2 = vld [vmem:[#allocation297_spill] sm:$0xff] }
 0x94d   : > { %v19728_v46 = vpop.eup %13766  ;;  %13432 = vmatpush3.msra.mxu1 %v2392_v7  ;;  %v22858_v7 = vld [vmem:[#allocation204_spill] sm:$0xff] }
 0x94e   : > { %v8609_v30 = vmul.f32 1.442695, %v8562_v27  ;;  %13433 = vmatprep.mubr.msk.f32.mxu1 %vm7264_vm2, %v19728_v46  ;;  %13436 = vmatprep.subr.mxu1 %v2529_v26  ;;  %v8715_v41 = vsel %vm7264_vm2, %v22858_v7, 0.0  ;;  %v19740_v11 = vpop.eup %13768  ;;  %v8617_v7 = vmul.f32 1.442695, %v8566_v54 }
 0x94f   : > { %v8465_v35 = vpop.permute.xlu0 %8464  ;;  %13434 = vmatmul.mubr.msk.f32.vlgmr.msra.gmra.mxu1 %vm7264_vm2, %v13765_v1  ;;  %8773 = vadd.xlane.f32.xlu1 %v8772_v3  ;;  %22859 = vst [vmem:[#allocation163_spill] sm:$0xff] %v19740_v11  ;;  %v2739_v1 = vrot.slane %v2731_v58, %v22779_v9 }
 0x950   : > { %13778 = vpow2.f32 %v8609_v30  ;;  %v8563_v23 = vsub.f32 %v22860_v28, %v8465_v35  ;;  %8716 = vadd.xlane.f32.xlu0 %v8715_v41  ;;  %13437 = vmatpush3.msra.mxu1 %v2529_v26  ;;  %v8721_v30 = vsel %vm7264_vm2, %v19740_v11, 0.0  ;;  %v22862_v26 = vld [vmem:[#allocation264_spill] sm:$0xff]  ;;  %v2394_v35 = vcombine.high %v2354_v4, %v2386_v36  ;;  %v22864_v11 = vld [vmem:[#allocation397_spill] sm:$0xff]  ;;  %v22865_v36 = vld [vmem:[#allocation319_spill] sm:$0xff] }
 0x951   : > { %v19743_v27 = vpop.eup %13770  ;;  %13438 = vmatprep.subr.mxu1 %v2393_v38  ;;  %v2795_v58 = vcombine.low %v2739_v1, %v2771_v17  ;;  %v8568_v28 = vsub.f32 %v22863_v2, %v8491_v37 }
 0x952   : > { %v8611_v51 = vmul.f32 1.442695, %v8563_v23  ;;  %13440 = vmatprep.mubr.msk.f32.mxu1 %vm7264_vm2, %v19743_v27  ;;  %13439 = vmatpush3.msra.mxu1 %v2393_v38 }
 0x953   : > { %v8469_v57 = vpop.permute.xlu0 %8468  ;;  %13443 = vmatprep.subr.mxu1 %v2530_v31  ;;  %v8621_v37 = vmul.f32 1.442695, %v8568_v28 }
 0x954   : > { %13780 = vpow2.f32 %v8611_v51  ;;  %v8564_v3 = vsub.f32 %v22862_v26, %v8469_v57  ;;  %8722 = vadd.xlane.f32.xlu0 %v8721_v30  ;;  %v8727_v51 = vsel %vm7264_vm2, %v22864_v11, 0.0  ;;  %v22866_v26 = vld [vmem:[#allocation322_spill] sm:$0xff] }
 0x955   : > { %v13773_v33 = vpop.eup %13772  ;;  %v8570_v11 = vsub.f32 %v22866_v26, %v8502_v60  ;;  %v2732_v60 = vcombine.high %v19712_v14, %v19715_v50  ;;  %v2716_v50 = vcombine.high %v19674_v24, %v19677_v53  ;;  %v22868_v14 = vld [vmem:[#allocation128_spill] sm:$0xff]  ;;  %v8745_v26 = vsel %vm7264_vm2, %v19565_v20, 0.0 }
 0x956   : > { %v8613_v41 = vmul.f32 1.442695, %v8564_v3  ;;  %13441 = vmatmul.mubr.msk.f32.vlgmr.msra.gmra.mxu1 %vm7264_vm2, %v13773_v33  ;;  %v8778_v38 = vsel %vm7264_vm2, %v13773_v33, 0.0  ;;  %v19758_v57 = vpop.eup %13774 }
 0x957   : > { %v8476_v23 = vpop.permute.xlu0 %8475  ;;  %8779 = vadd.xlane.f32.xlu1 %v8778_v38  ;;  %13444 = vmatpush3.msra.mxu1 %v2530_v31  ;;  %v8513_v31 = vpop.permute.xlu1 %8512  ;;  %v8733_v33 = vsel %vm7264_vm2, %v19758_v57, 0.0 }
 0x958   : > { %13782 = vpow2.f32 %v8613_v41  ;;  %v8565_v4 = vsub.f32 %v22865_v36, %v8476_v23  ;;  %8728 = vadd.xlane.f32.xlu0 %v8727_v51  ;;  %13445 = vmatprep.subr.mxu1 %v2394_v35  ;;  %v22867_v41 = vld [vmem:[#allocation350_spill] sm:$0xff]  ;;  %v2764_v51 = vcombine.high %v19720_v43, %v19723_v42  ;;  %v2684_v36 = vcombine.high %v19668_v47, %v19671_v49 }
 0x959   : > { %v19761_v54 = vpop.eup %13776  ;;  %13446 = vmatpush3.msra.mxu1 %v2394_v35  ;;  %13784 = vpow2.f32 %v8617_v7  ;;  %v2668_v35 = vcombine.high %v22851_v55, %v22850_v59  ;;  %v2796_v7 = vcombine.high %v2739_v1, %v2771_v17  ;;  %v8739_v59 = vsel %vm7264_vm2, %v19539_v10, 0.0  ;;  %v22869_v1 = vld [vmem:[#allocation352_spill] sm:$0xff] }
 0x95a   : > { %v8615_v30 = vmul.f32 1.442695, %v8565_v4  ;;  %13447 = vmatprep.mubr.msk.f32.mxu1 %vm7264_vm2, %v19761_v54  ;;  %13450 = vmatprep.subr.mxu1 %v2795_v58  ;;  %v8625_v4 = vmul.f32 1.442695, %v8570_v11  ;;  %v2700_v55 = vcombine.high %v22853_v13, %v22852_v15  ;;  %v8572_v17 = vsub.f32 %v22869_v1, %v8513_v31 }
 0x95b   : > { %v8487_v3 = vpop.permute.xlu0 %8486  ;;  %v2746_v15 = vrot.slane %v2732_v60, %v22779_v9  ;;  %v2778_v13 = vrot.slane %v2764_v51, %v22779_v9  ;;  %v19798_v11 = vrot.slane %v2668_v35, %v22778_v18  ;;  %v19801_v31 = vrot.slane %v2684_v36, %v22778_v18 }
 0x95c   : > { %13786 = vpow2.f32 %v8615_v30  ;;  %v8567_v38 = vsub.f32 %v22867_v41, %v8487_v3  ;;  %8734 = vadd.xlane.f32.xlu0 %v8733_v33  ;;  %v19805_v33 = vrot.slane %v2700_v55, %v22778_v18  ;;  %v19808_v41 = vrot.slane %v2716_v50, %v22778_v18 }
 0x95d   : > { %v13779_v2 = vpop.eup %13778  ;;  %13788 = vpow2.f32 %v8621_v37  ;;  %v8524_v37 = vpop.permute.xlu1 %8523  ;;  %v2797_v60 = vcombine.low %v2746_v15, %v2778_v13  ;;  %v2747_v50 = vcombine.low %v19798_v11, %v19801_v31 }
 0x95e   : > { %v8619_v23 = vmul.f32 1.442695, %v8567_v38  ;;  %13448 = vmatmul.mubr.msk.f32.vlgmr.msra.gmra.mxu1 %vm7264_vm2, %v13779_v2  ;;  %v8784_v28 = vsel %vm7264_vm2, %v13779_v2, 0.0  ;;  %v8629_v2 = vmul.f32 1.442695, %v8572_v17  ;;  %v22873_v17 = vld [vmem:[#allocation356_spill] sm:$0xff] }
 0x95f   : > { %v8498_v30 = vpop.permute.xlu0 %8497  ;;  %8785 = vadd.xlane.f32.xlu1 %v8784_v28  ;;  %13451 = vmatpush3.msra.mxu1 %v2795_v58 }
 0x960   : > { %13790 = vpow2.f32 %v8619_v23  ;;  %v8569_v43 = vsub.f32 %v22868_v14, %v8498_v30  ;;  %8740 = vadd.xlane.f32.xlu0 %v8739_v59  ;;  %13452 = vmatprep.subr.mxu1 %v19436_v62  ;;  %v22871_v23 = vld [vmem:[#allocation354_spill] sm:$0xff]  ;;  %v8751_v30 = vsel %vm7264_vm2, %v19621_v63, 0.0  ;;  %v22872_v59 = vld [vmem:[#allocation215_spill] sm:$0xff]  ;;  %v2779_v14 = vcombine.low %v19805_v33, %v19808_v41 }
 0x961   : > { %v19787_v42 = vpop.eup %13780  ;;  %13453 = vmatpush3.msra.mxu1 %v19436_v62  ;;  %13792 = vpow2.f32 %v8625_v4  ;;  %v22870_v62 = vld [vmem:[#allocation105_spill] sm:$0xff]  ;;  %v8574_v20 = vsub.f32 %v22871_v23, %v8524_v37  ;;  %v8535_v36 = vpop.permute.xlu1 %8534 }
 0x962   : > { %v8623_v10 = vmul.f32 1.442695, %v8569_v43  ;;  %13454 = vmatprep.mubr.msk.f32.mxu1 %vm7264_vm2, %v19787_v42  ;;  %13457 = vmatprep.subr.mxu1 %v2796_v7  ;;  %v8576_v37 = vsub.f32 %v22873_v17, %v8535_v36  ;;  %v8775_v17 = vsel %vm7264_vm2, %v19743_v27, 0.0  ;;  %v8781_v27 = vsel %vm7264_vm2, %v19761_v54, 0.0 }
 0x963   : > { %v8509_v58 = vpop.permute.xlu0 %8508  ;;  %v8633_v1 = vmul.f32 1.442695, %v8574_v20 }
 0x964   : > { %13794 = vpow2.f32 %v8623_v10  ;;  %v8571_v3 = vsub.f32 %v22870_v62, %v8509_v58  ;;  %8746 = vadd.xlane.f32.xlu0 %v8745_v26  ;;  %v8757_v58 = vsel %vm7264_vm2, %v19650_v8, 0.0  ;;  %v2798_v26 = vcombine.high %v2746_v15, %v2778_v13 }
 0x965   : > { %v13783_v38 = vpop.eup %13782  ;;  %v8546_v20 = vpop.permute.xlu1 %8545  ;;  %v8637_v8 = vmul.f32 1.442695, %v8576_v37 }
 0x966   : > { %v8627_v28 = vmul.f32 1.442695, %v8571_v3  ;;  %13455 = vmatmul.mubr.msk.f32.vlgmr.msra.gmra.mxu1 %vm7264_vm2, %v13783_v38  ;;  %v8790_v35 = vsel %vm7264_vm2, %v13783_v38, 0.0  ;;  %v13785_v51 = vpop.eup %13784  ;;  %v2755_v38 = vrot.slane %v2747_v50, %v22779_v9  ;;  %v2780_v50 = vcombine.high %v19805_v33, %v19808_v41 }
 0x967   : > { %v8520_v4 = vpop.permute.xlu0 %8519  ;;  %8791 = vadd.xlane.f32.xlu1 %v8790_v35  ;;  %13458 = vmatpush3.msra.mxu1 %v2796_v7  ;;  %v8796_v7 = vsel %vm7264_vm2, %v13785_v51, 0.0  ;;  %v8763_v35 = vsel %vm7264_vm2, %v19688_v61, 0.0  ;;  %v2748_v61 = vcombine.high %v19798_v11, %v19801_v31 }
 0x968   : > { %13796 = vpow2.f32 %v8627_v28  ;;  %v8573_v55 = vsub.f32 %v22872_v59, %v8520_v4  ;;  %8752 = vadd.xlane.f32.xlu0 %v8751_v30  ;;  %13459 = vmatprep.subr.mxu1 %v19438_v12  ;;  %v22876_v4 = vld [vmem:[#allocation14_spill] sm:$0xff]  ;;  %v2794_v33 = vrot.slane %v2780_v50, %v22779_v9 }
 0x969   : > { %v19821_v43 = vpop.eup %13786  ;;  %13798 = vpow2.f32 %v8629_v2  ;;  %13460 = vmatpush3.msra.mxu1 %v19438_v12  ;;  %v22874_v12 = vld [vmem:[#allocation321_spill] sm:$0xff]  ;;  %v2787_v2 = vrot.slane %v2779_v14, %v22779_v9 }
 0x96a   : > { %v8631_v63 = vmul.f32 1.442695, %v8573_v55  ;;  %13461 = vmatprep.mubr.msk.f32.mxu1 %vm7264_vm2, %v19821_v43  ;;  %13464 = vmatprep.subr.mxu1 %v2797_v60  ;;  %v13789_v62 = vpop.eup %13788 }
 0x96b   : > { %v8531_v10 = vpop.permute.xlu0 %8530  ;;  %13462 = vmatmul.mubr.msk.f32.vlgmr.msra.gmra.mxu1 %vm7264_vm2, %v13785_v51  ;;  %8797 = vadd.xlane.f32.xlu1 %v8796_v7  ;;  %v8802_v13 = vsel %vm7264_vm2, %v13789_v62, 0.0  ;;  %v22875_v51 = vld [vmem:[#allocation358_spill] sm:$0xff]  ;;  %v2800_v11 = vcombine.high %v2755_v38, %v2787_v2 }
 0x96c   : > { %13800 = vpow2.f32 %v8631_v63  ;;  %v8575_v3 = vsub.f32 %v22874_v12, %v8531_v10  ;;  %8758 = vadd.xlane.f32.xlu0 %v8757_v58  ;;  %13465 = vmatpush3.msra.mxu1 %v2797_v60  ;;  %v8578_v36 = vsub.f32 %v22875_v51, %v8546_v20  ;;  %v8769_v63 = vsel %vm7264_vm2, %v19728_v46, 0.0  ;;  %v22885_v20 = vld [vmem:[#allocation191_spill] sm:$0xff]  ;;  %v22890_v51 = vld [vmem:[#allocation193_spill] sm:$0xff] }
 0x96d   : > { %v19834_v23 = vpop.eup %13790  ;;  %13466 = vmatprep.subr.mxu1 %v19453_v16  ;;  %13802 = vpow2.f32 %v8633_v1 }
 0x96e   : > { %v8635_v28 = vmul.f32 1.442695, %v8575_v3  ;;  %13467 = vmatpush3.msra.mxu1 %v19453_v16  ;;  %13468 = vmatprep.mubr.msk.f32.mxu1 %vm7264_vm2, %v19834_v23  ;;  %v13793_v60 = vpop.eup %13792  ;;  %v2799_v16 = vcombine.low %v2755_v38, %v2787_v2  ;;  %v8641_v14 = vmul.f32 1.442695, %v8578_v36  ;;  %v8787_v3 = vsel %vm7264_vm2, %v19787_v42, 0.0  ;;  %v22891_v36 = vld [vmem:[#allocation96_spill] sm:$0xff] }
 0x96f   : > { %v8542_v15 = vpop.permute.xlu0 %8541  ;;  %13469 = vmatmul.mubr.msk.f32.vlgmr.msra.gmra.mxu1 %vm7264_vm2, %v13789_v62  ;;  %13471 = vmatprep.subr.mxu1 %v2798_v26  ;;  %v8808_v1 = vsel %vm7264_vm2, %v13793_v60, 0.0  ;;  %v8793_v42 = vsel %vm7264_vm2, %v19821_v43, 0.0 }
 0x970   : > { %13804 = vpow2.f32 %v8635_v28  ;;  %v8577_v30 = vsub.f32 %v22876_v4, %v8542_v15  ;;  %8803 = vadd.xlane.f32.xlu1 %v8802_v13  ;;  %8764 = vadd.xlane.f32.xlu0 %v8763_v35  ;;  %v22888_v13 = vld [vmem:[#allocation381_spill] sm:$0xff]  ;;  %v22889_v35 = vld [vmem:[#allocation183_spill] sm:$0xff] }
 0x971   : > { %v19846_v59 = vpop.eup %13794  ;;  %13472 = vmatpush3.msra.mxu1 %v2798_v26  ;;  %13806 = vpow2.f32 %v8637_v8  ;;  %v22886_v8 = vld [vmem:[#allocation181_spill] sm:$0xff] }
 0x972   : > { %v8639_v55 = vmul.f32 1.442695, %v8577_v30  ;;  %13473 = vmatprep.subr.mxu1 %v19455_v39  ;;  %13475 = vmatprep.mubr.msk.f32.mxu1 %vm7264_vm2, %v19846_v59 }
 0x973   : > { %13474 = vmatpush3.msra.mxu1 %v19455_v39  ;;  %v2762_v39 = vrot.slane %v2748_v61, %v22779_v9 }
 0x974   : > { %13476 = vmatmul.mubr.msk.f32.vlgmr.msra.gmra.mxu1 %vm7264_vm2, %v13793_v60  ;;  %13478 = vmatprep.subr.mxu1 %v2799_v16  ;;  %13808 = vpow2.f32 %v8639_v55 }
 0x975   : > { %v19860_v7 = vpop.eup %13796  ;;  %8809 = vadd.xlane.f32.xlu1 %v8808_v1  ;;  %8770 = vadd.xlane.f32.xlu0 %v8769_v63  ;;  %13810 = vpow2.f32 %v8641_v14  ;;  %v2801_v37 = vcombine.low %v2762_v39, %v2794_v33  ;;  %v2802_v26 = vcombine.high %v2762_v39, %v2794_v33 }
 0x976   : > { %v13799_v31 = vpop.eup %13798  ;;  %13479 = vmatpush3.msra.mxu1 %v2799_v16  ;;  %13482 = vmatprep.mubr.msk.f32.mxu1 %vm7264_vm2, %v19860_v7 }
 0x977   : > { %13480 = vmatprep.subr.mxu1 %v19482_v45  ;;  %v8814_v41 = vsel %vm7264_vm2, %v13799_v31, 0.0 }
 0x978   : > { %13481 = vmatpush3.msra.mxu1 %v19482_v45 }
 0x979   : > { %v19868_v46 = vpop.eup %13800  ;;  %13483 = vmatmul.mubr.msk.f32.vlgmr.msra.gmra.mxu1 %vm7264_vm2, %v13799_v31  ;;  %13485 = vmatprep.subr.mxu1 %v2800_v11 }
 0x97a   : > { %8815 = vadd.xlane.f32.xlu1 %v8814_v41  ;;  %8776 = vadd.xlane.f32.xlu0 %v8775_v17  ;;  %v13803_v10 = vpop.eup %13802 }
 0x97b   : > { %13486 = vmatpush3.msra.mxu1 %v2800_v11  ;;  %13489 = vmatprep.mubr.msk.f32.mxu1 %vm7264_vm2, %v19868_v46  ;;  %v8820_v58 = vsel %vm7264_vm2, %v13803_v10, 0.0 }
 0x97c   : > { %13487 = vmatprep.subr.mxu1 %v19484_v44 }
 0x97d   : > { %v19877_v45 = vpop.eup %13804  ;;  %13488 = vmatpush3.msra.mxu1 %v19484_v44  ;;  %v19890_v44 = vpop.xlane.xlu1 %8647 }
 0x97e   : > { %13490 = vmatmul.mubr.msk.f32.vlgmr.msra.gmra.mxu1 %vm7264_vm2, %v13803_v10  ;;  %13492 = vmatprep.subr.mxu1 %v2801_v37  ;;  %v13807_v62 = vpop.eup %13806 }
 0x97f   : > { %8821 = vadd.xlane.f32.xlu1 %v8820_v58  ;;  %8782 = vadd.xlane.f32.xlu0 %v8781_v27  ;;  %v8826_v54 = vsel %vm7264_vm2, %v13807_v62, 0.0 }
 0x980   : > { %13493 = vmatpush3.msra.mxu1 %v2801_v37  ;;  %13496 = vmatprep.mubr.msk.f32.mxu1 %vm7264_vm2, %v19877_v45 }
 0x981   : > { %13494 = vmatprep.subr.mxu1 %v19494_v25  ;;  %v19887_v12 = vpop.eup %13808  ;;  %v19905_v2 = vpop.xlane.xlu1 %8659 }
 0x982   : > { %13495 = vmatpush3.msra.mxu1 %v19494_v25  ;;  %v13811_v38 = vpop.eup %13810  ;;  %v8829_v15 = vsel %vm7264_vm2, %v19887_v12, 0.0 }
 0x983   : > { %13497 = vmatmul.mubr.msk.f32.vlgmr.msra.gmra.mxu1 %vm7264_vm2, %v13807_v62  ;;  %13499 = vmatprep.subr.mxu1 %v2802_v26  ;;  %v8832_v25 = vsel %vm7264_vm2, %v13811_v38, 0.0 }
 0x984   : > { %8827 = vadd.xlane.f32.xlu1 %v8826_v54  ;;  %8788 = vadd.xlane.f32.xlu0 %v8787_v3 }
 0x985   : > { %13500 = vmatpush3.msra.mxu1 %v2802_v26  ;;  %13503 = vmatprep.mubr.msk.f32.mxu1 %vm7264_vm2, %v19887_v12  ;;  %v19918_v43 = vpop.xlane.xlu1 %8665 }
 0x986   : > { %13501 = vmatprep.subr.mxu1 %v19498_v48 }
 0x987   : > { %13502 = vmatpush3.msra.mxu1 %v19498_v48  ;;  %v8799_v48 = vsel %vm7264_vm2, %v19834_v23, 0.0  ;;  %v8823_v23 = vsel %vm7264_vm2, %v19877_v45, 0.0 }
 0x988   : > { %13504 = vmatmul.mubr.msk.f32.vlgmr.msra.gmra.mxu1 %vm7264_vm2, %v13811_v38  ;;  %13513 = vmatprep.subr.mxu1 %v18908_v19 }
 0x989   : > { %8833 = vadd.xlane.f32.xlu1 %v8832_v25  ;;  %8794 = vadd.xlane.f32.xlu0 %v8793_v42 }
 0x98a   : > { %13514 = vmatpush3.msra.mxu1 %v18908_v19  ;;  %13517 = vmatprep.mubr.msk.f32.mxu1 %vm7264_vm2, %v19526_v56  ;;  %v8805_v19 = vsel %vm7264_vm2, %v19846_v59, 0.0  ;;  %v8811_v56 = vsel %vm7264_vm2, %v19860_v7, 0.0 }
 0x98b   : > { %13515 = vmatprep.subr.mxu1 %v22823_v40 }
 0x98c   : > { %13516 = vmatpush3.msra.mxu1 %v22823_v40  ;;  %v22882_v40 = vld [vmem:[#allocation74_spill] sm:$0xff] }
 0x98d   : > { %13518 = vmatmul.mubr.msk.f32.vlgmr.msra.gmra.mxu1 %vm7264_vm2, %v19531_v34  ;;  %13527 = vmatprep.subr.mxu1 %v18911_v21  ;;  %v22879_v34 = vld [vmem:[#allocation385_spill] sm:$0xff] }
 0x98e   : > { %8800 = vadd.xlane.f32.xlu0 %v8799_v48  ;;  %13528 = vmatpush3.msra.mxu1 %v18911_v21  ;;  %v19934_v21 = vpop.xlane.xlu1 %8671 }
 0x98f   : > { %13531 = vmatprep.mubr.msk.f32.mxu1 %vm7264_vm2, %v19545_v5  ;;  %13529 = vmatprep.subr.mxu1 %v22822_v0  ;;  %v22880_v5 = vld [vmem:[#allocation180_spill] sm:$0xff] }
 0x990   : > { %13530 = vmatpush3.msra.mxu1 %v22822_v0  ;;  %v22881_v0 = vld [vmem:[#allocation197_spill] sm:$0xff] }
 0x991   : > { %13532 = vmatmul.mubr.msk.f32.vlgmr.msra.gmra.mxu1 %vm7264_vm2, %v19409_v6  ;;  %13541 = vmatprep.subr.mxu1 %v18937_v22  ;;  %v22877_v6 = vld [vmem:[#allocation409_spill] sm:$0xff] }
 0x992   : > { %8806 = vadd.xlane.f32.xlu0 %v8805_v19  ;;  %13542 = vmatpush3.msra.mxu1 %v18937_v22  ;;  %v22878_v22 = vld [vmem:[#allocation106_spill] sm:$0xff] }
 0x993   : > { %13545 = vmatprep.mubr.msk.f32.mxu1 %vm7264_vm2, %v19576_v29  ;;  %13543 = vmatprep.subr.mxu1 %v22827_v32  ;;  %v19952_v29 = vpop.xlane.xlu1 %8677 }
 0x994   : > { %13544 = vmatpush3.msra.mxu1 %v22827_v32  ;;  %v22883_v32 = vld [vmem:[#allocation166_spill] sm:$0xff] }
 0x995   : > { %13546 = vmatmul.mubr.msk.f32.vlgmr.msra.gmra.mxu1 %vm7264_vm2, %v19432_v52  ;;  %13555 = vmatprep.subr.mxu1 %v22877_v6  ;;  %v8817_v52 = vsel %vm7264_vm2, %v19868_v46, 0.0 }
 0x996   : > { %8812 = vadd.xlane.f32.xlu0 %v8811_v56  ;;  %13556 = vmatpush3.msra.mxu1 %v22877_v6 }
 0x997   : > { %13559 = vmatprep.mubr.msk.f32.mxu1 %vm7264_vm2, %v22878_v22  ;;  %13557 = vmatprep.subr.mxu1 %v22879_v34  ;;  %v19968_v28 = vpop.xlane.xlu1 %8683 }
 0x998   : > { %13558 = vmatpush3.msra.mxu1 %v22879_v34 }
 0x999   : > { %13560 = vmatmul.mubr.msk.f32.vlgmr.msra.gmra.mxu1 %vm7264_vm2, %v22880_v5  ;;  %13569 = vmatprep.subr.mxu1 %v19668_v47 }
 0x99a   : > { %8818 = vadd.xlane.f32.xlu0 %v8817_v52  ;;  %13570 = vmatpush3.msra.mxu1 %v19668_v47  ;;  %v22884_v47 = vld [vmem:[#allocation387_spill] sm:$0xff] }
 0x99b   : > { %13573 = vmatprep.mubr.msk.f32.mxu1 %vm7264_vm2, %v22881_v0  ;;  %13571 = vmatprep.subr.mxu1 %v22882_v40 }
 0x99c   : > { %13572 = vmatpush3.msra.mxu1 %v22882_v40  ;;  %v22902_v40 = vld [vmem:[#allocation417_spill] sm:$0xff] }
 0x99d   : > { %13574 = vmatmul.mubr.msk.f32.vlgmr.msra.gmra.mxu1 %vm7264_vm2, %v22883_v32  ;;  %13583 = vmatprep.subr.mxu1 %v19671_v49 }
 0x99e   : > { %8824 = vadd.xlane.f32.xlu0 %v8823_v23  ;;  %13584 = vmatpush3.msra.mxu1 %v19671_v49  ;;  %v22887_v49 = vld [vmem:[#allocation163_spill] sm:$0xff] }
 0x99f   : > { %13587 = vmatprep.mubr.msk.f32.mxu1 %vm7264_vm2, %v22884_v47  ;;  %13585 = vmatprep.subr.mxu1 %v22885_v20 }
 0x9a0   : > { %13586 = vmatpush3.msra.mxu1 %v22885_v20 }
 0x9a1   : > { %13588 = vmatmul.mubr.msk.f32.vlgmr.msra.gmra.mxu1 %vm7264_vm2, %v22886_v8  ;;  %13597 = vmatprep.subr.mxu1 %v19674_v24  ;;  %v22904_v8 = vld [vmem:[#allocation418_spill] sm:$0xff] }
 0x9a2   : > { %8830 = vadd.xlane.f32.xlu0 %v8829_v15  ;;  %13598 = vmatpush3.msra.mxu1 %v19674_v24  ;;  %v19988_v24 = vpop.xlane.xlu1 %8689 }
 0x9a3   : > { %13601 = vmatprep.mubr.msk.f32.mxu1 %vm7264_vm2, %v22887_v49  ;;  %13599 = vmatprep.subr.mxu1 %v22888_v13 }
 0x9a4   : > { %13600 = vmatpush3.msra.mxu1 %v22888_v13 }
 0x9a5   : > { %13602 = vmatmul.mubr.msk.f32.vlgmr.msra.gmra.mxu1 %vm7264_vm2, %v22889_v35  ;;  %13611 = vmatprep.subr.mxu1 %v19677_v53  ;;  %v19983_v60 = vpop.xlane.xlu0 %8644 }
 0x9a6   : > { %13612 = vmatpush3.msra.mxu1 %v19677_v53  ;;  %13615 = vmatprep.mubr.msk.f32.mxu1 %vm7264_vm2, %v19758_v57  ;;  %v19996_v30 = vpop.xlane.xlu1 %8695 }
 0x9a7   : > { %13613 = vmatprep.subr.mxu1 %v22890_v51 }
 0x9a8   : > { %13614 = vmatpush3.msra.mxu1 %v22890_v51 }
 0x9a9   : > { %13616 = vmatmul.mubr.msk.f32.vlgmr.msra.gmra.mxu1 %vm7264_vm2, %v22891_v36  ;;  %v19994_v4 = vpop.xlane.xlu0 %8650 }
 0x9aa   : > { %v20002_v53 = vpop.xlane.xlu1 %8701 }
 0x9ad   : > { %v19998_v16 = vpop.xlane.xlu0 %8653 }
 0x9ae   : > { %v20006_v55 = vpop.xlane.xlu1 %8707 }
 0x9b1   : > { %v20000_v59 = vpop.xlane.xlu0 %8656 }
 0x9b2   : > { %v20012_v14 = vpop.xlane.xlu1 %8713 }
 0x9b5   : > { %v20004_v57 = vpop.xlane.xlu0 %8662 }
 0x9b6   : > { %v20016_v63 = vpop.xlane.xlu1 %8719 }
 0x9b9   : > { %v20008_v61 = vpop.xlane.xlu0 %8668 }
 0x9ba   : > { %v20022_v31 = vpop.xlane.xlu1 %8725 }
 0x9bb   : > { %22892 = vst [vmem:[#allocation388_spill] sm:$0xff] %v20022_v31 }
 0x9bd   : > { %v20010_v50 = vpop.xlane.xlu0 %8674 }
 0x9be   : > { %v20026_v33 = vpop.xlane.xlu1 %8731 }
 0x9bf   : > { %22893 = vst [vmem:[#allocation165_spill] sm:$0xff] %v20026_v33 }
 0x9c1   : > { %v20014_v1 = vpop.xlane.xlu0 %8680 }
 0x9c2   : > { %v20032_v17 = vpop.xlane.xlu1 %8737 }
 0x9c3   : > { %22895 = vst [vmem:[#allocation137_spill] sm:$0xff] %v20032_v17 }
 0x9c5   : > { %v20018_v7 = vpop.xlane.xlu0 %8686 }
 0x9c6   : > { %v8744_v10 = vpop.xlane.xlu1 %8743 }
 0x9c9   : > { %v20020_v11 = vpop.xlane.xlu0 %8692 }
 0x9ca   : > { %v8750_v58 = vpop.xlane.xlu1 %8749 }
 0x9cb   : > { %v8883_v15 = vrot.slane %v8750_v58, %v22904_v8 }
 0x9cd   : > { %v20024_v39 = vpop.xlane.xlu0 %8698 }
 0x9ce   : > { %v8756_v26 = vpop.xlane.xlu1 %8755 }
 0x9d1   : > { %v20028_v46 = vpop.xlane.xlu0 %8704 }
 0x9d2   : > { %v8762_v12 = vpop.xlane.xlu1 %8761 }
 0x9d3   : > { %v8901_v58 = vrot.slane %v8762_v12, %v22904_v8 }
 0x9d5   : > { %v20030_v41 = vpop.xlane.xlu0 %8710 }
 0x9d6   : > { %22894 = vst [vmem:[#allocation399_spill] sm:$0xff] %v20030_v41  ;;  %v8768_v3 = vpop.xlane.xlu1 %8767 }
 0x9d9   : > { %v20034_v37 = vpop.xlane.xlu0 %8716 }
 0x9da   : > { %22896 = vst [vmem:[#allocation167_spill] sm:$0xff] %v20034_v37  ;;  %v8774_v42 = vpop.xlane.xlu1 %8773 }
 0x9dd   : > { %v20036_v45 = vpop.xlane.xlu0 %8722 }
 0x9de   : > { %22897 = vst [vmem:[#allocation72_spill] sm:$0xff] %v20036_v45 }
 0x9e0   : > { %v8780_v56 = vpop.xlane.xlu1 %8779 }
 0x9e1   : > { %v20038_v27 = vpop.xlane.xlu0 %8728 }
 0x9e2   : > { %22898 = vst [vmem:[#allocation109_spill] sm:$0xff] %v20038_v27 }
 0x9e5   : > { %v20040_v62 = vpop.xlane.xlu0 %8734 }
 0x9e6   : > { %22899 = vst [vmem:[#allocation122_spill] sm:$0xff] %v20040_v62  ;;  %v8874_v62 = vrot.slane %v8744_v10, %v22904_v8 }
 0x9e8   : > { %v8786_v5 = vpop.xlane.xlu1 %8785 }
 0x9e9   : > { %v8741_v54 = vpop.xlane.xlu0 %8740 }
 0x9ea   : > { %v13400_v25 = vpop.f32.mrf.mxu1  ;;  %v8870_v49 = vrot.slane %v8741_v54, %v22902_v40 }
 0x9ec   : > { %v20042_v19 = vpop.f32.mrf.mxu1  ;;  %v8875_v54 = vsel %vm3102_vm1, %v8874_v62, %v8870_v49  ;;  %v8919_v62 = vrot.slane %v8774_v42, %v22904_v8 }
 0x9ed   : > { %v8747_v38 = vpop.xlane.xlu0 %8746  ;;  %22900 = vst [vmem:[#allocation108_spill] sm:$0xff] %v20042_v19 }
 0x9ee   : > { %v8879_v32 = vrot.slane %v8747_v38, %v22902_v40  ;;  %v8892_v38 = vrot.slane %v8756_v26, %v22904_v8 }
 0x9f0   : > { %v20051_v13 = vpop.xlane.xlu1 %8791 }
 0x9f1   : > { %v8753_v48 = vpop.xlane.xlu0 %8752 }
 0x9f2   : > { %v13407_v6 = vpop.f32.mrf.mxu1  ;;  %v8888_v35 = vrot.slane %v8753_v48, %v22902_v40  ;;  %v8910_v48 = vrot.slane %v8768_v3, %v22904_v8 }
 0x9f4   : > { %v20044_v34 = vpop.f32.mrf.mxu1  ;;  %v8893_v27 = vsel %vm3102_vm1, %v8892_v38, %v8888_v35  ;;  %v20066_v10 = vpop.xlane.xlu1 %8797 }
 0x9f5   : > { %v8759_v22 = vpop.xlane.xlu0 %8758  ;;  %22901 = vst [vmem:[#allocation64_spill] sm:$0xff] %v20044_v34 }
 0x9f9   : > { %v8765_v52 = vpop.xlane.xlu0 %8764 }
 0x9fa   : > { %v13414_v0 = vpop.f32.mrf.mxu1 }
 0x9fb   : > { %v10869_v23 = vcombine.low %v13400_v25, %v13414_v0  ;;  %v10870_v47 = vcombine.high %v13400_v25, %v13414_v0  ;;  %v8884_v25 = vsel %vm3102_vm1, %v8883_v15, %v8879_v32  ;;  %v8897_v0 = vrot.slane %v8759_v22, %v22902_v40 }
 0x9fc   : > { %v20047_v20 = vpop.f32.mrf.mxu1  ;;  %v9011_v17 = vsel %vm3239_vm3, %v8884_v25, %v8875_v54 }
 0x9fd   : > { %22903 = vst [vmem:[#allocation136_spill] sm:$0xff] %v20047_v20  ;;  %v10598_v51 = vcombine.high %v20042_v19, %v20047_v20  ;;  %v8906_v19 = vrot.slane %v8765_v52, %v22902_v40  ;;  %v8902_v26 = vsel %vm3102_vm1, %v8901_v58, %v8897_v0  ;;  %v9012_v49 = vsel %vm3240_vm4, %v8893_v27, %v9011_v17 }
 0x9fe   : > { %v8771_v36 = vpop.xlane.xlu0 %8770  ;;  %v10877_v3 = vrot.slane %v10869_v23, %v22778_v18  ;;  %v10884_v52 = vrot.slane %v10870_v47, %v22778_v18  ;;  %v9013_v42 = vsel %vm3242_vm5, %v8902_v26, %v9012_v49 }
 0x9ff   : > { %v8915_v32 = vrot.slane %v8771_v36, %v22902_v40  ;;  %v8911_v17 = vsel %vm3102_vm1, %v8910_v48, %v8906_v19  ;;  %v10612_v47 = vrot.slane %v10598_v51, %v22778_v18 }
 0xa00   : > { %v9014_v26 = vsel %vm3244_vm6, %v8911_v17, %v9013_v42 }
 0xa01   : > { %v8920_v27 = vsel %vm3102_vm1, %v8919_v62, %v8915_v32 }
 0xa02   : > { %v13421_v20 = vpop.f32.mrf.mxu1  ;;  %v9015_v48 = vsel %vm3246_vm7, %v8920_v27, %v9014_v26 }
 0xa03   : > { %v8777_v22 = vpop.xlane.xlu0 %8776  ;;  %v10885_v15 = vcombine.low %v13407_v6, %v13421_v20  ;;  %v10886_v12 = vcombine.high %v13407_v6, %v13421_v20  ;;  %v8928_v6 = vrot.slane %v8780_v56, %v22904_v8  ;;  %v20089_v56 = vpop.xlane.xlu1 %8803 }
 0xa04   : > { %v8924_v35 = vrot.slane %v8777_v22, %v22902_v40  ;;  %v20074_v38 = vpop.f32.mrf.mxu1 }
 0xa05   : > { %22905 = vst [vmem:[#allocation149_spill] sm:$0xff] %v20074_v38  ;;  %v10893_v25 = vrot.slane %v10885_v15, %v22778_v18  ;;  %v10900_v0 = vrot.slane %v10886_v12, %v22778_v18  ;;  %v10614_v36 = vcombine.high %v20044_v34, %v20074_v38  ;;  %v8937_v34 = vrot.slane %v8786_v5, %v22904_v8 }
 0xa06   : > { %v8929_v54 = vsel %vm3102_vm1, %v8928_v6, %v8924_v35 }
 0xa07   : > { %v10933_v23 = vcombine.low %v10877_v3, %v10893_v25  ;;  %v10934_v20 = vcombine.high %v10877_v3, %v10893_v25  ;;  %v10949_v58 = vcombine.low %v10884_v52, %v10900_v0  ;;  %v10950_v22 = vcombine.high %v10884_v52, %v10900_v0  ;;  %v20099_v25 = vpop.xlane.xlu1 %8809 }
 0xa08   : > { %v10628_v15 = vrot.slane %v10614_v36, %v22778_v18  ;;  %v8783_v12 = vpop.xlane.xlu0 %8782  ;;  %v9016_v51 = vsel %vm3248_vm8, %v8929_v54, %v9015_v48  ;;  %v8955_v48 = vrot.slane %v20066_v10, %v22904_v8 }
 0xa09   : > { %v8933_v19 = vrot.slane %v8783_v12, %v22902_v40  ;;  %v20125_v10 = vrot.slane %v10933_v23, %v22779_v9 }
 0xa0a   : > { %v10677_v32 = vcombine.low %v10612_v47, %v10628_v15  ;;  %v10678_v62 = vcombine.high %v10612_v47, %v10628_v15  ;;  %v13428_v49 = vpop.f32.mrf.mxu1 }
 0xa0b   : > { %v8938_v3 = vsel %vm3102_vm1, %v8937_v34, %v8933_v19  ;;  %v20103_v42 = vpop.xlane.xlu1 %8815  ;;  %v8946_v19 = vrot.slane %v20051_v13, %v22904_v8 }
 0xa0c   : > { %v9017_v35 = vsel %vm3250_vm9, %v8938_v3, %v9016_v51  ;;  %v20097_v52 = vpop.f32.mrf.mxu1  ;;  %v8964_v51 = vrot.slane %v20089_v56, %v22904_v8  ;;  %v8982_v3 = vrot.slane %v20103_v42, %v22904_v8  ;;  %v20128_v56 = vrot.slane %v10934_v20, %v22779_v9 }
 0xa0d   : > { %22906 = vst [vmem:[#allocation162_spill] sm:$0xff] %v20097_v52  ;;  %v8789_v5 = vpop.xlane.xlu0 %8788  ;;  %9027 = vxpose.xlu0.b32.start [1/2] (short) (narrow) %v9017_v35, 16 }
 0xa0f   : > { %v13435_v0 = vpop.f32.mrf.mxu1  ;;  %v20109_v12 = vpop.xlane.xlu1 %8821 }
 0xa10   : > { %v8991_v35 = vrot.slane %v20109_v12, %v22904_v8  ;;  %v20135_v12 = vrot.slane %v10949_v58, %v22779_v9  ;;  %v20148_v58 = vrot.slane %v10677_v32, %v22779_v9 }
 0xa11   : > { %v20101_v6 = vpop.f32.mrf.mxu1 }
 0xa12   : > { %v8795_v36 = vpop.xlane.xlu0 %8794  ;;  %22907 = vst [vmem:[#allocation185_spill] sm:$0xff] %v20101_v6  ;;  %22910 = vst [vmem:[#allocation404_spill] sm:$0xff] %v20135_v12 }
 0xa13   : > { %v8828_v33 = vpop.xlane.xlu1 %8827 }
 0xa16   : > { %v13442_v17 = vpop.f32.mrf.mxu1 }
 0xa17   : > { %v8801_v27 = vpop.xlane.xlu0 %8800  ;;  %v10901_v47 = vcombine.low %v13428_v49, %v13442_v17  ;;  %v10902_v54 = vcombine.high %v13428_v49, %v13442_v17  ;;  %v8973_v49 = vrot.slane %v20099_v25, %v22904_v8  ;;  %v8951_v17 = vrot.slane %v8795_v36, %v22902_v40 }
 0xa18   : > { %v20105_v15 = vpop.f32.mrf.mxu1  ;;  %v8942_v25 = vrot.slane %v8789_v5, %v22902_v40  ;;  %v20138_v36 = vrot.slane %v10950_v22, %v22779_v9  ;;  %v20151_v22 = vrot.slane %v10678_v62, %v22779_v9 }
 0xa19   : > { %22908 = vst [vmem:[#allocation401_spill] sm:$0xff] %v20105_v15  ;;  %v10630_v34 = vcombine.high %v20097_v52, %v20105_v15  ;;  %v10909_v45 = vrot.slane %v10901_v47, %v22778_v18  ;;  %v8960_v47 = vrot.slane %v8801_v27, %v22902_v40 }
 0xa1a   : > { %22911 = vst [vmem:[#allocation170_spill] sm:$0xff] %v20138_v36  ;;  %v8947_v27 = vsel %vm3102_vm1, %v8946_v19, %v8942_v25 }
 0xa1b   : > { %v8807_v26 = vpop.xlane.xlu0 %8806  ;;  %v10644_v37 = vrot.slane %v10630_v34, %v22778_v18  ;;  %v8965_v19 = vsel %vm3102_vm1, %v8964_v51, %v8960_v47 }
 0xa1e   : > { %v13449_v52 = vpop.f32.mrf.mxu1 }
 0xa1f   : > { %v8813_v15 = vpop.xlane.xlu0 %8812  ;;  %v10917_v13 = vcombine.low %v13435_v0, %v13449_v52  ;;  %v10918_v38 = vcombine.high %v13435_v0, %v13449_v52  ;;  %v10916_v52 = vrot.slane %v10902_v54, %v22778_v18  ;;  %v8956_v0 = vsel %vm3102_vm1, %v8955_v48, %v8951_v17 }
 0xa20   : > { %v20132_v42 = vpop.f32.mrf.mxu1 }
 0xa21   : > { %22909 = vst [vmem:[#allocation402_spill] sm:$0xff] %v20132_v42  ;;  %v10925_v23 = vrot.slane %v10917_v13, %v22778_v18  ;;  %v10932_v20 = vrot.slane %v10918_v38, %v22778_v18  ;;  %v10646_v5 = vcombine.high %v20101_v6, %v20132_v42  ;;  %v8969_v38 = vrot.slane %v8807_v26, %v22902_v40 }
 0xa22   : > { %v8978_v6 = vrot.slane %v8813_v15, %v22902_v40  ;;  %v9018_v26 = vsel %vm3239_vm3, %v8956_v0, %v8947_v27 }
 0xa23   : > { %v8819_v54 = vpop.xlane.xlu0 %8818  ;;  %v10965_v31 = vcombine.low %v10909_v45, %v10925_v23  ;;  %v10966_v13 = vcombine.high %v10909_v45, %v10925_v23  ;;  %v10981_v41 = vcombine.low %v10916_v52, %v10932_v20  ;;  %v10982_v42 = vcombine.high %v10916_v52, %v10932_v20  ;;  %v8834_v23 = vpop.xlane.xlu1 %8833 }
 0xa24   : > { %v10660_v48 = vrot.slane %v10646_v5, %v22778_v18  ;;  %v9000_v45 = vrot.slane %v8828_v33, %v22904_v8  ;;  %v8987_v15 = vrot.slane %v8819_v54, %v22902_v40  ;;  %v8974_v5 = vsel %vm3102_vm1, %v8973_v49, %v8969_v38 }
 0xa25   : > { %v20159_v32 = vrot.slane %v10965_v31, %v22779_v9  ;;  %v20162_v62 = vrot.slane %v10966_v13, %v22779_v9  ;;  %v20165_v34 = vrot.slane %v10981_v41, %v22779_v9  ;;  %v8983_v33 = vsel %vm3102_vm1, %v8982_v3, %v8978_v6 }
 0xa26   : > { %v10709_v17 = vcombine.low %v10644_v37, %v10660_v48  ;;  %v13456_v52 = vpop.f32.mrf.mxu1  ;;  %v10710_v25 = vcombine.high %v10644_v37, %v10660_v48  ;;  %v20189_v47 = vrot.slane %v10982_v42, %v22779_v9  ;;  %v9009_v6 = vrot.slane %v8834_v23, %v22904_v8 }
 0xa27   : > { %22912 = vst [vmem:[#allocation179_spill] sm:$0xff] %v20165_v34  ;;  %v8825_v31 = vpop.xlane.xlu0 %8824  ;;  %v9019_v3 = vsel %vm3240_vm4, %v8965_v19, %v9018_v26  ;;  %v8992_v38 = vsel %vm3102_vm1, %v8991_v35, %v8987_v15 }
 0xa28   : > { %v8996_v0 = vrot.slane %v8825_v31, %v22902_v40  ;;  %v20178_v54 = vpop.f32.mrf.mxu1  ;;  %v20181_v13 = vrot.slane %v10709_v17, %v22779_v9  ;;  %v20184_v37 = vrot.slane %v10710_v25, %v22779_v9  ;;  %22913 = vst [vmem:[#allocation38_spill] sm:$0xff] %v20189_v47  ;;  %v9020_v27 = vsel %vm3242_vm5, %v8974_v5, %v9019_v3 }
 0xa29   : > { %v9021_v8 = vsel %vm3244_vm6, %v8983_v33, %v9020_v27 }
 0xa2a   : > { %v9001_v17 = vsel %vm3102_vm1, %v9000_v45, %v8996_v0  ;;  %v9022_v45 = vsel %vm3246_vm7, %v8992_v38, %v9021_v8 }
 0xa2b   : > { %v8831_v25 = vpop.xlane.xlu0 %8830  ;;  %v13463_v31 = vpop.f32.mrf.mxu1  ;;  %v9023_v33 = vsel %vm3248_vm8, %v9001_v17, %v9022_v45 }
 0xa2c   : > { %v9005_v26 = vrot.slane %v8831_v25, %v22902_v40 }
 0xa2d   : > { %v20211_v23 = vpop.f32.mrf.mxu1 }
 0xa2e   : > { %v9010_v40 = vsel %vm3102_vm1, %v9009_v6, %v9005_v26 }
 0xa2f   : > { %v9024_v0 = vsel %vm3250_vm9, %v9010_v40, %v9023_v33  ;;  %v13470_v3 = vpop.f32.mrf.mxu1 }
 0xa30   : > { %9028 = vxpose.xlu0.b32.end [2/2] (short) (narrow) %v9024_v0, 16  ;;  %v11005_v38 = vcombine.low %v13456_v52, %v13470_v3  ;;  %v11006_v25 = vcombine.high %v13456_v52, %v13470_v3 }
 0xa31   : > { %v20222_v8 = vpop.f32.mrf.mxu1 }
 0xa32   : > { %v11013_v17 = vrot.slane %v11005_v38, %v22778_v18  ;;  %v11020_v6 = vrot.slane %v11006_v25, %v22778_v18 }
 0xa34   : > { %v13477_v51 = vpop.f32.mrf.mxu1 }
 0xa35   : > { %v11021_v41 = vcombine.low %v13463_v31, %v13477_v51  ;;  %v11022_v19 = vcombine.high %v13463_v31, %v13477_v51 }
 0xa36   : > { %v20224_v20 = vpop.f32.mrf.mxu1 }
 0xa37   : > { %v11029_v26 = vrot.slane %v11021_v41, %v22778_v18  ;;  %v11036_v45 = vrot.slane %v11022_v19, %v22778_v18 }
 0xa39   : > { %v11069_v33 = vcombine.low %v11013_v17, %v11029_v26  ;;  %v11070_v40 = vcombine.high %v11013_v17, %v11029_v26  ;;  %v11085_v0 = vcombine.low %v11020_v6, %v11036_v45  ;;  %v11086_v27 = vcombine.high %v11020_v6, %v11036_v45  ;;  %v13484_v52 = vpop.f32.mrf.mxu1 }
 0xa3b   : > { %v20230_v3 = vpop.f32.mrf.mxu1  ;;  %v20241_v36 = vrot.slane %v11069_v33, %v22779_v9  ;;  %v22922_v33 = vld [vmem:[#allocation164_spill] sm:$0xff] }
 0xa3e   : > { %v13491_v5 = vpop.f32.mrf.mxu1 }
 0xa40   : > { %v20232_v49 = vpop.f32.mrf.mxu1 }
 0xa43   : > { %v13498_v51 = vpop.f32.mrf.mxu1 }
 0xa44   : > { %v11037_v31 = vcombine.low %v13484_v52, %v13498_v51  ;;  %v11038_v42 = vcombine.high %v13484_v52, %v13498_v51  ;;  %v20244_v52 = vrot.slane %v11070_v40, %v22779_v9 }
 0xa45   : > { %v20234_v38 = vpop.f32.mrf.mxu1 }
 0xa46   : > { %v11045_v19 = vrot.slane %v11037_v31, %v22778_v18  ;;  %v11052_v17 = vrot.slane %v11038_v42, %v22778_v18 }
 0xa48   : > { %v13505_v25 = vpop.f32.mrf.mxu1 }
 0xa49   : > { %v11053_v15 = vcombine.low %v13491_v5, %v13505_v25  ;;  %v11054_v41 = vcombine.high %v13491_v5, %v13505_v25  ;;  %v20247_v5 = vrot.slane %v11085_v0, %v22779_v9  ;;  %v20268_v25 = vrot.slane %v11086_v27, %v22779_v9  ;;  %v22920_v27 = vld [vmem:[#allocation391_spill] sm:$0xff]  ;;  %v22921_v0 = vld [vmem:[#allocation130_spill] sm:$0xff] }
 0xa4b   : > { %v11061_v6 = vrot.slane %v11053_v15, %v22778_v18  ;;  %v11068_v26 = vrot.slane %v11054_v41, %v22778_v18  ;;  %22914 = vst [vmem:[#allocation194_spill] sm:$0xff] %v20247_v5  ;;  %22918 = vst [vmem:[#allocation70_spill] sm:$0xff] %v20268_v25  ;;  %v22924_v41 = vld [vmem:[#allocation90_spill] sm:$0xff] }
 0xa4d   : > { %v11101_v45 = vcombine.low %v11045_v19, %v11061_v6  ;;  %v11102_v48 = vcombine.high %v11045_v19, %v11061_v6  ;;  %v11117_v35 = vcombine.low %v11052_v17, %v11068_v26  ;;  %v11118_v47 = vcombine.high %v11052_v17, %v11068_v26  ;;  %v22919_v6 = vld [vmem:[#allocation158_spill] sm:$0xff] }
 0xa4f   : > { %v20250_v51 = vrot.slane %v11101_v45, %v22779_v9  ;;  %v20253_v42 = vrot.slane %v11102_v48, %v22779_v9  ;;  %v20256_v15 = vrot.slane %v11117_v35, %v22779_v9  ;;  %v20259_v31 = vrot.slane %v11118_v47, %v22779_v9  ;;  %v22923_v35 = vld [vmem:[#allocation207_spill] sm:$0xff] }
 0xa51   : > { %22915 = vst [vmem:[#allocation66_spill] sm:$0xff] %v20253_v42  ;;  %22916 = vst [vmem:[#allocation77_spill] sm:$0xff] %v20256_v15  ;;  %v22925_v15 = vld [vmem:[#allocation199_spill] sm:$0xff] }
 0xa52   : > { %22917 = vst [vmem:[#allocation169_spill] sm:$0xff] %v20259_v31 }
 0xaa8   : > { %v9043_v17 = vpop.trf.xlu0 }
 0xaa9   : > { %v9108_v26 = vrot.slane %v9043_v17, %v22919_v6  ;;  %v9064_v45 = vrot.slane %v9043_v17, %v22920_v27  ;;  %v9075_v34 = vrot.slane %v9043_v17, %v22923_v35  ;;  %v9086_v25 = vrot.slane %v9043_v17, %v22921_v0 }
 0xaaa   : > { %v9097_v42 = vrot.slane %v9043_v17, %v22922_v33 }
 0xaab   : > { %9114 = vbcast.lane.b32.xlu0 %v9108_v26, 264  ;;  %9066 = vbcast.lane.b32.xlu1 %v9064_v45, 256 }
 0xaac   : > { %v9044_v48 = vpop.trf.xlu0 }
 0xaad   : > { %v9174_v40 = vrot.slane %v9044_v48, %v22921_v0  ;;  %v9185_v47 = vrot.slane %v9044_v48, %v22922_v33  ;;  %v9196_v19 = vrot.slane %v9044_v48, %v22919_v6  ;;  %v9207_v31 = vrot.slane %v9044_v48, %v22924_v41 }
 0xaae   : > { %v9218_v5 = vrot.slane %v9044_v48, %v22925_v15  ;;  %v9130_v0 = vrot.slane %v9043_v17, %v22925_v15  ;;  %v9163_v33 = vrot.slane %v9044_v48, %v22923_v35 }
 0xaaf   : > { %9070 = vbcast.lane.b32.xlu1 %v9064_v45, 264  ;;  %9180 = vbcast.lane.b32.xlu0 %v9174_v40, 264  ;;  %v22926_v45 = vld [vmem:[#allocation392_spill] sm:$0xff] }
 0xab0   : > { %v9229_v12 = vrot.slane %v9044_v48, %v22926_v45  ;;  %v9141_v6 = vrot.slane %v9043_v17, %v22926_v45 }
 0xab3   : > { %9077 = vbcast.lane.b32.xlu1 %v9075_v34, 256  ;;  %9191 = vbcast.lane.b32.xlu0 %v9185_v47, 264 }
 0xab7   : > { %9081 = vbcast.lane.b32.xlu1 %v9075_v34, 264  ;;  %9202 = vbcast.lane.b32.xlu0 %v9196_v19, 264  ;;  %v9119_v34 = vrot.slane %v9043_v17, %v22924_v41 }
 0xabb   : > { %9088 = vbcast.lane.b32.xlu1 %v9086_v25, 256  ;;  %9213 = vbcast.lane.b32.xlu0 %v9207_v31, 264 }
 0xabf   : > { %9092 = vbcast.lane.b32.xlu1 %v9086_v25, 264  ;;  %9224 = vbcast.lane.b32.xlu0 %v9218_v5, 264  ;;  %v9152_v25 = vrot.slane %v9044_v48, %v22920_v27 }
 0xac3   : > { %9099 = vbcast.lane.b32.xlu1 %v9097_v42, 256  ;;  %9235 = vbcast.lane.b32.xlu0 %v9229_v12, 264 }
 0xac7   : > { %9103 = vbcast.lane.b32.xlu1 %v9097_v42, 264 }
 0xacb   : > { %9110 = vbcast.lane.b32.xlu1 %v9108_v26, 256 }
 0xacf   : > { %9121 = vbcast.lane.b32.xlu1 %v9119_v34, 256 }
 0xad3   : > { %9125 = vbcast.lane.b32.xlu1 %v9119_v34, 264 }
 0xad7   : > { %9132 = vbcast.lane.b32.xlu1 %v9130_v0, 256 }
 0xadb   : > { %9136 = vbcast.lane.b32.xlu1 %v9130_v0, 264 }
 0xadf   : > { %9143 = vbcast.lane.b32.xlu1 %v9141_v6, 256 }
 0xae3   : > { %9147 = vbcast.lane.b32.xlu1 %v9141_v6, 264 }
 0xae7   : > { %9154 = vbcast.lane.b32.xlu1 %v9152_v25, 256 }
 0xaeb   : > { %9158 = vbcast.lane.b32.xlu1 %v9152_v25, 264 }
 0xaef   : > { %9165 = vbcast.lane.b32.xlu1 %v9163_v33, 256 }
 0xaf3   : > { %9169 = vbcast.lane.b32.xlu1 %v9163_v33, 264 }
 0xaf7   : > { %9176 = vbcast.lane.b32.xlu1 %v9174_v40, 256 }
 0xafb   : > { %9187 = vbcast.lane.b32.xlu1 %v9185_v47, 256  ;;  %v20300_v47 = vstv %s11141_s0 }
 0xaff   : > { %9198 = vbcast.lane.b32.xlu1 %v9196_v19, 256 }
 0xb03   : > { %9209 = vbcast.lane.b32.xlu1 %v9207_v31, 256 }
 0xb07   : > { %9220 = vbcast.lane.b32.xlu1 %v9218_v5, 256 }
 0xb0b   : > { %9231 = vbcast.lane.b32.xlu1 %v9229_v12, 256 }
 0xb1d   : > { %v9067_v42 = vpop.permute.xlu1 %9066  ;;  %v9115_v6 = vpop.permute.xlu0 %9114 }
 0xb1e   : > { %v9269_v15 = vadd.f32 %v9067_v42, %v19983_v60  ;;  %v9278_v33 = vadd.f32 %v9115_v6, %v19934_v21 }
 0xb20   : > { %13812 = vrcp.f32 %v9269_v15 }
 0xb21   : > { %v9071_v41 = vpop.permute.xlu1 %9070 }
 0xb22   : > { %v9270_v17 = vadd.f32 %v9071_v41, %v19890_v44 }
 0xb24   : > { %13814 = vrcp.f32 %v9270_v17 }
 0xb25   : > { %v9078_v26 = vpop.permute.xlu1 %9077 }
 0xb26   : > { %v9271_v48 = vadd.f32 %v9078_v26, %v19994_v4 }
 0xb28   : > { %13816 = vrcp.f32 %v9271_v48 }
 0xb29   : > { %v9082_v35 = vpop.permute.xlu1 %9081 }
 0xb2a   : > { %v9272_v40 = vadd.f32 %v9082_v35, %v19998_v16 }
 0xb2c   : > { %13818 = vrcp.f32 %v9272_v40 }
 0xb2d   : > { %v13813_v12 = vpop.eup %13812  ;;  %v9089_v5 = vpop.permute.xlu1 %9088 }
 0xb2e   : > { %v9273_v60 = vadd.f32 %v9089_v5, %v20000_v59  ;;  %v11175_v31 = vmul.f32 %v13813_v12, %v20300_v47 }
 0xb30   : > { %13820 = vrcp.f32 %v9273_v60  ;;  %12505 = vperm.xlu1 %13683, %v11175_v31  }
 0xb31   : > { %v13815_v44 = vpop.eup %13814  ;;  %v9093_v19 = vpop.permute.xlu1 %9092 }
 0xb32   : > { %v9274_v27 = vadd.f32 %v9093_v19, %v19905_v2  ;;  %v11176_v4 = vmul.f32 %v13815_v44, %v20300_v47 }
 0xb34   : > { %13822 = vrcp.f32 %v9274_v27  ;;  %12510 = vperm.xlu0 %13682, %v11176_v4  }
 0xb35   : > { %v13817_v16 = vpop.eup %13816  ;;  %v9100_v45 = vpop.permute.xlu1 %9099 }
 0xb36   : > { %v9275_v34 = vadd.f32 %v9100_v45, %v20004_v57  ;;  %v11177_v0 = vmul.f32 %v13817_v16, %v20300_v47 }
 0xb38   : > { %13824 = vrcp.f32 %v9275_v34  ;;  %12515 = vperm.xlu1 %13683, %v11177_v0  }
 0xb39   : > { %v13819_v59 = vpop.eup %13818  ;;  %v9104_v25 = vpop.permute.xlu1 %9103 }
 0xb3a   : > { %v9276_v42 = vadd.f32 %v9104_v25, %v19918_v43  ;;  %v11178_v2 = vmul.f32 %v13819_v59, %v20300_v47 }
 0xb3c   : > { %13826 = vrcp.f32 %v9276_v42  ;;  %12520 = vperm.xlu0 %13682, %v11178_v2   ;;  %v9181_v42 = vpop.permute.xlu0 %9180 }
 0xb3d   : > { %v13821_v15 = vpop.eup %13820  ;;  %v9111_v41 = vpop.permute.xlu1 %9110  ;;  %13828 = vrcp.f32 %v9278_v33 }
 0xb3e   : > { %v9277_v57 = vadd.f32 %v9111_v41, %v20008_v61  ;;  %v11179_v17 = vmul.f32 %v13821_v15, %v20300_v47 }
 0xb40   : > { %13830 = vrcp.f32 %v9277_v57  ;;  %12525 = vperm.xlu1 %13683, %v11179_v17  }
 0xb41   : > { %v13823_v26 = vpop.eup %13822  ;;  %v9122_v48 = vpop.permute.xlu1 %9121 }
 0xb42   : > { %v9279_v35 = vadd.f32 %v9122_v48, %v20010_v50  ;;  %v11180_v21 = vmul.f32 %v13823_v26, %v20300_v47 }
 0xb44   : > { %13832 = vrcp.f32 %v9279_v35  ;;  %12530 = vperm.xlu0 %13682, %v11180_v21  }
 0xb45   : > { %v13825_v43 = vpop.eup %13824  ;;  %v9126_v40 = vpop.permute.xlu1 %9125 }
 0xb46   : > { %v9280_v12 = vadd.f32 %v9126_v40, %v19952_v29  ;;  %v11181_v5 = vmul.f32 %v13825_v43, %v20300_v47  ;;  %v9290_v40 = vadd.f32 %v9181_v42, %v20006_v55 }
 0xb48   : > { %13834 = vrcp.f32 %v9280_v12  ;;  %12535 = vperm.xlu1 %13683, %v11181_v5  }
 0xb49   : > { %v13827_v61 = vpop.eup %13826  ;;  %v9133_v60 = vpop.permute.xlu1 %9132 }
 0xb4a   : > { %v9281_v31 = vadd.f32 %v9133_v60, %v20014_v1  ;;  %v11182_v44 = vmul.f32 %v13827_v61, %v20300_v47  ;;  %v13829_v19 = vpop.eup %13828 }
 0xb4b   : > { %v11184_v29 = vmul.f32 %v13829_v19, %v20300_v47 }
 0xb4c   : > { %13836 = vrcp.f32 %v9281_v31  ;;  %12540 = vperm.xlu0 %13682, %v11182_v44  }
 0xb4d   : > { %v13831_v50 = vpop.eup %13830  ;;  %v9137_v27 = vpop.permute.xlu1 %9136 }
 0xb4e   : > { %v9282_v4 = vadd.f32 %v9137_v27, %v19968_v28  ;;  %v11183_v16 = vmul.f32 %v13831_v50, %v20300_v47 }
 0xb50   : > { %13838 = vrcp.f32 %v9282_v4  ;;  %12545 = vperm.xlu1 %13683, %v11183_v16   ;;  %12550 = vperm.xlu0 %13682, %v11184_v29   ;;  %v22927_v4 = vld [vmem:[#allocation399_spill] sm:$0xff] }
 0xb51   : > { %v13833_v45 = vpop.eup %13832  ;;  %v9144_v34 = vpop.permute.xlu1 %9143 }
 0xb52   : > { %v9283_v1 = vadd.f32 %v9144_v34, %v20018_v7  ;;  %v11185_v0 = vmul.f32 %v13833_v45, %v20300_v47 }
 0xb54   : > { %13840 = vrcp.f32 %v9283_v1  ;;  %12555 = vperm.xlu1 %13683, %v11185_v0   ;;  %v22929_v0 = vld [vmem:[#allocation167_spill] sm:$0xff] }
 0xb55   : > { %v13835_v6 = vpop.eup %13834  ;;  %v9148_v59 = vpop.permute.xlu1 %9147 }
 0xb56   : > { %v9284_v25 = vadd.f32 %v9148_v59, %v19988_v24  ;;  %v11186_v28 = vmul.f32 %v13835_v6, %v20300_v47  ;;  %v9192_v24 = vpop.permute.xlu0 %9191 }
 0xb58   : > { %13842 = vrcp.f32 %v9284_v25  ;;  %12560 = vperm.xlu0 %13682, %v11186_v28  }
 0xb59   : > { %v13837_v33 = vpop.eup %13836  ;;  %v9155_v2 = vpop.permute.xlu1 %9154 }
 0xb5a   : > { %v9285_v15 = vadd.f32 %v9155_v2, %v20020_v11  ;;  %v11187_v41 = vmul.f32 %v13837_v33, %v20300_v47  ;;  %v9203_v12 = vpop.permute.xlu0 %9202  ;;  %v22930_v33 = vld [vmem:[#allocation165_spill] sm:$0xff]  ;;  %v22931_v2 = vld [vmem:[#allocation72_spill] sm:$0xff] }
 0xb5c   : > { %13844 = vrcp.f32 %v9285_v15  ;;  %12565 = vperm.xlu1 %13683, %v11187_v41  }
 0xb5d   : > { %v13839_v7 = vpop.eup %13838  ;;  %v9159_v57 = vpop.permute.xlu1 %9158 }
 0xb5e   : > { %v9286_v17 = vadd.f32 %v9159_v57, %v19996_v30  ;;  %v11188_v26 = vmul.f32 %v13839_v7, %v20300_v47  ;;  %v9214_v50 = vpop.permute.xlu0 %9213 }
 0xb60   : > { %13846 = vrcp.f32 %v9286_v17  ;;  %12570 = vperm.xlu0 %13682, %v11188_v26  }
 0xb61   : > { %v13841_v48 = vpop.eup %13840  ;;  %v9166_v35 = vpop.permute.xlu1 %9165 }
 0xb62   : > { %v9287_v21 = vadd.f32 %v9166_v35, %v20024_v39  ;;  %v11189_v43 = vmul.f32 %v13841_v48, %v20300_v47  ;;  %v9292_v39 = vadd.f32 %v9192_v24, %v20012_v14  ;;  %v9225_v14 = vpop.permute.xlu0 %9224  ;;  %v22932_v24 = vld [vmem:[#allocation137_spill] sm:$0xff] }
 0xb63   : > { %v9298_v42 = vadd.f32 %v9225_v14, %v22930_v33  ;;  %v22933_v35 = vld [vmem:[#allocation109_spill] sm:$0xff] }
 0xb64   : > { %13848 = vrcp.f32 %v9287_v21  ;;  %12575 = vperm.xlu1 %13683, %v11189_v43  }
 0xb65   : > { %v13843_v11 = vpop.eup %13842  ;;  %v9170_v5 = vpop.permute.xlu1 %9169 }
 0xb66   : > { %v9288_v30 = vadd.f32 %v9170_v5, %v20002_v53  ;;  %v11190_v61 = vmul.f32 %v13843_v11, %v20300_v47  ;;  %v9294_v53 = vadd.f32 %v9203_v12, %v20016_v63  ;;  %v9236_v7 = vpop.permute.xlu0 %9235  ;;  %v22934_v5 = vld [vmem:[#allocation122_spill] sm:$0xff] }
 0xb67   : > { %v9300_v48 = vadd.f32 %v9236_v7, %v22932_v24  ;;  %v22942_v7 = vld [vmem:[#allocation108_spill] sm:$0xff] }
 0xb68   : > { %13850 = vrcp.f32 %v9288_v30  ;;  %12580 = vperm.xlu0 %13682, %v11190_v61  }
 0xb69   : > { %v13845_v60 = vpop.eup %13844  ;;  %13852 = vrcp.f32 %v9290_v40  ;;  %v9177_v31 = vpop.permute.xlu1 %9176 }
 0xb6a   : > { %v9289_v44 = vadd.f32 %v9177_v31, %v20028_v46  ;;  %v11191_v19 = vmul.f32 %v13845_v60, %v20300_v47  ;;  %v22928_v46 = vld [vmem:[#allocation388_spill] sm:$0xff] }
 0xb6b   : > { %v9296_v1 = vadd.f32 %v9214_v50, %v22928_v46 }
 0xb6c   : > { %13854 = vrcp.f32 %v9289_v44  ;;  %12585 = vperm.xlu1 %13683, %v11191_v19  }
 0xb6d   : > { %v13847_v55 = vpop.eup %13846  ;;  %v9188_v27 = vpop.permute.xlu1 %9187  ;;  %13856 = vrcp.f32 %v9292_v39 }
 0xb6e   : > { %v9291_v16 = vadd.f32 %v9188_v27, %v22927_v4  ;;  %v11192_v29 = vmul.f32 %v13847_v55, %v20300_v47 }
 0xb70   : > { %13858 = vrcp.f32 %v9291_v16  ;;  %12590 = vperm.xlu0 %13682, %v11192_v29  }
 0xb71   : > { %v13849_v45 = vpop.eup %13848  ;;  %v9199_v34 = vpop.permute.xlu1 %9198  ;;  %13860 = vrcp.f32 %v9294_v53 }
 0xb72   : > { %v9293_v6 = vadd.f32 %v9199_v34, %v22929_v0  ;;  %v11193_v59 = vmul.f32 %v13849_v45, %v20300_v47  ;;  %v22935_v0 = vld [vmem:[#allocation402_spill] sm:$0xff] }
 0xb74   : > { %13862 = vrcp.f32 %v9293_v6  ;;  %12595 = vperm.xlu1 %13683, %v11193_v59   ;;  %v22936_v6 = vld [vmem:[#allocation185_spill] sm:$0xff] }
 0xb75   : > { %v13851_v25 = vpop.eup %13850  ;;  %v9210_v63 = vpop.permute.xlu1 %9209  ;;  %13864 = vrcp.f32 %v9296_v1  ;;  %v10645_v59 = vcombine.low %v22936_v6, %v22935_v0 }
 0xb76   : > { %v13853_v28 = vpop.eup %13852  ;;  %v9295_v15 = vadd.f32 %v9210_v63, %v22931_v2  ;;  %v11194_v41 = vmul.f32 %v13851_v25, %v20300_v47  ;;  %v20364_v25 = vpop.f32.mrf.mxu1  ;;  %v22937_v63 = vld [vmem:[#allocation149_spill] sm:$0xff]  ;;  %v22940_v2 = vld [vmem:[#allocation162_spill] sm:$0xff] }
 0xb77   : > { %v11196_v26 = vmul.f32 %v13853_v28, %v20300_v47  ;;  %v22938_v28 = vld [vmem:[#allocation64_spill] sm:$0xff] }
 0xb78   : > { %13866 = vrcp.f32 %v9295_v15  ;;  %12600 = vperm.xlu0 %13682, %v11194_v41   ;;  %v10613_v33 = vcombine.low %v22938_v28, %v22937_v63  ;;  %v22941_v41 = vld [vmem:[#allocation136_spill] sm:$0xff] }
 0xb79   : > { %v13855_v57 = vpop.eup %13854  ;;  %v9221_v17 = vpop.permute.xlu1 %9220  ;;  %13868 = vrcp.f32 %v9298_v42  ;;  %v22939_v42 = vld [vmem:[#allocation401_spill] sm:$0xff] }
 0xb7a   : > { %v9297_v21 = vadd.f32 %v9221_v17, %v22933_v35  ;;  %v11195_v43 = vmul.f32 %v13855_v57, %v20300_v47  ;;  %v13857_v11 = vpop.eup %13856  ;;  %v10629_v15 = vcombine.low %v22940_v2, %v22939_v42  ;;  %v10597_v57 = vcombine.low %v22942_v7, %v22941_v41  ;;  %v22943_v7 = vld [vmem:[#allocation400_spill] sm:$0xff] }
 0xb7b   : > { %v11198_v60 = vmul.f32 %v13857_v11, %v20300_v47  ;;  %v10653_v17 = vrot.slane %v10645_v59, %v22778_v18  ;;  %v10765_v35 = vcombine.low %v20230_v3, %v20234_v38  ;;  %v10733_v11 = vcombine.low %v20178_v54, %v20222_v8 }
 0xb7c   : > { %13870 = vrcp.f32 %v9297_v21  ;;  %12605 = vperm.xlu1 %13683, %v11195_v43   ;;  %12610 = vperm.xlu0 %13682, %v11196_v26   ;;  %v10621_v26 = vrot.slane %v10613_v33, %v22778_v18  ;;  %v10637_v24 = vrot.slane %v10629_v15, %v22778_v18  ;;  %v10605_v21 = vrot.slane %v10597_v57, %v22778_v18 }
 0xb7d   : > { %v13859_v40 = vpop.eup %13858  ;;  %v9232_v12 = vpop.permute.xlu1 %9231  ;;  %13872 = vrcp.f32 %v9300_v48  ;;  %v10749_v48 = vcombine.low %v20211_v23, %v20224_v20 }
 0xb7e   : > { %v9299_v30 = vadd.f32 %v9232_v12, %v22934_v5  ;;  %v11197_v61 = vmul.f32 %v13859_v40, %v20300_v47  ;;  %v13861_v31 = vpop.eup %13860  ;;  %v10693_v43 = vcombine.low %v10637_v24, %v10653_v17  ;;  %v10661_v12 = vcombine.low %v10605_v21, %v10621_v26 }
 0xb7f   : > { %v11200_v19 = vmul.f32 %v13861_v31, %v20300_v47  ;;  %v10757_v5 = vrot.slane %v10749_v48, %v22778_v18  ;;  %v10662_v6 = vcombine.high %v10605_v21, %v10621_v26  ;;  %v10782_v21 = vcombine.high %v20232_v49, %v20364_v25 }
 0xb80   : > { %13874 = vrcp.f32 %v9299_v30  ;;  %12615 = vperm.xlu1 %13683, %v11197_v61   ;;  %12620 = vperm.xlu0 %13682, %v11198_v60   ;;  %v10773_v30 = vrot.slane %v10765_v35, %v22778_v18  ;;  %v10741_v61 = vrot.slane %v10733_v11, %v22778_v18  ;;  %v10701_v31 = vrot.slane %v10693_v43, %v22779_v9 }
 0xb81   : > { %v13863_v39 = vpop.eup %13862 }
 0xb82   : > { %v11199_v44 = vmul.f32 %v13863_v39, %v20300_v47  ;;  %v13865_v50 = vpop.eup %13864  ;;  %v10797_v39 = vcombine.low %v10741_v61, %v10757_v5  ;;  %v10798_v48 = vcombine.high %v10741_v61, %v10757_v5  ;;  %v10766_v5 = vcombine.high %v20230_v3, %v20234_v38 }
 0xb83   : > { %v11202_v53 = vmul.f32 %v13865_v50, %v20300_v47 }
 0xb84   : > { %12625 = vperm.xlu1 %13683, %v11199_v44   ;;  %12630 = vperm.xlu0 %13682, %v11200_v19   ;;  %v10669_v44 = vrot.slane %v10661_v12, %v22779_v9  ;;  %v13512_v19 = vpop.f32.mrf.mxu0  ;;  %v10812_v61 = vrot.slane %v10798_v48, %v22779_v9  ;;  %v10780_v3 = vrot.slane %v10766_v5, %v22778_v18 }
 0xb85   : > { %v13867_v55 = vpop.eup %13866 }
 0xb86   : > { %v11201_v27 = vmul.f32 %v13867_v55, %v20300_v47  ;;  %v13869_v4 = vpop.eup %13868  ;;  %v10725_v55 = vcombine.low %v10669_v44, %v10701_v31  ;;  %v10726_v28 = vcombine.high %v10669_v44, %v10701_v31  ;;  %v10750_v31 = vcombine.high %v20211_v23, %v20224_v20 }
 0xb87   : > { %v11204_v45 = vmul.f32 %v13869_v4, %v20300_v47  ;;  %v10796_v44 = vrot.slane %v10782_v21, %v22778_v18  ;;  %v22950_v21 = vcombine.low %v20148_v58, %v20181_v13 }
 0xb88   : > { %12635 = vperm.xlu1 %13683, %v11201_v27   ;;  %12640 = vperm.xlu0 %13682, %v11202_v53   ;;  %v10805_v27 = vrot.slane %v10797_v39, %v22779_v9  ;;  %v11279_v53 = vpop.f32.mrf.mxu0  ;;  %v10764_v23 = vrot.slane %v10750_v31, %v22778_v18 }
 0xb89   : > { %v13871_v16 = vpop.eup %13870  ;;  %v11280_v4 = vadd.f32 %v11279_v53, %v10725_v55  ;;  %v10846_v31 = vcombine.high %v10780_v3, %v10796_v44 }
 0xb8a   : > { %v11203_v29 = vmul.f32 %v13871_v16, %v20300_v47  ;;  %v13873_v14 = vpop.eup %13872 }
 0xb8b   : > { %v11206_v1 = vmul.f32 %v13873_v14, %v20300_v47 }
 0xb8c   : > { %12645 = vperm.xlu1 %13683, %v11203_v29   ;;  %12650 = vperm.xlu0 %13682, %v11204_v45   ;;  %v13519_v29 = vpop.f32.mrf.mxu1 }
 0xb8d   : > { %v13875_v34 = vpop.eup %13874 }
 0xb8e   : > { %v11205_v46 = vmul.f32 %v13875_v34, %v20300_v47  ;;  %v10781_v47 = vcombine.low %v20232_v49, %v20364_v25  ;;  %v10694_v34 = vcombine.high %v10637_v24, %v10653_v17  ;;  %v11360_v59 = vpop.f32.mrf.mxu1  ;;  %v10676_v17 = vrot.slane %v10662_v6, %v22779_v9  ;;  %v13526_v24 = vpop.f32.mrf.mxu0 }
 0xb8f   : > { %v11361_v41 = vadd.f32 %v11360_v59, %v10726_v28  ;;  %v10734_v25 = vcombine.high %v20178_v54, %v20222_v8  ;;  %v22946_v54 = vld [vmem:[#allocation76_spill] sm:$0xff]  ;;  %v22947_v59 = vld [vmem:[#allocation43_spill] sm:$0xff] }
 0xb90   : > { %12655 = vperm.xlu1 %13683, %v11205_v46   ;;  %12660 = vperm.xlu0 %13682, %v11206_v1   ;;  %v10789_v40 = vrot.slane %v10781_v47, %v22778_v18  ;;  %v13908_v46 = vld [vmem:[%s14016_s10] sm:$0xff]  ;;  %v10708_v42 = vrot.slane %v10694_v34, %v22779_v9 }
 0xb91   : > { %v10748_v53 = vrot.slane %v10734_v25, %v22778_v18 }
 0xb92   : > { %v10829_v60 = vcombine.low %v10773_v30, %v10789_v40  ;;  %v10830_v2 = vcombine.high %v10773_v30, %v10789_v40  ;;  %v10727_v35 = vcombine.low %v10676_v17, %v10708_v42  ;;  %v22944_v40 = vld [vmem:[#allocation111_spill] sm:$0xff]  ;;  %v10728_v34 = vcombine.high %v10676_v17, %v10708_v42 }
 0xb94   : > { %v10837_v50 = vrot.slane %v10829_v60, %v22779_v9  ;;  %v10844_v11 = vrot.slane %v10830_v2, %v22779_v9  ;;  %v11441_v60 = vpop.f32.mrf.mxu0 }
 0xb95   : > { %v11442_v49 = vadd.f32 %v11441_v60, %v10727_v35 }
 0xb96   : > { %v10861_v16 = vcombine.low %v10805_v27, %v10837_v50  ;;  %v10862_v15 = vcombine.high %v10805_v27, %v10837_v50  ;;  %v10863_v55 = vcombine.low %v10812_v61, %v10844_v11  ;;  %v13533_v27 = vpop.f32.mrf.mxu1  ;;  %v13540_v2 = vpop.f32.mrf.mxu0 }
 0xb98   : > { %v11285_v0 = vadd.f32 %v13512_v19, %v10861_v16  ;;  %v11366_v43 = vadd.f32 %v13519_v29, %v10862_v15  ;;  %v22945_v19 = vld [vmem:[#allocation267_spill] sm:$0xff]  ;;  %v11447_v16 = vadd.f32 %v13526_v24, %v10863_v55  ;;  %v11522_v29 = vpop.f32.mrf.mxu1  ;;  %v11603_v24 = vpop.f32.mrf.mxu0 }
 0xb9a   : > { %v13547_v42 = vpop.f32.mrf.mxu1 }
 0xb9c   : > { %v11684_v48 = vpop.f32.mrf.mxu1 }
 0xbab   : > { %v12506_v45 = vpop.permute.xlu1 %12505 }
 0xbac   : > { %v12663_v14 = vmul.f32 %v12506_v45, %v11280_v4  ;;  %v10845_v4 = vcombine.low %v10780_v3, %v10796_v44  ;;  %v10860_v3 = vrot.slane %v10846_v31, %v22779_v9  ;;  %v22964_v31 = vcombine.low %v20241_v36, %v20250_v51 }
 0xbae   : > { %v12695_v1 = vadd.f32 %v13908_v46, %v12663_v14  ;;  %v10813_v14 = vcombine.low %v10748_v53, %v10764_v23  ;;  %v10853_v6 = vrot.slane %v10845_v4, %v22779_v9  ;;  %v22954_v4 = vld [vmem:[#allocation220_spill] sm:$0xff] }
 0xbaf   : > { %v12511_v63 = vpop.permute.xlu0 %12510 }
 0xbb0   : > { %12727 = vst.msk [vmem:[%s20397_s17] sm:$0xff] %vm377_vm0, %v12695_v1  ;;  %v12664_v33 = vmul.f32 %v12511_v63, %v11285_v0  ;;  %v10864_v1 = vcombine.high %v10812_v61, %v10844_v11  ;;  %v11523_v0 = vadd.f32 %v11522_v29, %v10728_v34  ;;  %v10821_v28 = vrot.slane %v10813_v14, %v22779_v9  ;;  %v13561_v34 = vpop.f32.mrf.mxu1 }
 0xbb1   : > { %v22951_v61 = vcombine.high %v20148_v58, %v20181_v13  ;;  %v22956_v29 = vcombine.low %v20151_v22, %v20184_v37 }
 0xbb2   : > { %v12696_v57 = vadd.f32 %v22943_v7, %v12664_v33  ;;  %v11528_v15 = vadd.f32 %v13533_v27, %v10864_v1  ;;  %v10866_v5 = vcombine.high %v10821_v28, %v10853_v6  ;;  %v10814_v27 = vcombine.high %v10748_v53, %v10764_v23  ;;  %v22955_v53 = vld [vmem:[#allocation190_spill] sm:$0xff] }
 0xbb3   : > { %v12516_v47 = vpop.permute.xlu1 %12515 }
 0xbb4   : > { %12728 = vst.msk [vmem:[%s20397_s17 + $0x8] sm:$0xff] %vm377_vm0, %v12696_v57  ;;  %v12665_v26 = vmul.f32 %v12516_v47, %v11361_v41  ;;  %v22948_v41 = vld [vmem:[#allocation299_spill] sm:$0xff]  ;;  %v10865_v57 = vcombine.low %v10821_v28, %v10853_v6  ;;  %v11690_v44 = vadd.f32 %v13547_v42, %v10866_v5  ;;  %v10828_v13 = vrot.slane %v10814_v27, %v22779_v9 }
 0xbb5   : > { %v22958_v28 = vcombine.high %v20151_v22, %v20184_v37  ;;  %v22961_v22 = vld [vmem:[#allocation303_spill] sm:$0xff] }
 0xbb6   : > { %v12697_v12 = vadd.f32 %v22944_v40, %v12665_v26  ;;  %v22949_v26 = vld [vmem:[#allocation301_spill] sm:$0xff]  ;;  %v11609_v11 = vadd.f32 %v13540_v2, %v10865_v57  ;;  %v10867_v14 = vcombine.low %v10828_v13, %v10860_v3  ;;  %v22959_v2 = vld [vmem:[#allocation168_spill] sm:$0xff] }
 0xbb7   : > { %v12521_v30 = vpop.permute.xlu0 %12520 }
 0xbb8   : > { %12729 = vst.msk [vmem:[%s20397_s17 + $0x10] sm:$0xff] %vm377_vm0, %v12697_v12  ;;  %v12666_v39 = vmul.f32 %v12521_v30, %v11366_v43  ;;  %v11604_v43 = vadd.f32 %v11603_v24, %v22950_v21  ;;  %v22962_v21 = vcombine.low %v20125_v10, %v20159_v32 }
 0xbba   : > { %v12698_v50 = vadd.f32 %v22945_v19, %v12666_v39  ;;  %v11685_v39 = vadd.f32 %v11684_v48, %v22951_v61  ;;  %v22953_v19 = vld [vmem:[#allocation110_spill] sm:$0xff] }
 0xbbb   : > { %v12526_v20 = vpop.permute.xlu1 %12525 }
 0xbbc   : > { %12730 = vst.msk [vmem:[%s20397_s17 + $0x18] sm:$0xff] %vm377_vm0, %v12698_v50  ;;  %v12667_v38 = vmul.f32 %v12526_v20, %v11442_v49  ;;  %v22952_v49 = vld [vmem:[#allocation323_spill] sm:$0xff] }
 0xbbe   : > { %v12699_v8 = vadd.f32 %v22946_v54, %v12667_v38  ;;  %v13554_v38 = vpop.f32.mrf.mxu0 }
 0xbbf   : > { %v12531_v45 = vpop.permute.xlu0 %12530  ;;  %v11771_v9 = vadd.f32 %v13554_v38, %v10867_v14 }
 0xbc0   : > { %12731 = vst.msk [vmem:[%s20397_s17 + $0x20] sm:$0xff] %vm377_vm0, %v12699_v8  ;;  %v12668_v46 = vmul.f32 %v12531_v45, %v11447_v16  ;;  %v11765_v23 = vpop.f32.mrf.mxu0 }
 0xbc1   : > { %v11766_v45 = vadd.f32 %v11765_v23, %v22956_v29  ;;  %v22969_v23 = vld [vmem:[#allocation116_spill] sm:$0xff] }
 0xbc2   : > { %v12700_v63 = vadd.f32 %v22947_v59, %v12668_v46  ;;  %v11846_v59 = vpop.f32.mrf.mxu1  ;;  %v13568_v57 = vpop.f32.mrf.mxu0 }
 0xbc3   : > { %v12536_v18 = vpop.permute.xlu1 %12535  ;;  %v11933_v5 = vadd.f32 %v13568_v57, %v22964_v31 }
 0xbc4   : > { %12732 = vst.msk [vmem:[%s20397_s17 + $0x28] sm:$0xff] %vm377_vm0, %v12700_v63  ;;  %v12669_v33 = vmul.f32 %v12536_v18, %v11523_v0  ;;  %v22957_v0 = vld [vmem:[#allocation270_spill] sm:$0xff] }
 0xbc6   : > { %v12701_v7 = vadd.f32 %v22948_v41, %v12669_v33  ;;  %v11847_v33 = vadd.f32 %v11846_v59, %v22958_v28  ;;  %v10868_v41 = vcombine.high %v10828_v13, %v10860_v3  ;;  %v22974_v59 = vcombine.high %v20128_v56, %v20162_v62  ;;  %v22975_v28 = vld [vmem:[#allocation403_spill] sm:$0xff] }
 0xbc7   : > { %v12541_v17 = vpop.permute.xlu0 %12540 }
 0xbc8   : > { %12733 = vst.msk [vmem:[%s20397_s17 + $0x30] sm:$0xff] %vm377_vm0, %v12701_v7  ;;  %v12670_v47 = vmul.f32 %v12541_v17, %v11528_v15  ;;  %v11852_v17 = vadd.f32 %v13561_v34, %v10868_v41 }
 0xbca   : > { %v12702_v35 = vadd.f32 %v22949_v26, %v12670_v47  ;;  %v22960_v47 = vld [vmem:[#allocation115_spill] sm:$0xff] }
 0xbcb   : > { %v12546_v40 = vpop.permute.xlu1 %12545  ;;  %v12551_v12 = vpop.permute.xlu0 %12550 }
 0xbcc   : > { %12734 = vst.msk [vmem:[%s20397_s17 + $0x38] sm:$0xff] %vm377_vm0, %v12702_v35  ;;  %v12671_v30 = vmul.f32 %v12546_v40, %v11604_v43  ;;  %v12672_v60 = vmul.f32 %v12551_v12, %v11609_v11  ;;  %v11927_v35 = vpop.f32.mrf.mxu0  ;;  %v13575_v11 = vpop.f32.mrf.mxu1 }
 0xbcd   : > { %v11928_v43 = vadd.f32 %v11927_v35, %v22962_v21  ;;  %v22983_v21 = vld [vmem:[#allocation77_spill] sm:$0xff] }
 0xbce   : > { %v12703_v25 = vadd.f32 %v22952_v49, %v12671_v30  ;;  %v12704_v50 = vadd.f32 %v22953_v19, %v12672_v60  ;;  %v22963_v30 = vld [vmem:[#allocation113_spill] sm:$0xff]  ;;  %v12008_v61 = vpop.f32.mrf.mxu1  ;;  %v13582_v38 = vpop.f32.mrf.mxu0 }
 0xbcf   : > { %v12556_v55 = vpop.permute.xlu1 %12555 }
 0xbd0   : > { %12735 = vst.msk [vmem:[%s20397_s17 + $0x40] sm:$0xff] %vm377_vm0, %v12703_v25  ;;  %12736 = vst.msk [vmem:[%s20397_s17 + $0x48] sm:$0xff] %vm377_vm0, %v12704_v50  ;;  %v12673_v20 = vmul.f32 %v12556_v55, %v11685_v39  ;;  %v22965_v25 = vcombine.high %v20125_v10, %v20159_v32  ;;  %v22966_v50 = vld [vmem:[#allocation305_spill] sm:$0xff]  ;;  %v12089_v32 = vpop.f32.mrf.mxu0 }
 0xbd2   : > { %v12705_v54 = vadd.f32 %v22954_v4, %v12673_v20  ;;  %v12009_v19 = vadd.f32 %v12008_v61, %v22965_v25  ;;  %v13589_v4 = vpop.f32.mrf.mxu1 }
 0xbd3   : > { %v12561_v58 = vpop.permute.xlu0 %12560 }
 0xbd4   : > { %12737 = vst.msk [vmem:[%s20397_s17 + $0x50] sm:$0xff] %vm377_vm0, %v12705_v54  ;;  %v12674_v8 = vmul.f32 %v12561_v58, %v11690_v44  ;;  %v22967_v44 = vcombine.high %v20241_v36, %v20250_v51  ;;  %v22968_v54 = vld [vmem:[#allocation82_spill] sm:$0xff] }
 0xbd6   : > { %v12706_v16 = vadd.f32 %v22955_v53, %v12674_v8  ;;  %v12014_v3 = vadd.f32 %v13575_v11, %v22967_v44  ;;  %v12170_v8 = vpop.f32.mrf.mxu1 }
 0xbd7   : > { %v12566_v46 = vpop.permute.xlu1 %12565 }
 0xbd8   : > { %12738 = vst.msk [vmem:[%s20397_s17 + $0x58] sm:$0xff] %vm377_vm0, %v12706_v16  ;;  %v12675_v1 = vmul.f32 %v12566_v46, %v11766_v45  ;;  %v22970_v16 = vcombine.low %v20128_v56, %v20162_v62  ;;  %v22971_v45 = vld [vmem:[#allocation66_spill] sm:$0xff]  ;;  %v22978_v62 = vld [vmem:[#allocation273_spill] sm:$0xff] }
 0xbd9   : > { %v22972_v36 = vcombine.low %v20244_v52, %v22971_v45 }
 0xbda   : > { %v12707_v6 = vadd.f32 %v22957_v0, %v12675_v1  ;;  %v12090_v29 = vadd.f32 %v12089_v32, %v22970_v16  ;;  %v13596_v0 = vpop.f32.mrf.mxu0 }
 0xbdb   : > { %v12571_v63 = vpop.permute.xlu0 %12570  ;;  %v12095_v51 = vadd.f32 %v13582_v38, %v22972_v36 }
 0xbdc   : > { %12739 = vst.msk [vmem:[%s20397_s17 + $0x60] sm:$0xff] %vm377_vm0, %v12707_v6  ;;  %v12676_v18 = vmul.f32 %v12571_v63, %v11771_v9  ;;  %v22973_v6 = vcombine.high %v20244_v52, %v22971_v45  ;;  %v12171_v63 = vadd.f32 %v12170_v8, %v22974_v59  ;;  %v12251_v57 = vpop.f32.mrf.mxu0  ;;  %v22991_v8 = vld [vmem:[#allocation170_spill] sm:$0xff]  ;;  %v22995_v45 = vld [vmem:[#allocation169_spill] sm:$0xff] }
 0xbde   : > { %v12708_v15 = vadd.f32 %v22959_v2, %v12676_v18  ;;  %v12176_v9 = vadd.f32 %v13589_v4, %v22973_v6  ;;  %v13603_v18 = vpop.f32.mrf.mxu1  ;;  %v22976_v2 = vld [vmem:[#allocation49_spill] sm:$0xff]  ;;  %v13610_v31 = vpop.f32.mrf.mxu0 }
 0xbdf   : > { %v12576_v42 = vpop.permute.xlu1 %12575 }
 0xbe0   : > { %12740 = vst.msk [vmem:[%s20397_s17 + $0x68] sm:$0xff] %vm377_vm0, %v12708_v15  ;;  %v12677_v7 = vmul.f32 %v12576_v42, %v11847_v33  ;;  %v12413_v4 = vpop.f32.mrf.mxu0 }
 0xbe2   : > { %v12709_v24 = vadd.f32 %v22960_v47, %v12677_v7  ;;  %v22977_v47 = vld [vmem:[#allocation327_spill] sm:$0xff] }
 0xbe3   : > { %v12581_v48 = vpop.permute.xlu0 %12580 }
 0xbe4   : > { %12741 = vst.msk [vmem:[%s20397_s17 + $0x70] sm:$0xff] %vm377_vm0, %v12709_v24  ;;  %v12678_v26 = vmul.f32 %v12581_v48, %v11852_v17  ;;  %v12332_v17 = vpop.f32.mrf.mxu1  ;;  %v22979_v48 = vld [vmem:[#allocation404_spill] sm:$0xff] }
 0xbe6   : > { %v12710_v37 = vadd.f32 %v22961_v22, %v12678_v26  ;;  %v22980_v26 = vld [vmem:[#allocation179_spill] sm:$0xff]  ;;  %v13617_v25 = vpop.f32.mrf.mxu1 }
 0xbe7   : > { %v12586_v40 = vpop.permute.xlu1 %12585  ;;  %v22981_v35 = vcombine.low %v22979_v48, %v22980_v26 }
 0xbe8   : > { %12742 = vst.msk [vmem:[%s20397_s17 + $0x78] sm:$0xff] %vm377_vm0, %v12710_v37  ;;  %v12679_v12 = vmul.f32 %v12586_v40, %v11928_v43  ;;  %v22982_v37 = vld [vmem:[#allocation194_spill] sm:$0xff] }
 0xbe9   : > { %v12252_v22 = vadd.f32 %v12251_v57, %v22981_v35  ;;  %v22984_v43 = vcombine.low %v22982_v37, %v22983_v21  ;;  %v23002_v57 = vld [vmem:[#allocation407_spill] sm:$0xff] }
 0xbea   : > { %v12711_v60 = vadd.f32 %v22963_v30, %v12679_v12 }
 0xbeb   : > { %v12591_v39 = vpop.permute.xlu0 %12590  ;;  %v12257_v11 = vadd.f32 %v13596_v0, %v22984_v43 }
 0xbec   : > { %12743 = vst.msk [vmem:[%s20397_s17 + $0x80] sm:$0xff] %vm377_vm0, %v12711_v60  ;;  %v12680_v49 = vmul.f32 %v12591_v39, %v11933_v5  ;;  %v22985_v5 = vcombine.high %v22982_v37, %v22983_v21  ;;  %v22986_v39 = vcombine.high %v22979_v48, %v22980_v26 }
 0xbee   : > { %v12712_v55 = vadd.f32 %v22966_v50, %v12680_v49  ;;  %v12338_v61 = vadd.f32 %v13603_v18, %v22985_v5  ;;  %v12333_v49 = vadd.f32 %v12332_v17, %v22986_v39 }
 0xbef   : > { %v12596_v27 = vpop.permute.xlu1 %12595 }
 0xbf0   : > { %12744 = vst.msk [vmem:[%s20397_s17 + $0x88] sm:$0xff] %vm377_vm0, %v12712_v55  ;;  %v12681_v20 = vmul.f32 %v12596_v27, %v12009_v19  ;;  %v22987_v19 = vld [vmem:[#allocation85_spill] sm:$0xff]  ;;  %v22988_v55 = vld [vmem:[#allocation198_spill] sm:$0xff] }
 0xbf2   : > { %v12713_v58 = vadd.f32 %v22968_v54, %v12681_v20  ;;  %v12494_v54 = vpop.f32.mrf.mxu1 }
 0xbf3   : > { %v12601_v13 = vpop.permute.xlu0 %12600 }
 0xbf4   : > { %12745 = vst.msk [vmem:[%s20397_s17 + $0x90] sm:$0xff] %vm377_vm0, %v12713_v58  ;;  %v12682_v10 = vmul.f32 %v12601_v13, %v12014_v3  ;;  %v22989_v58 = vld [vmem:[#allocation135_spill] sm:$0xff] }
 0xbf6   : > { %v12714_v53 = vadd.f32 %v22969_v23, %v12682_v10  ;;  %v22990_v10 = vld [vmem:[#allocation329_spill] sm:$0xff]  ;;  %v22992_v23 = vld [vmem:[#allocation38_spill] sm:$0xff] }
 0xbf7   : > { %v12606_v14 = vpop.permute.xlu1 %12605  ;;  %v12611_v34 = vpop.permute.xlu0 %12610 }
 0xbf8   : > { %12746 = vst.msk [vmem:[%s20397_s17 + $0x98] sm:$0xff] %vm377_vm0, %v12714_v53  ;;  %v12683_v46 = vmul.f32 %v12606_v14, %v12090_v29  ;;  %v12684_v1 = vmul.f32 %v12611_v34, %v12095_v51  ;;  %v22993_v53 = vcombine.low %v22991_v8, %v22992_v23  ;;  %v22994_v29 = vld [vmem:[#allocation70_spill] sm:$0xff] }
 0xbf9   : > { %v22996_v36 = vcombine.low %v22994_v29, %v22995_v45  ;;  %v22997_v0 = vcombine.high %v22994_v29, %v22995_v45 }
 0xbfa   : > { %v12715_v33 = vadd.f32 %v22975_v28, %v12683_v46  ;;  %v12716_v15 = vadd.f32 %v22976_v2, %v12684_v1  ;;  %v12414_v16 = vadd.f32 %v12413_v4, %v22993_v53  ;;  %v23000_v28 = vld [vmem:[#allocation405_spill] sm:$0xff] }
 0xbfb   : > { %v12616_v42 = vpop.permute.xlu1 %12615  ;;  %v12621_v41 = vpop.permute.xlu0 %12620  ;;  %v12419_v51 = vadd.f32 %v13610_v31, %v22996_v36  ;;  %v12500_v6 = vadd.f32 %v13617_v25, %v22997_v0 }
 0xbfc   : > { %12747 = vst.msk [vmem:[%s20397_s17 + $0xa0] sm:$0xff] %vm377_vm0, %v12715_v33  ;;  %12748 = vst.msk [vmem:[%s20397_s17 + $0xa8] sm:$0xff] %vm377_vm0, %v12716_v15  ;;  %v12685_v7 = vmul.f32 %v12616_v42, %v12171_v63  ;;  %v12686_v52 = vmul.f32 %v12621_v41, %v12176_v9  ;;  %v22998_v9 = vcombine.high %v22991_v8, %v22992_v23  ;;  %v22999_v63 = vld [vmem:[#allocation129_spill] sm:$0xff] }
 0xbfe   : > { %v12717_v56 = vadd.f32 %v22977_v47, %v12685_v7  ;;  %v12718_v24 = vadd.f32 %v22978_v62, %v12686_v52  ;;  %v12495_v59 = vadd.f32 %v12494_v54, %v22998_v9  ;;  %v23001_v7 = vld [vmem:[#allocation35_spill] sm:$0xff] }
 0xbff   : > { %v12626_v40 = vpop.permute.xlu1 %12625  ;;  %v12631_v12 = vpop.permute.xlu0 %12630 }
 0xc00   : > { %12749 = vst.msk [vmem:[%s20397_s17 + $0xb0] sm:$0xff] %vm377_vm0, %v12717_v56  ;;  %12750 = vst.msk [vmem:[%s20397_s17 + $0xb8] sm:$0xff] %vm377_vm0, %v12718_v24  ;;  %v12687_v30 = vmul.f32 %v12626_v40, %v12252_v22  ;;  %v12688_v60 = vmul.f32 %v12631_v12, %v12257_v11 }
 0xc02   : > { %v12719_v50 = vadd.f32 %v22987_v19, %v12687_v30  ;;  %v12720_v27 = vadd.f32 %v22988_v55, %v12688_v60 }
 0xc03   : > { %v12636_v20 = vpop.permute.xlu1 %12635  ;;  %v12641_v38 = vpop.permute.xlu0 %12640 }
 0xc04   : > { %12751 = vst.msk [vmem:[%s20397_s17 + $0xc0] sm:$0xff] %vm377_vm0, %v12719_v50  ;;  %12752 = vst.msk [vmem:[%s20397_s17 + $0xc8] sm:$0xff] %vm377_vm0, %v12720_v27  ;;  %v12689_v44 = vmul.f32 %v12636_v20, %v12333_v49  ;;  %v12690_v3 = vmul.f32 %v12641_v38, %v12338_v61 }
 0xc06   : > { %v12721_v13 = vadd.f32 %v22989_v58, %v12689_v44  ;;  %v12722_v32 = vadd.f32 %v22990_v10, %v12690_v3 }
 0xc07   : > { %v12646_v14 = vpop.permute.xlu1 %12645  ;;  %v12651_v34 = vpop.permute.xlu0 %12650 }
 0xc08   : > { %12753 = vst.msk [vmem:[%s20397_s17 + $0xd0] sm:$0xff] %vm377_vm0, %v12721_v13  ;;  %12754 = vst.msk [vmem:[%s20397_s17 + $0xd8] sm:$0xff] %vm377_vm0, %v12722_v32  ;;  %v12691_v46 = vmul.f32 %v12646_v14, %v12414_v16  ;;  %v12692_v1 = vmul.f32 %v12651_v34, %v12419_v51 }
 0xc0a   : > { %v12723_v18 = vadd.f32 %v22999_v63, %v12691_v46  ;;  %v12724_v33 = vadd.f32 %v23000_v28, %v12692_v1 }
 0xc0b   : > { %v12656_v2 = vpop.permute.xlu1 %12655  ;;  %v12661_v15 = vpop.permute.xlu0 %12660 }
 0xc0c   : > { %12755 = vst.msk [vmem:[%s20397_s17 + $0xe0] sm:$0xff] %vm377_vm0, %v12723_v18  ;;  %12756 = vst.msk [vmem:[%s20397_s17 + $0xe8] sm:$0xff] %vm377_vm0, %v12724_v33  ;;  %v12693_v42 = vmul.f32 %v12656_v2, %v12495_v59  ;;  %v12694_v41 = vmul.f32 %v12661_v15, %v12500_v6 }
 0xc0e   : > { %v12725_v52 = vadd.f32 %v23001_v7, %v12693_v42  ;;  %v12726_v17 = vadd.f32 %v23002_v57, %v12694_v41 }
 0xc10   : > { %12757 = vst.msk [vmem:[%s20397_s17 + $0xf0] sm:$0xff] %vm377_vm0, %v12725_v52  ;;  %12758 = vst.msk [vmem:[%s20397_s17 + $0xf8] sm:$0xff] %vm377_vm0, %v12726_v17 }
 0xc11 PF: > { %s20_s11 = sadd.s32 1, %s13915_s11  }
 0xc12   : > { %p17_p4 = scmp.ge.s32.totalorder %s20_s11, 4  }
 0xc14   :  { %19 = sbr.rel (!%p17_p4) target bundleno = 2 (0x2), region = 86 }

</bundles_post_ra>
